<compile_context>
chip_gen: v7x
topology: tpu7x:2x2x1
jax: 0.10.0
libtpu: 0.0.40
codegen_flags: <defaults>
</compile_context>

<pallas_src>
import functools

import jax
import jax.numpy as jnp
import numpy as np
from jax.experimental import pallas as pl
from jax.experimental.pallas import tpu as pltpu

EPS = 1e-5
# Inter-layer activation storage dtype in HBM (h1/h2/h3).  bf16 halves the
# read+write traffic of the memory-bound conv2/conv3/conv4 streams; the
# consumer casts to bf16 for the MXU anyway.  Stats stay f32.
ACT_DTYPE = jnp.bfloat16
VMEM_LIMIT = 32 * 1024 * 1024    # scoped-VMEM cap; safe on v5e/v6e/v7x (64 MiB phys)


# ---------------------------------------------------------------------------
# Kernels
# ---------------------------------------------------------------------------

def _conv1_kernel(x_ref, w_ref, b_ref, h_ref, s_ref, ss_ref):
    """conv1 (1x1, cin zero-padded 3->8) as one bf16 MXU matmul; accumulates
    bn1 per-channel sum / sum-of-squares as (8, C) per-sublane partials into a
    per-core accumulator block."""
    i = pl.program_id(1)

    @pl.when(i == 0)
    def _init():
        s_ref[...] = jnp.zeros_like(s_ref)
        ss_ref[...] = jnp.zeros_like(ss_ref)

    x = x_ref[...].astype(jnp.bfloat16)                      # (TILE, 8)
    h = jnp.dot(x, w_ref[...], preferred_element_type=jnp.float32) + b_ref[...]
    hp = h.reshape(h.shape[0] // 8, 8, h.shape[1])           # sublane-partial view
    s_ref[...] += jnp.sum(hp, axis=0)                        # VALU-only adds
    ss_ref[...] += jnp.sum(hp * hp, axis=0)
    h_ref[...] = h.astype(h_ref.dtype)                       # bf16 to HBM


def _conv_mid_kernel(h_in_ref, bn_ref, w_ref, b_ref, h_ref, s_ref, ss_ref):
    """conv2 / conv3: fused previous-layer BN (scale/shift) + ReLU, one bf16
    MXU matmul (f32 accumulation), per-sublane BN-stat partials (per core)."""
    i = pl.program_id(1)

    @pl.when(i == 0)
    def _init():
        s_ref[...] = jnp.zeros_like(s_ref)
        ss_ref[...] = jnp.zeros_like(ss_ref)

    scale = bn_ref[0:1, :]
    shift = bn_ref[1:2, :]
    a = jnp.maximum(h_in_ref[...].astype(jnp.float32) * scale + shift, 0.0)
    h = jnp.dot(a.astype(jnp.bfloat16), w_ref[...],
                preferred_element_type=jnp.float32) + b_ref[...]
    hp = h.reshape(h.shape[0] // 8, 8, h.shape[1])
    s_ref[...] += jnp.sum(hp, axis=0)
    ss_ref[...] += jnp.sum(hp * hp, axis=0)
    h_ref[...] = h.astype(h_ref.dtype)


def _conv4_pool_kernel(h_in_ref, bn_ref, w_ref, b_ref,
                       mx_ref, mn_ref, s_ref, ss_ref):
    """conv4 fused with the global max-pool: per-batch running (8, C)
    sublane-partial max/min of the pre-BN activations (the wrapper applies
    bn4's monotone affine to max or min depending on sign(scale)), plus
    per-batch bn4 stat partials.  h4 never hits HBM."""
    ti = pl.program_id(1)

    @pl.when(ti == 0)
    def _init():
        s_ref[...] = jnp.zeros_like(s_ref)
        ss_ref[...] = jnp.zeros_like(ss_ref)
        mx_ref[...] = jnp.full(mx_ref.shape, -jnp.inf, mx_ref.dtype)
        mn_ref[...] = jnp.full(mn_ref.shape, jnp.inf, mn_ref.dtype)

    scale = bn_ref[0:1, :]
    shift = bn_ref[1:2, :]
    a = jnp.maximum(h_in_ref[...].astype(jnp.float32) * scale + shift, 0.0)
    h = jnp.dot(a.astype(jnp.bfloat16), w_ref[...],
                preferred_element_type=jnp.float32) + b_ref[...]   # (TILE, 512)
    hp = h.reshape(h.shape[0] // 8, 8, h.shape[1])
    s_ref[...] += jnp.sum(hp, axis=0)
    ss_ref[...] += jnp.sum(hp * hp, axis=0)
    mx_ref[...] = jnp.maximum(mx_ref[...], jnp.max(hp, axis=0))
    mn_ref[...] = jnp.minimum(mn_ref[...], jnp.min(hp, axis=0))


def _fc_head_kernel(B, pooled_ref, w1_ref, w2_ref, w3_ref, slab_ref, out_ref):
    """fc1/fc_bn1/relu -> fc2/fc_bn2/relu -> fc3 on a sublane-padded
    (B_pad, 512) pooled input; batch statistics use only the first B rows.
    Output is a lane-dense (B_pad, 128) block (first zdim columns valid)."""
    p = pooled_ref[...]                                            # (B_pad, 512)
    rows = jax.lax.broadcasted_iota(jnp.int32, (p.shape[0], 1), 0)
    mask = (rows < B).astype(jnp.float32)
    inv_b = 1.0 / float(B)
    slab = slab_ref[...]                                           # (8, 256)

    def bn_relu(h, gamma, beta):
        hm = h * mask
        mean = jnp.sum(hm, axis=0, keepdims=True) * inv_b
        var = jnp.sum(hm * hm, axis=0, keepdims=True) * inv_b - mean * mean
        scale = gamma * jax.lax.rsqrt(var + EPS)
        shift = beta - mean * scale
        return jnp.maximum(h * scale + shift, 0.0)

    h = jnp.dot(p.astype(jnp.bfloat16), w1_ref[...],
                preferred_element_type=jnp.float32) + slab[0:1, :256]
    h = bn_relu(h, slab[1:2, :256], slab[2:3, :256])               # (B_pad, 256)
    h = jnp.dot(h.astype(jnp.bfloat16), w2_ref[...],
                preferred_element_type=jnp.float32) + slab[3:4, :128]
    h = bn_relu(h, slab[4:5, :128], slab[5:6, :128])               # (B_pad, 128)
    z = jnp.dot(h.astype(jnp.bfloat16), w3_ref[...],
                preferred_element_type=jnp.float32) + slab[6:7, :128]
    out_ref[...] = z                                               # (B_pad, 128)


# ---------------------------------------------------------------------------
# pallas_call wrappers
# ---------------------------------------------------------------------------

def _conv1_call(x8, w1, b1, *, tile, ncores):
    M, cin = x8.shape
    cout = w1.shape[1]
    nt_c = (M // tile) // ncores
    return pl.pallas_call(
        _conv1_kernel,
        grid=(ncores, nt_c),
        in_specs=[
            pl.BlockSpec((tile, cin), lambda c, i: (c * nt_c + i, 0)),
            pl.BlockSpec((cin, cout), lambda c, i: (0, 0)),
            pl.BlockSpec((1, cout), lambda c, i: (0, 0)),
        ],
        out_specs=[
            pl.BlockSpec((tile, cout), lambda c, i: (c * nt_c + i, 0)),
            pl.BlockSpec((8, cout), lambda c, i: (c, 0)),   # per-core sum partials
            pl.BlockSpec((8, cout), lambda c, i: (c, 0)),   # per-core sumsq partials
        ],
        out_shape=[
            jax.ShapeDtypeStruct((M, cout), ACT_DTYPE),
            jax.ShapeDtypeStruct((ncores * 8, cout), jnp.float32),
            jax.ShapeDtypeStruct((ncores * 8, cout), jnp.float32),
        ],
        compiler_params=pltpu.CompilerParams(
            dimension_semantics=("parallel", "arbitrary"),
            vmem_limit_bytes=VMEM_LIMIT),
    )(x8, w1, b1)


def _conv_mid_call(h_in, bn_in, w_bf16, b, *, tile, ncores):
    M, cin = h_in.shape
    cout = w_bf16.shape[1]
    nt_c = (M // tile) // ncores
    return pl.pallas_call(
        _conv_mid_kernel,
        grid=(ncores, nt_c),
        in_specs=[
            pl.BlockSpec((tile, cin), lambda c, i: (c * nt_c + i, 0)),
            pl.BlockSpec((2, cin), lambda c, i: (0, 0)),
            pl.BlockSpec((cin, cout), lambda c, i: (0, 0)),
            pl.BlockSpec((1, cout), lambda c, i: (0, 0)),
        ],
        out_specs=[
            pl.BlockSpec((tile, cout), lambda c, i: (c * nt_c + i, 0)),
            pl.BlockSpec((8, cout), lambda c, i: (c, 0)),
            pl.BlockSpec((8, cout), lambda c, i: (c, 0)),
        ],
        out_shape=[
            jax.ShapeDtypeStruct((M, cout), ACT_DTYPE),
            jax.ShapeDtypeStruct((ncores * 8, cout), jnp.float32),
            jax.ShapeDtypeStruct((ncores * 8, cout), jnp.float32),
        ],
        compiler_params=pltpu.CompilerParams(
            dimension_semantics=("parallel", "arbitrary"),
            vmem_limit_bytes=VMEM_LIMIT),
    )(h_in, bn_in, w_bf16, b)


def _conv4_pool_call(h_in, bn_in, w_bf16, b, *, B, T, tile):
    _, cin = h_in.shape
    cout = w_bf16.shape[1]
    # All accumulators are per-batch partial blocks keyed by bi, so the B axis
    # is safely "parallel" (megacore split on v7x).
    return pl.pallas_call(
        _conv4_pool_kernel,
        grid=(B, T),
        in_specs=[
            pl.BlockSpec((tile, cin), lambda bi, ti: (bi * T + ti, 0)),
            pl.BlockSpec((2, cin), lambda bi, ti: (0, 0)),
            pl.BlockSpec((cin, cout), lambda bi, ti: (0, 0)),
            pl.BlockSpec((1, cout), lambda bi, ti: (0, 0)),
        ],
        out_specs=[
            pl.BlockSpec((8, cout), lambda bi, ti: (bi, 0)),   # per-batch max(h4) partials
            pl.BlockSpec((8, cout), lambda bi, ti: (bi, 0)),   # per-batch min(h4) partials
            pl.BlockSpec((8, cout), lambda bi, ti: (bi, 0)),   # per-batch sum partials
            pl.BlockSpec((8, cout), lambda bi, ti: (bi, 0)),   # per-batch sumsq partials
        ],
        out_shape=[
            jax.ShapeDtypeStruct((B * 8, cout), jnp.float32),
            jax.ShapeDtypeStruct((B * 8, cout), jnp.float32),
            jax.ShapeDtypeStruct((B * 8, cout), jnp.float32),
            jax.ShapeDtypeStruct((B * 8, cout), jnp.float32),
        ],
        compiler_params=pltpu.CompilerParams(
            dimension_semantics=("parallel", "arbitrary"),
            vmem_limit_bytes=VMEM_LIMIT),
    )(h_in, bn_in, w_bf16, b)


def _fc_head_call(pooled_pad, p, *, B, zdim):
    assert zdim <= 128
    B_pad = pooled_pad.shape[0]
    fw1 = p["fw1"].astype(jnp.bfloat16)                       # (512, 256)
    fw2 = p["fw2"].astype(jnp.bfloat16)                       # (256, 128)
    fw3 = jnp.zeros((128, 128), jnp.float32).at[:, :zdim].set(p["fw3"])
    fw3 = fw3.astype(jnp.bfloat16)                            # zero-padded cols

    def pad256(v):
        return jnp.zeros((1, 256), jnp.float32).at[:, :v.shape[1]].set(v)

    slab = jnp.concatenate(
        [pad256(p["fb1"]), pad256(p["fg1"]), pad256(p["fbe1"]),
         pad256(p["fb2"]), pad256(p["fg2"]), pad256(p["fbe2"]),
         pad256(p["fb3"]), jnp.zeros((1, 256), jnp.float32)], axis=0)  # (8, 256)

    kernel = functools.partial(_fc_head_kernel, B)
    return pl.pallas_call(
        kernel,
        out_shape=jax.ShapeDtypeStruct((B_pad, 128), jnp.float32),
        in_specs=[pl.BlockSpec(memory_space=pltpu.MemorySpace.VMEM)] * 5,
        out_specs=pl.BlockSpec(memory_space=pltpu.MemorySpace.VMEM),
        compiler_params=pltpu.CompilerParams(vmem_limit_bytes=VMEM_LIMIT),
    )(pooled_pad, fw1, fw2, fw3, slab)


# ---------------------------------------------------------------------------
# Encoder wrapper (chain of kernels) + pure-JAX reference
# ---------------------------------------------------------------------------

def _pick_tile(total, cap):
    """Largest multiple of 16 that divides `total` and is <= cap."""
    t = (min(cap, total) // 16) * 16
    while t >= 16:
        if total % t == 0:
            return t
        t -= 16
    raise ValueError(f"no valid tile for total={total}")


def _bn_fuse(s_part, ss_part, count, gamma, beta):
    """Reduce partial stat blocks and fold batch stats + gamma/beta into one
    per-channel scale/shift packed as a (2, C) array."""
    s = jnp.sum(s_part, axis=0, keepdims=True)
    ss = jnp.sum(ss_part, axis=0, keepdims=True)
    mean = s / count
    # TODO(synk): single-pass E[h^2]-E[h]^2 can cancel at very large M (~1e6
    # points); a Welford/centered per-tile accumulation would be more robust.
    var = jnp.maximum(ss / count - mean * mean, 0.0)
    scale = gamma * jax.lax.rsqrt(var + EPS)
    shift = beta - mean * scale
    return jnp.concatenate([scale, shift], axis=0)


@functools.partial(jax.jit, static_argnames=("B", "N", "zdim", "tile"))
def encoder_pallas(x, params, *, B, N, zdim, tile=None):
    p = params
    M = B * N
    assert M % 16 == 0 and N % 16 == 0

    # Row tile over M = B*N for conv1-3 (decoupled from N; 1-2K row sweet spot).
    if tile is None:
        tile = _pick_tile(M, 2048)
    assert M % tile == 0 and tile % 16 == 0     # bf16 activations pack 16 sublanes
    nt = M // tile
    ncores = 2 if nt % 2 == 0 else 1            # megacore split (v7x); harmless elsewhere

    # Per-batch point tile for conv4 (fused max-pool needs batch-aligned tiles).
    tile4 = _pick_tile(N, 1024)
    T = N // tile4

    # conv1: pad cin 3 -> 8 so the contraction runs on the MXU.
    x2 = x.reshape(M, -1).astype(jnp.float32)
    cin = x2.shape[1]
    x8 = jnp.zeros((M, 8), jnp.float32).at[:, :cin].set(x2)
    w1p = jnp.zeros((8, p["w1"].shape[1]), jnp.float32).at[:cin, :].set(p["w1"])
    w1p = w1p.astype(jnp.bfloat16)

    h1, s1, ss1 = _conv1_call(x8, w1p, p["b1"], tile=tile, ncores=ncores)
    bn1 = _bn_fuse(s1, ss1, M, p["g1"], p["be1"])

    # conv2, conv3 (bf16 MXU, bf16 activation round-trip) + their BN stats
    h2, s2, ss2 = _conv_mid_call(h1, bn1, p["w2"].astype(jnp.bfloat16), p["b2"],
                                 tile=tile, ncores=ncores)
    bn2 = _bn_fuse(s2, ss2, M, p["g2"], p["be2"])
    h3, s3, ss3 = _conv_mid_call(h2, bn2, p["w3"].astype(jnp.bfloat16), p["b3"],
                                 tile=tile, ncores=ncores)
    bn3 = _bn_fuse(s3, ss3, M, p["g3"], p["be3"])

    # conv4 fused with the per-batch max-pool (running max/min of pre-BN h4)
    mx, mn, s4, ss4 = _conv4_pool_call(h3, bn3, p["w4"].astype(jnp.bfloat16),
                                       p["b4"], B=B, T=T, tile=tile4)
    bn4 = _bn_fuse(s4, ss4, M, p["g4"], p["be4"])
    scale4, shift4 = bn4[0:1, :], bn4[1:2, :]
    mx_b = jnp.max(mx.reshape(B, 8, -1), axis=1)             # (B, 512)
    mn_b = jnp.min(mn.reshape(B, 8, -1), axis=1)
    pooled = jnp.where(scale4 >= 0.0, mx_b * scale4 + shift4,
                       mn_b * scale4 + shift4)

    # fc head (tiny) in its own kernel, lane-dense padded output
    B_pad = max(8, ((B + 7) // 8) * 8)
    pooled_pad = jnp.zeros((B_pad, 512), jnp.float32).at[:B, :].set(pooled)
    z_pad = _fc_head_call(pooled_pad, p, B=B, zdim=zdim)
    return z_pad[:B, :zdim]


def encoder_ref(x, params, *, B, N, zdim):
    """Pure-JAX reference mirroring the kernel numerics (bf16 MXU operands with
    f32 accumulation, ACT_DTYPE inter-layer storage) for the correctness check."""
    p = params
    xf = x.reshape(B * N, -1).astype(jnp.float32)

    def mm(a, w):
        return jnp.dot(a.astype(jnp.bfloat16), w.astype(jnp.bfloat16),
                       preferred_element_type=jnp.float32)

    def bn(h, gamma, beta, hq=None):
        mu = jnp.mean(h, axis=0, keepdims=True)
        var = jnp.mean((h - mu) ** 2, axis=0, keepdims=True)
        hq = h if hq is None else hq
        return (hq - mu) * jax.lax.rsqrt(var + EPS) * gamma + beta

    def store(h):  # inter-layer HBM storage round-trip
        return h.astype(ACT_DTYPE).astype(jnp.float32)

    h = mm(xf, p["w1"]) + p["b1"]
    a = jnp.maximum(bn(h, p["g1"], p["be1"], store(h)), 0.0)
    h = mm(a, p["w2"]) + p["b2"]
    a = jnp.maximum(bn(h, p["g2"], p["be2"], store(h)), 0.0)
    h = mm(a, p["w3"]) + p["b3"]
    a = jnp.maximum(bn(h, p["g3"], p["be3"], store(h)), 0.0)
    h4 = mm(a, p["w4"]) + p["b4"]
    a4 = bn(h4, p["g4"], p["be4"])                       # no ReLU on layer 4
    pooled = jnp.max(a4.reshape(B, N, -1), axis=1)       # torch.max(x, 2)[0]

    f = jnp.maximum(bn(mm(pooled, p["fw1"]) + p["fb1"], p["fg1"], p["fbe1"]), 0.0)
    f = jnp.maximum(bn(mm(f, p["fw2"]) + p["fb2"], p["fg2"], p["fbe2"]), 0.0)
    return mm(f, p["fw3"]) + p["fb3"]


# ---------------------------------------------------------------------------
# Parameters + PointFlow.forward glue
# ---------------------------------------------------------------------------

def make_params(key, *, input_dim, zdim):
    """Deterministic synthetic parameters.  Conv/Linear weights are stored
    pre-transposed as (C_in, C_out); biases and BN gamma/beta as (1, C)."""
    dims_conv = [(input_dim, 128), (128, 128), (128, 256), (256, 512)]
    dims_fc = [(512, 256), (256, 128), (128, zdim)]
    keys = iter(jax.random.split(key, 32))
    p = {}
    for li, (ci, co) in enumerate(dims_conv, start=1):
        p[f"w{li}"] = jax.random.normal(next(keys), (ci, co), jnp.float32) * 0.05
        p[f"b{li}"] = jax.random.normal(next(keys), (1, co), jnp.float32) * 0.01
        p[f"g{li}"] = 1.0 + 0.1 * jax.random.normal(next(keys), (1, co), jnp.float32)
        p[f"be{li}"] = 0.1 * jax.random.normal(next(keys), (1, co), jnp.float32)
    # flip sign of a few bn4 gammas to exercise the max/min pooling branches
    p["g4"] = p["g4"] * jnp.where(jnp.arange(512)[None, :] % 5 == 0, -1.0, 1.0)
    for li, (ci, co) in enumerate(dims_fc, start=1):
        p[f"fw{li}"] = jax.random.normal(next(keys), (ci, co), jnp.float32) * 0.05
        p[f"fb{li}"] = jax.random.normal(next(keys), (1, co), jnp.float32) * 0.01
        if li < 3:  # fc_bn1, fc_bn2 (fc3 has no BN)
            p[f"fg{li}"] = 1.0 + 0.1 * jax.random.normal(next(keys), (1, co), jnp.float32)
            p[f"fbe{li}"] = 0.1 * jax.random.normal(next(keys), (1, co), jnp.float32)
    return p


def pointflow_forward(x, params, *, B, N, zdim, tile=None):
    """PointFlow.forward semantics for use_deterministic_encoder=True,
    use_latent_flow=False (the components that are defined in the module)."""
    z_mu = encoder_pallas(x, params, B=B, N=N, zdim=zdim, tile=tile)
    z_sigma = jnp.zeros_like(z_mu)                 # Encoder returns (ms, 0)
    z = z_mu + 0.0 * z_sigma                       # deterministic encoder
    entropy = jnp.zeros((B,), jnp.float32)         # deterministic encoder
    log_pz = jnp.zeros((B, 1), jnp.float32)        # use_latent_flow == False
    z_new = z + (log_pz * 0.0).mean()
    # TODO(synk): point_cnf / latent_cnf are external CNF (ODE-flow) modules with
    # no definition in the provided source; recon_loss / log_px are not computed.
    entropy_loss = -entropy.mean()
    prior_loss = -log_pz.mean()
    prior_nats = prior_loss / float(zdim)
    return {
        "z": z_new,
        "entropy": entropy.mean(),
        "prior_nats": prior_nats,
        "entropy_loss": entropy_loss,
        "prior_loss": prior_loss,
    }


if __name__ == "__main__":
    B, N, INPUT_DIM, ZDIM = 4, 256, 3, 32
    TILE = 512   # rows of M=B*N per tile for conv1-3 (nt=2 -> exercises the
                 # 2-way parallel grid axis and the partial-stat reduction)

    key = jax.random.PRNGKey(0)
    kx, kp = jax.random.split(key)
    x = jax.random.normal(kx, (B, N, INPUT_DIM), jnp.float32)   # (batch, points, 3)
    params = make_params(kp, input_dim=INPUT_DIM, zdim=ZDIM)

    out = pointflow_forward(x, params, B=B, N=N, zdim=ZDIM, tile=TILE)
    z = jax.block_until_ready(out["z"])

    # correctness check against the pure-JAX reference (mirrored numerics)
    z_ref = jax.block_until_ready(encoder_ref(x, params, B=B, N=N, zdim=ZDIM))
    np.testing.assert_allclose(np.asarray(z), np.asarray(z_ref), rtol=5e-3, atol=5e-3)

    assert z.shape == (B, ZDIM)
    print("KERNEL_OK")
</pallas_src>

<mosaic_0001>
module attributes {stable_mosaic.version = 11 : i64} {
  func.func @_conv_mid_kernel(%arg0: i32, %arg1: i32, %arg2: memref<512x128xbf16, #tpu.memory_space<vmem>>, %arg3: memref<2x128xf32, #tpu.memory_space<vmem>>, %arg4: memref<128x256xbf16, #tpu.memory_space<vmem>>, %arg5: memref<1x256xf32, #tpu.memory_space<vmem>>, %arg6: memref<512x256xbf16, #tpu.memory_space<vmem>>, %arg7: memref<8x256xf32, #tpu.memory_space<vmem>>, %arg8: memref<8x256xf32, #tpu.memory_space<vmem>>) attributes {dimension_semantics = [#tpu.dimension_semantics<parallel>, #tpu.dimension_semantics<arbitrary>], iteration_bounds = array<i64: 2, 1>, scalar_prefetch = 0 : i64, scratch_operands = 0 : i64, tpu.core_type = #tpu.core_type<tc>, window_params = [{transform_indices = @transform_0, window_bounds = array<i64: 512, 128>}, {pipeline_mode = #tpu.pipeline_mode<synchronous>, transform_indices = @transform_1, window_bounds = array<i64: 2, 128>}, {pipeline_mode = #tpu.pipeline_mode<synchronous>, transform_indices = @transform_2, window_bounds = array<i64: 128, 256>}, {pipeline_mode = #tpu.pipeline_mode<synchronous>, transform_indices = @transform_3, window_bounds = array<i64: 1, 256>}, {transform_indices = @transform_4, window_bounds = array<i64: 512, 256>}, {transform_indices = @transform_5, window_bounds = array<i64: 8, 256>}, {transform_indices = @transform_6, window_bounds = array<i64: 8, 256>}]} {
    %c0_i32 = arith.constant 0 : i32
    %0 = arith.cmpi eq, %arg1, %c0_i32 : i32
    %1 = arith.extui %0 : i1 to i32
    %c0_i32_0 = arith.constant 0 : i32
    %2 = arith.cmpi ne, %1, %c0_i32_0 : i32
    scf.if %2 {
      %cst_22 = arith.constant 0.000000e+00 : f32
      %31 = vector.broadcast %cst_22 : f32 to vector<8x256xf32>
      %c0_23 = arith.constant 0 : index
      %c0_24 = arith.constant 0 : index
      %32 = vector.load %arg7[%c0_23, %c0_24] : memref<8x256xf32, #tpu.memory_space<vmem>>, vector<8x256xf32>
      tpu.vector_store %arg7[%c0_23, %c0_24], %31 {strides = array<i32>} : memref<8x256xf32, #tpu.memory_space<vmem>>, vector<8x256xf32>,
      %cst_25 = arith.constant 0.000000e+00 : f32
      %33 = vector.broadcast %cst_25 : f32 to vector<8x256xf32>
      %c0_26 = arith.constant 0 : index
      %c0_27 = arith.constant 0 : index
      %34 = vector.load %arg8[%c0_26, %c0_27] : memref<8x256xf32, #tpu.memory_space<vmem>>, vector<8x256xf32>
      tpu.vector_store %arg8[%c0_26, %c0_27], %33 {strides = array<i32>} : memref<8x256xf32, #tpu.memory_space<vmem>>, vector<8x256xf32>,
    } else {
    }
    %c0 = arith.constant 0 : index
    %c0_1 = arith.constant 0 : index
    %3 = vector.load %arg3[%c0, %c0_1] : memref<2x128xf32, #tpu.memory_space<vmem>>, vector<1x128xf32>
    %c1 = arith.constant 1 : index
    %c0_2 = arith.constant 0 : index
    %4 = vector.load %arg3[%c1, %c0_2] : memref<2x128xf32, #tpu.memory_space<vmem>>, vector<1x128xf32>
    %c0_3 = arith.constant 0 : index
    %c0_4 = arith.constant 0 : index
    %5 = vector.load %arg2[%c0_3, %c0_4] : memref<512x128xbf16, #tpu.memory_space<vmem>>, vector<512x128xbf16>
    %6 = arith.extf %5 : vector<512x128xbf16> to vector<512x128xf32>
    %7 = vector.broadcast %3 : vector<1x128xf32> to vector<512x128xf32>
    %8 = arith.mulf %6, %7 : vector<512x128xf32>
    %9 = vector.broadcast %4 : vector<1x128xf32> to vector<512x128xf32>
    %10 = arith.addf %8, %9 : vector<512x128xf32>
    %cst = arith.constant 0.000000e+00 : f32
    %11 = vector.broadcast %cst : f32 to vector<512x128xf32>
    %12 = arith.maximumf %10, %11 : vector<512x128xf32>
    %13 = arith.truncf %12 : vector<512x128xf32> to vector<512x128xbf16>
    %c0_5 = arith.constant 0 : index
    %c0_6 = arith.constant 0 : index
    %14 = vector.load %arg4[%c0_5, %c0_6] : memref<128x256xbf16, #tpu.memory_space<vmem>>, vector<128x256xbf16>
    %cst_7 = arith.constant dense<0.000000e+00> : vector<512x256xf32>
    %15 = tpu.matmul %13, %14, %cst_7 {dimension_numbers = #tpu.dot_dimension_numbers<[1], [0], [0], [1], [0, 0, 1, 1], [], []>} : vector<512x128xbf16>, vector<128x256xbf16>, vector<512x256xf32> -> vector<512x256xf32>
    %c0_8 = arith.constant 0 : index
    %c0_9 = arith.constant 0 : index
    %16 = vector.load %arg5[%c0_8, %c0_9] : memref<1x256xf32, #tpu.memory_space<vmem>>, vector<1x256xf32>
    %17 = vector.broadcast %16 : vector<1x256xf32> to vector<512x256xf32>
    %18 = arith.addf %15, %17 : vector<512x256xf32>
    %19 = vector.shape_cast %18 : vector<512x256xf32> to vector<64x8x256xf32>
    %c0_10 = arith.constant 0 : index
    %c0_11 = arith.constant 0 : index
    %20 = vector.load %arg7[%c0_10, %c0_11] : memref<8x256xf32, #tpu.memory_space<vmem>>, vector<8x256xf32>
    %cst_12 = arith.constant dense<0.000000e+00> : vector<8x256xf32>
    %21 = vector.multi_reduction <add>, %19, %cst_12 [0] : vector<64x8x256xf32> to vector<8x256xf32>
    %22 = arith.addf %20, %21 : vector<8x256xf32>
    %c0_13 = arith.constant 0 : index
    %c0_14 = arith.constant 0 : index
    %23 = vector.load %arg7[%c0_13, %c0_14] : memref<8x256xf32, #tpu.memory_space<vmem>>, vector<8x256xf32>
    tpu.vector_store %arg7[%c0_13, %c0_14], %22 {strides = array<i32>} : memref<8x256xf32, #tpu.memory_space<vmem>>, vector<8x256xf32>,
    %c0_15 = arith.constant 0 : index
    %c0_16 = arith.constant 0 : index
    %24 = vector.load %arg8[%c0_15, %c0_16] : memref<8x256xf32, #tpu.memory_space<vmem>>, vector<8x256xf32>
    %25 = arith.mulf %19, %19 : vector<64x8x256xf32>
    %cst_17 = arith.constant dense<0.000000e+00> : vector<8x256xf32>
    %26 = vector.multi_reduction <add>, %25, %cst_17 [0] : vector<64x8x256xf32> to vector<8x256xf32>
    %27 = arith.addf %24, %26 : vector<8x256xf32>
    %c0_18 = arith.constant 0 : index
    %c0_19 = arith.constant 0 : index
    %28 = vector.load %arg8[%c0_18, %c0_19] : memref<8x256xf32, #tpu.memory_space<vmem>>, vector<8x256xf32>
    tpu.vector_store %arg8[%c0_18, %c0_19], %27 {strides = array<i32>} : memref<8x256xf32, #tpu.memory_space<vmem>>, vector<8x256xf32>,
    %29 = arith.truncf %18 : vector<512x256xf32> to vector<512x256xbf16>
    %c0_20 = arith.constant 0 : index
    %c0_21 = arith.constant 0 : index
    %30 = vector.load %arg6[%c0_20, %c0_21] : memref<512x256xbf16, #tpu.memory_space<vmem>>, vector<512x256xbf16>
    tpu.vector_store %arg6[%c0_20, %c0_21], %29 {strides = array<i32>} : memref<512x256xbf16, #tpu.memory_space<vmem>>, vector<512x256xbf16>,
    return
  }
  func.func @transform_0(%arg0: i32, %arg1: i32) -> (i32, i32) {
    %c1_i32 = arith.constant 1 : i32
    %0 = arith.muli %arg0, %c1_i32 : i32
    %1 = arith.addi %0, %arg1 : i32
    %c0_i32 = arith.constant 0 : i32
    %c0_i32_0 = arith.constant 0 : i32
    return %1, %c0_i32 : i32, i32
  }
  func.func @transform_1(%arg0: i32, %arg1: i32) -> (i32, i32) {
    %c0_i32 = arith.constant 0 : i32
    %c0_i32_0 = arith.constant 0 : i32
    %c0_i32_1 = arith.constant 0 : i32
    return %c0_i32, %c0_i32_0 : i32, i32
  }
  func.func @transform_2(%arg0: i32, %arg1: i32) -> (i32, i32) {
    %c0_i32 = arith.constant 0 : i32
    %c0_i32_0 = arith.constant 0 : i32
    %c0_i32_1 = arith.constant 0 : i32
    return %c0_i32, %c0_i32_0 : i32, i32
  }
  func.func @transform_3(%arg0: i32, %arg1: i32) -> (i32, i32) {
    %c0_i32 = arith.constant 0 : i32
    %c0_i32_0 = arith.constant 0 : i32
    %c0_i32_1 = arith.constant 0 : i32
    return %c0_i32, %c0_i32_0 : i32, i32
  }
  func.func @transform_4(%arg0: i32, %arg1: i32) -> (i32, i32) {
    %c1_i32 = arith.constant 1 : i32
    %0 = arith.muli %arg0, %c1_i32 : i32
    %1 = arith.addi %0, %arg1 : i32
    %c0_i32 = arith.constant 0 : i32
    %c0_i32_0 = arith.constant 0 : i32
    return %1, %c0_i32 : i32, i32
  }
  func.func @transform_5(%arg0: i32, %arg1: i32) -> (i32, i32) {
    %c0_i32 = arith.constant 0 : i32
    %c0_i32_0 = arith.constant 0 : i32
    return %arg0, %c0_i32 : i32, i32
  }
  func.func @transform_6(%arg0: i32, %arg1: i32) -> (i32, i32) {
    %c0_i32 = arith.constant 0 : i32
    %c0_i32_0 = arith.constant 0 : i32
    return %arg0, %c0_i32 : i32, i32
  }
}

module attributes {stable_mosaic.version = 11 : i64} {
  func.func @_conv1_kernel(%arg0: i32, %arg1: i32, %arg2: memref<512x8xf32, #tpu.memory_space<vmem>>, %arg3: memref<8x128xbf16, #tpu.memory_space<vmem>>, %arg4: memref<1x128xf32, #tpu.memory_space<vmem>>, %arg5: memref<512x128xbf16, #tpu.memory_space<vmem>>, %arg6: memref<8x128xf32, #tpu.memory_space<vmem>>, %arg7: memref<8x128xf32, #tpu.memory_space<vmem>>) attributes {dimension_semantics = [#tpu.dimension_semantics<parallel>, #tpu.dimension_semantics<arbitrary>], iteration_bounds = array<i64: 2, 1>, scalar_prefetch = 0 : i64, scratch_operands = 0 : i64, tpu.core_type = #tpu.core_type<tc>, window_params = [{transform_indices = @transform_0, window_bounds = array<i64: 512, 8>}, {pipeline_mode = #tpu.pipeline_mode<synchronous>, transform_indices = @transform_1, window_bounds = array<i64: 8, 128>}, {pipeline_mode = #tpu.pipeline_mode<synchronous>, transform_indices = @transform_2, window_bounds = array<i64: 1, 128>}, {transform_indices = @transform_3, window_bounds = array<i64: 512, 128>}, {transform_indices = @transform_4, window_bounds = array<i64: 8, 128>}, {transform_indices = @transform_5, window_bounds = array<i64: 8, 128>}]} {
    %c0_i32 = arith.constant 0 : i32
    %0 = arith.cmpi eq, %arg1, %c0_i32 : i32
    %1 = arith.extui %0 : i1 to i32
    %c0_i32_0 = arith.constant 0 : i32
    %2 = arith.cmpi ne, %1, %c0_i32_0 : i32
    scf.if %2 {
      %cst_18 = arith.constant 0.000000e+00 : f32
      %22 = vector.broadcast %cst_18 : f32 to vector<8x128xf32>
      %c0_19 = arith.constant 0 : index
      %c0_20 = arith.constant 0 : index
      %23 = vector.load %arg6[%c0_19, %c0_20] : memref<8x128xf32, #tpu.memory_space<vmem>>, vector<8x128xf32>
      tpu.vector_store %arg6[%c0_19, %c0_20], %22 {strides = array<i32>} : memref<8x128xf32, #tpu.memory_space<vmem>>, vector<8x128xf32>,
      %cst_21 = arith.constant 0.000000e+00 : f32
      %24 = vector.broadcast %cst_21 : f32 to vector<8x128xf32>
      %c0_22 = arith.constant 0 : index
      %c0_23 = arith.constant 0 : index
      %25 = vector.load %arg7[%c0_22, %c0_23] : memref<8x128xf32, #tpu.memory_space<vmem>>, vector<8x128xf32>
      tpu.vector_store %arg7[%c0_22, %c0_23], %24 {strides = array<i32>} : memref<8x128xf32, #tpu.memory_space<vmem>>, vector<8x128xf32>,
    } else {
    }
    %c0 = arith.constant 0 : index
    %c0_1 = arith.constant 0 : index
    %3 = vector.load %arg2[%c0, %c0_1] : memref<512x8xf32, #tpu.memory_space<vmem>>, vector<512x8xf32>
    %4 = arith.truncf %3 : vector<512x8xf32> to vector<512x8xbf16>
    %c0_2 = arith.constant 0 : index
    %c0_3 = arith.constant 0 : index
    %5 = vector.load %arg3[%c0_2, %c0_3] : memref<8x128xbf16, #tpu.memory_space<vmem>>, vector<8x128xbf16>
    %cst = arith.constant dense<0.000000e+00> : vector<512x128xf32>
    %6 = tpu.matmul %4, %5, %cst {dimension_numbers = #tpu.dot_dimension_numbers<[1], [0], [0], [1], [0, 0, 1, 1], [], []>} : vector<512x8xbf16>, vector<8x128xbf16>, vector<512x128xf32> -> vector<512x128xf32>
    %c0_4 = arith.constant 0 : index
    %c0_5 = arith.constant 0 : index
    %7 = vector.load %arg4[%c0_4, %c0_5] : memref<1x128xf32, #tpu.memory_space<vmem>>, vector<1x128xf32>
    %8 = vector.broadcast %7 : vector<1x128xf32> to vector<512x128xf32>
    %9 = arith.addf %6, %8 : vector<512x128xf32>
    %10 = vector.shape_cast %9 : vector<512x128xf32> to vector<64x8x128xf32>
    %c0_6 = arith.constant 0 : index
    %c0_7 = arith.constant 0 : index
    %11 = vector.load %arg6[%c0_6, %c0_7] : memref<8x128xf32, #tpu.memory_space<vmem>>, vector<8x128xf32>
    %cst_8 = arith.constant dense<0.000000e+00> : vector<8x128xf32>
    %12 = vector.multi_reduction <add>, %10, %cst_8 [0] : vector<64x8x128xf32> to vector<8x128xf32>
    %13 = arith.addf %11, %12 : vector<8x128xf32>
    %c0_9 = arith.constant 0 : index
    %c0_10 = arith.constant 0 : index
    %14 = vector.load %arg6[%c0_9, %c0_10] : memref<8x128xf32, #tpu.memory_space<vmem>>, vector<8x128xf32>
    tpu.vector_store %arg6[%c0_9, %c0_10], %13 {strides = array<i32>} : memref<8x128xf32, #tpu.memory_space<vmem>>, vector<8x128xf32>,
    %c0_11 = arith.constant 0 : index
    %c0_12 = arith.constant 0 : index
    %15 = vector.load %arg7[%c0_11, %c0_12] : memref<8x128xf32, #tpu.memory_space<vmem>>, vector<8x128xf32>
    %16 = arith.mulf %10, %10 : vector<64x8x128xf32>
    %cst_13 = arith.constant dense<0.000000e+00> : vector<8x128xf32>
    %17 = vector.multi_reduction <add>, %16, %cst_13 [0] : vector<64x8x128xf32> to vector<8x128xf32>
    %18 = arith.addf %15, %17 : vector<8x128xf32>
    %c0_14 = arith.constant 0 : index
    %c0_15 = arith.constant 0 : index
    %19 = vector.load %arg7[%c0_14, %c0_15] : memref<8x128xf32, #tpu.memory_space<vmem>>, vector<8x128xf32>
    tpu.vector_store %arg7[%c0_14, %c0_15], %18 {strides = array<i32>} : memref<8x128xf32, #tpu.memory_space<vmem>>, vector<8x128xf32>,
    %20 = arith.truncf %9 : vector<512x128xf32> to vector<512x128xbf16>
    %c0_16 = arith.constant 0 : index
    %c0_17 = arith.constant 0 : index
    %21 = vector.load %arg5[%c0_16, %c0_17] : memref<512x128xbf16, #tpu.memory_space<vmem>>, vector<512x128xbf16>
    tpu.vector_store %arg5[%c0_16, %c0_17], %20 {strides = array<i32>} : memref<512x128xbf16, #tpu.memory_space<vmem>>, vector<512x128xbf16>,
    return
  }
  func.func @transform_0(%arg0: i32, %arg1: i32) -> (i32, i32) {
    %c1_i32 = arith.constant 1 : i32
    %0 = arith.muli %arg0, %c1_i32 : i32
    %1 = arith.addi %0, %arg1 : i32
    %c0_i32 = arith.constant 0 : i32
    %c0_i32_0 = arith.constant 0 : i32
    return %1, %c0_i32 : i32, i32
  }
  func.func @transform_1(%arg0: i32, %arg1: i32) -> (i32, i32) {
    %c0_i32 = arith.constant 0 : i32
    %c0_i32_0 = arith.constant 0 : i32
    %c0_i32_1 = arith.constant 0 : i32
    return %c0_i32, %c0_i32_0 : i32, i32
  }
  func.func @transform_2(%arg0: i32, %arg1: i32) -> (i32, i32) {
    %c0_i32 = arith.constant 0 : i32
    %c0_i32_0 = arith.constant 0 : i32
    %c0_i32_1 = arith.constant 0 : i32
    return %c0_i32, %c0_i32_0 : i32, i32
  }
  func.func @transform_3(%arg0: i32, %arg1: i32) -> (i32, i32) {
    %c1_i32 = arith.constant 1 : i32
    %0 = arith.muli %arg0, %c1_i32 : i32
    %1 = arith.addi %0, %arg1 : i32
    %c0_i32 = arith.constant 0 : i32
    %c0_i32_0 = arith.constant 0 : i32
    return %1, %c0_i32 : i32, i32
  }
  func.func @transform_4(%arg0: i32, %arg1: i32) -> (i32, i32) {
    %c0_i32 = arith.constant 0 : i32
    %c0_i32_0 = arith.constant 0 : i32
    return %arg0, %c0_i32 : i32, i32
  }
  func.func @transform_5(%arg0: i32, %arg1: i32) -> (i32, i32) {
    %c0_i32 = arith.constant 0 : i32
    %c0_i32_0 = arith.constant 0 : i32
    return %arg0, %c0_i32 : i32, i32
  }
}

module attributes {stable_mosaic.version = 11 : i64} {
  func.func @_conv_mid_kernel(%arg0: i32, %arg1: i32, %arg2: memref<512x128xbf16, #tpu.memory_space<vmem>>, %arg3: memref<2x128xf32, #tpu.memory_space<vmem>>, %arg4: memref<128x128xbf16, #tpu.memory_space<vmem>>, %arg5: memref<1x128xf32, #tpu.memory_space<vmem>>, %arg6: memref<512x128xbf16, #tpu.memory_space<vmem>>, %arg7: memref<8x128xf32, #tpu.memory_space<vmem>>, %arg8: memref<8x128xf32, #tpu.memory_space<vmem>>) attributes {dimension_semantics = [#tpu.dimension_semantics<parallel>, #tpu.dimension_semantics<arbitrary>], iteration_bounds = array<i64: 2, 1>, scalar_prefetch = 0 : i64, scratch_operands = 0 : i64, tpu.core_type = #tpu.core_type<tc>, window_params = [{transform_indices = @transform_0, window_bounds = array<i64: 512, 128>}, {pipeline_mode = #tpu.pipeline_mode<synchronous>, transform_indices = @transform_1, window_bounds = array<i64: 2, 128>}, {pipeline_mode = #tpu.pipeline_mode<synchronous>, transform_indices = @transform_2, window_bounds = array<i64: 128, 128>}, {pipeline_mode = #tpu.pipeline_mode<synchronous>, transform_indices = @transform_3, window_bounds = array<i64: 1, 128>}, {transform_indices = @transform_4, window_bounds = array<i64: 512, 128>}, {transform_indices = @transform_5, window_bounds = array<i64: 8, 128>}, {transform_indices = @transform_6, window_bounds = array<i64: 8, 128>}]} {
    %c0_i32 = arith.constant 0 : i32
    %0 = arith.cmpi eq, %arg1, %c0_i32 : i32
    %1 = arith.extui %0 : i1 to i32
    %c0_i32_0 = arith.constant 0 : i32
    %2 = arith.cmpi ne, %1, %c0_i32_0 : i32
    scf.if %2 {
      %cst_22 = arith.constant 0.000000e+00 : f32
      %31 = vector.broadcast %cst_22 : f32 to vector<8x128xf32>
      %c0_23 = arith.constant 0 : index
      %c0_24 = arith.constant 0 : index
      %32 = vector.load %arg7[%c0_23, %c0_24] : memref<8x128xf32, #tpu.memory_space<vmem>>, vector<8x128xf32>
      tpu.vector_store %arg7[%c0_23, %c0_24], %31 {strides = array<i32>} : memref<8x128xf32, #tpu.memory_space<vmem>>, vector<8x128xf32>,
      %cst_25 = arith.constant 0.000000e+00 : f32
      %33 = vector.broadcast %cst_25 : f32 to vector<8x128xf32>
      %c0_26 = arith.constant 0 : index
      %c0_27 = arith.constant 0 : index
      %34 = vector.load %arg8[%c0_26, %c0_27] : memref<8x128xf32, #tpu.memory_space<vmem>>, vector<8x128xf32>
      tpu.vector_store %arg8[%c0_26, %c0_27], %33 {strides = array<i32>} : memref<8x128xf32, #tpu.memory_space<vmem>>, vector<8x128xf32>,
    } else {
    }
    %c0 = arith.constant 0 : index
    %c0_1 = arith.constant 0 : index
    %3 = vector.load %arg3[%c0, %c0_1] : memref<2x128xf32, #tpu.memory_space<vmem>>, vector<1x128xf32>
    %c1 = arith.constant 1 : index
    %c0_2 = arith.constant 0 : index
    %4 = vector.load %arg3[%c1, %c0_2] : memref<2x128xf32, #tpu.memory_space<vmem>>, vector<1x128xf32>
    %c0_3 = arith.constant 0 : index
    %c0_4 = arith.constant 0 : index
    %5 = vector.load %arg2[%c0_3, %c0_4] : memref<512x128xbf16, #tpu.memory_space<vmem>>, vector<512x128xbf16>
    %6 = arith.extf %5 : vector<512x128xbf16> to vector<512x128xf32>
    %7 = vector.broadcast %3 : vector<1x128xf32> to vector<512x128xf32>
    %8 = arith.mulf %6, %7 : vector<512x128xf32>
    %9 = vector.broadcast %4 : vector<1x128xf32> to vector<512x128xf32>
    %10 = arith.addf %8, %9 : vector<512x128xf32>
    %cst = arith.constant 0.000000e+00 : f32
    %11 = vector.broadcast %cst : f32 to vector<512x128xf32>
    %12 = arith.maximumf %10, %11 : vector<512x128xf32>
    %13 = arith.truncf %12 : vector<512x128xf32> to vector<512x128xbf16>
    %c0_5 = arith.constant 0 : index
    %c0_6 = arith.constant 0 : index
    %14 = vector.load %arg4[%c0_5, %c0_6] : memref<128x128xbf16, #tpu.memory_space<vmem>>, vector<128x128xbf16>
    %cst_7 = arith.constant dense<0.000000e+00> : vector<512x128xf32>
    %15 = tpu.matmul %13, %14, %cst_7 {dimension_numbers = #tpu.dot_dimension_numbers<[1], [0], [0], [1], [0, 0, 1, 1], [], []>} : vector<512x128xbf16>, vector<128x128xbf16>, vector<512x128xf32> -> vector<512x128xf32>
    %c0_8 = arith.constant 0 : index
    %c0_9 = arith.constant 0 : index
    %16 = vector.load %arg5[%c0_8, %c0_9] : memref<1x128xf32, #tpu.memory_space<vmem>>, vector<1x128xf32>
    %17 = vector.broadcast %16 : vector<1x128xf32> to vector<512x128xf32>
    %18 = arith.addf %15, %17 : vector<512x128xf32>
    %19 = vector.shape_cast %18 : vector<512x128xf32> to vector<64x8x128xf32>
    %c0_10 = arith.constant 0 : index
    %c0_11 = arith.constant 0 : index
    %20 = vector.load %arg7[%c0_10, %c0_11] : memref<8x128xf32, #tpu.memory_space<vmem>>, vector<8x128xf32>
    %cst_12 = arith.constant dense<0.000000e+00> : vector<8x128xf32>
    %21 = vector.multi_reduction <add>, %19, %cst_12 [0] : vector<64x8x128xf32> to vector<8x128xf32>
    %22 = arith.addf %20, %21 : vector<8x128xf32>
    %c0_13 = arith.constant 0 : index
    %c0_14 = arith.constant 0 : index
    %23 = vector.load %arg7[%c0_13, %c0_14] : memref<8x128xf32, #tpu.memory_space<vmem>>, vector<8x128xf32>
    tpu.vector_store %arg7[%c0_13, %c0_14], %22 {strides = array<i32>} : memref<8x128xf32, #tpu.memory_space<vmem>>, vector<8x128xf32>,
    %c0_15 = arith.constant 0 : index
    %c0_16 = arith.constant 0 : index
    %24 = vector.load %arg8[%c0_15, %c0_16] : memref<8x128xf32, #tpu.memory_space<vmem>>, vector<8x128xf32>
    %25 = arith.mulf %19, %19 : vector<64x8x128xf32>
    %cst_17 = arith.constant dense<0.000000e+00> : vector<8x128xf32>
    %26 = vector.multi_reduction <add>, %25, %cst_17 [0] : vector<64x8x128xf32> to vector<8x128xf32>
    %27 = arith.addf %24, %26 : vector<8x128xf32>
    %c0_18 = arith.constant 0 : index
    %c0_19 = arith.constant 0 : index
    %28 = vector.load %arg8[%c0_18, %c0_19] : memref<8x128xf32, #tpu.memory_space<vmem>>, vector<8x128xf32>
    tpu.vector_store %arg8[%c0_18, %c0_19], %27 {strides = array<i32>} : memref<8x128xf32, #tpu.memory_space<vmem>>, vector<8x128xf32>,
    %29 = arith.truncf %18 : vector<512x128xf32> to vector<512x128xbf16>
    %c0_20 = arith.constant 0 : index
    %c0_21 = arith.constant 0 : index
    %30 = vector.load %arg6[%c0_20, %c0_21] : memref<512x128xbf16, #tpu.memory_space<vmem>>, vector<512x128xbf16>
    tpu.vector_store %arg6[%c0_20, %c0_21], %29 {strides = array<i32>} : memref<512x128xbf16, #tpu.memory_space<vmem>>, vector<512x128xbf16>,
    return
  }
  func.func @transform_0(%arg0: i32, %arg1: i32) -> (i32, i32) {
    %c1_i32 = arith.constant 1 : i32
    %0 = arith.muli %arg0, %c1_i32 : i32
    %1 = arith.addi %0, %arg1 : i32
    %c0_i32 = arith.constant 0 : i32
    %c0_i32_0 = arith.constant 0 : i32
    return %1, %c0_i32 : i32, i32
  }
  func.func @transform_1(%arg0: i32, %arg1: i32) -> (i32, i32) {
    %c0_i32 = arith.constant 0 : i32
    %c0_i32_0 = arith.constant 0 : i32
    %c0_i32_1 = arith.constant 0 : i32
    return %c0_i32, %c0_i32_0 : i32, i32
  }
  func.func @transform_2(%arg0: i32, %arg1: i32) -> (i32, i32) {
    %c0_i32 = arith.constant 0 : i32
    %c0_i32_0 = arith.constant 0 : i32
    %c0_i32_1 = arith.constant 0 : i32
    return %c0_i32, %c0_i32_0 : i32, i32
  }
  func.func @transform_3(%arg0: i32, %arg1: i32) -> (i32, i32) {
    %c0_i32 = arith.constant 0 : i32
    %c0_i32_0 = arith.constant 0 : i32
    %c0_i32_1 = arith.constant 0 : i32
    return %c0_i32, %c0_i32_0 : i32, i32
  }
  func.func @transform_4(%arg0: i32, %arg1: i32) -> (i32, i32) {
    %c1_i32 = arith.constant 1 : i32
    %0 = arith.muli %arg0, %c1_i32 : i32
    %1 = arith.addi %0, %arg1 : i32
    %c0_i32 = arith.constant 0 : i32
    %c0_i32_0 = arith.constant 0 : i32
    return %1, %c0_i32 : i32, i32
  }
  func.func @transform_5(%arg0: i32, %arg1: i32) -> (i32, i32) {
    %c0_i32 = arith.constant 0 : i32
    %c0_i32_0 = arith.constant 0 : i32
    return %arg0, %c0_i32 : i32, i32
  }
  func.func @transform_6(%arg0: i32, %arg1: i32) -> (i32, i32) {
    %c0_i32 = arith.constant 0 : i32
    %c0_i32_0 = arith.constant 0 : i32
    return %arg0, %c0_i32 : i32, i32
  }
}

module attributes {stable_mosaic.version = 11 : i64} {
  func.func @_conv4_pool_kernel(%arg0: i32, %arg1: i32, %arg2: memref<256x256xbf16, #tpu.memory_space<vmem>>, %arg3: memref<2x256xf32, #tpu.memory_space<vmem>>, %arg4: memref<256x512xbf16, #tpu.memory_space<vmem>>, %arg5: memref<1x512xf32, #tpu.memory_space<vmem>>, %arg6: memref<8x512xf32, #tpu.memory_space<vmem>>, %arg7: memref<8x512xf32, #tpu.memory_space<vmem>>, %arg8: memref<8x512xf32, #tpu.memory_space<vmem>>, %arg9: memref<8x512xf32, #tpu.memory_space<vmem>>) attributes {dimension_semantics = [#tpu.dimension_semantics<parallel>, #tpu.dimension_semantics<arbitrary>], iteration_bounds = array<i64: 4, 1>, scalar_prefetch = 0 : i64, scratch_operands = 0 : i64, tpu.core_type = #tpu.core_type<tc>, window_params = [{transform_indices = @transform_0, window_bounds = array<i64: 256, 256>}, {pipeline_mode = #tpu.pipeline_mode<synchronous>, transform_indices = @transform_1, window_bounds = array<i64: 2, 256>}, {pipeline_mode = #tpu.pipeline_mode<synchronous>, transform_indices = @transform_2, window_bounds = array<i64: 256, 512>}, {pipeline_mode = #tpu.pipeline_mode<synchronous>, transform_indices = @transform_3, window_bounds = array<i64: 1, 512>}, {transform_indices = @transform_4, window_bounds = array<i64: 8, 512>}, {transform_indices = @transform_5, window_bounds = array<i64: 8, 512>}, {transform_indices = @transform_6, window_bounds = array<i64: 8, 512>}, {transform_indices = @transform_7, window_bounds = array<i64: 8, 512>}]} {
    %c0_i32 = arith.constant 0 : i32
    %0 = arith.cmpi eq, %arg1, %c0_i32 : i32
    %1 = arith.extui %0 : i1 to i32
    %c0_i32_0 = arith.constant 0 : i32
    %2 = arith.cmpi ne, %1, %c0_i32_0 : i32
    scf.if %2 {
      %cst_30 = arith.constant 0.000000e+00 : f32
      %37 = vector.broadcast %cst_30 : f32 to vector<8x512xf32>
      %c0_31 = arith.constant 0 : index
      %c0_32 = arith.constant 0 : index
      %38 = vector.load %arg8[%c0_31, %c0_32] : memref<8x512xf32, #tpu.memory_space<vmem>>, vector<8x512xf32>
      tpu.vector_store %arg8[%c0_31, %c0_32], %37 {strides = array<i32>} : memref<8x512xf32, #tpu.memory_space<vmem>>, vector<8x512xf32>,
      %cst_33 = arith.constant 0.000000e+00 : f32
      %39 = vector.broadcast %cst_33 : f32 to vector<8x512xf32>
      %c0_34 = arith.constant 0 : index
      %c0_35 = arith.constant 0 : index
      %40 = vector.load %arg9[%c0_34, %c0_35] : memref<8x512xf32, #tpu.memory_space<vmem>>, vector<8x512xf32>
      tpu.vector_store %arg9[%c0_34, %c0_35], %39 {strides = array<i32>} : memref<8x512xf32, #tpu.memory_space<vmem>>, vector<8x512xf32>,
      %cst_36 = arith.constant 0xFF800000 : f32
      %41 = vector.broadcast %cst_36 : f32 to vector<8x512xf32>
      %c0_37 = arith.constant 0 : index
      %c0_38 = arith.constant 0 : index
      %42 = vector.load %arg6[%c0_37, %c0_38] : memref<8x512xf32, #tpu.memory_space<vmem>>, vector<8x512xf32>
      tpu.vector_store %arg6[%c0_37, %c0_38], %41 {strides = array<i32>} : memref<8x512xf32, #tpu.memory_space<vmem>>, vector<8x512xf32>,
      %cst_39 = arith.constant 0x7F800000 : f32
      %43 = vector.broadcast %cst_39 : f32 to vector<8x512xf32>
      %c0_40 = arith.constant 0 : index
      %c0_41 = arith.constant 0 : index
      %44 = vector.load %arg7[%c0_40, %c0_41] : memref<8x512xf32, #tpu.memory_space<vmem>>, vector<8x512xf32>
      tpu.vector_store %arg7[%c0_40, %c0_41], %43 {strides = array<i32>} : memref<8x512xf32, #tpu.memory_space<vmem>>, vector<8x512xf32>,
    } else {
    }
    %c0 = arith.constant 0 : index
    %c0_1 = arith.constant 0 : index
    %3 = vector.load %arg3[%c0, %c0_1] : memref<2x256xf32, #tpu.memory_space<vmem>>, vector<1x256xf32>
    %c1 = arith.constant 1 : index
    %c0_2 = arith.constant 0 : index
    %4 = vector.load %arg3[%c1, %c0_2] : memref<2x256xf32, #tpu.memory_space<vmem>>, vector<1x256xf32>
    %c0_3 = arith.constant 0 : index
    %c0_4 = arith.constant 0 : index
    %5 = vector.load %arg2[%c0_3, %c0_4] : memref<256x256xbf16, #tpu.memory_space<vmem>>, vector<256x256xbf16>
    %6 = arith.extf %5 : vector<256x256xbf16> to vector<256x256xf32>
    %7 = vector.broadcast %3 : vector<1x256xf32> to vector<256x256xf32>
    %8 = arith.mulf %6, %7 : vector<256x256xf32>
    %9 = vector.broadcast %4 : vector<1x256xf32> to vector<256x256xf32>
    %10 = arith.addf %8, %9 : vector<256x256xf32>
    %cst = arith.constant 0.000000e+00 : f32
    %11 = vector.broadcast %cst : f32 to vector<256x256xf32>
    %12 = arith.maximumf %10, %11 : vector<256x256xf32>
    %13 = arith.truncf %12 : vector<256x256xf32> to vector<256x256xbf16>
    %c0_5 = arith.constant 0 : index
    %c0_6 = arith.constant 0 : index
    %14 = vector.load %arg4[%c0_5, %c0_6] : memref<256x512xbf16, #tpu.memory_space<vmem>>, vector<256x512xbf16>
    %cst_7 = arith.constant dense<0.000000e+00> : vector<256x512xf32>
    %15 = tpu.matmul %13, %14, %cst_7 {dimension_numbers = #tpu.dot_dimension_numbers<[1], [0], [0], [1], [0, 0, 1, 1], [], []>} : vector<256x256xbf16>, vector<256x512xbf16>, vector<256x512xf32> -> vector<256x512xf32>
    %c0_8 = arith.constant 0 : index
    %c0_9 = arith.constant 0 : index
    %16 = vector.load %arg5[%c0_8, %c0_9] : memref<1x512xf32, #tpu.memory_space<vmem>>, vector<1x512xf32>
    %17 = vector.broadcast %16 : vector<1x512xf32> to vector<256x512xf32>
    %18 = arith.addf %15, %17 : vector<256x512xf32>
    %19 = vector.shape_cast %18 : vector<256x512xf32> to vector<32x8x512xf32>
    %c0_10 = arith.constant 0 : index
    %c0_11 = arith.constant 0 : index
    %20 = vector.load %arg8[%c0_10, %c0_11] : memref<8x512xf32, #tpu.memory_space<vmem>>, vector<8x512xf32>
    %cst_12 = arith.constant dense<0.000000e+00> : vector<8x512xf32>
    %21 = vector.multi_reduction <add>, %19, %cst_12 [0] : vector<32x8x512xf32> to vector<8x512xf32>
    %22 = arith.addf %20, %21 : vector<8x512xf32>
    %c0_13 = arith.constant 0 : index
    %c0_14 = arith.constant 0 : index
    %23 = vector.load %arg8[%c0_13, %c0_14] : memref<8x512xf32, #tpu.memory_space<vmem>>, vector<8x512xf32>
    tpu.vector_store %arg8[%c0_13, %c0_14], %22 {strides = array<i32>} : memref<8x512xf32, #tpu.memory_space<vmem>>, vector<8x512xf32>,
    %c0_15 = arith.constant 0 : index
    %c0_16 = arith.constant 0 : index
    %24 = vector.load %arg9[%c0_15, %c0_16] : memref<8x512xf32, #tpu.memory_space<vmem>>, vector<8x512xf32>
    %25 = arith.mulf %19, %19 : vector<32x8x512xf32>
    %cst_17 = arith.constant dense<0.000000e+00> : vector<8x512xf32>
    %26 = vector.multi_reduction <add>, %25, %cst_17 [0] : vector<32x8x512xf32> to vector<8x512xf32>
    %27 = arith.addf %24, %26 : vector<8x512xf32>
    %c0_18 = arith.constant 0 : index
    %c0_19 = arith.constant 0 : index
    %28 = vector.load %arg9[%c0_18, %c0_19] : memref<8x512xf32, #tpu.memory_space<vmem>>, vector<8x512xf32>
    tpu.vector_store %arg9[%c0_18, %c0_19], %27 {strides = array<i32>} : memref<8x512xf32, #tpu.memory_space<vmem>>, vector<8x512xf32>,
    %c0_20 = arith.constant 0 : index
    %c0_21 = arith.constant 0 : index
    %29 = vector.load %arg6[%c0_20, %c0_21] : memref<8x512xf32, #tpu.memory_space<vmem>>, vector<8x512xf32>
    %cst_22 = arith.constant dense<0xFF800000> : vector<8x512xf32>
    %30 = vector.multi_reduction <maximumf>, %19, %cst_22 [0] : vector<32x8x512xf32> to vector<8x512xf32>
    %31 = arith.maximumf %29, %30 : vector<8x512xf32>
    %c0_23 = arith.constant 0 : index
    %c0_24 = arith.constant 0 : index
    %32 = vector.load %arg6[%c0_23, %c0_24] : memref<8x512xf32, #tpu.memory_space<vmem>>, vector<8x512xf32>
    tpu.vector_store %arg6[%c0_23, %c0_24], %31 {strides = array<i32>} : memref<8x512xf32, #tpu.memory_space<vmem>>, vector<8x512xf32>,
    %c0_25 = arith.constant 0 : index
    %c0_26 = arith.constant 0 : index
    %33 = vector.load %arg7[%c0_25, %c0_26] : memref<8x512xf32, #tpu.memory_space<vmem>>, vector<8x512xf32>
    %cst_27 = arith.constant dense<0x7F800000> : vector<8x512xf32>
    %34 = vector.multi_reduction <minimumf>, %19, %cst_27 [0] : vector<32x8x512xf32> to vector<8x512xf32>
    %35 = arith.minimumf %33, %34 : vector<8x512xf32>
    %c0_28 = arith.constant 0 : index
    %c0_29 = arith.constant 0 : index
    %36 = vector.load %arg7[%c0_28, %c0_29] : memref<8x512xf32, #tpu.memory_space<vmem>>, vector<8x512xf32>
    tpu.vector_store %arg7[%c0_28, %c0_29], %35 {strides = array<i32>} : memref<8x512xf32, #tpu.memory_space<vmem>>, vector<8x512xf32>,
    return
  }
  func.func @transform_0(%arg0: i32, %arg1: i32) -> (i32, i32) {
    %c1_i32 = arith.constant 1 : i32
    %0 = arith.muli %arg0, %c1_i32 : i32
    %1 = arith.addi %0, %arg1 : i32
    %c0_i32 = arith.constant 0 : i32
    %c0_i32_0 = arith.constant 0 : i32
    return %1, %c0_i32 : i32, i32
  }
  func.func @transform_1(%arg0: i32, %arg1: i32) -> (i32, i32) {
    %c0_i32 = arith.constant 0 : i32
    %c0_i32_0 = arith.constant 0 : i32
    %c0_i32_1 = arith.constant 0 : i32
    return %c0_i32, %c0_i32_0 : i32, i32
  }
  func.func @transform_2(%arg0: i32, %arg1: i32) -> (i32, i32) {
    %c0_i32 = arith.constant 0 : i32
    %c0_i32_0 = arith.constant 0 : i32
    %c0_i32_1 = arith.constant 0 : i32
    return %c0_i32, %c0_i32_0 : i32, i32
  }
  func.func @transform_3(%arg0: i32, %arg1: i32) -> (i32, i32) {
    %c0_i32 = arith.constant 0 : i32
    %c0_i32_0 = arith.constant 0 : i32
    %c0_i32_1 = arith.constant 0 : i32
    return %c0_i32, %c0_i32_0 : i32, i32
  }
  func.func @transform_4(%arg0: i32, %arg1: i32) -> (i32, i32) {
    %c0_i32 = arith.constant 0 : i32
    %c0_i32_0 = arith.constant 0 : i32
    return %arg0, %c0_i32 : i32, i32
  }
  func.func @transform_5(%arg0: i32, %arg1: i32) -> (i32, i32) {
    %c0_i32 = arith.constant 0 : i32
    %c0_i32_0 = arith.constant 0 : i32
    return %arg0, %c0_i32 : i32, i32
  }
  func.func @transform_6(%arg0: i32, %arg1: i32) -> (i32, i32) {
    %c0_i32 = arith.constant 0 : i32
    %c0_i32_0 = arith.constant 0 : i32
    return %arg0, %c0_i32 : i32, i32
  }
  func.func @transform_7(%arg0: i32, %arg1: i32) -> (i32, i32) {
    %c0_i32 = arith.constant 0 : i32
    %c0_i32_0 = arith.constant 0 : i32
    return %arg0, %c0_i32 : i32, i32
  }
}

module attributes {stable_mosaic.version = 11 : i64} {
  func.func @_fc_head_kernel(%arg0: memref<8x512xf32, #tpu.memory_space<vmem>>, %arg1: memref<512x256xbf16, #tpu.memory_space<vmem>>, %arg2: memref<256x128xbf16, #tpu.memory_space<vmem>>, %arg3: memref<128x128xbf16, #tpu.memory_space<vmem>>, %arg4: memref<8x256xf32, #tpu.memory_space<vmem>>, %arg5: memref<8x128xf32, #tpu.memory_space<vmem>>) attributes {dimension_semantics = [], scalar_prefetch = 0 : i64, scratch_operands = 0 : i64, tpu.core_type = #tpu.core_type<tc>} {
    %c0 = arith.constant 0 : index
    %c0_0 = arith.constant 0 : index
    %0 = vector.load %arg0[%c0, %c0_0] : memref<8x512xf32, #tpu.memory_space<vmem>>, vector<8x512xf32>
    %1 = tpu.iota {dimensions = array<i32: 0>} : vector<8x1xi32>
    %c4_i32 = arith.constant 4 : i32
    %2 = vector.broadcast %c4_i32 : i32 to vector<8x1xi32>
    %3 = arith.cmpi slt, %1, %2 : vector<8x1xi32>
    %4 = arith.extui %3 : vector<8x1xi1> to vector<8x1xi32>
    %5 = arith.sitofp %4 : vector<8x1xi32> to vector<8x1xf32>
    %c0_1 = arith.constant 0 : index
    %c0_2 = arith.constant 0 : index
    %6 = vector.load %arg4[%c0_1, %c0_2] : memref<8x256xf32, #tpu.memory_space<vmem>>, vector<8x256xf32>
    %7 = arith.truncf %0 : vector<8x512xf32> to vector<8x512xbf16>
    %c0_3 = arith.constant 0 : index
    %c0_4 = arith.constant 0 : index
    %8 = vector.load %arg1[%c0_3, %c0_4] : memref<512x256xbf16, #tpu.memory_space<vmem>>, vector<512x256xbf16>
    %cst = arith.constant dense<0.000000e+00> : vector<8x256xf32>
    %9 = tpu.matmul %7, %8, %cst {dimension_numbers = #tpu.dot_dimension_numbers<[1], [0], [0], [1], [0, 0, 1, 1], [], []>} : vector<8x512xbf16>, vector<512x256xbf16>, vector<8x256xf32> -> vector<8x256xf32>
    %10 = vector.extract_strided_slice %6 {offsets = [0, 0], sizes = [1, 256], strides = [1, 1]} : vector<8x256xf32> to vector<1x256xf32>
    %11 = vector.broadcast %10 : vector<1x256xf32> to vector<8x256xf32>
    %12 = arith.addf %9, %11 : vector<8x256xf32>
    %13 = vector.extract_strided_slice %6 {offsets = [1, 0], sizes = [1, 256], strides = [1, 1]} : vector<8x256xf32> to vector<1x256xf32>
    %14 = vector.extract_strided_slice %6 {offsets = [2, 0], sizes = [1, 256], strides = [1, 1]} : vector<8x256xf32> to vector<1x256xf32>
    %15 = vector.broadcast %5 : vector<8x1xf32> to vector<8x256xf32>
    %16 = arith.mulf %12, %15 : vector<8x256xf32>
    %cst_5 = arith.constant dense<0.000000e+00> : vector<256xf32>
    %17 = vector.multi_reduction <add>, %16, %cst_5 [0] : vector<8x256xf32> to vector<256xf32>
    %18 = vector.shape_cast %17 : vector<256xf32> to vector<1x256xf32>
    %cst_6 = arith.constant 2.500000e-01 : f32
    %19 = vector.broadcast %cst_6 : f32 to vector<1x256xf32>
    %20 = arith.mulf %18, %19 : vector<1x256xf32>
    %21 = arith.mulf %16, %16 : vector<8x256xf32>
    %cst_7 = arith.constant dense<0.000000e+00> : vector<256xf32>
    %22 = vector.multi_reduction <add>, %21, %cst_7 [0] : vector<8x256xf32> to vector<256xf32>
    %23 = vector.shape_cast %22 : vector<256xf32> to vector<1x256xf32>
    %cst_8 = arith.constant 2.500000e-01 : f32
    %24 = vector.broadcast %cst_8 : f32 to vector<1x256xf32>
    %25 = arith.mulf %23, %24 : vector<1x256xf32>
    %26 = arith.mulf %20, %20 : vector<1x256xf32>
    %27 = arith.subf %25, %26 : vector<1x256xf32>
    %cst_9 = arith.constant 9.99999974E-6 : f32
    %28 = vector.broadcast %cst_9 : f32 to vector<1x256xf32>
    %29 = arith.addf %27, %28 : vector<1x256xf32>
    %30 = math.rsqrt %29 : vector<1x256xf32>
    %31 = arith.mulf %13, %30 : vector<1x256xf32>
    %32 = arith.mulf %20, %31 : vector<1x256xf32>
    %33 = arith.subf %14, %32 : vector<1x256xf32>
    %34 = vector.broadcast %31 : vector<1x256xf32> to vector<8x256xf32>
    %35 = arith.mulf %12, %34 : vector<8x256xf32>
    %36 = vector.broadcast %33 : vector<1x256xf32> to vector<8x256xf32>
    %37 = arith.addf %35, %36 : vector<8x256xf32>
    %cst_10 = arith.constant 0.000000e+00 : f32
    %38 = vector.broadcast %cst_10 : f32 to vector<8x256xf32>
    %39 = arith.maximumf %37, %38 : vector<8x256xf32>
    %40 = arith.truncf %39 : vector<8x256xf32> to vector<8x256xbf16>
    %c0_11 = arith.constant 0 : index
    %c0_12 = arith.constant 0 : index
    %41 = vector.load %arg2[%c0_11, %c0_12] : memref<256x128xbf16, #tpu.memory_space<vmem>>, vector<256x128xbf16>
    %cst_13 = arith.constant dense<0.000000e+00> : vector<8x128xf32>
    %42 = tpu.matmul %40, %41, %cst_13 {dimension_numbers = #tpu.dot_dimension_numbers<[1], [0], [0], [1], [0, 0, 1, 1], [], []>} : vector<8x256xbf16>, vector<256x128xbf16>, vector<8x128xf32> -> vector<8x128xf32>
    %43 = vector.extract_strided_slice %6 {offsets = [3, 0], sizes = [1, 128], strides = [1, 1]} : vector<8x256xf32> to vector<1x128xf32>
    %44 = vector.broadcast %43 : vector<1x128xf32> to vector<8x128xf32>
    %45 = arith.addf %42, %44 : vector<8x128xf32>
    %46 = vector.extract_strided_slice %6 {offsets = [4, 0], sizes = [1, 128], strides = [1, 1]} : vector<8x256xf32> to vector<1x128xf32>
    %47 = vector.extract_strided_slice %6 {offsets = [5, 0], sizes = [1, 128], strides = [1, 1]} : vector<8x256xf32> to vector<1x128xf32>
    %48 = vector.broadcast %5 : vector<8x1xf32> to vector<8x128xf32>
    %49 = arith.mulf %45, %48 : vector<8x128xf32>
    %cst_14 = arith.constant dense<0.000000e+00> : vector<128xf32>
    %50 = vector.multi_reduction <add>, %49, %cst_14 [0] : vector<8x128xf32> to vector<128xf32>
    %51 = vector.shape_cast %50 : vector<128xf32> to vector<1x128xf32>
    %cst_15 = arith.constant 2.500000e-01 : f32
    %52 = vector.broadcast %cst_15 : f32 to vector<1x128xf32>
    %53 = arith.mulf %51, %52 : vector<1x128xf32>
    %54 = arith.mulf %49, %49 : vector<8x128xf32>
    %cst_16 = arith.constant dense<0.000000e+00> : vector<128xf32>
    %55 = vector.multi_reduction <add>, %54, %cst_16 [0] : vector<8x128xf32> to vector<128xf32>
    %56 = vector.shape_cast %55 : vector<128xf32> to vector<1x128xf32>
    %cst_17 = arith.constant 2.500000e-01 : f32
    %57 = vector.broadcast %cst_17 : f32 to vector<1x128xf32>
    %58 = arith.mulf %56, %57 : vector<1x128xf32>
    %59 = arith.mulf %53, %53 : vector<1x128xf32>
    %60 = arith.subf %58, %59 : vector<1x128xf32>
    %cst_18 = arith.constant 9.99999974E-6 : f32
    %61 = vector.broadcast %cst_18 : f32 to vector<1x128xf32>
    %62 = arith.addf %60, %61 : vector<1x128xf32>
    %63 = math.rsqrt %62 : vector<1x128xf32>
    %64 = arith.mulf %46, %63 : vector<1x128xf32>
    %65 = arith.mulf %53, %64 : vector<1x128xf32>
    %66 = arith.subf %47, %65 : vector<1x128xf32>
    %67 = vector.broadcast %64 : vector<1x128xf32> to vector<8x128xf32>
    %68 = arith.mulf %45, %67 : vector<8x128xf32>
    %69 = vector.broadcast %66 : vector<1x128xf32> to vector<8x128xf32>
    %70 = arith.addf %68, %69 : vector<8x128xf32>
    %cst_19 = arith.constant 0.000000e+00 : f32
    %71 = vector.broadcast %cst_19 : f32 to vector<8x128xf32>
    %72 = arith.maximumf %70, %71 : vector<8x128xf32>
    %73 = arith.truncf %72 : vector<8x128xf32> to vector<8x128xbf16>
    %c0_20 = arith.constant 0 : index
    %c0_21 = arith.constant 0 : index
    %74 = vector.load %arg3[%c0_20, %c0_21] : memref<128x128xbf16, #tpu.memory_space<vmem>>, vector<128x128xbf16>
    %cst_22 = arith.constant dense<0.000000e+00> : vector<8x128xf32>
    %75 = tpu.matmul %73, %74, %cst_22 {dimension_numbers = #tpu.dot_dimension_numbers<[1], [0], [0], [1], [0, 0, 1, 1], [], []>} : vector<8x128xbf16>, vector<128x128xbf16>, vector<8x128xf32> -> vector<8x128xf32>
    %76 = vector.extract_strided_slice %6 {offsets = [6, 0], sizes = [1, 128], strides = [1, 1]} : vector<8x256xf32> to vector<1x128xf32>
    %77 = vector.broadcast %76 : vector<1x128xf32> to vector<8x128xf32>
    %78 = arith.addf %75, %77 : vector<8x128xf32>
    %c0_23 = arith.constant 0 : index
    %c0_24 = arith.constant 0 : index
    %79 = vector.load %arg5[%c0_23, %c0_24] : memref<8x128xf32, #tpu.memory_space<vmem>>, vector<8x128xf32>
    tpu.vector_store %arg5[%c0_23, %c0_24], %78 {strides = array<i32>} : memref<8x128xf32, #tpu.memory_space<vmem>>, vector<8x128xf32>,
    return
  }
}

</mosaic_0001>

<bundles_post_ra>
// kernel: encoder_pallas.5
= control target key start
LH: loop header
LB: loop body
LE: loop exit
PB: predicated region body
PF: predicated region fallthrough
CT: control target
= control target key end

     0   :  { %s1967_s18 = smov 0   ;;  %s1969_s19 = smov 0   ;;  %s2411_s0 = inlined_call_operand.vmem [shape: f32[1024,8], index: 0, kind: input, shape index: {}]   ;;  %s2412_s1 = inlined_call_operand.vmem [shape: bf16[8,128], index: 1, kind: input, shape index: {}]   ;;  %s2413_s2 = inlined_call_operand.vmem [shape: f32[1,128], index: 2, kind: input, shape index: {}]   ;;  %s2414_s3 = inlined_call_operand.vmem [shape: bf16[1024,128], index: 3, kind: output, shape index: {0}]   ;;  %s2415_s4 = inlined_call_operand.vmem [shape: f32[16,128], index: 4, kind: output, shape index: {1}]   ;;  %s2416_s5 = inlined_call_operand.vmem [shape: f32[16,128], index: 5, kind: output, shape index: {2}]  }
   0x1   :  { %s1971_s20 = smov 0  }
   0x2 LB: > { %s28_s21 = sadd.s32 1, %s1931_s19  ;;  %p1424_p0 = scmp.ge.s32.totalorder %s1935_s20, 1  ;;  %s1935_s20 = sphi %s1971_s20, %s16_s20   ;;  %s1931_s19 = sphi %s1969_s19, %s2418_s19   ;;  %s1927_s18 = sphi %s1967_s18, %s2417_s18  }
   0x3   : > { %p30_p1 = scmp.ge.s32.totalorder %s28_s21, 2  ;;  %p211_p2 = scmp.lt.s32.totalorder %s1935_s20, 3 }
   0x5   : > { %s2420_s21 = smov (%p30_p1, %s28_s21), 0  ;;  %p212_p3 = pnand %p1424_p0, %p211_p2 }
   0x6   : > { %v376_v0 = vld [vmem:[%s2412_s1] sm:$0xf] (!%p212_p3)  ;;  %vm481_vm0 = vcmask (!%p212_p3), 1043456   ;;  %s1425_s24 = sshll.u32 (!%p212_p3), %s1927_s18, 6  ;;  %vm384_vm1 = vcmask (!%p212_p3), 64512   ;;  %p265_p5 = scmp.lt.s32.totalorder (!%p212_p3), %s1927_s18, 1 }
   0x7   : > { %215 = sbr.rel (%p212_p3) target bundleno = 367 (0x16f), region = 32  ;;  %1886 = vmatprep.subr.msk.bf16.mxu0 (!%p212_p3), %vm481_vm0, %v376_v0  ;;  %v483_v1 = vsel (!%p212_p3), %vm481_vm0, %v376_v0, 0  ;;  %p251_p4 = scmp.lt.s32.totalorder (!%p212_p3), %s1425_s24, 127  ;;  %1887 = vmatprep.subr.msk.bf16.mxu1 (!%p212_p3), %vm481_vm0, %v376_v0 }
   0x8   : > { %1819 = vmatpush3.bf16.msra.mxu0 (!%p212_p3), %v483_v1  ;;  %1885 = vmatpush3.bf16.msra.mxu1 (!%p212_p3), %v483_v1 }
   0xe   : > { %s2422_s24 = smov (!%p251_p4, %s1425_s24), 127  ;;  %s2424_s18 = smov (!%p265_p5, %s1927_s18), 1 }
   0xf   : > { %s1426_s25 = sshll.u32 %s2422_s24, 3  ;;  %s1428_s6 = sshll.u32 %s2422_s24, 2 }
  0x10   : > { %s1997_s28 = scalar_lea.vmem %s2411_s0, %s1426_s25  ;;  %s2107_s9 = scalar_lea.vmem %s2414_s3, %s1428_s6 }
  0x11   : > { %v280_v2 = vld [vmem:[%s1997_s28] sm:$0xff]  ;;  %v281_v3 = vld [vmem:[%s1997_s28 + $0x8] sm:$0xff]  ;;  %v282_v4 = vld [vmem:[%s1997_s28 + $0x10] sm:$0xff]  ;;  %s1429_s10 = sshll.u32 %s2424_s18, 3 }
  0x12   : > { %v344_v5 = vpack.c.bf16 %v281_v3, %v280_v2  ;;  %v283_v6 = vld [vmem:[%s1997_s28 + $0x18] sm:$0xff]  ;;  %v284_v7 = vld [vmem:[%s1997_s28 + $0x20] sm:$0xff]  ;;  %v285_v8 = vld [vmem:[%s1997_s28 + $0x28] sm:$0xff]  ;;  %s268_s13 = scalar_lea.vmem %s2415_s4, %s1429_s10  ;;  %s272_s16 = scalar_lea.vmem %s2416_s5, %s1429_s10 }
  0x13   : > { %v345_v9 = vpack.c.bf16 %v283_v6, %v282_v4  ;;  %v346_v10 = vpack.c.bf16 %v285_v8, %v284_v7  ;;  %v286_v11 = vld [vmem:[%s1997_s28 + $0x30] sm:$0xff]  ;;  %v287_v12 = vld [vmem:[%s1997_s28 + $0x38] sm:$0xff]  ;;  %v288_v13 = vld [vmem:[%s1997_s28 + $0x40] sm:$0xff] }
  0x14   : > { %1820 = vmatprep.mubr.msk.bf16.mxu0 %vm384_vm1, %v344_v5  ;;  %v289_v14 = vld [vmem:[%s1997_s28 + $0x48] sm:$0xff]  ;;  %v347_v15 = vpack.c.bf16 %v287_v12, %v286_v11  ;;  %v312_v17 = vld [vmem:[%s1997_s28 + $0x100] sm:$0xff]  ;;  %v314_v19 = vld [vmem:[%s1997_s28 + $0x110] sm:$0xff] }
  0x15   : > { %1821 = vmatmul.mubr.msk.bf16.vlgmr.msra.gmra.mrb[0].mxu0 %vm384_vm1, %v345_v9  ;;  %v348_v16 = vpack.c.bf16 %v289_v14, %v288_v13  ;;  %v313_v18 = vld [vmem:[%s1997_s28 + $0x108] sm:$0xff]  ;;  %v315_v20 = vld [vmem:[%s1997_s28 + $0x118] sm:$0xff]  ;;  %v316_v23 = vld [vmem:[%s1997_s28 + $0x120] sm:$0xff] }
  0x16   : > { %1824 = vmatprep.mubr.msk.bf16.mxu0 %vm384_vm1, %v346_v10  ;;  %v360_v21 = vpack.c.bf16 %v313_v18, %v312_v17  ;;  %v361_v22 = vpack.c.bf16 %v315_v20, %v314_v19  ;;  %v317_v24 = vld [vmem:[%s1997_s28 + $0x128] sm:$0xff]  ;;  %v290_v25 = vld [vmem:[%s1997_s28 + $0x50] sm:$0xff]  ;;  %v291_v26 = vld [vmem:[%s1997_s28 + $0x58] sm:$0xff] }
  0x17   : > { %v362_v27 = vpack.c.bf16 %v317_v24, %v316_v23  ;;  %v292_v28 = vld [vmem:[%s1997_s28 + $0x60] sm:$0xff]  ;;  %v293_v29 = vld [vmem:[%s1997_s28 + $0x68] sm:$0xff]  ;;  %v349_v30 = vpack.c.bf16 %v291_v26, %v290_v25  ;;  %v318_v31 = vld [vmem:[%s1997_s28 + $0x130] sm:$0xff] }
  0x18   : > { %1852 = vmatprep.mubr.msk.bf16.mxu1 %vm384_vm1, %v360_v21  ;;  %v319_v32 = vld [vmem:[%s1997_s28 + $0x138] sm:$0xff]  ;;  %v350_v33 = vpack.c.bf16 %v293_v29, %v292_v28  ;;  %v320_v34 = vld [vmem:[%s1997_s28 + $0x140] sm:$0xff]  ;;  %v321_v35 = vld [vmem:[%s1997_s28 + $0x148] sm:$0xff] }
  0x19   : > { %1853 = vmatmul.mubr.msk.bf16.vlgmr.msra.gmra.mrb[0].mxu1 %vm384_vm1, %v361_v22  ;;  %v363_v36 = vpack.c.bf16 %v319_v32, %v318_v31  ;;  %v364_v37 = vpack.c.bf16 %v321_v35, %v320_v34  ;;  %v294_v38 = vld [vmem:[%s1997_s28 + $0x70] sm:$0xff]  ;;  %v295_v39 = vld [vmem:[%s1997_s28 + $0x78] sm:$0xff]  ;;  %v296_v40 = vld [vmem:[%s1997_s28 + $0x80] sm:$0xff] }
  0x1a   : > { %1856 = vmatprep.mubr.msk.bf16.mxu1 %vm384_vm1, %v362_v27  ;;  %v297_v41 = vld [vmem:[%s1997_s28 + $0x88] sm:$0xff]  ;;  %v351_v42 = vpack.c.bf16 %v295_v39, %v294_v38  ;;  %v322_v43 = vld [vmem:[%s1997_s28 + $0x150] sm:$0xff]  ;;  %v323_v44 = vld [vmem:[%s1997_s28 + $0x158] sm:$0xff] }
  0x1b   : > { %v352_v45 = vpack.c.bf16 %v297_v41, %v296_v40  ;;  %v324_v46 = vld [vmem:[%s1997_s28 + $0x160] sm:$0xff]  ;;  %v325_v47 = vld [vmem:[%s1997_s28 + $0x168] sm:$0xff]  ;;  %v365_v48 = vpack.c.bf16 %v323_v44, %v322_v43  ;;  %v298_v50 = vld [vmem:[%s1997_s28 + $0x90] sm:$0xff] }
  0x1c   : > { %v366_v49 = vpack.c.bf16 %v325_v47, %v324_v46  ;;  %v299_v51 = vld [vmem:[%s1997_s28 + $0x98] sm:$0xff]  ;;  %v300_v52 = vld [vmem:[%s1997_s28 + $0xa0] sm:$0xff]  ;;  %v301_v53 = vld [vmem:[%s1997_s28 + $0xa8] sm:$0xff] }
  0x1d   : > { %1825 = vmatmul.mubr.msk.bf16.gmra.mrb[4].mxu0 %vm384_vm1, %v347_v15  ;;  %v353_v54 = vpack.c.bf16 %v299_v51, %v298_v50  ;;  %v326_v55 = vld [vmem:[%s1997_s28 + $0x170] sm:$0xff]  ;;  %v327_v56 = vld [vmem:[%s1997_s28 + $0x178] sm:$0xff]  ;;  %v354_v57 = vpack.c.bf16 %v301_v53, %v300_v52  ;;  %v328_v58 = vld [vmem:[%s1997_s28 + $0x180] sm:$0xff] }
  0x1e   : > { %1828 = vmatprep.mubr.msk.bf16.mxu0 %vm384_vm1, %v348_v16  ;;  %v329_v59 = vld [vmem:[%s1997_s28 + $0x188] sm:$0xff]  ;;  %v367_v60 = vpack.c.bf16 %v327_v56, %v326_v55  ;;  %v302_v62 = vld [vmem:[%s1997_s28 + $0xb0] sm:$0xff]  ;;  %v303_v63 = vld [vmem:[%s1997_s28 + $0xb8] sm:$0xff] }
  0x1f   : > { %v368_v61 = vpack.c.bf16 %v329_v59, %v328_v58  ;;  %v304_v0 = vld [vmem:[%s1997_s28 + $0xc0] sm:$0xff]  ;;  %v305_v1 = vld [vmem:[%s1997_s28 + $0xc8] sm:$0xff]  ;;  %v355_v2 = vpack.c.bf16 %v303_v63, %v302_v62  ;;  %v330_v3 = vld [vmem:[%s1997_s28 + $0x190] sm:$0xff] }
  0x20   : > { %v331_v4 = vld [vmem:[%s1997_s28 + $0x198] sm:$0xff]  ;;  %v356_v5 = vpack.c.bf16 %v305_v1, %v304_v0  ;;  %v332_v6 = vld [vmem:[%s1997_s28 + $0x1a0] sm:$0xff]  ;;  %v333_v7 = vld [vmem:[%s1997_s28 + $0x1a8] sm:$0xff] }
  0x21   : > { %1857 = vmatmul.mubr.msk.bf16.gmra.mrb[4].mxu1 %vm384_vm1, %v363_v36  ;;  %v369_v8 = vpack.c.bf16 %v331_v4, %v330_v3  ;;  %v370_v9 = vpack.c.bf16 %v333_v7, %v332_v6  ;;  %v306_v10 = vld [vmem:[%s1997_s28 + $0xd0] sm:$0xff]  ;;  %v307_v11 = vld [vmem:[%s1997_s28 + $0xd8] sm:$0xff]  ;;  %v308_v12 = vld [vmem:[%s1997_s28 + $0xe0] sm:$0xff] }
  0x22   : > { %1860 = vmatprep.mubr.msk.bf16.mxu1 %vm384_vm1, %v364_v37  ;;  %v309_v13 = vld [vmem:[%s1997_s28 + $0xe8] sm:$0xff]  ;;  %v357_v14 = vpack.c.bf16 %v307_v11, %v306_v10  ;;  %v334_v15 = vld [vmem:[%s1997_s28 + $0x1b0] sm:$0xff]  ;;  %v335_v16 = vld [vmem:[%s1997_s28 + $0x1b8] sm:$0xff] }
  0x23   : > { %v358_v17 = vpack.c.bf16 %v309_v13, %v308_v12  ;;  %v336_v18 = vld [vmem:[%s1997_s28 + $0x1c0] sm:$0xff]  ;;  %v337_v19 = vld [vmem:[%s1997_s28 + $0x1c8] sm:$0xff]  ;;  %v371_v20 = vpack.c.bf16 %v335_v16, %v334_v15  ;;  %v310_v22 = vld [vmem:[%s1997_s28 + $0xf0] sm:$0xff] }
  0x24   : > { %v372_v21 = vpack.c.bf16 %v337_v19, %v336_v18  ;;  %v311_v23 = vld [vmem:[%s1997_s28 + $0xf8] sm:$0xff]  ;;  %v338_v25 = vld [vmem:[%s1997_s28 + $0x1d0] sm:$0xff]  ;;  %v340_v27 = vld [vmem:[%s1997_s28 + $0x1e0] sm:$0xff] }
  0x25   : > { %1829 = vmatmul.mubr.msk.bf16.gmra.mrb[8].mxu0 %vm384_vm1, %v349_v30  ;;  %v359_v24 = vpack.c.bf16 %v311_v23, %v310_v22  ;;  %v339_v26 = vld [vmem:[%s1997_s28 + $0x1d8] sm:$0xff]  ;;  %v341_v28 = vld [vmem:[%s1997_s28 + $0x1e8] sm:$0xff]  ;;  %v342_v31 = vld [vmem:[%s1997_s28 + $0x1f0] sm:$0xff] }
  0x26   : > { %1832 = vmatprep.mubr.msk.bf16.mxu0 %vm384_vm1, %v350_v33  ;;  %v373_v29 = vpack.c.bf16 %v339_v26, %v338_v25  ;;  %v374_v30 = vpack.c.bf16 %v341_v28, %v340_v27  ;;  %v343_v32 = vld [vmem:[%s1997_s28 + $0x1f8] sm:$0xff]  ;;  %v2098_v34 = vld [vmem:[%s2413_s2] ss:$0 sm:$0xff] }
  0x27   : > { %v375_v33 = vpack.c.bf16 %v343_v32, %v342_v31 }
  0x29   : > { %1861 = vmatmul.mubr.msk.bf16.gmra.mrb[8].mxu1 %vm384_vm1, %v365_v48 }
  0x2a   : > { %1864 = vmatprep.mubr.msk.bf16.mxu1 %vm384_vm1, %v366_v49 }
  0x2d   : > { %1833 = vmatmul.mubr.msk.bf16.gmra.mrb[12].mxu0 %vm384_vm1, %v351_v42 }
  0x2e   : > { %1836 = vmatprep.mubr.msk.bf16.mxu0 %vm384_vm1, %v352_v45 }
  0x31   : > { %1865 = vmatmul.mubr.msk.bf16.gmra.mrb[12].mxu1 %vm384_vm1, %v367_v60 }
  0x32   : > { %1868 = vmatprep.mubr.msk.bf16.mxu1 %vm384_vm1, %v368_v61 }
  0x35   : > { %1837 = vmatmul.mubr.msk.bf16.gmra.mrb[16].mxu0 %vm384_vm1, %v353_v54 }
  0x36   : > { %1840 = vmatprep.mubr.msk.bf16.mxu0 %vm384_vm1, %v354_v57 }
  0x39   : > { %1869 = vmatmul.mubr.msk.bf16.gmra.mrb[16].mxu1 %vm384_vm1, %v369_v8 }
  0x3a   : > { %1872 = vmatprep.mubr.msk.bf16.mxu1 %vm384_vm1, %v370_v9 }
  0x3d   : > { %1841 = vmatmul.mubr.msk.bf16.gmra.mrb[20].mxu0 %vm384_vm1, %v355_v2 }
  0x3e   : > { %1844 = vmatprep.mubr.msk.bf16.mxu0 %vm384_vm1, %v356_v5 }
  0x41   : > { %1873 = vmatmul.mubr.msk.bf16.gmra.mrb[20].mxu1 %vm384_vm1, %v371_v20 }
  0x42   : > { %1876 = vmatprep.mubr.msk.bf16.mxu1 %vm384_vm1, %v372_v21 }
  0x45   : > { %1845 = vmatmul.mubr.msk.bf16.gmra.mrb[24].mxu0 %vm384_vm1, %v357_v14 }
  0x46   : > { %1848 = vmatprep.mubr.msk.bf16.mxu0 %vm384_vm1, %v358_v17 }
  0x49   : > { %1877 = vmatmul.mubr.msk.bf16.gmra.mrb[24].mxu1 %vm384_vm1, %v373_v29 }
  0x4a   : > { %1880 = vmatprep.mubr.msk.bf16.mxu1 %vm384_vm1, %v374_v30 }
  0x4d   : > { %1849 = vmatmul.mubr.msk.bf16.gmra.mrb[28].mxu0 %vm384_vm1, %v359_v24 }
  0x51   : > { %1881 = vmatmul.mubr.msk.bf16.gmra.mrb[28].mxu1 %vm384_vm1, %v375_v33 }
  0xe8   : > { %v1822_v35 = vpop.f32.mrb[0].mxu0 }
  0xe9   : > { %v519_v36 = vpop.f32.mrb[1].mxu0  ;;  %v528_v39 = vadd.f32 %v1822_v35, %v2098_v34 }
  0xea   : > { %v520_v37 = vadd.f32 %v2098_v34, %v519_v36  ;;  %v1823_v38 = vpop.f32.mrb[2].mxu0 }
  0xeb   : > { %v531_v40 = vadd.f32 %v1823_v38, %v2098_v34  ;;  %v522_v41 = vpop.f32.mrb[3].mxu0  ;;  %v843_v48 = vmul.f32 %v528_v39, %v528_v39 }
  0xec   : > { %v523_v42 = vadd.f32 %v2098_v34, %v522_v41  ;;  %v841_v44 = vmul.f32 %v520_v37, %v520_v37  ;;  %v1854_v61 = vpop.f32.mrb[0].mxu1 }
  0xed   : > { %v1602_v43 = vpack.c.bf16 %v531_v40, %v528_v39  ;;  %v844_v53 = vmul.f32 %v531_v40, %v531_v40  ;;  %v647_v2 = vpop.f32.mrb[1].mxu1  ;;  %v2117_v4 = vadd.f32 %v1854_v61, %v2098_v34 }
  0xee   : > { %v775_v45 = vadd.f32 %v523_v42, %v520_v37  ;;  %v842_v46 = vmul.f32 %v523_v42, %v523_v42  ;;  %v1597_v47 = vpack.c.bf16 %v523_v42, %v520_v37  ;;  %v2120_v5 = vadd.f32 %v2098_v34, %v647_v2  ;;  %v1855_v6 = vpop.f32.mrb[2].mxu1 }
  0xef   : > { %1754 = vst [vmem:[%s2107_s9 + $0x8] sm:$0xff] %v1602_v43   ;;  %v650_v11 = vpop.f32.mrb[3].mxu1  ;;  %v2124_v12 = vadd.f32 %v1855_v6, %v2098_v34 }
  0xf0   : > { %v776_v49 = vadd.f32 %v775_v45, %v528_v39  ;;  %v905_v50 = vadd.f32 %v842_v46, %v841_v44  ;;  %1598 = vst [vmem:[%s2107_s9] sm:$0xff] %v1597_v47   ;;  %v1826_v51 = vpop.f32.mrb[4].mxu0  ;;  %v2127_v13 = vadd.f32 %v2098_v34, %v650_v11 }
  0xf1   : > { %v535_v52 = vpop.f32.mrb[5].mxu0  ;;  %v544_v58 = vadd.f32 %v1826_v51, %v2098_v34  ;;  %v1682_v20 = vpack.c.bf16 %v2124_v12, %v2117_v4 }
  0xf2   : > { %v906_v54 = vadd.f32 %v905_v50, %v843_v48  ;;  %v536_v55 = vadd.f32 %v2098_v34, %v535_v52  ;;  %v777_v56 = vadd.f32 %v776_v49, %v531_v40  ;;  %v1827_v57 = vpop.f32.mrb[6].mxu0  ;;  %v1677_v25 = vpack.c.bf16 %v2127_v13, %v2120_v5 }
  0xf3   : > { %v547_v59 = vadd.f32 %v1827_v57, %v2098_v34  ;;  %v538_v60 = vpop.f32.mrb[7].mxu0  ;;  %v847_v14 = vmul.f32 %v544_v58, %v544_v58  ;;  %1770 = vst [vmem:[%s2107_s9 + $0x88] sm:$0xff] %v1682_v20  }
  0xf4   : > { %v778_v62 = vadd.f32 %v777_v56, %v536_v55  ;;  %v845_v63 = vmul.f32 %v536_v55, %v536_v55  ;;  %v907_v0 = vadd.f32 %v906_v54, %v844_v53  ;;  %v539_v1 = vadd.f32 %v2098_v34, %v538_v60  ;;  %v1858_v29 = vpop.f32.mrb[4].mxu1  ;;  %1769 = vst [vmem:[%s2107_s9 + $0x80] sm:$0xff] %v1677_v25  }
  0xf5   : > { %v1612_v3 = vpack.c.bf16 %v547_v59, %v544_v58  ;;  %v848_v18 = vmul.f32 %v547_v59, %v547_v59  ;;  %v663_v35 = vpop.f32.mrb[5].mxu1  ;;  %v2141_v37 = vadd.f32 %v1858_v29, %v2098_v34 }
  0xf6   : > { %v908_v7 = vadd.f32 %v907_v0, %v845_v63  ;;  %v779_v8 = vadd.f32 %v778_v62, %v539_v1  ;;  %v846_v9 = vmul.f32 %v539_v1, %v539_v1  ;;  %v1607_v10 = vpack.c.bf16 %v539_v1, %v536_v55  ;;  %v1859_v39 = vpop.f32.mrb[6].mxu1 }
  0xf7   : > { %1756 = vst [vmem:[%s2107_s9 + $0x18] sm:$0xff] %v1612_v3   ;;  %v2144_v38 = vadd.f32 %v2098_v34, %v663_v35  ;;  %v666_v44 = vpop.f32.mrb[7].mxu1  ;;  %v2148_v45 = vadd.f32 %v1859_v39, %v2098_v34 }
  0xf8   : > { %v780_v15 = vadd.f32 %v779_v8, %v544_v58  ;;  %v909_v16 = vadd.f32 %v908_v7, %v846_v9  ;;  %1755 = vst [vmem:[%s2107_s9 + $0x10] sm:$0xff] %v1607_v10   ;;  %v1830_v17 = vpop.f32.mrb[8].mxu0  ;;  %v2151_v46 = vadd.f32 %v2098_v34, %v666_v44 }
  0xf9   : > { %v551_v19 = vpop.f32.mrb[9].mxu0  ;;  %v560_v26 = vadd.f32 %v1830_v17, %v2098_v34  ;;  %v1692_v53 = vpack.c.bf16 %v2148_v45, %v2141_v37 }
  0xfa   : > { %v910_v21 = vadd.f32 %v909_v16, %v847_v14  ;;  %v552_v22 = vadd.f32 %v2098_v34, %v551_v19  ;;  %v781_v23 = vadd.f32 %v780_v15, %v547_v59  ;;  %v1831_v24 = vpop.f32.mrb[10].mxu0  ;;  %v1687_v58 = vpack.c.bf16 %v2151_v46, %v2144_v38 }
  0xfb   : > { %v563_v27 = vadd.f32 %v1831_v24, %v2098_v34  ;;  %v554_v28 = vpop.f32.mrb[11].mxu0  ;;  %v851_v47 = vmul.f32 %v560_v26, %v560_v26  ;;  %1772 = vst [vmem:[%s2107_s9 + $0x98] sm:$0xff] %v1692_v53  }
  0xfc   : > { %v782_v30 = vadd.f32 %v781_v23, %v552_v22  ;;  %v849_v31 = vmul.f32 %v552_v22, %v552_v22  ;;  %v911_v32 = vadd.f32 %v910_v21, %v848_v18  ;;  %v555_v33 = vadd.f32 %v2098_v34, %v554_v28  ;;  %v1862_v62 = vpop.f32.mrb[8].mxu1  ;;  %1771 = vst [vmem:[%s2107_s9 + $0x90] sm:$0xff] %v1687_v58  }
  0xfd   : > { %v1622_v36 = vpack.c.bf16 %v563_v27, %v560_v26  ;;  %v852_v51 = vmul.f32 %v563_v27, %v563_v27  ;;  %v679_v3 = vpop.f32.mrb[9].mxu1  ;;  %v2165_v7 = vadd.f32 %v1862_v62, %v2098_v34 }
  0xfe   : > { %v912_v40 = vadd.f32 %v911_v32, %v849_v31  ;;  %v783_v41 = vadd.f32 %v782_v30, %v555_v33  ;;  %v850_v42 = vmul.f32 %v555_v33, %v555_v33  ;;  %v1617_v43 = vpack.c.bf16 %v555_v33, %v552_v22  ;;  %v1863_v9 = vpop.f32.mrb[10].mxu1 }
  0xff   : > { %1758 = vst [vmem:[%s2107_s9 + $0x28] sm:$0xff] %v1622_v36   ;;  %v2168_v8 = vadd.f32 %v2098_v34, %v679_v3  ;;  %v682_v16 = vpop.f32.mrb[11].mxu1  ;;  %v2172_v17 = vadd.f32 %v1863_v9, %v2098_v34 }
 0x100   : > { %v784_v48 = vadd.f32 %v783_v41, %v560_v26  ;;  %v913_v49 = vadd.f32 %v912_v40, %v850_v42  ;;  %1757 = vst [vmem:[%s2107_s9 + $0x20] sm:$0xff] %v1617_v43   ;;  %v1834_v50 = vpop.f32.mrb[12].mxu0  ;;  %v2175_v18 = vadd.f32 %v2098_v34, %v682_v16 }
 0x101   : > { %v567_v52 = vpop.f32.mrb[13].mxu0  ;;  %v576_v59 = vadd.f32 %v1834_v50, %v2098_v34  ;;  %v1702_v25 = vpack.c.bf16 %v2172_v17, %v2165_v7 }
 0x102   : > { %v914_v54 = vadd.f32 %v913_v49, %v851_v47  ;;  %v568_v55 = vadd.f32 %v2098_v34, %v567_v52  ;;  %v785_v56 = vadd.f32 %v784_v48, %v563_v27  ;;  %v1835_v57 = vpop.f32.mrb[14].mxu0  ;;  %v1697_v30 = vpack.c.bf16 %v2175_v18, %v2168_v8 }
 0x103   : > { %v579_v60 = vadd.f32 %v1835_v57, %v2098_v34  ;;  %v570_v61 = vpop.f32.mrb[15].mxu0  ;;  %v855_v19 = vmul.f32 %v576_v59, %v576_v59  ;;  %1774 = vst [vmem:[%s2107_s9 + $0xa8] sm:$0xff] %v1702_v25  }
 0x104   : > { %v786_v63 = vadd.f32 %v785_v56, %v568_v55  ;;  %v853_v0 = vmul.f32 %v568_v55, %v568_v55  ;;  %v915_v1 = vadd.f32 %v914_v54, %v852_v51  ;;  %v571_v2 = vadd.f32 %v2098_v34, %v570_v61  ;;  %v1866_v35 = vpop.f32.mrb[12].mxu1  ;;  %1773 = vst [vmem:[%s2107_s9 + $0xa0] sm:$0xff] %v1697_v30  }
 0x105   : > { %v1632_v6 = vpack.c.bf16 %v579_v60, %v576_v59  ;;  %v856_v23 = vmul.f32 %v579_v60, %v579_v60  ;;  %v695_v42 = vpop.f32.mrb[13].mxu1  ;;  %v2189_v44 = vadd.f32 %v1866_v35, %v2098_v34 }
 0x106   : > { %v916_v10 = vadd.f32 %v915_v1, %v853_v0  ;;  %v787_v11 = vadd.f32 %v786_v63, %v571_v2  ;;  %v854_v14 = vmul.f32 %v571_v2, %v571_v2  ;;  %v1627_v15 = vpack.c.bf16 %v571_v2, %v568_v55  ;;  %v1867_v48 = vpop.f32.mrb[14].mxu1 }
 0x107   : > { %1760 = vst [vmem:[%s2107_s9 + $0x38] sm:$0xff] %v1632_v6   ;;  %v2192_v47 = vadd.f32 %v2098_v34, %v695_v42  ;;  %v698_v53 = vpop.f32.mrb[15].mxu1  ;;  %v2196_v54 = vadd.f32 %v1867_v48, %v2098_v34 }
 0x108   : > { %v788_v20 = vadd.f32 %v787_v11, %v576_v59  ;;  %v917_v21 = vadd.f32 %v916_v10, %v854_v14  ;;  %1759 = vst [vmem:[%s2107_s9 + $0x30] sm:$0xff] %v1627_v15   ;;  %v1838_v22 = vpop.f32.mrb[16].mxu0  ;;  %v2199_v55 = vadd.f32 %v2098_v34, %v698_v53 }
 0x109   : > { %v583_v24 = vpop.f32.mrb[17].mxu0  ;;  %v592_v31 = vadd.f32 %v1838_v22, %v2098_v34  ;;  %v1712_v62 = vpack.c.bf16 %v2196_v54, %v2189_v44 }
 0x10a   : > { %v918_v26 = vadd.f32 %v917_v21, %v855_v19  ;;  %v584_v27 = vadd.f32 %v2098_v34, %v583_v24  ;;  %v789_v28 = vadd.f32 %v788_v20, %v579_v60  ;;  %v1839_v29 = vpop.f32.mrb[18].mxu0  ;;  %v1707_v3 = vpack.c.bf16 %v2199_v55, %v2192_v47 }
 0x10b   : > { %v595_v32 = vadd.f32 %v1839_v29, %v2098_v34  ;;  %v586_v33 = vpop.f32.mrb[19].mxu0  ;;  %v859_v56 = vmul.f32 %v592_v31, %v592_v31  ;;  %1776 = vst [vmem:[%s2107_s9 + $0xb8] sm:$0xff] %v1712_v62  }
 0x10c   : > { %v790_v36 = vadd.f32 %v789_v28, %v584_v27  ;;  %v857_v39 = vmul.f32 %v584_v27, %v584_v27  ;;  %v919_v40 = vadd.f32 %v918_v26, %v856_v23  ;;  %v587_v41 = vadd.f32 %v2098_v34, %v586_v33  ;;  %v1870_v11 = vpop.f32.mrb[16].mxu1  ;;  %1775 = vst [vmem:[%s2107_s9 + $0xb0] sm:$0xff] %v1707_v3  }
 0x10d   : > { %v1642_v43 = vpack.c.bf16 %v595_v32, %v592_v31  ;;  %v860_v60 = vmul.f32 %v595_v32, %v595_v32  ;;  %v711_v20 = vpop.f32.mrb[17].mxu1  ;;  %v2213_v22 = vadd.f32 %v1870_v11, %v2098_v34 }
 0x10e   : > { %v920_v49 = vadd.f32 %v919_v40, %v857_v39  ;;  %v791_v50 = vadd.f32 %v790_v36, %v587_v41  ;;  %v858_v51 = vmul.f32 %v587_v41, %v587_v41  ;;  %v1637_v52 = vpack.c.bf16 %v587_v41, %v584_v27  ;;  %v1871_v24 = vpop.f32.mrb[18].mxu1 }
 0x10f   : > { %1762 = vst [vmem:[%s2107_s9 + $0x48] sm:$0xff] %v1642_v43   ;;  %v2216_v23 = vadd.f32 %v2098_v34, %v711_v20  ;;  %v714_v29 = vpop.f32.mrb[19].mxu1  ;;  %v2220_v30 = vadd.f32 %v1871_v24, %v2098_v34 }
 0x110   : > { %v792_v57 = vadd.f32 %v791_v50, %v592_v31  ;;  %v921_v58 = vadd.f32 %v920_v49, %v858_v51  ;;  %1761 = vst [vmem:[%s2107_s9 + $0x40] sm:$0xff] %v1637_v52   ;;  %v1842_v59 = vpop.f32.mrb[20].mxu0  ;;  %v2223_v31 = vadd.f32 %v2098_v34, %v714_v29 }
 0x111   : > { %v599_v61 = vpop.f32.mrb[21].mxu0  ;;  %v608_v6 = vadd.f32 %v1842_v59, %v2098_v34  ;;  %v1722_v41 = vpack.c.bf16 %v2220_v30, %v2213_v22 }
 0x112   : > { %v922_v63 = vadd.f32 %v921_v58, %v859_v56  ;;  %v600_v0 = vadd.f32 %v2098_v34, %v599_v61  ;;  %v793_v1 = vadd.f32 %v792_v57, %v595_v32  ;;  %v1843_v2 = vpop.f32.mrb[22].mxu0  ;;  %v1717_v50 = vpack.c.bf16 %v2223_v31, %v2216_v23 }
 0x113   : > { %v611_v9 = vadd.f32 %v1843_v2, %v2098_v34  ;;  %v602_v10 = vpop.f32.mrb[23].mxu0  ;;  %v863_v32 = vmul.f32 %v608_v6, %v608_v6  ;;  %1778 = vst [vmem:[%s2107_s9 + $0xc8] sm:$0xff] %v1722_v41  }
 0x114   : > { %v794_v14 = vadd.f32 %v793_v1, %v600_v0  ;;  %v861_v15 = vmul.f32 %v600_v0, %v600_v0  ;;  %v923_v16 = vadd.f32 %v922_v63, %v860_v60  ;;  %v603_v19 = vadd.f32 %v2098_v34, %v602_v10  ;;  %v1874_v56 = vpop.f32.mrb[20].mxu1  ;;  %1777 = vst [vmem:[%s2107_s9 + $0xc0] sm:$0xff] %v1717_v50  }
 0x115   : > { %v1652_v21 = vpack.c.bf16 %v611_v9, %v608_v6  ;;  %v864_v39 = vmul.f32 %v611_v9, %v611_v9  ;;  %v727_v61 = vpop.f32.mrb[21].mxu1  ;;  %v2237_v63 = vadd.f32 %v1874_v56, %v2098_v34 }
 0x116   : > { %v924_v25 = vadd.f32 %v923_v16, %v861_v15  ;;  %v795_v26 = vadd.f32 %v794_v14, %v603_v19  ;;  %v862_v27 = vmul.f32 %v603_v19, %v603_v19  ;;  %v1647_v28 = vpack.c.bf16 %v603_v19, %v600_v0  ;;  %v1875_v1 = vpop.f32.mrb[22].mxu1 }
 0x117   : > { %1764 = vst [vmem:[%s2107_s9 + $0x58] sm:$0xff] %v1652_v21   ;;  %v2240_v0 = vadd.f32 %v2098_v34, %v727_v61  ;;  %v730_v10 = vpop.f32.mrb[23].mxu1  ;;  %v2244_v11 = vadd.f32 %v1875_v1, %v2098_v34 }
 0x118   : > { %v796_v33 = vadd.f32 %v795_v26, %v608_v6  ;;  %v925_v35 = vadd.f32 %v924_v25, %v862_v27  ;;  %1763 = vst [vmem:[%s2107_s9 + $0x50] sm:$0xff] %v1647_v28   ;;  %v1846_v36 = vpop.f32.mrb[24].mxu0  ;;  %v2247_v14 = vadd.f32 %v2098_v34, %v730_v10 }
 0x119   : > { %v615_v40 = vpop.f32.mrb[25].mxu0  ;;  %v624_v51 = vadd.f32 %v1846_v36, %v2098_v34  ;;  %v1732_v25 = vpack.c.bf16 %v2244_v11, %v2237_v63 }
 0x11a   : > { %v926_v42 = vadd.f32 %v925_v35, %v863_v32  ;;  %v616_v43 = vadd.f32 %v2098_v34, %v615_v40  ;;  %v797_v48 = vadd.f32 %v796_v33, %v611_v9  ;;  %v1847_v49 = vpop.f32.mrb[26].mxu0  ;;  %v1727_v32 = vpack.c.bf16 %v2247_v14, %v2240_v0 }
 0x11b   : > { %v627_v52 = vadd.f32 %v1847_v49, %v2098_v34  ;;  %v618_v53 = vpop.f32.mrb[27].mxu0  ;;  %v867_v15 = vmul.f32 %v624_v51, %v624_v51  ;;  %1780 = vst [vmem:[%s2107_s9 + $0xd8] sm:$0xff] %v1732_v25  }
 0x11c   : > { %v798_v57 = vadd.f32 %v797_v48, %v616_v43  ;;  %v865_v58 = vmul.f32 %v616_v43, %v616_v43  ;;  %v927_v59 = vadd.f32 %v926_v42, %v864_v39  ;;  %v619_v60 = vadd.f32 %v2098_v34, %v618_v53  ;;  %v1878_v39 = vpop.f32.mrb[24].mxu1  ;;  %1779 = vst [vmem:[%s2107_s9 + $0xd0] sm:$0xff] %v1727_v32  }
 0x11d   : > { %v1662_v62 = vpack.c.bf16 %v627_v52, %v624_v51  ;;  %v868_v21 = vmul.f32 %v627_v52, %v627_v52  ;;  %v743_v48 = vpop.f32.mrb[25].mxu1  ;;  %v2261_v50 = vadd.f32 %v1878_v39, %v2098_v34  ;;  %v874_v32 = vmul.f32 %v2127_v13, %v2127_v13 }
 0x11e   : > { %v928_v2 = vadd.f32 %v927_v59, %v865_v58  ;;  %v799_v3 = vadd.f32 %v798_v57, %v619_v60  ;;  %v866_v6 = vmul.f32 %v619_v60, %v619_v60  ;;  %v1657_v9 = vpack.c.bf16 %v619_v60, %v616_v43 }
 0x11f   : > { %1766 = vst [vmem:[%s2107_s9 + $0x68] sm:$0xff] %v1662_v62  }
 0x120   : > { %v800_v16 = vadd.f32 %v799_v3, %v624_v51  ;;  %v929_v19 = vadd.f32 %v928_v2, %v866_v6  ;;  %1765 = vst [vmem:[%s2107_s9 + $0x60] sm:$0xff] %v1657_v9   ;;  %v1850_v20 = vpop.f32.mrb[28].mxu0  ;;  %v2264_v51 = vadd.f32 %v2098_v34, %v743_v48 }
 0x121   : > { %v631_v24 = vpop.f32.mrb[29].mxu0  ;;  %v640_v33 = vadd.f32 %v1850_v20, %v2098_v34 }
 0x122   : > { %v930_v26 = vadd.f32 %v929_v19, %v867_v15  ;;  %v632_v27 = vadd.f32 %v2098_v34, %v631_v24  ;;  %v801_v28 = vadd.f32 %v800_v16, %v627_v52  ;;  %v1851_v29 = vpop.f32.mrb[30].mxu0  ;;  %v1879_v52 = vpop.f32.mrb[26].mxu1  ;;  %v873_v16 = vmul.f32 %v2120_v5, %v2120_v5 }
 0x123   : > { %v643_v35 = vadd.f32 %v1851_v29, %v2098_v34  ;;  %v634_v36 = vpop.f32.mrb[31].mxu0  ;;  %v746_v59 = vpop.f32.mrb[27].mxu1  ;;  %v2268_v60 = vadd.f32 %v1879_v52, %v2098_v34  ;;  %v871_v62 = vmul.f32 %v640_v33, %v640_v33 }
 0x124   : > { %v802_v40 = vadd.f32 %v801_v28, %v632_v27  ;;  %v869_v41 = vmul.f32 %v632_v27, %v632_v27  ;;  %v931_v42 = vadd.f32 %v930_v26, %v868_v21  ;;  %v635_v43 = vadd.f32 %v2098_v34, %v634_v36  ;;  %v1882_v19 = vpop.f32.mrb[28].mxu1 }
 0x125   : > { %v1672_v49 = vpack.c.bf16 %v643_v35, %v640_v33  ;;  %v2271_v61 = vadd.f32 %v2098_v34, %v746_v59  ;;  %v1742_v3 = vpack.c.bf16 %v2268_v60, %v2261_v50  ;;  %v872_v9 = vmul.f32 %v643_v35, %v643_v35  ;;  %v759_v25 = vpop.f32.mrb[29].mxu1 }
 0x126   : > { %v932_v53 = vadd.f32 %v931_v42, %v869_v41  ;;  %v803_v56 = vadd.f32 %v802_v40, %v635_v43  ;;  %v870_v57 = vmul.f32 %v635_v43, %v635_v43  ;;  %v1667_v58 = vpack.c.bf16 %v635_v43, %v632_v27  ;;  %v1883_v27 = vpop.f32.mrb[30].mxu1 }
 0x127   : > { %1768 = vst [vmem:[%s2107_s9 + $0x78] sm:$0xff] %v1672_v49   ;;  %v1737_v6 = vpack.c.bf16 %v2271_v61, %v2264_v51  ;;  %1782 = vst [vmem:[%s2107_s9 + $0xe8] sm:$0xff] %v1742_v3   ;;  %v2284_v24 = vadd.f32 %v1882_v19, %v2098_v34  ;;  %v2287_v26 = vadd.f32 %v2098_v34, %v759_v25 }
 0x128   : > { %v804_v1 = vadd.f32 %v803_v56, %v640_v33  ;;  %v933_v2 = vadd.f32 %v932_v53, %v870_v57  ;;  %1767 = vst [vmem:[%s2107_s9 + $0x70] sm:$0xff] %v1667_v58   ;;  %v2293_v33 = vadd.f32 %v1883_v27, %v2098_v34  ;;  %v875_v36 = vmul.f32 %v2117_v4, %v2117_v4 }
 0x129   : > { %1781 = vst [vmem:[%s2107_s9 + $0xe0] sm:$0xff] %v1737_v6   ;;  %v878_v56 = vmul.f32 %v2151_v46, %v2151_v46  ;;  %v879_v57 = vmul.f32 %v2141_v37, %v2141_v37  ;;  %v880_v59 = vmul.f32 %v2148_v45, %v2148_v45  ;;  %v886_v27 = vmul.f32 %v2199_v55, %v2199_v55 }
 0x12a   : > { %v934_v10 = vadd.f32 %v933_v2, %v871_v62  ;;  %v805_v15 = vadd.f32 %v804_v1, %v643_v35  ;;  %v1752_v41 = vpack.c.bf16 %v2293_v33, %v2284_v24 }
 0x12c   : > { %v806_v20 = vadd.f32 %v805_v15, %v2120_v5  ;;  %v935_v21 = vadd.f32 %v934_v10, %v872_v9  ;;  %v762_v5 = vpop.f32.mrb[31].mxu1  ;;  %1784 = vst [vmem:[%s2107_s9 + $0xf8] sm:$0xff] %v1752_v41   ;;  %v882_v9 = vmul.f32 %v2175_v18, %v2175_v18  ;;  %v890_v41 = vmul.f32 %v2223_v31, %v2223_v31 }
 0x12d   : > { %v2296_v35 = vadd.f32 %v2098_v34, %v762_v5  ;;  %v877_v34 = vmul.f32 %v2144_v38, %v2144_v38 }
 0x12e   : > { %v936_v28 = vadd.f32 %v935_v21, %v873_v16  ;;  %v807_v29 = vadd.f32 %v806_v20, %v2127_v13  ;;  %v876_v13 = vmul.f32 %v2124_v12, %v2124_v12 }
 0x12f   : > { %v1747_v42 = vpack.c.bf16 %v2296_v35, %v2287_v26 }
 0x130   : > { %v808_v39 = vadd.f32 %v807_v29, %v2117_v4  ;;  %v937_v40 = vadd.f32 %v936_v28, %v874_v32 }
 0x131   : > { %1783 = vst [vmem:[%s2107_s9 + $0xf0] sm:$0xff] %v1747_v42  }
 0x132   : > { %v938_v43 = vadd.f32 %v937_v40, %v875_v36  ;;  %v809_v48 = vadd.f32 %v808_v39, %v2124_v12 }
 0x134   : > { %v810_v4 = vadd.f32 %v809_v48, %v2144_v38  ;;  %v939_v49 = vadd.f32 %v938_v43, %v876_v13  ;;  %v881_v38 = vmul.f32 %v2168_v8, %v2168_v8 }
 0x136   : > { %v940_v52 = vadd.f32 %v939_v49, %v877_v34  ;;  %v811_v53 = vadd.f32 %v810_v4, %v2151_v46 }
 0x138   : > { %v812_v58 = vadd.f32 %v811_v53, %v2141_v37  ;;  %v941_v12 = vadd.f32 %v940_v52, %v878_v56  ;;  %v883_v37 = vmul.f32 %v2165_v7, %v2165_v7  ;;  %v894_v52 = vmul.f32 %v2247_v14, %v2247_v14 }
 0x13a   : > { %v942_v62 = vadd.f32 %v941_v12, %v879_v57  ;;  %v813_v1 = vadd.f32 %v812_v58, %v2148_v45  ;;  %v884_v45 = vmul.f32 %v2172_v17, %v2172_v17  ;;  %v897_v58 = vmul.f32 %v2264_v51, %v2264_v51 }
 0x13c   : > { %v814_v2 = vadd.f32 %v813_v1, %v2168_v8  ;;  %v943_v3 = vadd.f32 %v942_v62, %v880_v59  ;;  %v885_v8 = vmul.f32 %v2192_v47, %v2192_v47  ;;  %v899_v1 = vmul.f32 %v2261_v50, %v2261_v50 }
 0x13e   : > { %v944_v6 = vadd.f32 %v943_v3, %v881_v38  ;;  %v815_v46 = vadd.f32 %v814_v2, %v2175_v18 }
 0x140   : > { %v816_v10 = vadd.f32 %v815_v46, %v2165_v7  ;;  %v945_v15 = vadd.f32 %v944_v6, %v882_v9  ;;  %v887_v7 = vmul.f32 %v2189_v44, %v2189_v44  ;;  %v901_v6 = vmul.f32 %v2287_v26, %v2287_v26 }
 0x142   : > { %v946_v16 = vadd.f32 %v945_v15, %v883_v37  ;;  %v817_v19 = vadd.f32 %v816_v10, %v2172_v17  ;;  %v888_v17 = vmul.f32 %v2196_v54, %v2196_v54  ;;  %v903_v10 = vmul.f32 %v2284_v24, %v2284_v24 }
 0x144   : > { %v818_v20 = vadd.f32 %v817_v19, %v2192_v47  ;;  %v947_v21 = vadd.f32 %v946_v16, %v884_v45  ;;  %v889_v47 = vmul.f32 %v2216_v23, %v2216_v23  ;;  %v904_v45 = vmul.f32 %v2293_v33, %v2293_v33 }
 0x146   : > { %v948_v25 = vadd.f32 %v947_v21, %v885_v8  ;;  %v819_v18 = vadd.f32 %v818_v20, %v2199_v55 }
 0x148   : > { %v820_v28 = vadd.f32 %v819_v18, %v2189_v44  ;;  %v949_v29 = vadd.f32 %v948_v25, %v886_v27  ;;  %v891_v44 = vmul.f32 %v2213_v22, %v2213_v22 }
 0x14a   : > { %v950_v32 = vadd.f32 %v949_v29, %v887_v7  ;;  %v821_v5 = vadd.f32 %v820_v28, %v2196_v54  ;;  %v892_v54 = vmul.f32 %v2220_v30, %v2220_v30 }
 0x14c   : > { %v822_v36 = vadd.f32 %v821_v5, %v2216_v23  ;;  %v951_v39 = vadd.f32 %v950_v32, %v888_v17  ;;  %v893_v23 = vmul.f32 %v2240_v0, %v2240_v0 }
 0x14e   : > { %v952_v40 = vadd.f32 %v951_v39, %v889_v47  ;;  %v823_v55 = vadd.f32 %v822_v36, %v2223_v31 }
 0x150   : > { %v824_v42 = vadd.f32 %v823_v55, %v2213_v22  ;;  %v953_v13 = vadd.f32 %v952_v40, %v890_v41  ;;  %v895_v22 = vmul.f32 %v2237_v63, %v2237_v63 }
 0x152   : > { %v954_v43 = vadd.f32 %v953_v13, %v891_v44  ;;  %v825_v48 = vadd.f32 %v824_v42, %v2220_v30  ;;  %v896_v30 = vmul.f32 %v2244_v11, %v2244_v11 }
 0x154   : > { %v826_v34 = vadd.f32 %v825_v48, %v2240_v0  ;;  %v955_v4 = vadd.f32 %v954_v43, %v892_v54 }
 0x156   : > { %v956_v49 = vadd.f32 %v955_v4, %v893_v23  ;;  %v827_v31 = vadd.f32 %v826_v34, %v2247_v14 }
 0x158   : > { %v828_v53 = vadd.f32 %v827_v31, %v2237_v63  ;;  %v957_v56 = vadd.f32 %v956_v49, %v894_v52  ;;  %v898_v63 = vmul.f32 %v2271_v61, %v2271_v61 }
 0x15a   : > { %v958_v57 = vadd.f32 %v957_v56, %v895_v22  ;;  %v829_v0 = vadd.f32 %v828_v53, %v2244_v11  ;;  %v900_v11 = vmul.f32 %v2268_v60, %v2268_v60 }
 0x15c   : > { %v830_v12 = vadd.f32 %v829_v0, %v2264_v51  ;;  %v959_v14 = vadd.f32 %v958_v57, %v896_v30 }
 0x15e   : > { %v960_v59 = vadd.f32 %v959_v14, %v897_v58  ;;  %v831_v62 = vadd.f32 %v830_v12, %v2271_v61 }
 0x160   : > { %v832_v38 = vadd.f32 %v831_v62, %v2261_v50  ;;  %v961_v2 = vadd.f32 %v960_v59, %v898_v63  ;;  %v902_v50 = vmul.f32 %v2296_v35, %v2296_v35 }
 0x162   : > { %v962_v3 = vadd.f32 %v961_v2, %v899_v1  ;;  %v833_v51 = vadd.f32 %v832_v38, %v2268_v60 }
 0x164   : > { %v834_v46 = vadd.f32 %v833_v51, %v2287_v26  ;;  %v963_v9 = vadd.f32 %v962_v3, %v900_v11 }
 0x166   : > { %v964_v61 = vadd.f32 %v963_v9, %v901_v6  ;;  %v835_v37 = vadd.f32 %v834_v46, %v2296_v35 }
 0x168   : > { %v836_v15 = vadd.f32 %v835_v37, %v2284_v24  ;;  %v965_v60 = vadd.f32 %v964_v61, %v902_v50 }
 0x16a   : > { %v837_v26 = vadd.f32 %v836_v15, %v2293_v33  ;;  %v966_v16 = vadd.f32 %v965_v60, %v903_v10 }
 0x16c   : > { %v967_v19 = vadd.f32 %v966_v16, %v904_v45  ;;  %839 = vst [vmem:[%s268_s13] sm:$0xff] %v837_v26 }
 0x16e   : > { %969 = vst [vmem:[%s272_s16] sm:$0xff] %v967_v19 }
 0x16f PF: > { %s16_s20 = sadd.s32 1, %s1935_s20   ;;  %s2417_s18 = smov %s1931_s19 }
 0x170   : > { %p13_p6 = scmp.ge.s32.totalorder %s16_s20, 4   ;;  %s2418_s19 = smov %s2420_s21 }
 0x172   :  { %15 = sbr.rel (!%p13_p6) target bundleno = 2 (0x2), region = 90 }

// kernel: encoder_pallas.6
= control target key start
LH: loop header
LB: loop body
LE: loop exit
PB: predicated region body
PF: predicated region fallthrough
CT: control target
= control target key end

     0   :  { %s2405_s21 = smov 0   ;;  %s2407_s22 = smov 0   ;;  %s2981_s0 = inlined_call_operand.vmem [shape: bf16[1024,128], index: 0, kind: input, shape index: {}]   ;;  %s2982_s1 = inlined_call_operand.vmem [shape: f32[2,128], index: 1, kind: input, shape index: {}]   ;;  %s2983_s2 = inlined_call_operand.vmem [shape: bf16[128,128], index: 2, kind: input, shape index: {}]   ;;  %s2984_s3 = inlined_call_operand.vmem [shape: f32[1,128], index: 3, kind: input, shape index: {}]   ;;  %s2985_s4 = inlined_call_operand.vmem [shape: bf16[1024,128], index: 4, kind: output, shape index: {0}]   ;;  %s2986_s5 = inlined_call_operand.vmem [shape: f32[16,128], index: 5, kind: output, shape index: {1}]   ;;  %s2987_s6 = inlined_call_operand.vmem [shape: f32[16,128], index: 6, kind: output, shape index: {2}]  }
   0x1   :  { %s2409_s23 = smov 0  }
   0x2 LB: > { %s29_s24 = sadd.s32 1, %s2364_s22  ;;  %p1679_p0 = scmp.ge.s32.totalorder %s2368_s23, 1  ;;  %s2368_s23 = sphi %s2409_s23, %s17_s23   ;;  %s2364_s22 = sphi %s2407_s22, %s2989_s22   ;;  %s2360_s21 = sphi %s2405_s21, %s2988_s21  }
   0x3   : > { %p31_p1 = scmp.ge.s32.totalorder %s29_s24, 2  ;;  %p236_p2 = scmp.lt.s32.totalorder %s2368_s23, 3 }
   0x5   : > { %s2991_s24 = smov (%p31_p1, %s29_s24), 0  ;;  %p237_p3 = pnand %p1679_p0, %p236_p2 }
   0x6   : > { %v2338_v0 = vld [vmem:[%s2983_s2] sm:$0xff] (!%p237_p3)   ;;  %s1680_s27 = sshll.u32 (!%p237_p3), %s2360_s21, 6  ;;  %v2339_v1 = vld [vmem:[%s2983_s2 + $0x8] sm:$0xff] (!%p237_p3)   ;;  %v2340_v2 = vld [vmem:[%s2983_s2 + $0x10] sm:$0xff] (!%p237_p3)   ;;  %p292_p5 = scmp.lt.s32.totalorder (!%p237_p3), %s2360_s21, 1 }
   0x7   : > { %240 = sbr.rel (%p237_p3) target bundleno = 385 (0x181), region = 36  ;;  %p278_p4 = scmp.lt.s32.totalorder (!%p237_p3), %s1680_s27, 127  ;;  %2217 = vmatprep.subr.bf16.mxu0 (!%p237_p3), %v2338_v0  ;;  %2297 = vmatprep.subr.bf16.mxu1 (!%p237_p3), %v2338_v0  ;;  %v2341_v3 = vld [vmem:[%s2983_s2 + $0x18] sm:$0xff] (!%p237_p3)   ;;  %v2451_v4 = vld [vmem:[%s2982_s1] ss:$0 sm:$0xff] (!%p237_p3)  ;;  %v2343_v22 = vld [vmem:[%s2983_s2 + $0x28] sm:$0xff] (!%p237_p3)  }
   0x8   : > { %2218 = vmatpush3.bf16.msra.mxu0 (!%p237_p3), %v2338_v0  ;;  %2305 = vmatpush3.bf16.msra.mxu1 (!%p237_p3), %v2338_v0  ;;  %v2459_v10 = vld [vmem:[%s2982_s1 + $0x1] ss:$0 sm:$0xff] (!%p237_p3)  ;;  %v2344_v31 = vld [vmem:[%s2983_s2 + $0x30] sm:$0xff] (!%p237_p3)   ;;  %v2345_v43 = vld [vmem:[%s2983_s2 + $0x38] sm:$0xff] (!%p237_p3)  }
   0x9   : > { %2219 = vmatprep.subr.bf16.mxu0 (!%p237_p3), %v2339_v1  ;;  %2298 = vmatprep.subr.bf16.mxu1 (!%p237_p3), %v2339_v1  ;;  %v2342_v13 = vld [vmem:[%s2983_s2 + $0x20] sm:$0xff] (!%p237_p3)  }
   0xc   : > { %2220 = vmatpush3.bf16.msra.mxu0 (!%p237_p3), %v2339_v1  ;;  %2306 = vmatpush3.bf16.msra.mxu1 (!%p237_p3), %v2339_v1 }
   0xd   : > { %2221 = vmatprep.subr.bf16.mxu0 (!%p237_p3), %v2340_v2  ;;  %2299 = vmatprep.subr.bf16.mxu1 (!%p237_p3), %v2340_v2 }
   0xe   : > { %s2993_s27 = smov (!%p278_p4, %s1680_s27), 127  ;;  %s2995_s21 = smov (!%p292_p5, %s2360_s21), 1 }
   0xf   : > { %s1681_s8 = sshll.u32 %s2993_s27, 2  ;;  %s1684_s27 = sshll.u32 %s2995_s21, 3 }
  0x10   : > { %s2443_s11 = scalar_lea.vmem %s2981_s0, %s1681_s8  ;;  %2222 = vmatpush3.bf16.msra.mxu0 %v2340_v2  ;;  %2307 = vmatpush3.bf16.msra.mxu1 %v2340_v2  ;;  %s2677_s12 = scalar_lea.vmem %s2985_s4, %s1681_s8 }
  0x11   : > { %v1828_v5 = vld [vmem:[%s2443_s11] sm:$0xff]   ;;  %v2115_v8 = vld [vmem:[%s2443_s11 + $0x8] sm:$0xff]   ;;  %v2116_v9 = vld [vmem:[%s2443_s11 + $0x10] sm:$0xff]   ;;  %2223 = vmatprep.subr.bf16.mxu0 %v2341_v3  ;;  %2300 = vmatprep.subr.bf16.mxu1 %v2341_v3  ;;  %s295_s14 = scalar_lea.vmem %s2986_s5, %s1684_s27  ;;  %s299_s17 = scalar_lea.vmem %s2987_s6, %s1684_s27 }
  0x12   : > { %v1829_v6 = vunpack.c.l.bf16 %v1828_v5  ;;  %v1830_v7 = vunpack.c.h.bf16 %v1828_v5  ;;  %v1833_v14 = vunpack.c.l.bf16 %v2115_v8  ;;  %v1834_v15 = vunpack.c.h.bf16 %v2115_v8  ;;  %v2117_v26 = vld [vmem:[%s2443_s11 + $0x18] sm:$0xff]   ;;  %v2118_v29 = vld [vmem:[%s2443_s11 + $0x20] sm:$0xff]   ;;  %v2119_v38 = vld [vmem:[%s2443_s11 + $0x28] sm:$0xff]  }
  0x13   : > { %v1837_v16 = vunpack.c.l.bf16 %v2116_v9  ;;  %v1838_v19 = vunpack.c.h.bf16 %v2116_v9  ;;  %v1841_v30 = vunpack.c.l.bf16 %v2117_v26  ;;  %v1842_v35 = vunpack.c.h.bf16 %v2117_v26  ;;  %v2120_v41 = vld [vmem:[%s2443_s11 + $0x30] sm:$0xff]   ;;  %v2121_v42 = vld [vmem:[%s2443_s11 + $0x38] sm:$0xff]   ;;  %v2122_v48 = vld [vmem:[%s2443_s11 + $0x40] sm:$0xff]  }
  0x14   : > { %v441_v11 = vmul.f32 %v1829_v6, %v2451_v4  ;;  %v442_v12 = vmul.f32 %v1830_v7, %v2451_v4  ;;  %2224 = vmatpush3.bf16.msra.mxu0 %v2341_v3  ;;  %2308 = vmatpush3.bf16.msra.mxu1 %v2341_v3  ;;  %v443_v23 = vmul.f32 %v1833_v14, %v2451_v4  ;;  %v1845_v37 = vunpack.c.l.bf16 %v2118_v29  ;;  %v2123_v63 = vld [vmem:[%s2443_s11 + $0x48] sm:$0xff]   ;;  %v2124_v5 = vld [vmem:[%s2443_s11 + $0x50] sm:$0xff]  }
  0x15   : > { %2225 = vmatprep.subr.bf16.mxu0 %v2342_v13  ;;  %v444_v24 = vmul.f32 %v1834_v15, %v2451_v4  ;;  %v445_v25 = vmul.f32 %v1837_v16, %v2451_v4  ;;  %2301 = vmatprep.subr.bf16.mxu1 %v2342_v13  ;;  %v446_v28 = vmul.f32 %v1838_v19, %v2451_v4  ;;  %v1846_v40 = vunpack.c.h.bf16 %v2118_v29 }
  0x16   : > { %v509_v17 = vadd.f32 %v2459_v10, %v441_v11  ;;  %v510_v18 = vadd.f32 %v2459_v10, %v442_v12  ;;  %v511_v32 = vadd.f32 %v2459_v10, %v443_v23  ;;  %v447_v39 = vmul.f32 %v1841_v30, %v2451_v4  ;;  %v2125_v23 = vld [vmem:[%s2443_s11 + $0x58] sm:$0xff]  }
  0x17   : > { %v512_v33 = vadd.f32 %v2459_v10, %v444_v24  ;;  %v513_v34 = vadd.f32 %v2459_v10, %v445_v25  ;;  %v514_v36 = vadd.f32 %v2459_v10, %v446_v28  ;;  %v448_v47 = vmul.f32 %v1842_v35, %v2451_v4 }
  0x18   : > { %v573_v20 = vmax.f32 %v509_v17, 0.0  ;;  %v574_v21 = vmax.f32 %v510_v18, 0.0  ;;  %2226 = vmatpush3.bf16.msra.mxu0 %v2342_v13  ;;  %2309 = vmatpush3.bf16.msra.mxu1 %v2342_v13  ;;  %v575_v44 = vmax.f32 %v511_v32, 0.0  ;;  %v449_v50 = vmul.f32 %v1845_v37, %v2451_v4 }
  0x19   : > { %2227 = vmatprep.subr.bf16.mxu0 %v2343_v22  ;;  %2302 = vmatprep.subr.bf16.mxu1 %v2343_v22  ;;  %v576_v45 = vmax.f32 %v512_v33, 0.0  ;;  %v577_v46 = vmax.f32 %v513_v34, 0.0  ;;  %v578_v49 = vmax.f32 %v514_v36, 0.0  ;;  %v1849_v51 = vunpack.c.l.bf16 %v2119_v38 }
  0x1a   : > { %v637_v27 = vpack.c.bf16 %v574_v21, %v573_v20  ;;  %v1850_v52 = vunpack.c.h.bf16 %v2119_v38  ;;  %v1853_v53 = vunpack.c.l.bf16 %v2120_v41  ;;  %v1854_v54 = vunpack.c.h.bf16 %v2120_v41 }
  0x1b   : > { %v1857_v55 = vunpack.c.l.bf16 %v2121_v42  ;;  %v1858_v56 = vunpack.c.h.bf16 %v2121_v42  ;;  %v450_v57 = vmul.f32 %v1846_v40, %v2451_v4  ;;  %v1861_v58 = vunpack.c.l.bf16 %v2122_v48 }
  0x1c   : > { %2233 = vmatprep.mubr.bf16.mxu0 %v637_v27  ;;  %2228 = vmatpush3.bf16.msra.mxu0 %v2343_v22  ;;  %v1862_v59 = vunpack.c.h.bf16 %v2122_v48  ;;  %v638_v60 = vpack.c.bf16 %v576_v45, %v575_v44  ;;  %v515_v61 = vadd.f32 %v2459_v10, %v447_v39  ;;  %v516_v62 = vadd.f32 %v2459_v10, %v448_v47  ;;  %v2130_v44 = vld [vmem:[%s2443_s11 + $0x80] sm:$0xff]  }
  0x1d   : > { %2229 = vmatprep.subr.bf16.mxu0 %v2344_v31  ;;  %2310 = vmatpush3.bf16.msra.mxu1 %v2343_v22  ;;  %v639_v0 = vpack.c.bf16 %v578_v49, %v577_v46  ;;  %v517_v1 = vadd.f32 %v2459_v10, %v449_v50  ;;  %v451_v2 = vmul.f32 %v1849_v51, %v2451_v4  ;;  %v1865_v14 = vunpack.c.l.bf16 %v2123_v63 }
  0x1e   : > { %2303 = vmatprep.subr.bf16.mxu1 %v2344_v31  ;;  %v452_v3 = vmul.f32 %v1850_v52, %v2451_v4  ;;  %v453_v6 = vmul.f32 %v1853_v53, %v2451_v4  ;;  %v454_v7 = vmul.f32 %v1854_v54, %v2451_v4  ;;  %v455_v8 = vmul.f32 %v1857_v55, %v2451_v4  ;;  %v2530_v52 = vld [vmem:[%s2443_s11 + $0x60] sm:$0xff]  }
  0x1f   : > { %v456_v9 = vmul.f32 %v1858_v56, %v2451_v4  ;;  %v518_v11 = vadd.f32 %v2459_v10, %v450_v57  ;;  %v457_v12 = vmul.f32 %v1861_v58, %v2451_v4  ;;  %v458_v13 = vmul.f32 %v1862_v59, %v2451_v4  ;;  %v2131_v59 = vld [vmem:[%s2443_s11 + $0x88] sm:$0xff]  }
  0x20   : > { %2230 = vmatpush3.bf16.msra.mxu0 %v2344_v31  ;;  %v579_v15 = vmax.f32 %v515_v61, 0.0  ;;  %v580_v16 = vmax.f32 %v516_v62, 0.0  ;;  %v1866_v17 = vunpack.c.h.bf16 %v2123_v63  ;;  %v1869_v18 = vunpack.c.l.bf16 %v2124_v5 }
  0x21   : > { %2231 = vmatprep.subr.bf16.mxu0 %v2345_v43  ;;  %2311 = vmatpush3.bf16.msra.mxu1 %v2344_v31  ;;  %v581_v19 = vmax.f32 %v517_v1, 0.0  ;;  %v519_v20 = vadd.f32 %v2459_v10, %v451_v2  ;;  %v520_v21 = vadd.f32 %v2459_v10, %v452_v3  ;;  %v1870_v22 = vunpack.c.h.bf16 %v2124_v5 }
  0x22   : > { %2304 = vmatprep.subr.bf16.mxu1 %v2345_v43  ;;  %v521_v24 = vadd.f32 %v2459_v10, %v453_v6  ;;  %v522_v25 = vadd.f32 %v2459_v10, %v454_v7  ;;  %v523_v26 = vadd.f32 %v2459_v10, %v455_v8  ;;  %v524_v27 = vadd.f32 %v2459_v10, %v456_v9 }
  0x23   : > { %v582_v28 = vmax.f32 %v518_v11, 0.0  ;;  %v525_v29 = vadd.f32 %v2459_v10, %v457_v12  ;;  %v526_v30 = vadd.f32 %v2459_v10, %v458_v13  ;;  %v459_v31 = vmul.f32 %v1865_v14, %v2451_v4  ;;  %v2133_v11 = vld [vmem:[%s2443_s11 + $0x98] sm:$0xff]  }
  0x24   : > { %2232 = vmatpush3.bf16.msra.mxu0 %v2345_v43  ;;  %v640_v32 = vpack.c.bf16 %v580_v16, %v579_v15  ;;  %v460_v33 = vmul.f32 %v1866_v17, %v2451_v4  ;;  %v461_v34 = vmul.f32 %v1869_v18, %v2451_v4  ;;  %v1873_v35 = vunpack.c.l.bf16 %v2125_v23 }
  0x25   : > { %2312 = vmatpush3.bf16.msra.mxu1 %v2345_v43  ;;  %v583_v36 = vmax.f32 %v519_v20, 0.0  ;;  %v584_v37 = vmax.f32 %v520_v21, 0.0  ;;  %v462_v38 = vmul.f32 %v1870_v22, %v2451_v4  ;;  %v1874_v39 = vunpack.c.h.bf16 %v2125_v23 }
  0x26   : > { %v585_v40 = vmax.f32 %v521_v24, 0.0  ;;  %v586_v41 = vmax.f32 %v522_v25, 0.0  ;;  %v587_v42 = vmax.f32 %v523_v26, 0.0  ;;  %v588_v43 = vmax.f32 %v524_v27, 0.0  ;;  %v2134_v24 = vld [vmem:[%s2443_s11 + $0xa0] sm:$0xff]  }
  0x27   : > { %2234 = vmatmul.mubr.bf16.vlgmr.msra.gmra.mrb[0].mxu0 %v638_v60  ;;  %v641_v45 = vpack.c.bf16 %v582_v28, %v581_v19  ;;  %v589_v46 = vmax.f32 %v525_v29, 0.0  ;;  %v590_v47 = vmax.f32 %v526_v30, 0.0  ;;  %v527_v48 = vadd.f32 %v2459_v10, %v459_v31 }
  0x28   : > { %2237 = vmatprep.mubr.bf16.mxu0 %v639_v0  ;;  %v528_v49 = vadd.f32 %v2459_v10, %v460_v33  ;;  %v2526_v50 = vadd.f32 %v2459_v10, %v461_v34  ;;  %v463_v51 = vmul.f32 %v1873_v35, %v2451_v4  ;;  %v2533_v53 = vadd.f32 %v2459_v10, %v462_v38  ;;  %v2132_v0 = vld [vmem:[%s2443_s11 + $0x90] sm:$0xff]   ;;  %v2135_v33 = vld [vmem:[%s2443_s11 + $0xa8] sm:$0xff]  }
  0x29   : > { %v464_v54 = vmul.f32 %v1874_v39, %v2451_v4  ;;  %v1893_v55 = vunpack.c.l.bf16 %v2130_v44  ;;  %v642_v56 = vpack.c.bf16 %v584_v37, %v583_v36  ;;  %v643_v57 = vpack.c.bf16 %v586_v41, %v585_v40 }
  0x2a   : > { %v2536_v58 = vpack.c.bf16 %v588_v43, %v587_v42  ;;  %v2539_v60 = vpack.c.bf16 %v590_v47, %v589_v46  ;;  %v591_v61 = vmax.f32 %v527_v48, 0.0  ;;  %v1877_v62 = vunpack.c.l.bf16 %v2530_v52  ;;  %v2136_v46 = vld [vmem:[%s2443_s11 + $0xb0] sm:$0xff]   ;;  %v2127_v47 = vld [vmem:[%s2443_s11 + $0x68] sm:$0xff]  }
  0x2b   : > { %v1894_v63 = vunpack.c.h.bf16 %v2130_v44  ;;  %v592_v1 = vmax.f32 %v528_v49, 0.0  ;;  %v593_v2 = vmax.f32 %v2526_v50, 0.0  ;;  %v2545_v3 = vadd.f32 %v2459_v10, %v463_v51 }
  0x2c   : > { %v473_v5 = vmul.f32 %v1893_v55, %v2451_v4  ;;  %v594_v6 = vmax.f32 %v2533_v53, 0.0  ;;  %v2550_v7 = vadd.f32 %v2459_v10, %v464_v54  ;;  %v1897_v9 = vunpack.c.l.bf16 %v2131_v59 }
  0x2d   : > { %v474_v8 = vmul.f32 %v1894_v63, %v2451_v4  ;;  %v1878_v12 = vunpack.c.h.bf16 %v2530_v52  ;;  %v1898_v14 = vunpack.c.h.bf16 %v2131_v59  ;;  %v1901_v15 = vunpack.c.l.bf16 %v2132_v0 }
  0x2e   : > { %v541_v13 = vadd.f32 %v2459_v10, %v473_v5  ;;  %v2557_v16 = vmul.f32 %v1877_v62, %v2451_v4  ;;  %v475_v18 = vmul.f32 %v1897_v9, %v2451_v4  ;;  %v1902_v19 = vunpack.c.h.bf16 %v2132_v0 }
  0x2f   : > { %2238 = vmatmul.mubr.bf16.gmra.mrb[4].mxu0 %v640_v32  ;;  %v542_v17 = vadd.f32 %v2459_v10, %v474_v8  ;;  %v476_v21 = vmul.f32 %v1898_v14, %v2451_v4  ;;  %v477_v22 = vmul.f32 %v1901_v15, %v2451_v4  ;;  %v1905_v23 = vunpack.c.l.bf16 %v2133_v11 }
  0x30   : > { %2241 = vmatprep.mubr.bf16.mxu0 %v641_v45  ;;  %v605_v20 = vmax.f32 %v541_v13, 0.0  ;;  %v2564_v25 = vpack.c.bf16 %v592_v1, %v591_v61  ;;  %v543_v27 = vadd.f32 %v2459_v10, %v475_v18  ;;  %v478_v28 = vmul.f32 %v1902_v19, %v2451_v4  ;;  %v2137_v1 = vld [vmem:[%s2443_s11 + $0xb8] sm:$0xff]   ;;  %v2138_v18 = vld [vmem:[%s2443_s11 + $0xc0] sm:$0xff]   ;;  %v2128_v19 = vld [vmem:[%s2443_s11 + $0x70] sm:$0xff]  }
  0x31   : > { %v606_v26 = vmax.f32 %v542_v17, 0.0  ;;  %v544_v29 = vadd.f32 %v2459_v10, %v476_v21  ;;  %v545_v30 = vadd.f32 %v2459_v10, %v477_v22  ;;  %v1906_v31 = vunpack.c.h.bf16 %v2133_v11 }
  0x32   : > { %v479_v32 = vmul.f32 %v1905_v23, %v2451_v4  ;;  %v607_v35 = vmax.f32 %v543_v27, 0.0  ;;  %v546_v36 = vadd.f32 %v2459_v10, %v478_v28  ;;  %v1909_v37 = vunpack.c.l.bf16 %v2134_v24 }
  0x33   : > { %v653_v34 = vpack.c.bf16 %v606_v26, %v605_v20  ;;  %v608_v38 = vmax.f32 %v544_v29, 0.0  ;;  %v609_v39 = vmax.f32 %v545_v30, 0.0  ;;  %v480_v40 = vmul.f32 %v1906_v31, %v2451_v4 }
  0x34   : > { %v547_v41 = vadd.f32 %v2459_v10, %v479_v32  ;;  %v610_v42 = vmax.f32 %v546_v36, 0.0  ;;  %v1910_v43 = vunpack.c.h.bf16 %v2134_v24  ;;  %v481_v44 = vmul.f32 %v1909_v37, %v2451_v4 }
  0x35   : > { %2265 = vmatprep.mubr.bf16.mxu1 %v653_v34  ;;  %v1913_v45 = vunpack.c.l.bf16 %v2135_v33  ;;  %v654_v48 = vpack.c.bf16 %v608_v38, %v607_v35  ;;  %v548_v49 = vadd.f32 %v2459_v10, %v480_v40  ;;  %v1914_v54 = vunpack.c.h.bf16 %v2135_v33  ;;  %v2129_v33 = vld [vmem:[%s2443_s11 + $0x78] sm:$0xff]   ;;  %v2140_v40 = vld [vmem:[%s2443_s11 + $0xd0] sm:$0xff]  }
  0x36   : > { %v611_v51 = vmax.f32 %v547_v41, 0.0  ;;  %v655_v55 = vpack.c.bf16 %v610_v42, %v609_v39  ;;  %v1917_v63 = vunpack.c.l.bf16 %v2136_v46  ;;  %v1918_v0 = vunpack.c.h.bf16 %v2136_v46 }
  0x37   : > { %2242 = vmatmul.mubr.bf16.gmra.mrb[8].mxu0 %v642_v56  ;;  %v482_v56 = vmul.f32 %v1910_v43, %v2451_v4  ;;  %v483_v59 = vmul.f32 %v1913_v45, %v2451_v4  ;;  %2266 = vmatmul.mubr.bf16.vlgmr.msra.gmra.mrb[0].mxu1 %v654_v48  ;;  %v612_v61 = vmax.f32 %v548_v49, 0.0  ;;  %v484_v62 = vmul.f32 %v1914_v54, %v2451_v4 }
  0x38   : > { %2245 = vmatprep.mubr.bf16.mxu0 %v643_v57  ;;  %v549_v57 = vadd.f32 %v2459_v10, %v481_v44  ;;  %v595_v5 = vmax.f32 %v2545_v3, 0.0  ;;  %v1881_v8 = vunpack.c.l.bf16 %v2127_v47  ;;  %2269 = vmatprep.mubr.bf16.mxu1 %v655_v55  ;;  %v596_v13 = vmax.f32 %v2550_v7, 0.0 }
  0x39   : > { %v550_v9 = vadd.f32 %v2459_v10, %v482_v56  ;;  %v1882_v14 = vunpack.c.h.bf16 %v2127_v47  ;;  %v485_v15 = vmul.f32 %v1917_v63, %v2451_v4  ;;  %v486_v17 = vmul.f32 %v1918_v0, %v2451_v4 }
  0x3a   : > { %v613_v11 = vmax.f32 %v549_v57, 0.0  ;;  %v466_v3 = vmul.f32 %v1878_v12, %v2451_v4  ;;  %v1921_v21 = vunpack.c.l.bf16 %v2137_v1  ;;  %v1922_v22 = vunpack.c.h.bf16 %v2137_v1 }
  0x3b   : > { %v614_v20 = vmax.f32 %v550_v9, 0.0  ;;  %v551_v7 = vadd.f32 %v2459_v10, %v483_v59  ;;  %v552_v23 = vadd.f32 %v2459_v10, %v484_v62  ;;  %v553_v24 = vadd.f32 %v2459_v10, %v485_v15  ;;  %v2141_v15 = vld [vmem:[%s2443_s11 + $0xd8] sm:$0xff]  }
  0x3c   : > { %v554_v27 = vadd.f32 %v2459_v10, %v486_v17  ;;  %v1926_v28 = vunpack.c.h.bf16 %v2138_v18  ;;  %v647_v52 = vpack.c.bf16 %v594_v6, %v593_v2  ;;  %v533_v12 = vadd.f32 %v2459_v10, %v2557_v16  ;;  %v2139_v6 = vld [vmem:[%s2443_s11 + $0xc8] sm:$0xff]  }
  0x3d   : > { %v657_v26 = vpack.c.bf16 %v614_v20, %v613_v11  ;;  %v1885_v29 = vunpack.c.l.bf16 %v2128_v19  ;;  %v1886_v30 = vunpack.c.h.bf16 %v2128_v19  ;;  %v534_v31 = vadd.f32 %v2459_v10, %v466_v3 }
  0x3e   : > { %v467_v32 = vmul.f32 %v1881_v8, %v2451_v4  ;;  %v487_v34 = vmul.f32 %v1921_v21, %v2451_v4  ;;  %v488_v35 = vmul.f32 %v1922_v22, %v2451_v4  ;;  %v648_v36 = vpack.c.bf16 %v596_v13, %v595_v5 }
  0x3f   : > { %2246 = vmatmul.mubr.bf16.gmra.mrb[12].mxu0 %v2536_v58  ;;  %v656_v58 = vpack.c.bf16 %v612_v61, %v611_v51  ;;  %v468_v50 = vmul.f32 %v1882_v14, %v2451_v4  ;;  %v615_v53 = vmax.f32 %v551_v7, 0.0  ;;  %v616_v2 = vmax.f32 %v552_v23, 0.0 }
  0x40   : > { %2249 = vmatprep.mubr.bf16.mxu0 %v2539_v60  ;;  %v1925_v60 = vunpack.c.l.bf16 %v2138_v18  ;;  %v617_v16 = vmax.f32 %v553_v24, 0.0  ;;  %v618_v37 = vmax.f32 %v554_v27, 0.0  ;;  %v490_v39 = vmul.f32 %v1926_v28, %v2451_v4 }
  0x41   : > { %2270 = vmatmul.mubr.bf16.gmra.mrb[4].mxu1 %v656_v58  ;;  %v597_v41 = vmax.f32 %v533_v12, 0.0  ;;  %v469_v42 = vmul.f32 %v1885_v29, %v2451_v4  ;;  %v470_v43 = vmul.f32 %v1886_v30, %v2451_v4  ;;  %v1889_v44 = vunpack.c.l.bf16 %v2129_v33  ;;  %v2142_v58 = vld [vmem:[%s2443_s11 + $0xe0] sm:$0xff]  }
  0x42   : > { %2273 = vmatprep.mubr.bf16.mxu1 %v657_v26  ;;  %v489_v38 = vmul.f32 %v1925_v60, %v2451_v4  ;;  %v598_v45 = vmax.f32 %v534_v31, 0.0  ;;  %v555_v46 = vadd.f32 %v2459_v10, %v487_v34  ;;  %v556_v47 = vadd.f32 %v2459_v10, %v488_v35 }
  0x43   : > { %v1929_v48 = vunpack.c.l.bf16 %v2139_v6  ;;  %v658_v49 = vpack.c.bf16 %v616_v2, %v615_v53  ;;  %v1930_v51 = vunpack.c.h.bf16 %v2139_v6  ;;  %v1933_v54 = vunpack.c.l.bf16 %v2140_v40 }
  0x44   : > { %v1934_v55 = vunpack.c.h.bf16 %v2140_v40  ;;  %v535_v56 = vadd.f32 %v2459_v10, %v467_v32  ;;  %v557_v57 = vadd.f32 %v2459_v10, %v489_v38  ;;  %v558_v59 = vadd.f32 %v2459_v10, %v490_v39 }
  0x45   : > { %v536_v61 = vadd.f32 %v2459_v10, %v468_v50  ;;  %v537_v62 = vadd.f32 %v2459_v10, %v469_v42  ;;  %v538_v63 = vadd.f32 %v2459_v10, %v470_v43  ;;  %v1890_v0 = vunpack.c.h.bf16 %v2129_v33 }
  0x46   : > { %v649_v1 = vpack.c.bf16 %v598_v45, %v597_v41  ;;  %v619_v5 = vmax.f32 %v555_v46, 0.0  ;;  %v620_v8 = vmax.f32 %v556_v47, 0.0  ;;  %v491_v9 = vmul.f32 %v1929_v48, %v2451_v4  ;;  %v2144_v41 = vld [vmem:[%s2443_s11 + $0xf0] sm:$0xff]  }
  0x47   : > { %2250 = vmatmul.mubr.bf16.gmra.mrb[16].mxu0 %v2564_v25  ;;  %v659_v25 = vpack.c.bf16 %v618_v37, %v617_v16  ;;  %v492_v11 = vmul.f32 %v1930_v51, %v2451_v4  ;;  %v493_v13 = vmul.f32 %v1933_v54, %v2451_v4  ;;  %v494_v14 = vmul.f32 %v1934_v55, %v2451_v4  ;;  %v2143_v16 = vld [vmem:[%s2443_s11 + $0xe8] sm:$0xff]  }
  0x48   : > { %2253 = vmatprep.mubr.bf16.mxu0 %v647_v52  ;;  %v471_v17 = vmul.f32 %v1889_v44, %v2451_v4  ;;  %v621_v18 = vmax.f32 %v557_v57, 0.0  ;;  %v622_v3 = vmax.f32 %v558_v59, 0.0  ;;  %v599_v19 = vmax.f32 %v535_v56, 0.0 }
  0x49   : > { %2274 = vmatmul.mubr.bf16.gmra.mrb[8].mxu1 %v658_v49  ;;  %v600_v20 = vmax.f32 %v536_v61, 0.0  ;;  %v601_v21 = vmax.f32 %v537_v62, 0.0  ;;  %v472_v22 = vmul.f32 %v1890_v0, %v2451_v4  ;;  %v602_v7 = vmax.f32 %v538_v63, 0.0 }
  0x4a   : > { %2277 = vmatprep.mubr.bf16.mxu1 %v659_v25  ;;  %v660_v23 = vpack.c.bf16 %v620_v8, %v619_v5  ;;  %v559_v24 = vadd.f32 %v2459_v10, %v491_v9  ;;  %v1937_v26 = vunpack.c.l.bf16 %v2141_v15  ;;  %v560_v27 = vadd.f32 %v2459_v10, %v492_v11 }
  0x4b   : > { %v561_v60 = vadd.f32 %v2459_v10, %v493_v13  ;;  %v562_v28 = vadd.f32 %v2459_v10, %v494_v14  ;;  %v1938_v52 = vunpack.c.h.bf16 %v2141_v15  ;;  %v661_v12 = vpack.c.bf16 %v622_v3, %v621_v18 }
  0x4c   : > { %v1941_v29 = vunpack.c.l.bf16 %v2142_v58  ;;  %v1942_v30 = vunpack.c.h.bf16 %v2142_v58  ;;  %v650_v31 = vpack.c.bf16 %v600_v20, %v599_v19  ;;  %v539_v32 = vadd.f32 %v2459_v10, %v471_v17 }
  0x4d   : > { %v540_v33 = vadd.f32 %v2459_v10, %v472_v22  ;;  %v651_v34 = vpack.c.bf16 %v602_v7, %v601_v21  ;;  %v623_v35 = vmax.f32 %v559_v24, 0.0  ;;  %v624_v50 = vmax.f32 %v560_v27, 0.0 }
  0x4e   : > { %v625_v53 = vmax.f32 %v561_v60, 0.0  ;;  %v626_v2 = vmax.f32 %v562_v28, 0.0  ;;  %v496_v6 = vmul.f32 %v1938_v52, %v2451_v4  ;;  %v497_v37 = vmul.f32 %v1941_v29, %v2451_v4 }
  0x4f   : > { %2254 = vmatmul.mubr.bf16.gmra.mrb[20].mxu0 %v648_v36  ;;  %v495_v36 = vmul.f32 %v1937_v26, %v2451_v4  ;;  %v498_v38 = vmul.f32 %v1942_v30, %v2451_v4  ;;  %v603_v39 = vmax.f32 %v539_v32, 0.0  ;;  %v604_v40 = vmax.f32 %v540_v33, 0.0 }
  0x50   : > { %2257 = vmatprep.mubr.bf16.mxu0 %v649_v1  ;;  %v1945_v43 = vunpack.c.l.bf16 %v2143_v16  ;;  %v662_v44 = vpack.c.bf16 %v624_v50, %v623_v35  ;;  %v663_v45 = vpack.c.bf16 %v626_v2, %v625_v53  ;;  %v564_v46 = vadd.f32 %v2459_v10, %v496_v6  ;;  %v2145_v1 = vld [vmem:[%s2443_s11 + $0xf8] sm:$0xff]  }
  0x51   : > { %2278 = vmatmul.mubr.bf16.gmra.mrb[12].mxu1 %v660_v23  ;;  %v563_v42 = vadd.f32 %v2459_v10, %v495_v36  ;;  %v1946_v47 = vunpack.c.h.bf16 %v2143_v16  ;;  %v565_v48 = vadd.f32 %v2459_v10, %v497_v37  ;;  %v566_v49 = vadd.f32 %v2459_v10, %v498_v38 }
  0x52   : > { %2281 = vmatprep.mubr.bf16.mxu1 %v661_v12  ;;  %v1949_v51 = vunpack.c.l.bf16 %v2144_v41  ;;  %v1950_v54 = vunpack.c.h.bf16 %v2144_v41  ;;  %v652_v55 = vpack.c.bf16 %v604_v40, %v603_v39  ;;  %v499_v56 = vmul.f32 %v1945_v43, %v2451_v4 }
  0x53   : > { %v627_v25 = vmax.f32 %v563_v42, 0.0  ;;  %v628_v57 = vmax.f32 %v564_v46, 0.0  ;;  %v500_v59 = vmul.f32 %v1946_v47, %v2451_v4  ;;  %v629_v61 = vmax.f32 %v565_v48, 0.0 }
  0x54   : > { %v630_v62 = vmax.f32 %v566_v49, 0.0  ;;  %v501_v63 = vmul.f32 %v1949_v51, %v2451_v4  ;;  %v502_v0 = vmul.f32 %v1950_v54, %v2451_v4  ;;  %v567_v5 = vadd.f32 %v2459_v10, %v499_v56 }
  0x55   : > { %v664_v8 = vpack.c.bf16 %v628_v57, %v627_v25  ;;  %v568_v9 = vadd.f32 %v2459_v10, %v500_v59  ;;  %v1953_v11 = vunpack.c.l.bf16 %v2145_v1  ;;  %v1954_v13 = vunpack.c.h.bf16 %v2145_v1 }
  0x56   : > { %v665_v14 = vpack.c.bf16 %v630_v62, %v629_v61  ;;  %v569_v15 = vadd.f32 %v2459_v10, %v501_v63  ;;  %v570_v17 = vadd.f32 %v2459_v10, %v502_v0  ;;  %v631_v18 = vmax.f32 %v567_v5, 0.0 }
  0x57   : > { %2258 = vmatmul.mubr.bf16.gmra.mrb[24].mxu0 %v650_v31  ;;  %v632_v3 = vmax.f32 %v568_v9, 0.0  ;;  %v503_v19 = vmul.f32 %v1953_v11, %v2451_v4  ;;  %v504_v20 = vmul.f32 %v1954_v13, %v2451_v4  ;;  %v2667_v4 = vld [vmem:[%s2984_s3] ss:$0 sm:$0xff] }
  0x58   : > { %2261 = vmatprep.mubr.bf16.mxu0 %v651_v34  ;;  %v633_v21 = vmax.f32 %v569_v15, 0.0  ;;  %v634_v22 = vmax.f32 %v570_v17, 0.0 }
  0x59   : > { %2282 = vmatmul.mubr.bf16.gmra.mrb[16].mxu1 %v662_v44  ;;  %v666_v58 = vpack.c.bf16 %v632_v3, %v631_v18  ;;  %v571_v7 = vadd.f32 %v2459_v10, %v503_v19  ;;  %v572_v23 = vadd.f32 %v2459_v10, %v504_v20 }
  0x5a   : > { %2285 = vmatprep.mubr.bf16.mxu1 %v663_v45  ;;  %v667_v24 = vpack.c.bf16 %v634_v22, %v633_v21 }
  0x5b   : > { %v635_v26 = vmax.f32 %v571_v7, 0.0  ;;  %v636_v27 = vmax.f32 %v572_v23, 0.0 }
  0x5d   : > { %v668_v60 = vpack.c.bf16 %v636_v27, %v635_v26 }
  0x5f   : > { %2262 = vmatmul.mubr.bf16.gmra.mrb[28].mxu0 %v652_v55 }
  0x61   : > { %2286 = vmatmul.mubr.bf16.gmra.mrb[20].mxu1 %v664_v8 }
  0x62   : > { %2289 = vmatprep.mubr.bf16.mxu1 %v665_v14 }
  0x69   : > { %2290 = vmatmul.mubr.bf16.gmra.mrb[24].mxu1 %v666_v58 }
  0x6a   : > { %2293 = vmatprep.mubr.bf16.mxu1 %v667_v24 }
  0x71   : > { %2294 = vmatmul.mubr.bf16.gmra.mrb[28].mxu1 %v668_v60 }
  0xfa   : > { %v2235_v28 = vpop.f32.mrb[0].mxu0 }
  0xfb   : > { %v774_v52 = vpop.f32.mrb[1].mxu0  ;;  %v783_v10 = vadd.f32 %v2235_v28, %v2667_v4 }
  0xfc   : > { %v775_v12 = vadd.f32 %v2667_v4, %v774_v52  ;;  %v2236_v29 = vpop.f32.mrb[2].mxu0 }
  0xfd   : > { %v786_v30 = vadd.f32 %v2236_v29, %v2667_v4  ;;  %v777_v31 = vpop.f32.mrb[3].mxu0  ;;  %v1098_v53 = vmul.f32 %v783_v10, %v783_v10 }
  0xfe   : > { %v778_v32 = vadd.f32 %v2667_v4, %v777_v31  ;;  %v1096_v34 = vmul.f32 %v775_v12, %v775_v12 }
  0xff   : > { %v1963_v33 = vpack.c.bf16 %v786_v30, %v783_v10  ;;  %v1099_v38 = vmul.f32 %v786_v30, %v786_v30 }
 0x100   : > { %v1030_v35 = vadd.f32 %v778_v32, %v775_v12  ;;  %v1097_v36 = vmul.f32 %v778_v32, %v778_v32  ;;  %v1958_v50 = vpack.c.bf16 %v778_v32, %v775_v12 }
 0x101   : > { %2146 = vst [vmem:[%s2677_s12 + $0x8] sm:$0xff] %v1963_v33  }
 0x102   : > { %v1031_v2 = vadd.f32 %v1030_v35, %v783_v10  ;;  %v1160_v6 = vadd.f32 %v1097_v36, %v1096_v34  ;;  %1959 = vst [vmem:[%s2677_s12] sm:$0xff] %v1958_v50   ;;  %v2239_v16 = vpop.f32.mrb[4].mxu0 }
 0x103   : > { %v790_v37 = vpop.f32.mrb[5].mxu0  ;;  %v799_v43 = vadd.f32 %v2239_v16, %v2667_v4 }
 0x104   : > { %v1161_v39 = vadd.f32 %v1160_v6, %v1098_v53  ;;  %v791_v40 = vadd.f32 %v2667_v4, %v790_v37  ;;  %v1032_v41 = vadd.f32 %v1031_v2, %v786_v30  ;;  %v2240_v42 = vpop.f32.mrb[6].mxu0 }
 0x105   : > { %v802_v44 = vadd.f32 %v2240_v42, %v2667_v4  ;;  %v793_v45 = vpop.f32.mrb[7].mxu0  ;;  %v1102_v57 = vmul.f32 %v799_v43, %v799_v43 }
 0x106   : > { %v1033_v46 = vadd.f32 %v1032_v41, %v791_v40  ;;  %v1100_v47 = vmul.f32 %v791_v40, %v791_v40  ;;  %v1162_v48 = vadd.f32 %v1161_v39, %v1099_v38  ;;  %v794_v49 = vadd.f32 %v2667_v4, %v793_v45 }
 0x107   : > { %v1973_v51 = vpack.c.bf16 %v802_v44, %v799_v43  ;;  %v1103_v0 = vmul.f32 %v802_v44, %v802_v44 }
 0x108   : > { %v1163_v54 = vadd.f32 %v1162_v48, %v1100_v47  ;;  %v1034_v55 = vadd.f32 %v1033_v46, %v794_v49  ;;  %v1101_v56 = vmul.f32 %v794_v49, %v794_v49  ;;  %v1968_v25 = vpack.c.bf16 %v794_v49, %v791_v40 }
 0x109   : > { %2148 = vst [vmem:[%s2677_s12 + $0x18] sm:$0xff] %v1973_v51  }
 0x10a   : > { %v1035_v59 = vadd.f32 %v1034_v55, %v799_v43  ;;  %v1164_v61 = vadd.f32 %v1163_v54, %v1101_v56  ;;  %2147 = vst [vmem:[%s2677_s12 + $0x10] sm:$0xff] %v1968_v25   ;;  %v2243_v62 = vpop.f32.mrb[8].mxu0  ;;  %v2267_v7 = vpop.f32.mrb[0].mxu1 }
 0x10b   : > { %v806_v63 = vpop.f32.mrb[9].mxu0  ;;  %v815_v11 = vadd.f32 %v2243_v62, %v2667_v4  ;;  %v2694_v23 = vadd.f32 %v2267_v7, %v2667_v4  ;;  %v902_v24 = vpop.f32.mrb[1].mxu1 }
 0x10c   : > { %v1165_v1 = vadd.f32 %v1164_v61, %v1102_v57  ;;  %v807_v5 = vadd.f32 %v2667_v4, %v806_v63  ;;  %v1036_v8 = vadd.f32 %v1035_v59, %v802_v44  ;;  %v2244_v9 = vpop.f32.mrb[10].mxu0  ;;  %v2268_v52 = vpop.f32.mrb[2].mxu1  ;;  %v2704_v53 = vadd.f32 %v2667_v4, %v902_v24 }
 0x10d   : > { %v818_v13 = vadd.f32 %v2244_v9, %v2667_v4  ;;  %v809_v14 = vpop.f32.mrb[11].mxu0  ;;  %v1106_v26 = vmul.f32 %v815_v11, %v815_v11  ;;  %v2698_v29 = vadd.f32 %v2268_v52, %v2667_v4  ;;  %v905_v10 = vpop.f32.mrb[3].mxu1 }
 0x10e   : > { %v1037_v15 = vadd.f32 %v1036_v8, %v807_v5  ;;  %v1104_v17 = vmul.f32 %v807_v5, %v807_v5  ;;  %v1166_v18 = vadd.f32 %v1165_v1, %v1103_v0  ;;  %v810_v3 = vadd.f32 %v2667_v4, %v809_v14 }
 0x10f   : > { %v1983_v19 = vpack.c.bf16 %v818_v13, %v815_v11  ;;  %v1107_v30 = vmul.f32 %v818_v13, %v818_v13  ;;  %v2043_v2 = vpack.c.bf16 %v2698_v29, %v2694_v23  ;;  %v2711_v40 = vadd.f32 %v2667_v4, %v905_v10 }
 0x110   : > { %v1167_v20 = vadd.f32 %v1166_v18, %v1104_v17  ;;  %v1038_v21 = vadd.f32 %v1037_v15, %v810_v3  ;;  %v1105_v22 = vmul.f32 %v810_v3, %v810_v3  ;;  %v1978_v58 = vpack.c.bf16 %v810_v3, %v807_v5 }
 0x111   : > { %2150 = vst [vmem:[%s2677_s12 + $0x28] sm:$0xff] %v1983_v19   ;;  %2162 = vst [vmem:[%s2677_s12 + $0x88] sm:$0xff] %v2043_v2   ;;  %v2038_v46 = vpack.c.bf16 %v2711_v40, %v2704_v53 }
 0x112   : > { %v1039_v27 = vadd.f32 %v1038_v21, %v815_v11  ;;  %v1168_v60 = vadd.f32 %v1167_v20, %v1105_v22  ;;  %2149 = vst [vmem:[%s2677_s12 + $0x20] sm:$0xff] %v1978_v58   ;;  %v2247_v28 = vpop.f32.mrb[12].mxu0 }
 0x113   : > { %v822_v12 = vpop.f32.mrb[13].mxu0  ;;  %v831_v35 = vadd.f32 %v2247_v28, %v2667_v4  ;;  %2161 = vst [vmem:[%s2677_s12 + $0x80] sm:$0xff] %v2038_v46  }
 0x114   : > { %v1169_v31 = vadd.f32 %v1168_v60, %v1106_v26  ;;  %v823_v32 = vadd.f32 %v2667_v4, %v822_v12  ;;  %v1040_v33 = vadd.f32 %v1039_v27, %v818_v13  ;;  %v2248_v34 = vpop.f32.mrb[14].mxu0  ;;  %v2271_v45 = vpop.f32.mrb[4].mxu1 }
 0x115   : > { %v834_v36 = vadd.f32 %v2248_v34, %v2667_v4  ;;  %v825_v50 = vpop.f32.mrb[15].mxu0  ;;  %v2717_v47 = vadd.f32 %v2271_v45, %v2667_v4  ;;  %v918_v48 = vpop.f32.mrb[5].mxu1  ;;  %v1110_v49 = vmul.f32 %v831_v35, %v831_v35 }
 0x116   : > { %v1041_v6 = vadd.f32 %v1040_v33, %v823_v32  ;;  %v1108_v16 = vmul.f32 %v823_v32, %v823_v32  ;;  %v1170_v37 = vadd.f32 %v1169_v31, %v1107_v30  ;;  %v826_v38 = vadd.f32 %v2667_v4, %v825_v50  ;;  %v2272_v56 = vpop.f32.mrb[6].mxu1 }
 0x117   : > { %v1993_v39 = vpack.c.bf16 %v834_v36, %v831_v35  ;;  %v2722_v57 = vadd.f32 %v2272_v56, %v2667_v4  ;;  %v921_v59 = vpop.f32.mrb[7].mxu1  ;;  %v1111_v61 = vmul.f32 %v834_v36, %v834_v36  ;;  %v2728_v11 = vadd.f32 %v2667_v4, %v918_v48 }
 0x118   : > { %v1171_v41 = vadd.f32 %v1170_v37, %v1108_v16  ;;  %v1042_v42 = vadd.f32 %v1041_v6, %v826_v38  ;;  %v1109_v43 = vmul.f32 %v826_v38, %v826_v38  ;;  %v1988_v44 = vpack.c.bf16 %v826_v38, %v823_v32 }
 0x119   : > { %2152 = vst [vmem:[%s2677_s12 + $0x38] sm:$0xff] %v1993_v39   ;;  %v2053_v13 = vpack.c.bf16 %v2722_v57, %v2717_v47  ;;  %v2735_v19 = vadd.f32 %v2667_v4, %v921_v59 }
 0x11a   : > { %v1043_v51 = vadd.f32 %v1042_v42, %v831_v35  ;;  %v1172_v54 = vadd.f32 %v1171_v41, %v1109_v43  ;;  %2151 = vst [vmem:[%s2677_s12 + $0x30] sm:$0xff] %v1988_v44   ;;  %v2251_v55 = vpop.f32.mrb[16].mxu0 }
 0x11b   : > { %v838_v25 = vpop.f32.mrb[17].mxu0  ;;  %v847_v5 = vadd.f32 %v2251_v55, %v2667_v4  ;;  %2164 = vst [vmem:[%s2677_s12 + $0x98] sm:$0xff] %v2053_v13   ;;  %v2048_v24 = vpack.c.bf16 %v2735_v19, %v2728_v11 }
 0x11c   : > { %v1173_v62 = vadd.f32 %v1172_v54, %v1110_v49  ;;  %v839_v63 = vadd.f32 %v2667_v4, %v838_v25  ;;  %v1044_v0 = vadd.f32 %v1043_v51, %v834_v36  ;;  %v2252_v1 = vpop.f32.mrb[18].mxu0  ;;  %v2275_v7 = vpop.f32.mrb[8].mxu1 }
 0x11d   : > { %v850_v8 = vadd.f32 %v2252_v1, %v2667_v4  ;;  %v841_v9 = vpop.f32.mrb[19].mxu0  ;;  %v2741_v26 = vadd.f32 %v2275_v7, %v2667_v4  ;;  %v934_v27 = vpop.f32.mrb[9].mxu1  ;;  %v1114_v60 = vmul.f32 %v847_v5, %v847_v5  ;;  %2163 = vst [vmem:[%s2677_s12 + $0x90] sm:$0xff] %v2048_v24  }
 0x11e   : > { %v1045_v14 = vadd.f32 %v1044_v0, %v839_v63  ;;  %v1112_v15 = vmul.f32 %v839_v63, %v839_v63  ;;  %v1174_v17 = vadd.f32 %v1173_v62, %v1111_v61  ;;  %v842_v18 = vadd.f32 %v2667_v4, %v841_v9  ;;  %v2276_v10 = vpop.f32.mrb[10].mxu1 }
 0x11f   : > { %v2003_v3 = vpack.c.bf16 %v850_v8, %v847_v5  ;;  %v2746_v31 = vadd.f32 %v2276_v10, %v2667_v4  ;;  %v937_v32 = vpop.f32.mrb[11].mxu1  ;;  %v1115_v33 = vmul.f32 %v850_v8, %v850_v8  ;;  %v2752_v37 = vadd.f32 %v2667_v4, %v934_v27 }
 0x120   : > { %v1175_v20 = vadd.f32 %v1174_v17, %v1112_v15  ;;  %v1046_v21 = vadd.f32 %v1045_v14, %v842_v18  ;;  %v1113_v22 = vmul.f32 %v842_v18, %v842_v18  ;;  %v1998_v58 = vpack.c.bf16 %v842_v18, %v839_v63 }
 0x121   : > { %2154 = vst [vmem:[%s2677_s12 + $0x48] sm:$0xff] %v2003_v3   ;;  %v2063_v38 = vpack.c.bf16 %v2746_v31, %v2741_v26  ;;  %v2759_v45 = vadd.f32 %v2667_v4, %v937_v32 }
 0x122   : > { %v1047_v28 = vadd.f32 %v1046_v21, %v847_v5  ;;  %v1176_v52 = vadd.f32 %v1175_v20, %v1113_v22  ;;  %2153 = vst [vmem:[%s2677_s12 + $0x40] sm:$0xff] %v1998_v58   ;;  %v2255_v12 = vpop.f32.mrb[20].mxu0 }
 0x123   : > { %v854_v30 = vpop.f32.mrb[21].mxu0  ;;  %v863_v2 = vadd.f32 %v2255_v12, %v2667_v4  ;;  %2166 = vst [vmem:[%s2677_s12 + $0xa8] sm:$0xff] %v2063_v38   ;;  %v2058_v55 = vpack.c.bf16 %v2759_v45, %v2752_v37 }
 0x124   : > { %v1177_v34 = vadd.f32 %v1176_v52, %v1114_v60  ;;  %v855_v35 = vadd.f32 %v2667_v4, %v854_v30  ;;  %v1048_v36 = vadd.f32 %v1047_v28, %v850_v8  ;;  %v2256_v50 = vpop.f32.mrb[22].mxu0  ;;  %v2279_v54 = vpop.f32.mrb[12].mxu1 }
 0x125   : > { %v866_v6 = vadd.f32 %v2256_v50, %v2667_v4  ;;  %v857_v16 = vpop.f32.mrb[23].mxu0  ;;  %v2765_v56 = vadd.f32 %v2279_v54, %v2667_v4  ;;  %v950_v25 = vpop.f32.mrb[13].mxu1  ;;  %v1118_v59 = vmul.f32 %v863_v2, %v863_v2  ;;  %2165 = vst [vmem:[%s2677_s12 + $0xa0] sm:$0xff] %v2058_v55  }
 0x126   : > { %v1049_v39 = vadd.f32 %v1048_v36, %v855_v35  ;;  %v1116_v41 = vmul.f32 %v855_v35, %v855_v35  ;;  %v1178_v42 = vadd.f32 %v1177_v34, %v1115_v33  ;;  %v858_v43 = vadd.f32 %v2667_v4, %v857_v16  ;;  %v2280_v0 = vpop.f32.mrb[14].mxu1 }
 0x127   : > { %v2013_v44 = vpack.c.bf16 %v866_v6, %v863_v2  ;;  %v2770_v5 = vadd.f32 %v2280_v0, %v2667_v4  ;;  %v953_v8 = vpop.f32.mrb[15].mxu1  ;;  %v1119_v9 = vmul.f32 %v866_v6, %v866_v6  ;;  %v2776_v21 = vadd.f32 %v2667_v4, %v950_v25 }
 0x128   : > { %v1179_v46 = vadd.f32 %v1178_v42, %v1116_v41  ;;  %v1050_v48 = vadd.f32 %v1049_v39, %v858_v43  ;;  %v1117_v49 = vmul.f32 %v858_v43, %v858_v43  ;;  %v2008_v51 = vpack.c.bf16 %v858_v43, %v855_v35 }
 0x129   : > { %2156 = vst [vmem:[%s2677_s12 + $0x58] sm:$0xff] %v2013_v44   ;;  %v2073_v22 = vpack.c.bf16 %v2770_v5, %v2765_v56  ;;  %v2783_v28 = vadd.f32 %v2667_v4, %v953_v8 }
 0x12a   : > { %v1051_v61 = vadd.f32 %v1050_v48, %v863_v2  ;;  %v1180_v62 = vadd.f32 %v1179_v46, %v1117_v49  ;;  %2155 = vst [vmem:[%s2677_s12 + $0x50] sm:$0xff] %v2008_v51   ;;  %v2259_v63 = vpop.f32.mrb[24].mxu0 }
 0x12b   : > { %v870_v1 = vpop.f32.mrb[25].mxu0  ;;  %v879_v18 = vadd.f32 %v2259_v63, %v2667_v4  ;;  %2168 = vst [vmem:[%s2677_s12 + $0xb8] sm:$0xff] %v2073_v22   ;;  %v2068_v33 = vpack.c.bf16 %v2783_v28, %v2776_v21 }
 0x12c   : > { %v1181_v13 = vadd.f32 %v1180_v62, %v1118_v59  ;;  %v871_v14 = vadd.f32 %v2667_v4, %v870_v1  ;;  %v1052_v15 = vadd.f32 %v1051_v61, %v866_v6  ;;  %v2260_v17 = vpop.f32.mrb[26].mxu0  ;;  %v2283_v32 = vpop.f32.mrb[16].mxu1 }
 0x12d   : > { %v882_v3 = vadd.f32 %v2260_v17, %v2667_v4  ;;  %v873_v20 = vpop.f32.mrb[27].mxu0  ;;  %v2789_v34 = vadd.f32 %v2283_v32, %v2667_v4  ;;  %v966_v35 = vpop.f32.mrb[17].mxu1  ;;  %v1122_v36 = vmul.f32 %v879_v18, %v879_v18  ;;  %2167 = vst [vmem:[%s2677_s12 + $0xb0] sm:$0xff] %v2068_v33  }
 0x12e   : > { %v1053_v58 = vadd.f32 %v1052_v15, %v871_v14  ;;  %v1120_v7 = vmul.f32 %v871_v14, %v871_v14  ;;  %v1182_v24 = vadd.f32 %v1181_v13, %v1119_v9  ;;  %v874_v27 = vadd.f32 %v2667_v4, %v873_v20  ;;  %v2284_v16 = vpop.f32.mrb[18].mxu1 }
 0x12f   : > { %v2023_v60 = vpack.c.bf16 %v882_v3, %v879_v18  ;;  %v2794_v39 = vadd.f32 %v2284_v16, %v2667_v4  ;;  %v969_v41 = vpop.f32.mrb[19].mxu1  ;;  %v1123_v42 = vmul.f32 %v882_v3, %v882_v3  ;;  %v2800_v55 = vadd.f32 %v2667_v4, %v966_v35 }
 0x130   : > { %v1183_v52 = vadd.f32 %v1182_v24, %v1120_v7  ;;  %v1054_v12 = vadd.f32 %v1053_v58, %v874_v27  ;;  %v1121_v10 = vmul.f32 %v874_v27, %v874_v27  ;;  %v2018_v30 = vpack.c.bf16 %v874_v27, %v871_v14 }
 0x131   : > { %2158 = vst [vmem:[%s2677_s12 + $0x68] sm:$0xff] %v2023_v60   ;;  %v2083_v25 = vpack.c.bf16 %v2794_v39, %v2789_v34  ;;  %v2807_v1 = vadd.f32 %v2667_v4, %v969_v41  ;;  %v1128_v27 = vmul.f32 %v2704_v53, %v2704_v53  ;;  %v1129_v16 = vmul.f32 %v2711_v40, %v2711_v40 }
 0x132   : > { %v1055_v50 = vadd.f32 %v1054_v12, %v879_v18  ;;  %v1184_v2 = vadd.f32 %v1183_v52, %v1121_v10  ;;  %2157 = vst [vmem:[%s2677_s12 + $0x60] sm:$0xff] %v2018_v30   ;;  %v2263_v6 = vpop.f32.mrb[28].mxu0 }
 0x133   : > { %v886_v38 = vpop.f32.mrb[29].mxu0  ;;  %v895_v49 = vadd.f32 %v2263_v6, %v2667_v4  ;;  %2170 = vst [vmem:[%s2677_s12 + $0xc8] sm:$0xff] %v2083_v25   ;;  %v2078_v17 = vpack.c.bf16 %v2807_v1, %v2800_v55 }
 0x134   : > { %v1185_v43 = vadd.f32 %v1184_v2, %v1122_v36  ;;  %v887_v44 = vadd.f32 %v2667_v4, %v886_v38  ;;  %v1056_v46 = vadd.f32 %v1055_v50, %v882_v3  ;;  %v2264_v48 = vpop.f32.mrb[30].mxu0  ;;  %v2287_v15 = vpop.f32.mrb[20].mxu1 }
 0x135   : > { %v898_v51 = vadd.f32 %v2264_v48, %v2667_v4  ;;  %v889_v54 = vpop.f32.mrb[31].mxu0  ;;  %v2813_v18 = vadd.f32 %v2287_v15, %v2667_v4  ;;  %v982_v3 = vpop.f32.mrb[21].mxu1  ;;  %v1126_v20 = vmul.f32 %v895_v49, %v895_v49  ;;  %2169 = vst [vmem:[%s2677_s12 + $0xc0] sm:$0xff] %v2078_v17  }
 0x136   : > { %v1057_v59 = vadd.f32 %v1056_v46, %v887_v44  ;;  %v1124_v61 = vmul.f32 %v887_v44, %v887_v44  ;;  %v1186_v62 = vadd.f32 %v1185_v43, %v1123_v42  ;;  %v890_v63 = vadd.f32 %v2667_v4, %v889_v54  ;;  %v2288_v24 = vpop.f32.mrb[22].mxu1 }
 0x137   : > { %v2033_v0 = vpack.c.bf16 %v898_v51, %v895_v49  ;;  %v2817_v7 = vadd.f32 %v2667_v4, %v982_v3  ;;  %v2823_v60 = vadd.f32 %v2288_v24, %v2667_v4  ;;  %v985_v52 = vpop.f32.mrb[23].mxu1  ;;  %v1127_v12 = vmul.f32 %v898_v51, %v898_v51 }
 0x138   : > { %v1187_v8 = vadd.f32 %v1186_v62, %v1124_v61  ;;  %v1058_v9 = vadd.f32 %v1057_v59, %v890_v63  ;;  %v1125_v13 = vmul.f32 %v890_v63, %v890_v63  ;;  %v2028_v14 = vpack.c.bf16 %v890_v63, %v887_v44 }
 0x139   : > { %2160 = vst [vmem:[%s2677_s12 + $0x78] sm:$0xff] %v2033_v0   ;;  %v2826_v32 = vadd.f32 %v2667_v4, %v985_v52  ;;  %v2093_v33 = vpack.c.bf16 %v2823_v60, %v2813_v18  ;;  %v1132_v59 = vmul.f32 %v2728_v11, %v2728_v11 }
 0x13a   : > { %v1059_v22 = vadd.f32 %v1058_v9, %v895_v49  ;;  %v1188_v58 = vadd.f32 %v1187_v8, %v1125_v13  ;;  %2159 = vst [vmem:[%s2677_s12 + $0x70] sm:$0xff] %v2028_v14  }
 0x13b   : > { %v2088_v50 = vpack.c.bf16 %v2826_v32, %v2817_v7  ;;  %2172 = vst [vmem:[%s2677_s12 + $0xd8] sm:$0xff] %v2093_v33  }
 0x13c   : > { %v1189_v10 = vadd.f32 %v1188_v58, %v1126_v20  ;;  %v1060_v30 = vadd.f32 %v1059_v22, %v898_v51  ;;  %v2291_v38 = vpop.f32.mrb[24].mxu1 }
 0x13d   : > { %2171 = vst [vmem:[%s2677_s12 + $0xd0] sm:$0xff] %v2088_v50   ;;  %v2839_v41 = vadd.f32 %v2291_v38, %v2667_v4  ;;  %v998_v42 = vpop.f32.mrb[25].mxu1 }
 0x13e   : > { %v1061_v35 = vadd.f32 %v1060_v30, %v2704_v53  ;;  %v1190_v36 = vadd.f32 %v1189_v10, %v1127_v12  ;;  %v1130_v53 = vmul.f32 %v2694_v23, %v2694_v23  ;;  %v2845_v46 = vadd.f32 %v2667_v4, %v998_v42  ;;  %v2292_v48 = vpop.f32.mrb[26].mxu1 }
 0x13f   : > { %v2850_v49 = vadd.f32 %v2292_v48, %v2667_v4  ;;  %v1001_v51 = vpop.f32.mrb[27].mxu1  ;;  %v1136_v12 = vmul.f32 %v2752_v37, %v2752_v37  ;;  %v1140_v42 = vmul.f32 %v2776_v21, %v2776_v21  ;;  %v1141_v48 = vmul.f32 %v2783_v28, %v2783_v28 }
 0x140   : > { %v1191_v2 = vadd.f32 %v1190_v36, %v1128_v27  ;;  %v1062_v6 = vadd.f32 %v1061_v35, %v2711_v40  ;;  %v1131_v40 = vmul.f32 %v2698_v29, %v2698_v29 }
 0x141   : > { %v2103_v61 = vpack.c.bf16 %v2850_v49, %v2839_v41 }
 0x142   : > { %v1063_v43 = vadd.f32 %v1062_v6, %v2694_v23  ;;  %v1192_v44 = vadd.f32 %v1191_v2, %v1129_v16  ;;  %v2856_v23 = vadd.f32 %v2667_v4, %v1001_v51 }
 0x143   : > { %2174 = vst [vmem:[%s2677_s12 + $0xe8] sm:$0xff] %v2103_v61  }
 0x144   : > { %v1193_v54 = vadd.f32 %v1192_v44, %v1130_v53  ;;  %v1064_v25 = vadd.f32 %v1063_v43, %v2698_v29  ;;  %v2098_v0 = vpack.c.bf16 %v2856_v23, %v2845_v46  ;;  %v1133_v29 = vmul.f32 %v2735_v19, %v2735_v19  ;;  %v2295_v13 = vpop.f32.mrb[28].mxu1 }
 0x145   : > { %v2869_v14 = vadd.f32 %v2295_v13, %v2667_v4  ;;  %v1014_v15 = vpop.f32.mrb[29].mxu1 }
 0x146   : > { %v1065_v62 = vadd.f32 %v1064_v25, %v2728_v11  ;;  %v1194_v63 = vadd.f32 %v1193_v54, %v1131_v40  ;;  %2173 = vst [vmem:[%s2677_s12 + $0xe0] sm:$0xff] %v2098_v0   ;;  %v1134_v11 = vmul.f32 %v2717_v47, %v2717_v47  ;;  %v2875_v20 = vadd.f32 %v2667_v4, %v1014_v15  ;;  %v2296_v22 = vpop.f32.mrb[30].mxu1 }
 0x147   : > { %v2880_v58 = vadd.f32 %v2296_v22, %v2667_v4  ;;  %v1017_v24 = vpop.f32.mrb[31].mxu1 }
 0x148   : > { %v1195_v8 = vadd.f32 %v1194_v63, %v1132_v59  ;;  %v1066_v9 = vadd.f32 %v1065_v62, %v2735_v19  ;;  %v1135_v19 = vmul.f32 %v2722_v57, %v2722_v57  ;;  %v1145_v63 = vmul.f32 %v2807_v1, %v2807_v1 }
 0x149   : > { %v2113_v10 = vpack.c.bf16 %v2880_v58, %v2869_v14 }
 0x14a   : > { %v1067_v17 = vadd.f32 %v1066_v9, %v2717_v47  ;;  %v1196_v3 = vadd.f32 %v1195_v8, %v1133_v29  ;;  %v2886_v47 = vadd.f32 %v2667_v4, %v1017_v24  ;;  %v1138_v4 = vmul.f32 %v2741_v26, %v2741_v26 }
 0x14b   : > { %2176 = vst [vmem:[%s2677_s12 + $0xf8] sm:$0xff] %v2113_v10   ;;  %v1152_v24 = vmul.f32 %v2845_v46, %v2845_v46  ;;  %v1154_v10 = vmul.f32 %v2839_v41, %v2839_v41 }
 0x14c   : > { %v1197_v27 = vadd.f32 %v1196_v3, %v1134_v11  ;;  %v1068_v52 = vadd.f32 %v1067_v17, %v2722_v57  ;;  %v2108_v35 = vpack.c.bf16 %v2886_v47, %v2875_v20  ;;  %v1137_v57 = vmul.f32 %v2759_v45, %v2759_v45 }
 0x14d   : > { %v1149_v17 = vmul.f32 %v2826_v32, %v2826_v32 }
 0x14e   : > { %v1069_v30 = vadd.f32 %v1068_v52, %v2752_v37  ;;  %v1198_v33 = vadd.f32 %v1197_v27, %v1135_v19  ;;  %2175 = vst [vmem:[%s2677_s12 + $0xf0] sm:$0xff] %v2108_v35   ;;  %v1139_v37 = vmul.f32 %v2746_v31, %v2746_v31 }
 0x150   : > { %v1199_v36 = vadd.f32 %v1198_v33, %v1136_v12  ;;  %v1070_v50 = vadd.f32 %v1069_v30, %v2759_v45 }
 0x152   : > { %v1071_v2 = vadd.f32 %v1070_v50, %v2741_v26  ;;  %v1200_v6 = vadd.f32 %v1199_v36, %v1137_v57  ;;  %v1142_v26 = vmul.f32 %v2765_v56, %v2765_v56  ;;  %v1156_v36 = vmul.f32 %v2875_v20, %v2875_v20 }
 0x154   : > { %v1201_v16 = vadd.f32 %v1200_v6, %v1138_v4  ;;  %v1072_v38 = vadd.f32 %v1071_v2, %v2746_v31  ;;  %v1143_v31 = vmul.f32 %v2770_v5, %v2770_v5  ;;  %v1158_v2 = vmul.f32 %v2869_v14, %v2869_v14 }
 0x156   : > { %v1073_v53 = vadd.f32 %v1072_v38, %v2776_v21  ;;  %v1202_v43 = vadd.f32 %v1201_v16, %v1139_v37  ;;  %v1144_v21 = vmul.f32 %v2800_v55, %v2800_v55  ;;  %v1159_v37 = vmul.f32 %v2880_v58, %v2880_v58 }
 0x158   : > { %v1203_v45 = vadd.f32 %v1202_v43, %v1140_v42  ;;  %v1074_v44 = vadd.f32 %v1073_v53, %v2783_v28 }
 0x15a   : > { %v1075_v40 = vadd.f32 %v1074_v44, %v2765_v56  ;;  %v1204_v51 = vadd.f32 %v1203_v45, %v1141_v48  ;;  %v1146_v56 = vmul.f32 %v2789_v34, %v2789_v34 }
 0x15c   : > { %v1205_v54 = vadd.f32 %v1204_v51, %v1142_v26  ;;  %v1076_v25 = vadd.f32 %v1075_v40, %v2770_v5  ;;  %v1147_v5 = vmul.f32 %v2794_v39, %v2794_v39 }
 0x15e   : > { %v1077_v59 = vadd.f32 %v1076_v25, %v2800_v55  ;;  %v1206_v61 = vadd.f32 %v1205_v54, %v1143_v31  ;;  %v1148_v55 = vmul.f32 %v2817_v7, %v2817_v7 }
 0x160   : > { %v1207_v62 = vadd.f32 %v1206_v61, %v1144_v21  ;;  %v1078_v28 = vadd.f32 %v1077_v59, %v2807_v1 }
 0x162   : > { %v1079_v0 = vadd.f32 %v1078_v28, %v2789_v34  ;;  %v1208_v8 = vadd.f32 %v1207_v62, %v1145_v63  ;;  %v1150_v34 = vmul.f32 %v2813_v18, %v2813_v18 }
 0x164   : > { %v1209_v9 = vadd.f32 %v1208_v8, %v1146_v56  ;;  %v1080_v29 = vadd.f32 %v1079_v0, %v2794_v39  ;;  %v1151_v39 = vmul.f32 %v2823_v60, %v2823_v60 }
 0x166   : > { %v1081_v13 = vadd.f32 %v1080_v29, %v2817_v7  ;;  %v1210_v15 = vadd.f32 %v1209_v9, %v1147_v5 }
 0x168   : > { %v1211_v11 = vadd.f32 %v1210_v15, %v1148_v55  ;;  %v1082_v1 = vadd.f32 %v1081_v13, %v2826_v32 }
 0x16a   : > { %v1083_v3 = vadd.f32 %v1082_v1, %v2813_v18  ;;  %v1212_v22 = vadd.f32 %v1211_v11, %v1149_v17  ;;  %v1153_v18 = vmul.f32 %v2856_v23, %v2856_v23 }
 0x16c   : > { %v1213_v19 = vadd.f32 %v1212_v22, %v1150_v34  ;;  %v1084_v7 = vadd.f32 %v1083_v3, %v2823_v60  ;;  %v1155_v60 = vmul.f32 %v2850_v49, %v2850_v49 }
 0x16e   : > { %v1085_v27 = vadd.f32 %v1084_v7, %v2845_v46  ;;  %v1214_v32 = vadd.f32 %v1213_v19, %v1151_v39 }
 0x170   : > { %v1215_v52 = vadd.f32 %v1214_v32, %v1152_v24  ;;  %v1086_v12 = vadd.f32 %v1085_v27, %v2856_v23 }
 0x172   : > { %v1087_v30 = vadd.f32 %v1086_v12, %v2839_v41  ;;  %v1216_v33 = vadd.f32 %v1215_v52, %v1153_v18  ;;  %v1157_v41 = vmul.f32 %v2886_v47, %v2886_v47 }
 0x174   : > { %v1217_v35 = vadd.f32 %v1216_v33, %v1154_v10  ;;  %v1088_v46 = vadd.f32 %v1087_v30, %v2850_v49 }
 0x176   : > { %v1089_v50 = vadd.f32 %v1088_v46, %v2875_v20  ;;  %v1218_v57 = vadd.f32 %v1217_v35, %v1155_v60 }
 0x178   : > { %v1219_v23 = vadd.f32 %v1218_v57, %v1156_v36  ;;  %v1090_v4 = vadd.f32 %v1089_v50, %v2886_v47 }
 0x17a   : > { %v1091_v6 = vadd.f32 %v1090_v4, %v2869_v14  ;;  %v1220_v49 = vadd.f32 %v1219_v23, %v1157_v41 }
 0x17c   : > { %v1092_v20 = vadd.f32 %v1091_v6, %v2880_v58  ;;  %v1221_v16 = vadd.f32 %v1220_v49, %v1158_v2 }
 0x17e   : > { %v1222_v38 = vadd.f32 %v1221_v16, %v1159_v37  ;;  %1094 = vst [vmem:[%s295_s14] sm:$0xff] %v1092_v20 }
 0x180   : > { %1224 = vst [vmem:[%s299_s17] sm:$0xff] %v1222_v38 }
 0x181 PF: > { %s17_s23 = sadd.s32 1, %s2368_s23   ;;  %s2988_s21 = smov %s2364_s22 }
 0x182   : > { %p14_p6 = scmp.ge.s32.totalorder %s17_s23, 4   ;;  %s2989_s22 = smov %s2991_s24 }
 0x184   :  { %16 = sbr.rel (!%p14_p6) target bundleno = 2 (0x2), region = 94 }

// kernel: encoder_pallas.7
= control target key start
LH: loop header
LB: loop body
LE: loop exit
PB: predicated region body
PF: predicated region fallthrough
CT: control target
= control target key end

     0   :  { %s2564_s21 = smov 0   ;;  %s2566_s22 = smov 0   ;;  %s3449_s0 = inlined_call_operand.vmem [shape: bf16[1024,128], index: 0, kind: input, shape index: {}]   ;;  %s3450_s1 = inlined_call_operand.vmem [shape: f32[2,128], index: 1, kind: input, shape index: {}]   ;;  %s3451_s2 = inlined_call_operand.vmem [shape: bf16[128,256], index: 2, kind: input, shape index: {}]   ;;  %s3452_s3 = inlined_call_operand.vmem [shape: f32[1,256], index: 3, kind: input, shape index: {}]   ;;  %s3453_s4 = inlined_call_operand.vmem [shape: bf16[1024,256], index: 4, kind: output, shape index: {0}]   ;;  %s3454_s5 = inlined_call_operand.vmem [shape: f32[16,256], index: 5, kind: output, shape index: {1}]   ;;  %s3455_s6 = inlined_call_operand.vmem [shape: f32[16,256], index: 6, kind: output, shape index: {2}]  }
   0x1   :  { %s2568_s23 = smov 0  }
   0x2 LB: > { %s29_s24 = sadd.s32 1, %s2522_s22  ;;  %p2118_p0 = scmp.ge.s32.totalorder %s2526_s23, 1  ;;  %s2526_s23 = sphi %s2568_s23, %s17_s23   ;;  %s2522_s22 = sphi %s2566_s22, %s3545_s22   ;;  %s2518_s21 = sphi %s2564_s21, %s3544_s21  }
   0x3   : > { %p31_p1 = scmp.ge.s32.totalorder %s29_s24, 2  ;;  %p236_p2 = scmp.lt.s32.totalorder %s2526_s23, 3 }
   0x5   : > { %s3547_s24 = smov (%p31_p1, %s29_s24), 0  ;;  %p237_p3 = pnand %p2118_p0, %p236_p2 }
   0x7   : > { %240 = sbr.rel (%p237_p3) target bundleno = 454 (0x1c6), region = 36 }
   0xe   : > { %v2480_v0 = vld [vmem:[%s3451_s2 + $0x4] ss:$8 sps:$4 sm:$0xff]   ;;  %s2119_s27 = sshll.u32 %s2518_s21, 6  ;;  %v2482_v1 = vld [vmem:[%s3451_s2] ss:$8 sps:$4 sm:$0xff]   ;;  %v2528_v2 = vmov 0  }
   0xf   : > { %817 = vmatprep.mubr.bf16.mxu0 %v2528_v2  ;;  %p281_p4 = scmp.lt.s32.totalorder %s2119_s27, 127  ;;  %977 = vmatprep.mubr.bf16.mxu1 %v2528_v2  ;;  %v2483_v3 = vld [vmem:[%s3451_s2 + $0x14] ss:$8 sps:$4 sm:$0xff]   ;;  %v2485_v4 = vld [vmem:[%s3451_s2 + $0x10] ss:$8 sps:$4 sm:$0xff]   ;;  %p296_p5 = scmp.lt.s32.totalorder %s2518_s21, 1 }
  0x10   : > { %785 = vmatprep.subr.bf16.mxu0 %v2480_v0  ;;  %2438 = vmatprep.subr.bf16.mxu1 %v2480_v0  ;;  %v2486_v5 = vld [vmem:[%s3451_s2 + $0x24] ss:$8 sps:$4 sm:$0xff]   ;;  %v2488_v6 = vld [vmem:[%s3451_s2 + $0x20] ss:$8 sps:$4 sm:$0xff]   ;;  %v2489_v7 = vld [vmem:[%s3451_s2 + $0x34] ss:$8 sps:$4 sm:$0xff]  }
  0x11   : > { %786 = vmatpush1.bf16.msra.mxu0 %v2482_v1  ;;  %s3549_s27 = smov (!%p281_p4, %s2119_s27), 127  ;;  %2446 = vmatpush1.bf16.msra.mxu1 %v2482_v1  ;;  %v2491_v8 = vld [vmem:[%s3451_s2 + $0x30] ss:$8 sps:$4 sm:$0xff]   ;;  %v2492_v10 = vld [vmem:[%s3451_s2 + $0x44] ss:$8 sps:$4 sm:$0xff]   ;;  %s3551_s21 = smov (!%p296_p5, %s2518_s21), 1 }
  0x12   : > { %787 = vmatprep.subr.bf16.mxu0 %v2483_v3  ;;  %2439 = vmatprep.subr.bf16.mxu1 %v2483_v3  ;;  %s2120_s12 = sshll.u32 %s3549_s27, 2  ;;  %v2494_v13 = vld [vmem:[%s3451_s2 + $0x40] ss:$8 sps:$4 sm:$0xff]   ;;  %v2495_v15 = vld [vmem:[%s3451_s2 + $0x54] ss:$8 sps:$4 sm:$0xff]   ;;  %s2212_s30 = sshll.u32 %s3549_s27, 3 }
  0x13   : > { %s2614_s19 = scalar_lea.vmem %s3449_s0, %s2120_s12  ;;  %v2629_v14 = vld [vmem:[%s3450_s1] ss:$0 sm:$0xff]  ;;  %v2497_v18 = vld [vmem:[%s3451_s2 + $0x50] ss:$8 sps:$4 sm:$0xff]   ;;  %v2642_v19 = vld [vmem:[%s3450_s1 + $0x1] ss:$0 sm:$0xff]  ;;  %s2856_s9 = scalar_lea.vmem %s3453_s4, %s2212_s30 }
  0x14   : > { %v2280_v9 = vld [vmem:[%s2614_s19] sm:$0xff]   ;;  %v2407_v20 = vld [vmem:[%s2614_s19 + $0x8] sm:$0xff]   ;;  %v2501_v27 = vld [vmem:[%s3451_s2 + $0x74] ss:$8 sps:$4 sm:$0xff]   ;;  %s2213_s27 = sshll.u32 %s3551_s21, 4 }
  0x15   : > { %788 = vmatpush1.bf16.msra.mxu0 %v2485_v4  ;;  %2447 = vmatpush1.bf16.msra.mxu1 %v2485_v4  ;;  %v2281_v11 = vunpack.c.l.bf16 %v2280_v9  ;;  %v2282_v12 = vunpack.c.h.bf16 %v2280_v9  ;;  %v2498_v21 = vld [vmem:[%s3451_s2 + $0x64] ss:$8 sps:$4 sm:$0xff]   ;;  %v2285_v24 = vunpack.c.l.bf16 %v2407_v20  ;;  %v2286_v25 = vunpack.c.h.bf16 %v2407_v20  ;;  %v2500_v26 = vld [vmem:[%s3451_s2 + $0x60] ss:$8 sps:$4 sm:$0xff]   ;;  %v2408_v33 = vld [vmem:[%s2614_s19 + $0x10] sm:$0xff]   ;;  %s300_s12 = scalar_lea.vmem %s3454_s5, %s2213_s27  ;;  %s305_s14 = scalar_lea.vmem %s3455_s6, %s2213_s27 }
  0x16   : > { %789 = vmatprep.subr.bf16.mxu0 %v2486_v5  ;;  %2440 = vmatprep.subr.bf16.mxu1 %v2486_v5  ;;  %v2422_v28 = vld [vmem:[%s2614_s19 + $0x80] sm:$0xff]   ;;  %v2503_v34 = vld [vmem:[%s3451_s2 + $0x70] ss:$8 sps:$4 sm:$0xff]   ;;  %v2423_v36 = vld [vmem:[%s2614_s19 + $0x88] sm:$0xff]   ;;  %v2289_v37 = vunpack.c.l.bf16 %v2408_v33  ;;  %v2290_v38 = vunpack.c.h.bf16 %v2408_v33 }
  0x17   : > { %v449_v16 = vmul.f32 %v2281_v11, %v2629_v14  ;;  %v450_v17 = vmul.f32 %v2282_v12, %v2629_v14  ;;  %v451_v31 = vmul.f32 %v2285_v24, %v2629_v14  ;;  %v452_v32 = vmul.f32 %v2286_v25, %v2629_v14  ;;  %v2424_v52 = vld [vmem:[%s2614_s19 + $0x90] sm:$0xff]   ;;  %v2409_v56 = vld [vmem:[%s2614_s19 + $0x18] sm:$0xff]  }
  0x18   : > { %v2345_v35 = vunpack.c.l.bf16 %v2422_v28  ;;  %v2346_v39 = vunpack.c.h.bf16 %v2422_v28  ;;  %v2349_v45 = vunpack.c.l.bf16 %v2423_v36  ;;  %v2350_v46 = vunpack.c.h.bf16 %v2423_v36  ;;  %v2425_v9 = vld [vmem:[%s2614_s19 + $0x98] sm:$0xff]  }
  0x19   : > { %790 = vmatpush1.bf16.msra.mxu0 %v2488_v6  ;;  %2448 = vmatpush1.bf16.msra.mxu1 %v2488_v6  ;;  %v517_v22 = vadd.f32 %v2642_v19, %v449_v16  ;;  %v518_v23 = vadd.f32 %v2642_v19, %v450_v17  ;;  %v519_v41 = vadd.f32 %v2642_v19, %v451_v31  ;;  %v2353_v61 = vunpack.c.l.bf16 %v2424_v52  ;;  %v2410_v17 = vld [vmem:[%s2614_s19 + $0x20] sm:$0xff]  }
  0x1a   : > { %791 = vmatprep.subr.bf16.mxu0 %v2489_v7  ;;  %2441 = vmatprep.subr.bf16.mxu1 %v2489_v7  ;;  %v520_v42 = vadd.f32 %v2642_v19, %v452_v32  ;;  %v481_v43 = vmul.f32 %v2345_v35, %v2629_v14  ;;  %v482_v44 = vmul.f32 %v2346_v39, %v2629_v14  ;;  %v2293_v62 = vunpack.c.l.bf16 %v2409_v56  ;;  %v2426_v32 = vld [vmem:[%s2614_s19 + $0xa0] sm:$0xff]  }
  0x1b   : > { %v581_v29 = vmax.f32 %v517_v22, 0.0  ;;  %v582_v30 = vmax.f32 %v518_v23, 0.0  ;;  %v453_v48 = vmul.f32 %v2289_v37, %v2629_v14  ;;  %v483_v50 = vmul.f32 %v2349_v45, %v2629_v14  ;;  %v2411_v37 = vld [vmem:[%s2614_s19 + $0x28] sm:$0xff]  }
  0x1c   : > { %v549_v47 = vadd.f32 %v2642_v19, %v481_v43  ;;  %v550_v49 = vadd.f32 %v2642_v19, %v482_v44  ;;  %v484_v51 = vmul.f32 %v2350_v46, %v2629_v14  ;;  %v583_v53 = vmax.f32 %v519_v41, 0.0 }
  0x1d   : > { %792 = vmatpush1.bf16.msra.mxu0 %v2491_v8  ;;  %2449 = vmatpush1.bf16.msra.mxu1 %v2491_v8  ;;  %v645_v40 = vpack.c.bf16 %v582_v30, %v581_v29  ;;  %v584_v54 = vmax.f32 %v520_v42, 0.0  ;;  %v454_v55 = vmul.f32 %v2290_v38, %v2629_v14  ;;  %v551_v59 = vadd.f32 %v2642_v19, %v483_v50 }
  0x1e   : > { %793 = vmatprep.subr.bf16.mxu0 %v2492_v10  ;;  %2442 = vmatprep.subr.bf16.mxu1 %v2492_v10  ;;  %v613_v57 = vmax.f32 %v549_v47, 0.0  ;;  %v614_v58 = vmax.f32 %v550_v49, 0.0  ;;  %v552_v60 = vadd.f32 %v2642_v19, %v484_v51  ;;  %v2294_v63 = vunpack.c.h.bf16 %v2409_v56 }
  0x1f   : > { %v646_v1 = vpack.c.bf16 %v584_v54, %v583_v53  ;;  %v521_v3 = vadd.f32 %v2642_v19, %v453_v48  ;;  %v522_v4 = vadd.f32 %v2642_v19, %v454_v55  ;;  %v2354_v5 = vunpack.c.h.bf16 %v2424_v52  ;;  %v2427_v52 = vld [vmem:[%s2614_s19 + $0xa8] sm:$0xff]  }
  0x20   : > { %v661_v0 = vpack.c.bf16 %v614_v58, %v613_v57  ;;  %v615_v6 = vmax.f32 %v551_v59, 0.0  ;;  %v616_v7 = vmax.f32 %v552_v60, 0.0  ;;  %v485_v8 = vmul.f32 %v2353_v61, %v2629_v14  ;;  %v2412_v57 = vld [vmem:[%s2614_s19 + $0x30] sm:$0xff]  }
  0x21   : > { %794 = vmatpush1.bf16.msra.mxu0 %v2494_v13  ;;  %2450 = vmatpush1.bf16.msra.mxu1 %v2494_v13  ;;  %v486_v10 = vmul.f32 %v2354_v5, %v2629_v14  ;;  %v455_v11 = vmul.f32 %v2293_v62, %v2629_v14  ;;  %v456_v12 = vmul.f32 %v2294_v63, %v2629_v14  ;;  %v585_v13 = vmax.f32 %v521_v3, 0.0 }
  0x22   : > { %795 = vmatprep.subr.bf16.mxu0 %v2495_v15  ;;  %2443 = vmatprep.subr.bf16.mxu1 %v2495_v15  ;;  %v586_v15 = vmax.f32 %v522_v4, 0.0  ;;  %v2357_v16 = vunpack.c.l.bf16 %v2425_v9  ;;  %v553_v20 = vadd.f32 %v2642_v19, %v485_v8  ;;  %v2358_v22 = vunpack.c.h.bf16 %v2425_v9  ;;  %v2428_v9 = vld [vmem:[%s2614_s19 + $0xb0] sm:$0xff]  }
  0x23   : > { %v523_v23 = vadd.f32 %v2642_v19, %v455_v11  ;;  %v524_v24 = vadd.f32 %v2642_v19, %v456_v12  ;;  %v2361_v41 = vunpack.c.l.bf16 %v2426_v32  ;;  %v2362_v42 = vunpack.c.h.bf16 %v2426_v32 }
  0x24   : > { %v647_v25 = vpack.c.bf16 %v586_v15, %v585_v13  ;;  %v487_v28 = vmul.f32 %v2357_v16, %v2629_v14  ;;  %v617_v29 = vmax.f32 %v553_v20, 0.0  ;;  %v488_v31 = vmul.f32 %v2358_v22, %v2629_v14  ;;  %v2413_v15 = vld [vmem:[%s2614_s19 + $0x38] sm:$0xff]  }
  0x25   : > { %796 = vmatpush1.bf16.msra.mxu0 %v2497_v18  ;;  %2451 = vmatpush1.bf16.msra.mxu1 %v2497_v18  ;;  %v662_v18 = vpack.c.bf16 %v616_v7, %v615_v6  ;;  %v587_v33 = vmax.f32 %v523_v23, 0.0  ;;  %v2301_v43 = vunpack.c.l.bf16 %v2411_v37  ;;  %v2302_v47 = vunpack.c.h.bf16 %v2411_v37  ;;  %v2414_v37 = vld [vmem:[%s2614_s19 + $0x40] sm:$0xff]  }
  0x26   : > { %797 = vmatprep.subr.bf16.mxu0 %v2498_v21  ;;  %2444 = vmatprep.subr.bf16.mxu1 %v2498_v21  ;;  %v554_v21 = vadd.f32 %v2642_v19, %v486_v10  ;;  %v555_v38 = vadd.f32 %v2642_v19, %v487_v28  ;;  %v489_v50 = vmul.f32 %v2361_v41, %v2629_v14  ;;  %v2365_v58 = vunpack.c.l.bf16 %v2427_v52 }
  0x27   : > { %v490_v51 = vmul.f32 %v2362_v42, %v2629_v14  ;;  %v459_v53 = vmul.f32 %v2301_v43, %v2629_v14  ;;  %v460_v56 = vmul.f32 %v2302_v47, %v2629_v14  ;;  %v2366_v62 = vunpack.c.h.bf16 %v2427_v52 }
  0x28   : > { %v618_v30 = vmax.f32 %v554_v21, 0.0  ;;  %v619_v48 = vmax.f32 %v555_v38, 0.0  ;;  %v557_v60 = vadd.f32 %v2642_v19, %v489_v50  ;;  %v2305_v63 = vunpack.c.l.bf16 %v2412_v57 }
  0x29   : > { %798 = vmatpush1.bf16.msra.mxu0 %v2500_v26  ;;  %2452 = vmatpush1.bf16.msra.mxu1 %v2500_v26  ;;  %v2297_v26 = vunpack.c.l.bf16 %v2410_v17  ;;  %v558_v61 = vadd.f32 %v2642_v19, %v490_v51  ;;  %v527_v3 = vadd.f32 %v2642_v19, %v459_v53  ;;  %v528_v4 = vadd.f32 %v2642_v19, %v460_v56  ;;  %v2430_v51 = vld [vmem:[%s2614_s19 + $0xc0] sm:$0xff]   ;;  %v2415_v56 = vld [vmem:[%s2614_s19 + $0x48] sm:$0xff]  }
  0x2a   : > { %799 = vmatprep.subr.bf16.mxu0 %v2501_v27  ;;  %2445 = vmatprep.subr.bf16.mxu1 %v2501_v27  ;;  %v2298_v27 = vunpack.c.h.bf16 %v2410_v17  ;;  %v663_v39 = vpack.c.bf16 %v618_v30, %v617_v29  ;;  %v491_v5 = vmul.f32 %v2365_v58, %v2629_v14  ;;  %v621_v6 = vmax.f32 %v557_v60, 0.0 }
  0x2b   : > { %v457_v35 = vmul.f32 %v2297_v26, %v2629_v14  ;;  %v622_v7 = vmax.f32 %v558_v61, 0.0  ;;  %v492_v8 = vmul.f32 %v2366_v62, %v2629_v14  ;;  %v461_v10 = vmul.f32 %v2305_v63, %v2629_v14 }
  0x2c   : > { %v458_v36 = vmul.f32 %v2298_v27, %v2629_v14  ;;  %v591_v11 = vmax.f32 %v527_v3, 0.0  ;;  %v592_v12 = vmax.f32 %v528_v4, 0.0  ;;  %v559_v16 = vadd.f32 %v2642_v19, %v491_v5 }
  0x2d   : > { %800 = vmatpush1.bf16.msra.mxu0 %v2503_v34  ;;  %2453 = vmatpush1.bf16.msra.mxu1 %v2503_v34  ;;  %v588_v34 = vmax.f32 %v524_v24, 0.0  ;;  %v525_v45 = vadd.f32 %v2642_v19, %v457_v35  ;;  %v665_v17 = vpack.c.bf16 %v622_v7, %v621_v6  ;;  %v2369_v20 = vunpack.c.l.bf16 %v2428_v9 }
  0x2e   : > { %v526_v46 = vadd.f32 %v2642_v19, %v458_v36  ;;  %v2370_v21 = vunpack.c.h.bf16 %v2428_v9  ;;  %v2309_v22 = vunpack.c.l.bf16 %v2413_v15  ;;  %v2310_v23 = vunpack.c.h.bf16 %v2413_v15  ;;  %v2416_v15 = vld [vmem:[%s2614_s19 + $0x50] sm:$0xff]  }
  0x2f   : > { %v648_v44 = vpack.c.bf16 %v588_v34, %v587_v33  ;;  %v589_v54 = vmax.f32 %v525_v45, 0.0  ;;  %v650_v24 = vpack.c.bf16 %v592_v12, %v591_v11  ;;  %v623_v27 = vmax.f32 %v559_v16, 0.0 }
  0x30   : > { %818 = vmatmul.mubr.bf16.vlgmr.msra.gmra.mrb[0].mxu0 %v645_v40  ;;  %978 = vmatmul.mubr.bf16.vlgmr.msra.gmra.mrb[0].mxu1 %v661_v0  ;;  %v556_v40 = vadd.f32 %v2642_v19, %v488_v31  ;;  %v590_v55 = vmax.f32 %v526_v46, 0.0  ;;  %v2306_v0 = vunpack.c.h.bf16 %v2412_v57  ;;  %v493_v29 = vmul.f32 %v2369_v20, %v2629_v14  ;;  %v2429_v31 = vld [vmem:[%s2614_s19 + $0xb8] sm:$0xff]  }
  0x31   : > { %827 = vmatprep.mubr.bf16.mxu0 %v2528_v2  ;;  %987 = vmatprep.mubr.bf16.mxu1 %v2528_v2  ;;  %v494_v30 = vmul.f32 %v2370_v21, %v2629_v14  ;;  %v463_v32 = vmul.f32 %v2309_v22, %v2629_v14  ;;  %v464_v33 = vmul.f32 %v2310_v23, %v2629_v14  ;;  %v2373_v36 = vunpack.c.l.bf16 %v2429_v31 }
  0x32   : > { %v620_v49 = vmax.f32 %v556_v40, 0.0  ;;  %v462_v13 = vmul.f32 %v2306_v0, %v2629_v14  ;;  %v2374_v41 = vunpack.c.h.bf16 %v2429_v31  ;;  %v2313_v45 = vunpack.c.l.bf16 %v2414_v37 }
  0x33   : > { %v562_v40 = vadd.f32 %v2642_v19, %v494_v30  ;;  %v531_v42 = vadd.f32 %v2642_v19, %v463_v32  ;;  %v532_v43 = vadd.f32 %v2642_v19, %v464_v33  ;;  %v2314_v46 = vunpack.c.h.bf16 %v2414_v37  ;;  %v2432_v30 = vld [vmem:[%s2614_s19 + $0xd0] sm:$0xff]  }
  0x34   : > { %v664_v59 = vpack.c.bf16 %v620_v49, %v619_v48  ;;  %v530_v26 = vadd.f32 %v2642_v19, %v462_v13  ;;  %v495_v47 = vmul.f32 %v2373_v36, %v2629_v14  ;;  %v496_v50 = vmul.f32 %v2374_v41, %v2629_v14 }
  0x35   : > { %v626_v49 = vmax.f32 %v562_v40, 0.0  ;;  %v595_v52 = vmax.f32 %v531_v42, 0.0  ;;  %v596_v53 = vmax.f32 %v532_v43, 0.0  ;;  %v2377_v60 = vunpack.c.l.bf16 %v2430_v51 }
  0x36   : > { %v594_v35 = vmax.f32 %v530_v26, 0.0  ;;  %v563_v57 = vadd.f32 %v2642_v19, %v495_v47  ;;  %v2378_v61 = vunpack.c.h.bf16 %v2430_v51  ;;  %v2317_v62 = vunpack.c.l.bf16 %v2415_v56 }
  0x37   : > { %v652_v63 = vpack.c.bf16 %v596_v53, %v595_v52  ;;  %v2318_v3 = vunpack.c.h.bf16 %v2415_v56  ;;  %v497_v6 = vmul.f32 %v2377_v60, %v2629_v14  ;;  %v2385_v36 = vunpack.c.l.bf16 %v2432_v30  ;;  %v2418_v56 = vld [vmem:[%s2614_s19 + $0x60] sm:$0xff]  }
  0x38   : > { %828 = vmatmul.mubr.bf16.gmra.mrb[4].mxu0 %v646_v1  ;;  %988 = vmatmul.mubr.bf16.gmra.mrb[4].mxu1 %v662_v18  ;;  %v649_v1 = vpack.c.bf16 %v590_v55, %v589_v54  ;;  %v560_v18 = vadd.f32 %v2642_v19, %v492_v8  ;;  %v465_v54 = vmul.f32 %v2313_v45, %v2629_v14  ;;  %v627_v4 = vmax.f32 %v563_v57, 0.0  ;;  %v2431_v8 = vld [vmem:[%s2614_s19 + $0xc8] sm:$0xff]  }
  0x39   : > { %837 = vmatprep.mubr.bf16.mxu0 %v2528_v2  ;;  %997 = vmatprep.mubr.bf16.mxu1 %v2528_v2  ;;  %v466_v55 = vmul.f32 %v2314_v46, %v2629_v14  ;;  %v498_v7 = vmul.f32 %v2378_v61, %v2629_v14  ;;  %v467_v9 = vmul.f32 %v2317_v62, %v2629_v14  ;;  %v2381_v13 = vunpack.c.l.bf16 %v2431_v8 }
  0x3a   : > { %v624_v28 = vmax.f32 %v560_v18, 0.0  ;;  %v533_v0 = vadd.f32 %v2642_v19, %v465_v54  ;;  %v468_v12 = vmul.f32 %v2318_v3, %v2629_v14  ;;  %v2382_v20 = vunpack.c.h.bf16 %v2431_v8 }
  0x3b   : > { %v566_v18 = vadd.f32 %v2642_v19, %v498_v7  ;;  %v535_v21 = vadd.f32 %v2642_v19, %v467_v9  ;;  %v2386_v40 = vunpack.c.h.bf16 %v2432_v30  ;;  %v2434_v7 = vld [vmem:[%s2614_s19 + $0xe0] sm:$0xff]  }
  0x3c   : > { %v666_v38 = vpack.c.bf16 %v624_v28, %v623_v27  ;;  %v536_v23 = vadd.f32 %v2642_v19, %v468_v12  ;;  %v499_v28 = vmul.f32 %v2381_v13, %v2629_v14  ;;  %v2419_v12 = vld [vmem:[%s2614_s19 + $0x68] sm:$0xff]   ;;  %v2393_v13 = vunpack.c.l.bf16 %v2434_v7 }
  0x3d   : > { %v630_v27 = vmax.f32 %v566_v18, 0.0  ;;  %v599_v31 = vmax.f32 %v535_v21, 0.0  ;;  %v2394_v18 = vunpack.c.h.bf16 %v2434_v7 }
  0x3e   : > { %v600_v32 = vmax.f32 %v536_v23, 0.0 }
  0x40   : > { %838 = vmatmul.mubr.bf16.gmra.mrb[8].mxu0 %v647_v25  ;;  %998 = vmatmul.mubr.bf16.gmra.mrb[8].mxu1 %v663_v39  ;;  %v529_v25 = vadd.f32 %v2642_v19, %v461_v10  ;;  %v561_v39 = vadd.f32 %v2642_v19, %v493_v29  ;;  %v597_v10 = vmax.f32 %v533_v0, 0.0  ;;  %v500_v29 = vmul.f32 %v2382_v20, %v2629_v14 }
  0x41   : > { %847 = vmatprep.mubr.bf16.mxu0 %v2528_v2  ;;  %1007 = vmatprep.mubr.bf16.mxu1 %v2528_v2  ;;  %v654_v42 = vpack.c.bf16 %v600_v32, %v599_v31  ;;  %v2329_v0 = vunpack.c.l.bf16 %v2418_v56  ;;  %v2333_v20 = vunpack.c.l.bf16 %v2419_v12 }
  0x42   : > { %v593_v34 = vmax.f32 %v529_v25, 0.0  ;;  %v625_v48 = vmax.f32 %v561_v39, 0.0  ;;  %v2322_v25 = vunpack.c.h.bf16 %v2416_v15  ;;  %v568_v39 = vadd.f32 %v2642_v19, %v500_v29  ;;  %v2435_v29 = vld [vmem:[%s2614_s19 + $0xe8] sm:$0xff]  }
  0x43   : > { %v475_v30 = vmul.f32 %v2333_v20, %v2629_v14 }
  0x44   : > { %v667_v58 = vpack.c.bf16 %v626_v49, %v625_v48  ;;  %v632_v47 = vmax.f32 %v568_v39, 0.0  ;;  %v501_v48 = vmul.f32 %v2385_v36, %v2629_v14  ;;  %v502_v49 = vmul.f32 %v2386_v40, %v2629_v14 }
  0x45   : > { %v2398_v39 = vunpack.c.h.bf16 %v2435_v29 }
  0x48   : > { %848 = vmatmul.mubr.bf16.gmra.mrb[12].mxu0 %v648_v44  ;;  %1008 = vmatmul.mubr.bf16.gmra.mrb[12].mxu1 %v664_v59  ;;  %v651_v44 = vpack.c.bf16 %v594_v35, %v593_v34  ;;  %v564_v59 = vadd.f32 %v2642_v19, %v496_v50  ;;  %v470_v34 = vmul.f32 %v2322_v25, %v2629_v14  ;;  %v2417_v35 = vld [vmem:[%s2614_s19 + $0x58] sm:$0xff]  }
  0x49   : > { %857 = vmatprep.mubr.bf16.mxu0 %v2528_v2  ;;  %1017 = vmatprep.mubr.bf16.mxu1 %v2528_v2  ;;  %v2325_v41 = vunpack.c.l.bf16 %v2417_v35  ;;  %v2326_v45 = vunpack.c.h.bf16 %v2417_v35  ;;  %v2433_v50 = vld [vmem:[%s2614_s19 + $0xd8] sm:$0xff]   ;;  %v2397_v35 = vunpack.c.l.bf16 %v2435_v29 }
  0x4a   : > { %v628_v5 = vmax.f32 %v564_v59, 0.0  ;;  %v570_v59 = vadd.f32 %v2642_v19, %v502_v49  ;;  %v2390_v60 = vunpack.c.h.bf16 %v2433_v50  ;;  %v2436_v49 = vld [vmem:[%s2614_s19 + $0xf0] sm:$0xff]  }
  0x4b   : > { %v471_v51 = vmul.f32 %v2325_v41, %v2629_v14  ;;  %v472_v54 = vmul.f32 %v2326_v45, %v2629_v14 }
  0x4c   : > { %v668_v16 = vpack.c.bf16 %v628_v5, %v627_v4  ;;  %v634_v4 = vmax.f32 %v570_v59, 0.0  ;;  %v2402_v59 = vunpack.c.h.bf16 %v2436_v49 }
  0x4d   : > { %v539_v61 = vadd.f32 %v2642_v19, %v471_v51 }
  0x4f   : > { %v603_v8 = vmax.f32 %v539_v61, 0.0 }
  0x50   : > { %858 = vmatmul.mubr.bf16.gmra.mrb[16].mxu0 %v649_v1  ;;  %1018 = vmatmul.mubr.bf16.gmra.mrb[16].mxu1 %v665_v17  ;;  %v534_v1 = vadd.f32 %v2642_v19, %v466_v55  ;;  %v565_v17 = vadd.f32 %v2642_v19, %v497_v6  ;;  %v2389_v55 = vunpack.c.l.bf16 %v2433_v50  ;;  %v504_v6 = vmul.f32 %v2390_v60, %v2629_v14 }
  0x51   : > { %867 = vmatprep.mubr.bf16.mxu0 %v2528_v2  ;;  %1027 = vmatprep.mubr.bf16.mxu1 %v2528_v2 }
  0x52   : > { %v598_v11 = vmax.f32 %v534_v1, 0.0  ;;  %v629_v26 = vmax.f32 %v565_v17, 0.0  ;;  %v2330_v1 = vunpack.c.h.bf16 %v2418_v56  ;;  %v503_v5 = vmul.f32 %v2389_v55, %v2629_v14  ;;  %v2421_v55 = vld [vmem:[%s2614_s19 + $0x78] sm:$0xff]  }
  0x53   : > { %v572_v17 = vadd.f32 %v2642_v19, %v504_v6  ;;  %v2437_v6 = vld [vmem:[%s2614_s19 + $0xf8] sm:$0xff]  }
  0x54   : > { %v653_v22 = vpack.c.bf16 %v598_v11, %v597_v10  ;;  %v669_v37 = vpack.c.bf16 %v630_v27, %v629_v26  ;;  %v473_v10 = vmul.f32 %v2329_v0, %v2629_v14  ;;  %v474_v11 = vmul.f32 %v2330_v1, %v2629_v14 }
  0x55   : > { %v636_v26 = vmax.f32 %v572_v17, 0.0  ;;  %v505_v27 = vmul.f32 %v2393_v13, %v2629_v14  ;;  %v2342_v0 = vunpack.c.h.bf16 %v2421_v55 }
  0x56   : > { %v542_v23 = vadd.f32 %v2642_v19, %v474_v11  ;;  %v2405_v11 = vunpack.c.l.bf16 %v2437_v6 }
  0x58   : > { %868 = vmatmul.mubr.bf16.gmra.mrb[20].mxu0 %v650_v24  ;;  %1028 = vmatmul.mubr.bf16.gmra.mrb[20].mxu1 %v666_v38  ;;  %v2321_v24 = vunpack.c.l.bf16 %v2416_v15  ;;  %v567_v38 = vadd.f32 %v2642_v19, %v499_v28  ;;  %v506_v28 = vmul.f32 %v2394_v18, %v2629_v14  ;;  %v606_v32 = vmax.f32 %v542_v23, 0.0 }
  0x59   : > { %877 = vmatprep.mubr.bf16.mxu0 %v2528_v2  ;;  %1037 = vmatprep.mubr.bf16.mxu1 %v2528_v2  ;;  %v511_v23 = vmul.f32 %v2405_v11, %v2629_v14 }
  0x5a   : > { %v469_v33 = vmul.f32 %v2321_v24, %v2629_v14  ;;  %v631_v46 = vmax.f32 %v567_v38, 0.0  ;;  %v2334_v24 = vunpack.c.h.bf16 %v2419_v12  ;;  %v574_v38 = vadd.f32 %v2642_v19, %v506_v28 }
  0x5b   : > { %v579_v28 = vadd.f32 %v2642_v19, %v511_v23 }
  0x5c   : > { %v537_v43 = vadd.f32 %v2642_v19, %v469_v33  ;;  %v670_v57 = vpack.c.bf16 %v632_v47, %v631_v46  ;;  %v476_v33 = vmul.f32 %v2334_v24, %v2629_v14  ;;  %v638_v46 = vmax.f32 %v574_v38, 0.0 }
  0x5d   : > { %v507_v47 = vmul.f32 %v2397_v35, %v2629_v14 }
  0x5e   : > { %v601_v52 = vmax.f32 %v537_v43, 0.0  ;;  %v544_v43 = vadd.f32 %v2642_v19, %v476_v33  ;;  %v695_v33 = vlaneseq }
  0x60   : > { %878 = vmatmul.mubr.bf16.gmra.mrb[24].mxu0 %v651_v44  ;;  %1038 = vmatmul.mubr.bf16.gmra.mrb[24].mxu1 %v667_v58  ;;  %v538_v44 = vadd.f32 %v2642_v19, %v470_v34  ;;  %v569_v58 = vadd.f32 %v2642_v19, %v501_v48  ;;  %v2420_v34 = vld [vmem:[%s2614_s19 + $0x70] sm:$0xff]   ;;  %v508_v48 = vmul.f32 %v2398_v39, %v2629_v14 }
  0x61   : > { %887 = vmatprep.mubr.bf16.mxu0 %v2528_v2  ;;  %1047 = vmatprep.mubr.bf16.mxu1 %v2528_v2  ;;  %v2337_v40 = vunpack.c.l.bf16 %v2420_v34 }
  0x62   : > { %v602_v53 = vmax.f32 %v538_v44, 0.0  ;;  %v633_v3 = vmax.f32 %v569_v58, 0.0  ;;  %v2338_v44 = vunpack.c.h.bf16 %v2420_v34  ;;  %v576_v58 = vadd.f32 %v2642_v19, %v508_v48 }
  0x63   : > { %v477_v50 = vmul.f32 %v2337_v40, %v2629_v14  ;;  %v696_v34 = vshrl.u32 %v695_v33, 7 }
  0x64   : > { %v655_v62 = vpack.c.bf16 %v602_v53, %v601_v52  ;;  %v671_v15 = vpack.c.bf16 %v634_v4, %v633_v3  ;;  %v608_v52 = vmax.f32 %v544_v43, 0.0  ;;  %v478_v53 = vmul.f32 %v2338_v44, %v2629_v14 }
  0x65   : > { %v545_v60 = vadd.f32 %v2642_v19, %v477_v50  ;;  %v640_v3 = vmax.f32 %v576_v58, 0.0  ;;  %v697_v35 = vsub.s32 0, %v696_v34 }
  0x67   : > { %v609_v7 = vmax.f32 %v545_v60, 0.0 }
  0x68   : > { %888 = vmatmul.mubr.bf16.gmra.mrb[28].mxu0 %v652_v63  ;;  %1048 = vmatmul.mubr.bf16.gmra.mrb[28].mxu1 %v668_v16  ;;  %v540_v63 = vadd.f32 %v2642_v19, %v472_v54  ;;  %v571_v16 = vadd.f32 %v2642_v19, %v503_v5  ;;  %v2401_v54 = vunpack.c.l.bf16 %v2436_v49  ;;  %v510_v5 = vmul.f32 %v2402_v59, %v2629_v14 }
  0x69   : > { %897 = vmatprep.mubr.bf16.mxu0 %v2528_v2  ;;  %1057 = vmatprep.mubr.bf16.mxu1 %v2528_v2 }
  0x6a   : > { %v604_v9 = vmax.f32 %v540_v63, 0.0  ;;  %v635_v25 = vmax.f32 %v571_v16, 0.0  ;;  %v2341_v63 = vunpack.c.l.bf16 %v2421_v55  ;;  %v509_v4 = vmul.f32 %v2401_v54, %v2629_v14 }
  0x6b   : > { %v2406_v16 = vunpack.c.h.bf16 %v2437_v6 }
  0x6c   : > { %v656_v21 = vpack.c.bf16 %v604_v9, %v603_v8  ;;  %v672_v36 = vpack.c.bf16 %v636_v26, %v635_v25  ;;  %v479_v9 = vmul.f32 %v2341_v63, %v2629_v14  ;;  %v577_v13 = vadd.f32 %v2642_v19, %v509_v4 }
  0x6d   : > { %v512_v24 = vmul.f32 %v2406_v16, %v2629_v14 }
  0x6e   : > { %v547_v18 = vadd.f32 %v2642_v19, %v479_v9 }
  0x6f   : > { %v580_v29 = vadd.f32 %v2642_v19, %v512_v24 }
  0x70   : > { %898 = vmatmul.mubr.bf16.gmra.mrb[32].mxu0 %v653_v22  ;;  %1058 = vmatmul.mubr.bf16.gmra.mrb[32].mxu1 %v669_v37  ;;  %v541_v22 = vadd.f32 %v2642_v19, %v473_v10  ;;  %v573_v37 = vadd.f32 %v2642_v19, %v505_v27  ;;  %v480_v10 = vmul.f32 %v2342_v0, %v2629_v14  ;;  %v611_v25 = vmax.f32 %v547_v18, 0.0 }
  0x71   : > { %907 = vmatprep.mubr.bf16.mxu0 %v2528_v2  ;;  %1067 = vmatprep.mubr.bf16.mxu1 %v2528_v2 }
  0x72   : > { %v605_v31 = vmax.f32 %v541_v22, 0.0  ;;  %v637_v45 = vmax.f32 %v573_v37, 0.0  ;;  %v548_v20 = vadd.f32 %v2642_v19, %v480_v10  ;;  %v701_v37 = vsub.s32 1, %v696_v34 }
  0x74   : > { %v657_v41 = vpack.c.bf16 %v606_v32, %v605_v31  ;;  %v673_v56 = vpack.c.bf16 %v638_v46, %v637_v45  ;;  %v612_v26 = vmax.f32 %v548_v20, 0.0  ;;  %v643_v31 = vmax.f32 %v579_v28, 0.0 }
  0x75   : > { %v644_v32 = vmax.f32 %v580_v29, 0.0 }
  0x77   : > { %v676_v14 = vpack.c.bf16 %v644_v32, %v643_v31 }
  0x78   : > { %908 = vmatmul.mubr.bf16.gmra.mrb[36].mxu0 %v654_v42  ;;  %1068 = vmatmul.mubr.bf16.gmra.mrb[36].mxu1 %v670_v57  ;;  %v543_v42 = vadd.f32 %v2642_v19, %v475_v30  ;;  %v575_v57 = vadd.f32 %v2642_v19, %v507_v47  ;;  %v660_v30 = vpack.c.bf16 %v612_v26, %v611_v25 }
  0x79   : > { %917 = vmatprep.mubr.bf16.mxu0 %v2528_v2  ;;  %1077 = vmatprep.mubr.bf16.mxu1 %v2528_v2 }
  0x7a   : > { %v607_v51 = vmax.f32 %v543_v42, 0.0  ;;  %v639_v1 = vmax.f32 %v575_v57, 0.0 }
  0x7c   : > { %v658_v61 = vpack.c.bf16 %v608_v52, %v607_v51  ;;  %v674_v12 = vpack.c.bf16 %v640_v3, %v639_v1 }
  0x80   : > { %918 = vmatmul.mubr.bf16.gmra.mrb[40].mxu0 %v655_v62  ;;  %1078 = vmatmul.mubr.bf16.gmra.mrb[40].mxu1 %v671_v15  ;;  %v546_v62 = vadd.f32 %v2642_v19, %v478_v53  ;;  %v578_v15 = vadd.f32 %v2642_v19, %v510_v5 }
  0x81   : > { %927 = vmatprep.mubr.bf16.mxu0 %v2528_v2  ;;  %1087 = vmatprep.mubr.bf16.mxu1 %v2528_v2 }
  0x82   : > { %v610_v8 = vmax.f32 %v546_v62, 0.0  ;;  %v642_v22 = vmax.f32 %v578_v15, 0.0 }
  0x84   : > { %v659_v17 = vpack.c.bf16 %v610_v8, %v609_v7 }
  0x88   : > { %928 = vmatmul.mubr.bf16.gmra.mrb[44].mxu0 %v656_v21  ;;  %1088 = vmatmul.mubr.bf16.gmra.mrb[44].mxu1 %v672_v36  ;;  %v641_v21 = vmax.f32 %v577_v13, 0.0  ;;  %v693_v36 = vld [vmem:[%s3452_s3] sm:$0x3] }
  0x89   : > { %937 = vmatprep.mubr.bf16.mxu0 %v2528_v2  ;;  %1097 = vmatprep.mubr.bf16.mxu1 %v2528_v2  ;;  %v2846_v38 = vrot.slane %v693_v36, %v697_v35  ;;  %v2848_v19 = vrot.slane %v693_v36, %v701_v37 }
  0x8a   : > { %v675_v27 = vpack.c.bf16 %v642_v22, %v641_v21 }
  0x90   : > { %938 = vmatmul.mubr.bf16.gmra.mrb[48].mxu0 %v657_v41  ;;  %1098 = vmatmul.mubr.bf16.gmra.mrb[48].mxu1 %v673_v56 }
  0x91   : > { %947 = vmatprep.mubr.bf16.mxu0 %v2528_v2  ;;  %1107 = vmatprep.mubr.bf16.mxu1 %v2528_v2 }
  0x98   : > { %948 = vmatmul.mubr.bf16.gmra.mrb[52].mxu0 %v658_v61  ;;  %1108 = vmatmul.mubr.bf16.gmra.mrb[52].mxu1 %v674_v12 }
  0x99   : > { %957 = vmatprep.mubr.bf16.mxu0 %v2528_v2  ;;  %1117 = vmatprep.mubr.bf16.mxu1 %v2528_v2 }
  0xa0   : > { %958 = vmatmul.mubr.bf16.gmra.mrb[56].mxu0 %v659_v17  ;;  %1118 = vmatmul.mubr.bf16.gmra.mrb[56].mxu1 %v675_v27 }
  0xa1   : > { %967 = vmatprep.mubr.bf16.mxu0 %v2528_v2  ;;  %1127 = vmatprep.mubr.bf16.mxu1 %v2528_v2 }
  0xa8   : > { %968 = vmatmul.mubr.bf16.gmra.mrb[60].mxu0 %v660_v30  ;;  %1128 = vmatmul.mubr.bf16.gmra.mrb[60].mxu1 %v676_v14 }
 0x103   : > { %v819_v39 = vpop.f32.mrb[0].mxu0  ;;  %v979_v51 = vpop.f32.mrb[0].mxu1 }
 0x104   : > { %v820_v40 = vadd.f32 %v819_v39, %v2846_v38  ;;  %v821_v2 = vpop.f32.mrb[1].mxu0  ;;  %v2862_v55 = vadd.f32 %v979_v51, %v2846_v38  ;;  %v981_v56 = vpop.f32.mrb[1].mxu1 }
 0x105   : > { %v822_v41 = vadd.f32 %v821_v2, %v2848_v19  ;;  %v823_v42 = vpop.f32.mrb[2].mxu0  ;;  %v2865_v58 = vadd.f32 %v981_v56, %v2848_v19  ;;  %v983_v59 = vpop.f32.mrb[2].mxu1 }
 0x106   : > { %v824_v43 = vadd.f32 %v823_v42, %v2846_v38  ;;  %v825_v44 = vpop.f32.mrb[3].mxu0  ;;  %v1272_v47 = vmul.f32 %v820_v40, %v820_v40  ;;  %v985_v62 = vpop.f32.mrb[3].mxu1  ;;  %v2872_v3 = vadd.f32 %v983_v59, %v2846_v38 }
 0x107   : > { %v2215_v45 = vpack.c.bf16 %v822_v41, %v820_v40  ;;  %v826_v46 = vadd.f32 %v825_v44, %v2848_v19  ;;  %v1273_v48 = vmul.f32 %v822_v41, %v822_v41  ;;  %v2247_v1 = vpack.c.bf16 %v2865_v58, %v2862_v55 }
 0x108   : > { %v1140_v49 = vadd.f32 %v824_v43, %v820_v40  ;;  %v1274_v50 = vmul.f32 %v824_v43, %v824_v43  ;;  %v2875_v4 = vadd.f32 %v985_v62, %v2848_v19 }
 0x109   : > { %1914 = vst [vmem:[%s2856_s9] sm:$0xff] %v2215_v45  ;;  %v1203_v52 = vadd.f32 %v826_v46, %v822_v41  ;;  %v1275_v53 = vmul.f32 %v826_v46, %v826_v46  ;;  %v2216_v54 = vpack.c.bf16 %v826_v46, %v824_v43  ;;  %1946 = vst [vmem:[%s2856_s9 + $0x100] sm:$0xff] %v2247_v1 }
 0x10a   : > { %v1400_v57 = vadd.f32 %v1274_v50, %v1272_v47  ;;  %v2248_v20 = vpack.c.bf16 %v2875_v4, %v2872_v3 }
 0x10b   : > { %v1463_v60 = vadd.f32 %v1275_v53, %v1273_v48  ;;  %1915 = vst [vmem:[%s2856_s9 + $0x8] sm:$0xff] %v2216_v54  ;;  %v829_v61 = vpop.f32.mrb[4].mxu0  ;;  %v989_v21 = vpop.f32.mrb[4].mxu1 }
 0x10c   : > { %v830_v63 = vadd.f32 %v829_v61, %v2846_v38  ;;  %v831_v0 = vpop.f32.mrb[5].mxu0  ;;  %v991_v26 = vpop.f32.mrb[5].mxu1  ;;  %1947 = vst [vmem:[%s2856_s9 + $0x108] sm:$0xff] %v2248_v20  ;;  %v2886_v28 = vadd.f32 %v989_v21, %v2846_v38 }
 0x10d   : > { %v832_v5 = vadd.f32 %v831_v0, %v2848_v19  ;;  %v833_v6 = vpop.f32.mrb[6].mxu0  ;;  %v2889_v29 = vadd.f32 %v991_v26, %v2848_v19  ;;  %v993_v30 = vpop.f32.mrb[6].mxu1 }
 0x10e   : > { %v1141_v7 = vadd.f32 %v1140_v49, %v830_v63  ;;  %v1276_v8 = vmul.f32 %v830_v63, %v830_v63  ;;  %v834_v9 = vadd.f32 %v833_v6, %v2846_v38  ;;  %v835_v10 = vpop.f32.mrb[7].mxu0  ;;  %v995_v14 = vpop.f32.mrb[7].mxu1  ;;  %v2897_v39 = vadd.f32 %v993_v30, %v2846_v38 }
 0x10f   : > { %v1204_v11 = vadd.f32 %v1203_v52, %v832_v5  ;;  %v1277_v12 = vmul.f32 %v832_v5, %v832_v5  ;;  %v2217_v13 = vpack.c.bf16 %v832_v5, %v830_v63  ;;  %v836_v15 = vadd.f32 %v835_v10, %v2848_v19 }
 0x110   : > { %v1401_v16 = vadd.f32 %v1400_v57, %v1276_v8  ;;  %v1142_v17 = vadd.f32 %v1141_v7, %v834_v9  ;;  %v1278_v18 = vmul.f32 %v834_v9, %v834_v9  ;;  %v2249_v35 = vpack.c.bf16 %v2889_v29, %v2886_v28 }
 0x111   : > { %v1464_v22 = vadd.f32 %v1463_v60, %v1277_v12  ;;  %1916 = vst [vmem:[%s2856_s9 + $0x10] sm:$0xff] %v2217_v13  ;;  %v1205_v23 = vadd.f32 %v1204_v11, %v836_v15  ;;  %v1279_v24 = vmul.f32 %v836_v15, %v836_v15  ;;  %v2218_v25 = vpack.c.bf16 %v836_v15, %v834_v9 }
 0x112   : > { %v1402_v27 = vadd.f32 %v1401_v16, %v1278_v18  ;;  %1948 = vst [vmem:[%s2856_s9 + $0x110] sm:$0xff] %v2249_v35  ;;  %v2902_v43 = vadd.f32 %v995_v14, %v2848_v19 }
 0x113   : > { %v1465_v31 = vadd.f32 %v1464_v22, %v1279_v24  ;;  %1917 = vst [vmem:[%s2856_s9 + $0x18] sm:$0xff] %v2218_v25  ;;  %v839_v32 = vpop.f32.mrb[8].mxu0  ;;  %v999_v51 = vpop.f32.mrb[8].mxu1 }
 0x114   : > { %v840_v33 = vadd.f32 %v839_v32, %v2846_v38  ;;  %v841_v34 = vpop.f32.mrb[9].mxu0  ;;  %v1001_v57 = vpop.f32.mrb[9].mxu1  ;;  %v2250_v60 = vpack.c.bf16 %v2902_v43, %v2897_v39  ;;  %v2909_v61 = vadd.f32 %v999_v51, %v2846_v38 }
 0x115   : > { %v842_v36 = vadd.f32 %v841_v34, %v2848_v19  ;;  %v843_v37 = vpop.f32.mrb[10].mxu0  ;;  %v2912_v62 = vadd.f32 %v1001_v57, %v2848_v19  ;;  %v1003_v63 = vpop.f32.mrb[10].mxu1 }
 0x116   : > { %v1143_v40 = vadd.f32 %v1142_v17, %v840_v33  ;;  %v1280_v2 = vmul.f32 %v840_v33, %v840_v33  ;;  %v844_v41 = vadd.f32 %v843_v37, %v2846_v38  ;;  %v845_v42 = vpop.f32.mrb[11].mxu0  ;;  %v1005_v5 = vpop.f32.mrb[11].mxu1  ;;  %1949 = vst [vmem:[%s2856_s9 + $0x118] sm:$0xff] %v2250_v60  ;;  %v2921_v11 = vadd.f32 %v1003_v63, %v2846_v38 }
 0x117   : > { %v1206_v44 = vadd.f32 %v1205_v23, %v842_v36  ;;  %v1281_v45 = vmul.f32 %v842_v36, %v842_v36  ;;  %v2219_v46 = vpack.c.bf16 %v842_v36, %v840_v33  ;;  %v846_v47 = vadd.f32 %v845_v42, %v2848_v19 }
 0x118   : > { %v1403_v48 = vadd.f32 %v1402_v27, %v1280_v2  ;;  %v1144_v49 = vadd.f32 %v1143_v40, %v844_v41  ;;  %v1282_v50 = vmul.f32 %v844_v41, %v844_v41  ;;  %v2251_v8 = vpack.c.bf16 %v2912_v62, %v2909_v61 }
 0x119   : > { %v1466_v52 = vadd.f32 %v1465_v31, %v1281_v45  ;;  %1918 = vst [vmem:[%s2856_s9 + $0x20] sm:$0xff] %v2219_v46  ;;  %v1207_v53 = vadd.f32 %v1206_v44, %v846_v47  ;;  %v1283_v54 = vmul.f32 %v846_v47, %v846_v47  ;;  %v2220_v56 = vpack.c.bf16 %v846_v47, %v844_v41 }
 0x11a   : > { %v1404_v59 = vadd.f32 %v1403_v48, %v1282_v50  ;;  %1950 = vst [vmem:[%s2856_s9 + $0x120] sm:$0xff] %v2251_v8  ;;  %v2926_v17 = vadd.f32 %v1005_v5, %v2848_v19 }
 0x11b   : > { %v1467_v0 = vadd.f32 %v1466_v52, %v1283_v54  ;;  %1919 = vst [vmem:[%s2856_s9 + $0x28] sm:$0xff] %v2220_v56  ;;  %v849_v1 = vpop.f32.mrb[12].mxu0  ;;  %v1009_v26 = vpop.f32.mrb[12].mxu1 }
 0x11c   : > { %v850_v6 = vadd.f32 %v849_v1, %v2846_v38  ;;  %v851_v7 = vpop.f32.mrb[13].mxu0  ;;  %v1011_v14 = vpop.f32.mrb[13].mxu1  ;;  %v2252_v34 = vpack.c.bf16 %v2926_v17, %v2921_v11  ;;  %v2933_v35 = vadd.f32 %v1009_v26, %v2846_v38 }
 0x11d   : > { %v852_v9 = vadd.f32 %v851_v7, %v2848_v19  ;;  %v853_v10 = vpop.f32.mrb[14].mxu0  ;;  %v2936_v36 = vadd.f32 %v1011_v14, %v2848_v19  ;;  %v1013_v37 = vpop.f32.mrb[14].mxu1 }
 0x11e   : > { %v1145_v12 = vadd.f32 %v1144_v49, %v850_v6  ;;  %v1284_v13 = vmul.f32 %v850_v6, %v850_v6  ;;  %v854_v15 = vadd.f32 %v853_v10, %v2846_v38  ;;  %v855_v16 = vpop.f32.mrb[15].mxu0  ;;  %v1015_v41 = vpop.f32.mrb[15].mxu1  ;;  %1951 = vst [vmem:[%s2856_s9 + $0x128] sm:$0xff] %v2252_v34  ;;  %v2945_v48 = vadd.f32 %v1013_v37, %v2846_v38 }
 0x11f   : > { %v1208_v18 = vadd.f32 %v1207_v53, %v852_v9  ;;  %v1285_v20 = vmul.f32 %v852_v9, %v852_v9  ;;  %v2221_v21 = vpack.c.bf16 %v852_v9, %v850_v6  ;;  %v856_v22 = vadd.f32 %v855_v16, %v2848_v19 }
 0x120   : > { %v1405_v23 = vadd.f32 %v1404_v59, %v1284_v13  ;;  %v1146_v24 = vadd.f32 %v1145_v12, %v854_v15  ;;  %v1286_v25 = vmul.f32 %v854_v15, %v854_v15  ;;  %v2253_v45 = vpack.c.bf16 %v2936_v36, %v2933_v35 }
 0x121   : > { %v1468_v27 = vadd.f32 %v1467_v0, %v1285_v20  ;;  %1920 = vst [vmem:[%s2856_s9 + $0x30] sm:$0xff] %v2221_v21  ;;  %v1209_v30 = vadd.f32 %v1208_v18, %v856_v22  ;;  %v1287_v31 = vmul.f32 %v856_v22, %v856_v22  ;;  %v2222_v32 = vpack.c.bf16 %v856_v22, %v854_v15 }
 0x122   : > { %v1406_v33 = vadd.f32 %v1405_v23, %v1286_v25  ;;  %1952 = vst [vmem:[%s2856_s9 + $0x130] sm:$0xff] %v2253_v45  ;;  %v2950_v53 = vadd.f32 %v1015_v41, %v2848_v19 }
 0x123   : > { %v1469_v40 = vadd.f32 %v1468_v27, %v1287_v31  ;;  %1921 = vst [vmem:[%s2856_s9 + $0x38] sm:$0xff] %v2222_v32  ;;  %v859_v2 = vpop.f32.mrb[16].mxu0  ;;  %v1019_v1 = vpop.f32.mrb[16].mxu1 }
 0x124   : > { %v860_v42 = vadd.f32 %v859_v2, %v2846_v38  ;;  %v861_v44 = vpop.f32.mrb[17].mxu0  ;;  %v1021_v9 = vpop.f32.mrb[17].mxu1  ;;  %v2254_v12 = vpack.c.bf16 %v2950_v53, %v2945_v48  ;;  %v2957_v13 = vadd.f32 %v1019_v1, %v2846_v38 }
 0x125   : > { %v862_v46 = vadd.f32 %v861_v44, %v2848_v19  ;;  %v863_v47 = vpop.f32.mrb[18].mxu0  ;;  %v2960_v15 = vadd.f32 %v1021_v9, %v2848_v19  ;;  %v1023_v16 = vpop.f32.mrb[18].mxu1 }
 0x126   : > { %v1147_v49 = vadd.f32 %v1146_v24, %v860_v42  ;;  %v1288_v50 = vmul.f32 %v860_v42, %v860_v42  ;;  %v864_v51 = vadd.f32 %v863_v47, %v2846_v38  ;;  %v865_v52 = vpop.f32.mrb[19].mxu0  ;;  %v1025_v21 = vpop.f32.mrb[19].mxu1  ;;  %1953 = vst [vmem:[%s2856_s9 + $0x138] sm:$0xff] %v2254_v12  ;;  %v2969_v27 = vadd.f32 %v1023_v16, %v2846_v38 }
 0x127   : > { %v1210_v54 = vadd.f32 %v1209_v30, %v862_v46  ;;  %v1289_v56 = vmul.f32 %v862_v46, %v862_v46  ;;  %v2223_v57 = vpack.c.bf16 %v862_v46, %v860_v42  ;;  %v866_v59 = vadd.f32 %v865_v52, %v2848_v19 }
 0x128   : > { %v1407_v60 = vadd.f32 %v1406_v33, %v1288_v50  ;;  %v1148_v63 = vadd.f32 %v1147_v49, %v864_v51  ;;  %v1290_v0 = vmul.f32 %v864_v51, %v864_v51  ;;  %v2255_v24 = vpack.c.bf16 %v2960_v15, %v2957_v13 }
 0x129   : > { %v1470_v5 = vadd.f32 %v1469_v40, %v1289_v56  ;;  %1922 = vst [vmem:[%s2856_s9 + $0x40] sm:$0xff] %v2223_v57  ;;  %v1211_v6 = vadd.f32 %v1210_v54, %v866_v59  ;;  %v1291_v7 = vmul.f32 %v866_v59, %v866_v59  ;;  %v2224_v8 = vpack.c.bf16 %v866_v59, %v864_v51 }
 0x12a   : > { %v1408_v10 = vadd.f32 %v1407_v60, %v1290_v0  ;;  %1954 = vst [vmem:[%s2856_s9 + $0x140] sm:$0xff] %v2255_v24  ;;  %v2974_v33 = vadd.f32 %v1025_v21, %v2848_v19 }
 0x12b   : > { %v1471_v18 = vadd.f32 %v1470_v5, %v1291_v7  ;;  %1923 = vst [vmem:[%s2856_s9 + $0x48] sm:$0xff] %v2224_v8  ;;  %v869_v20 = vpop.f32.mrb[20].mxu0  ;;  %v1029_v45 = vpop.f32.mrb[20].mxu1 }
 0x12c   : > { %v870_v22 = vadd.f32 %v869_v20, %v2846_v38  ;;  %v871_v23 = vpop.f32.mrb[21].mxu0  ;;  %v1031_v51 = vpop.f32.mrb[21].mxu1  ;;  %v2256_v54 = vpack.c.bf16 %v2974_v33, %v2969_v27  ;;  %v2981_v56 = vadd.f32 %v1029_v45, %v2846_v38 }
 0x12d   : > { %v872_v25 = vadd.f32 %v871_v23, %v2848_v19  ;;  %v873_v26 = vpop.f32.mrb[22].mxu0  ;;  %v2984_v57 = vadd.f32 %v1031_v51, %v2848_v19  ;;  %v1033_v59 = vpop.f32.mrb[22].mxu1 }
 0x12e   : > { %v1149_v30 = vadd.f32 %v1148_v63, %v870_v22  ;;  %v1292_v31 = vmul.f32 %v870_v22, %v870_v22  ;;  %v874_v32 = vadd.f32 %v873_v26, %v2846_v38  ;;  %v875_v14 = vpop.f32.mrb[23].mxu0  ;;  %v1035_v0 = vpop.f32.mrb[23].mxu1  ;;  %1955 = vst [vmem:[%s2856_s9 + $0x148] sm:$0xff] %v2256_v54  ;;  %v2993_v9 = vadd.f32 %v1033_v59, %v2846_v38 }
 0x12f   : > { %v1212_v34 = vadd.f32 %v1211_v6, %v872_v25  ;;  %v1293_v37 = vmul.f32 %v872_v25, %v872_v25  ;;  %v2225_v40 = vpack.c.bf16 %v872_v25, %v870_v22  ;;  %v876_v2 = vadd.f32 %v875_v14, %v2848_v19 }
 0x130   : > { %v1409_v41 = vadd.f32 %v1408_v10, %v1292_v31  ;;  %v1150_v42 = vadd.f32 %v1149_v30, %v874_v32  ;;  %v1294_v44 = vmul.f32 %v874_v32, %v874_v32  ;;  %v2257_v6 = vpack.c.bf16 %v2984_v57, %v2981_v56 }
 0x131   : > { %v1472_v46 = vadd.f32 %v1471_v18, %v1293_v37  ;;  %1924 = vst [vmem:[%s2856_s9 + $0x50] sm:$0xff] %v2225_v40  ;;  %v1213_v47 = vadd.f32 %v1212_v34, %v876_v2  ;;  %v1295_v49 = vmul.f32 %v876_v2, %v876_v2  ;;  %v2226_v50 = vpack.c.bf16 %v876_v2, %v874_v32 }
 0x132   : > { %v1410_v52 = vadd.f32 %v1409_v41, %v1294_v44  ;;  %1956 = vst [vmem:[%s2856_s9 + $0x150] sm:$0xff] %v2257_v6  ;;  %v2998_v20 = vadd.f32 %v1035_v0, %v2848_v19 }
 0x133   : > { %v1473_v60 = vadd.f32 %v1472_v46, %v1295_v49  ;;  %1925 = vst [vmem:[%s2856_s9 + $0x58] sm:$0xff] %v2226_v50  ;;  %v879_v63 = vpop.f32.mrb[24].mxu0  ;;  %v1039_v31 = vpop.f32.mrb[24].mxu1 }
 0x134   : > { %v880_v1 = vadd.f32 %v879_v63, %v2846_v38  ;;  %v881_v5 = vpop.f32.mrb[25].mxu0  ;;  %v1041_v40 = vpop.f32.mrb[25].mxu1  ;;  %v2258_v41 = vpack.c.bf16 %v2998_v20, %v2993_v9 }
 0x135   : > { %v882_v7 = vadd.f32 %v881_v5, %v2848_v19  ;;  %v883_v8 = vpop.f32.mrb[26].mxu0  ;;  %v3008_v44 = vadd.f32 %v1041_v40, %v2848_v19  ;;  %v1043_v45 = vpop.f32.mrb[26].mxu1 }
 0x136   : > { %v1151_v10 = vadd.f32 %v1150_v42, %v880_v1  ;;  %v1296_v12 = vmul.f32 %v880_v1, %v880_v1  ;;  %v884_v16 = vadd.f32 %v883_v8, %v2846_v38  ;;  %v885_v18 = vpop.f32.mrb[27].mxu0  ;;  %v3005_v42 = vadd.f32 %v1039_v31, %v2846_v38  ;;  %v1045_v49 = vpop.f32.mrb[27].mxu1  ;;  %1957 = vst [vmem:[%s2856_s9 + $0x158] sm:$0xff] %v2258_v41 }
 0x137   : > { %v1214_v21 = vadd.f32 %v1213_v47, %v882_v7  ;;  %v1297_v22 = vmul.f32 %v882_v7, %v882_v7  ;;  %v2227_v23 = vpack.c.bf16 %v882_v7, %v880_v1  ;;  %v886_v24 = vadd.f32 %v885_v18, %v2848_v19 }
 0x138   : > { %v1411_v25 = vadd.f32 %v1410_v52, %v1296_v12  ;;  %v1152_v26 = vadd.f32 %v1151_v10, %v884_v16  ;;  %v1298_v30 = vmul.f32 %v884_v16, %v884_v16  ;;  %v2259_v52 = vpack.c.bf16 %v3008_v44, %v3005_v42 }
 0x139   : > { %v1474_v32 = vadd.f32 %v1473_v60, %v1297_v22  ;;  %1926 = vst [vmem:[%s2856_s9 + $0x60] sm:$0xff] %v2227_v23  ;;  %v1215_v14 = vadd.f32 %v1214_v21, %v886_v24  ;;  %v1299_v34 = vmul.f32 %v886_v24, %v886_v24  ;;  %v2228_v37 = vpack.c.bf16 %v886_v24, %v884_v16 }
 0x13a   : > { %v1412_v2 = vadd.f32 %v1411_v25, %v1298_v30  ;;  %v3017_v60 = vadd.f32 %v1043_v45, %v2846_v38  ;;  %1958 = vst [vmem:[%s2856_s9 + $0x160] sm:$0xff] %v2259_v52  ;;  %v3022_v6 = vadd.f32 %v1045_v49, %v2848_v19 }
 0x13b   : > { %v1475_v46 = vadd.f32 %v1474_v32, %v1299_v34  ;;  %1927 = vst [vmem:[%s2856_s9 + $0x68] sm:$0xff] %v2228_v37  ;;  %v889_v47 = vpop.f32.mrb[28].mxu0  ;;  %v1049_v22 = vpop.f32.mrb[28].mxu1 }
 0x13c   : > { %v890_v50 = vadd.f32 %v889_v47, %v2846_v38  ;;  %v891_v51 = vpop.f32.mrb[29].mxu0  ;;  %v1051_v30 = vpop.f32.mrb[29].mxu1  ;;  %v2260_v32 = vpack.c.bf16 %v3022_v6, %v3017_v60 }
 0x13d   : > { %v892_v54 = vadd.f32 %v891_v51, %v2848_v19  ;;  %v893_v59 = vpop.f32.mrb[30].mxu0  ;;  %v3032_v34 = vadd.f32 %v1051_v30, %v2848_v19  ;;  %v1053_v37 = vpop.f32.mrb[30].mxu1 }
 0x13e   : > { %v1153_v63 = vadd.f32 %v1152_v26, %v890_v50  ;;  %v1300_v0 = vmul.f32 %v890_v50, %v890_v50  ;;  %v894_v1 = vadd.f32 %v893_v59, %v2846_v38  ;;  %v895_v5 = vpop.f32.mrb[31].mxu0  ;;  %v1055_v41 = vpop.f32.mrb[31].mxu1  ;;  %1959 = vst [vmem:[%s2856_s9 + $0x168] sm:$0xff] %v2260_v32  ;;  %v3041_v51 = vadd.f32 %v1053_v37, %v2846_v38 }
 0x13f   : > { %v1216_v7 = vadd.f32 %v1215_v14, %v892_v54  ;;  %v1301_v8 = vmul.f32 %v892_v54, %v892_v54  ;;  %v2229_v10 = vpack.c.bf16 %v892_v54, %v890_v50  ;;  %v896_v12 = vadd.f32 %v895_v5, %v2848_v19 }
 0x140   : > { %v1413_v16 = vadd.f32 %v1412_v2, %v1300_v0  ;;  %v1154_v18 = vadd.f32 %v1153_v63, %v894_v1  ;;  %v1302_v21 = vmul.f32 %v894_v1, %v894_v1  ;;  %v3029_v14 = vadd.f32 %v1049_v22, %v2846_v38 }
 0x141   : > { %v1476_v23 = vadd.f32 %v1475_v46, %v1301_v8  ;;  %1928 = vst [vmem:[%s2856_s9 + $0x70] sm:$0xff] %v2229_v10  ;;  %v1217_v24 = vadd.f32 %v1216_v7, %v896_v12  ;;  %v1303_v25 = vmul.f32 %v896_v12, %v896_v12  ;;  %v2230_v26 = vpack.c.bf16 %v896_v12, %v894_v1 }
 0x142   : > { %v1414_v31 = vadd.f32 %v1413_v16, %v1302_v21  ;;  %v2261_v47 = vpack.c.bf16 %v3032_v34, %v3029_v14  ;;  %v3046_v0 = vadd.f32 %v1055_v41, %v2848_v19 }
 0x143   : > { %v1477_v40 = vadd.f32 %v1476_v23, %v1303_v25  ;;  %1929 = vst [vmem:[%s2856_s9 + $0x78] sm:$0xff] %v2230_v26  ;;  %v899_v2 = vpop.f32.mrb[32].mxu0  ;;  %v1059_v21 = vpop.f32.mrb[32].mxu1 }
 0x144   : > { %v900_v45 = vadd.f32 %v899_v2, %v2846_v38  ;;  %v901_v46 = vpop.f32.mrb[33].mxu0  ;;  %1960 = vst [vmem:[%s2856_s9 + $0x170] sm:$0xff] %v2261_v47  ;;  %v1061_v26 = vpop.f32.mrb[33].mxu1  ;;  %v3053_v32 = vadd.f32 %v1059_v21, %v2846_v38 }
 0x145   : > { %v902_v49 = vadd.f32 %v901_v46, %v2848_v19  ;;  %v903_v50 = vpop.f32.mrb[34].mxu0  ;;  %v1063_v37 = vpop.f32.mrb[34].mxu1 }
 0x146   : > { %v1155_v52 = vadd.f32 %v1154_v18, %v900_v45  ;;  %v1304_v54 = vmul.f32 %v900_v45, %v900_v45  ;;  %v904_v59 = vadd.f32 %v903_v50, %v2846_v38  ;;  %v905_v63 = vpop.f32.mrb[35].mxu0  ;;  %v1065_v41 = vpop.f32.mrb[35].mxu1 }
 0x147   : > { %v1218_v1 = vadd.f32 %v1217_v24, %v902_v49  ;;  %v1305_v5 = vmul.f32 %v902_v49, %v902_v49  ;;  %v2231_v7 = vpack.c.bf16 %v902_v49, %v900_v45  ;;  %v906_v8 = vadd.f32 %v905_v63, %v2848_v19 }
 0x148   : > { %v1415_v10 = vadd.f32 %v1414_v31, %v1304_v54  ;;  %v1156_v12 = vadd.f32 %v1155_v52, %v904_v59  ;;  %v1306_v16 = vmul.f32 %v904_v59, %v904_v59  ;;  %v2262_v24 = vpack.c.bf16 %v3046_v0, %v3041_v51 }
 0x149   : > { %v1478_v22 = vadd.f32 %v1477_v40, %v1305_v5  ;;  %1930 = vst [vmem:[%s2856_s9 + $0x80] sm:$0xff] %v2231_v7  ;;  %v1219_v18 = vadd.f32 %v1218_v1, %v906_v8  ;;  %v1307_v23 = vmul.f32 %v906_v8, %v906_v8  ;;  %v2232_v25 = vpack.c.bf16 %v906_v8, %v904_v59 }
 0x14a   : > { %v1416_v30 = vadd.f32 %v1415_v10, %v1306_v16  ;;  %v3056_v31 = vadd.f32 %v1061_v26, %v2848_v19  ;;  %1961 = vst [vmem:[%s2856_s9 + $0x178] sm:$0xff] %v2262_v24  ;;  %v3065_v52 = vadd.f32 %v1063_v37, %v2846_v38  ;;  %v3070_v5 = vadd.f32 %v1065_v41, %v2848_v19 }
 0x14b   : > { %v1479_v2 = vadd.f32 %v1478_v22, %v1307_v23  ;;  %1931 = vst [vmem:[%s2856_s9 + $0x88] sm:$0xff] %v2232_v25  ;;  %v909_v40 = vpop.f32.mrb[36].mxu0  ;;  %v1069_v25 = vpop.f32.mrb[36].mxu1 }
 0x14c   : > { %v910_v45 = vadd.f32 %v909_v40, %v2846_v38  ;;  %v911_v46 = vpop.f32.mrb[37].mxu0  ;;  %v2263_v47 = vpack.c.bf16 %v3056_v31, %v3053_v32  ;;  %v1071_v40 = vpop.f32.mrb[37].mxu1  ;;  %v3077_v41 = vadd.f32 %v1069_v25, %v2846_v38 }
 0x14d   : > { %v912_v49 = vadd.f32 %v911_v46, %v2848_v19  ;;  %v913_v50 = vpop.f32.mrb[38].mxu0 }
 0x14e   : > { %v1157_v54 = vadd.f32 %v1156_v12, %v910_v45  ;;  %v1308_v59 = vmul.f32 %v910_v45, %v910_v45  ;;  %v914_v63 = vadd.f32 %v913_v50, %v2846_v38  ;;  %v915_v1 = vpop.f32.mrb[39].mxu0  ;;  %1962 = vst [vmem:[%s2856_s9 + $0x180] sm:$0xff] %v2263_v47  ;;  %3500 = vst [vmem:[#allocation2_spill] sm:$0xff] %v3077_v41 }
 0x14f   : > { %v1220_v7 = vadd.f32 %v1219_v18, %v912_v49  ;;  %v1309_v8 = vmul.f32 %v912_v49, %v912_v49  ;;  %v2233_v10 = vpack.c.bf16 %v912_v49, %v910_v45  ;;  %v916_v16 = vadd.f32 %v915_v1, %v2848_v19  ;;  %v1073_v45 = vpop.f32.mrb[38].mxu1 }
 0x150   : > { %v1417_v21 = vadd.f32 %v1416_v30, %v1308_v59  ;;  %v1158_v22 = vadd.f32 %v1157_v54, %v914_v63  ;;  %v1310_v23 = vmul.f32 %v914_v63, %v914_v63  ;;  %v2264_v18 = vpack.c.bf16 %v3070_v5, %v3065_v52  ;;  %v1075_v49 = vpop.f32.mrb[39].mxu1 }
 0x151   : > { %v1480_v26 = vadd.f32 %v1479_v2, %v1309_v8  ;;  %1932 = vst [vmem:[%s2856_s9 + $0x90] sm:$0xff] %v2233_v10  ;;  %v1221_v12 = vadd.f32 %v1220_v7, %v916_v16  ;;  %v1311_v24 = vmul.f32 %v916_v16, %v916_v16  ;;  %v2234_v37 = vpack.c.bf16 %v916_v16, %v914_v63 }
 0x152   : > { %v1418_v46 = vadd.f32 %v1417_v21, %v1310_v23  ;;  %v3080_v30 = vadd.f32 %v1071_v40, %v2848_v19  ;;  %1963 = vst [vmem:[%s2856_s9 + $0x188] sm:$0xff] %v2264_v18  ;;  %v3089_v7 = vadd.f32 %v1073_v45, %v2846_v38  ;;  %v3094_v23 = vadd.f32 %v1075_v49, %v2848_v19 }
 0x153   : > { %v1481_v47 = vadd.f32 %v1480_v26, %v1311_v24  ;;  %1933 = vst [vmem:[%s2856_s9 + $0x98] sm:$0xff] %v2234_v37  ;;  %v919_v2 = vpop.f32.mrb[40].mxu0 }
 0x154   : > { %3501 = vst [vmem:[#allocation3_spill] sm:$0xff] %v3080_v30  ;;  %v920_v50 = vadd.f32 %v919_v2, %v2846_v38  ;;  %v921_v54 = vpop.f32.mrb[41].mxu0  ;;  %v2265_v59 = vpack.c.bf16 %v3080_v30, %v3077_v41  ;;  %3502 = vst [vmem:[#allocation4_spill] sm:$0xff] %v3089_v7  ;;  %v1079_v2 = vpop.f32.mrb[40].mxu1 }
 0x155   : > { %v922_v63 = vadd.f32 %v921_v54, %v2848_v19  ;;  %v923_v1 = vpop.f32.mrb[42].mxu0  ;;  %3503 = vst [vmem:[#allocation5_spill] sm:$0xff] %v3094_v23  ;;  %v3101_v49 = vadd.f32 %v1079_v2, %v2846_v38 }
 0x156   : > { %v1159_v8 = vadd.f32 %v1158_v22, %v920_v50  ;;  %v1312_v10 = vmul.f32 %v920_v50, %v920_v50  ;;  %v924_v16 = vadd.f32 %v923_v1, %v2846_v38  ;;  %v925_v21 = vpop.f32.mrb[43].mxu0  ;;  %1964 = vst [vmem:[%s2856_s9 + $0x190] sm:$0xff] %v2265_v59  ;;  %v1081_v59 = vpop.f32.mrb[41].mxu1 }
 0x157   : > { %v1222_v25 = vadd.f32 %v1221_v12, %v922_v63  ;;  %v1313_v26 = vmul.f32 %v922_v63, %v922_v63  ;;  %v2235_v24 = vpack.c.bf16 %v922_v63, %v920_v50  ;;  %v926_v37 = vadd.f32 %v925_v21, %v2848_v19  ;;  %3504 = vst [vmem:[#allocation6_spill] sm:$0xff] %v3101_v49  ;;  %v1083_v50 = vpop.f32.mrb[42].mxu1 }
 0x158   : > { %v1419_v40 = vadd.f32 %v1418_v46, %v1312_v10  ;;  %v1160_v18 = vadd.f32 %v1159_v8, %v924_v16  ;;  %v1314_v45 = vmul.f32 %v924_v16, %v924_v16  ;;  %v2266_v12 = vpack.c.bf16 %v3094_v23, %v3089_v7  ;;  %v1085_v8 = vpop.f32.mrb[43].mxu1 }
 0x159   : > { %v1482_v54 = vadd.f32 %v1481_v47, %v1313_v26  ;;  %1934 = vst [vmem:[%s2856_s9 + $0xa0] sm:$0xff] %v2235_v24  ;;  %v1223_v22 = vadd.f32 %v1222_v25, %v926_v37  ;;  %v1315_v1 = vmul.f32 %v926_v37, %v926_v37  ;;  %v2236_v30 = vpack.c.bf16 %v926_v37, %v924_v16 }
 0x15a   : > { %v1420_v41 = vadd.f32 %v1419_v40, %v1314_v45  ;;  %v3104_v46 = vadd.f32 %v1081_v59, %v2848_v19  ;;  %1965 = vst [vmem:[%s2856_s9 + $0x198] sm:$0xff] %v2266_v12  ;;  %v3113_v24 = vadd.f32 %v1083_v50, %v2846_v38  ;;  %v3118_v2 = vadd.f32 %v1085_v8, %v2848_v19 }
 0x15b   : > { %v1483_v63 = vadd.f32 %v1482_v54, %v1315_v1  ;;  %1935 = vst [vmem:[%s2856_s9 + $0xa8] sm:$0xff] %v2236_v30  ;;  %v929_v47 = vpop.f32.mrb[44].mxu0 }
 0x15c   : > { %3505 = vst [vmem:[#allocation7_spill] sm:$0xff] %v3104_v46  ;;  %v930_v10 = vadd.f32 %v929_v47, %v2846_v38  ;;  %v931_v16 = vpop.f32.mrb[45].mxu0  ;;  %v2267_v21 = vpack.c.bf16 %v3104_v46, %v3101_v49  ;;  %3506 = vst [vmem:[#allocation8_spill] sm:$0xff] %v3113_v24  ;;  %v1089_v46 = vpop.f32.mrb[44].mxu1 }
 0x15d   : > { %v932_v25 = vadd.f32 %v931_v16, %v2848_v19  ;;  %v933_v26 = vpop.f32.mrb[46].mxu0  ;;  %3507 = vst [vmem:[#allocation9_spill] sm:$0xff] %v3118_v2  ;;  %v3125_v8 = vadd.f32 %v1089_v46, %v2846_v38 }
 0x15e   : > { %v1161_v37 = vadd.f32 %v1160_v18, %v930_v10  ;;  %v1316_v40 = vmul.f32 %v930_v10, %v930_v10  ;;  %v934_v30 = vadd.f32 %v933_v26, %v2846_v38  ;;  %v935_v45 = vpop.f32.mrb[47].mxu0  ;;  %1966 = vst [vmem:[%s2856_s9 + $0x1a0] sm:$0xff] %v2267_v21  ;;  %v1091_v21 = vpop.f32.mrb[45].mxu1 }
 0x15f   : > { %v1224_v54 = vadd.f32 %v1223_v22, %v932_v25  ;;  %v1317_v1 = vmul.f32 %v932_v25, %v932_v25  ;;  %v2237_v59 = vpack.c.bf16 %v932_v25, %v930_v10  ;;  %v936_v12 = vadd.f32 %v935_v45, %v2848_v19  ;;  %3508 = vst [vmem:[#allocation10_spill] sm:$0xff] %v3125_v8  ;;  %v1093_v10 = vpop.f32.mrb[46].mxu1 }
 0x160   : > { %v1421_v47 = vadd.f32 %v1420_v41, %v1316_v40  ;;  %v1162_v16 = vadd.f32 %v1161_v37, %v934_v30  ;;  %v1318_v50 = vmul.f32 %v934_v30, %v934_v30  ;;  %v2268_v22 = vpack.c.bf16 %v3118_v2, %v3113_v24  ;;  %v1095_v37 = vpop.f32.mrb[47].mxu1 }
 0x161   : > { %v1484_v49 = vadd.f32 %v1483_v63, %v1317_v1  ;;  %1936 = vst [vmem:[%s2856_s9 + $0xb0] sm:$0xff] %v2237_v59  ;;  %v1225_v18 = vadd.f32 %v1224_v54, %v936_v12  ;;  %v1319_v26 = vmul.f32 %v936_v12, %v936_v12  ;;  %v2238_v23 = vpack.c.bf16 %v936_v12, %v934_v30 }
 0x162   : > { %v1422_v7 = vadd.f32 %v1421_v47, %v1318_v50  ;;  %v3128_v41 = vadd.f32 %v1091_v21, %v2848_v19  ;;  %1967 = vst [vmem:[%s2856_s9 + $0x1a8] sm:$0xff] %v2268_v22  ;;  %v3137_v1 = vadd.f32 %v1093_v10, %v2846_v38  ;;  %v3142_v47 = vadd.f32 %v1095_v37, %v2848_v19 }
 0x163   : > { %v1485_v25 = vadd.f32 %v1484_v49, %v1319_v26  ;;  %1937 = vst [vmem:[%s2856_s9 + $0xb8] sm:$0xff] %v2238_v23  ;;  %v939_v63 = vpop.f32.mrb[48].mxu0 }
 0x164   : > { %3509 = vst [vmem:[#allocation11_spill] sm:$0xff] %v3128_v41  ;;  %v940_v40 = vadd.f32 %v939_v63, %v2846_v38  ;;  %v941_v30 = vpop.f32.mrb[49].mxu0  ;;  %v2269_v45 = vpack.c.bf16 %v3128_v41, %v3125_v8  ;;  %3510 = vst [vmem:[#allocation12_spill] sm:$0xff] %v3137_v1  ;;  %v1099_v41 = vpop.f32.mrb[48].mxu1 }
 0x165   : > { %v942_v54 = vadd.f32 %v941_v30, %v2848_v19  ;;  %v943_v46 = vpop.f32.mrb[50].mxu0  ;;  %3511 = vst [vmem:[#allocation13_spill] sm:$0xff] %v3142_v47  ;;  %v3149_v37 = vadd.f32 %v1099_v41, %v2846_v38 }
 0x166   : > { %v1163_v59 = vadd.f32 %v1162_v16, %v940_v40  ;;  %v1320_v12 = vmul.f32 %v940_v40, %v940_v40  ;;  %v944_v23 = vadd.f32 %v943_v46, %v2846_v38  ;;  %v945_v49 = vpop.f32.mrb[51].mxu0  ;;  %1968 = vst [vmem:[%s2856_s9 + $0x1b0] sm:$0xff] %v2269_v45  ;;  %v1101_v45 = vpop.f32.mrb[49].mxu1 }
 0x167   : > { %v1226_v50 = vadd.f32 %v1225_v18, %v942_v54  ;;  %v1321_v26 = vmul.f32 %v942_v54, %v942_v54  ;;  %v2239_v21 = vpack.c.bf16 %v942_v54, %v940_v40  ;;  %v946_v22 = vadd.f32 %v945_v49, %v2848_v19  ;;  %3512 = vst [vmem:[#allocation14_spill] sm:$0xff] %v3149_v37  ;;  %v1103_v40 = vpop.f32.mrb[50].mxu1 }
 0x168   : > { %v1423_v63 = vadd.f32 %v1422_v7, %v1320_v12  ;;  %v1164_v30 = vadd.f32 %v1163_v59, %v944_v23  ;;  %v1322_v10 = vmul.f32 %v944_v23, %v944_v23  ;;  %v2270_v18 = vpack.c.bf16 %v3142_v47, %v3137_v1  ;;  %v1105_v59 = vpop.f32.mrb[51].mxu1 }
 0x169   : > { %v1486_v8 = vadd.f32 %v1485_v25, %v1321_v26  ;;  %1938 = vst [vmem:[%s2856_s9 + $0xc0] sm:$0xff] %v2239_v21  ;;  %v1227_v16 = vadd.f32 %v1226_v50, %v946_v22  ;;  %v1323_v46 = vmul.f32 %v946_v22, %v946_v22  ;;  %v2240_v2 = vpack.c.bf16 %v946_v22, %v944_v23 }
 0x16a   : > { %v1424_v24 = vadd.f32 %v1423_v63, %v1322_v10  ;;  %v3152_v7 = vadd.f32 %v1101_v45, %v2848_v19  ;;  %1969 = vst [vmem:[%s2856_s9 + $0x1b8] sm:$0xff] %v2270_v18  ;;  %v3161_v26 = vadd.f32 %v1103_v40, %v2846_v38  ;;  %v3166_v63 = vadd.f32 %v1105_v59, %v2848_v19 }
 0x16b   : > { %v1487_v54 = vadd.f32 %v1486_v8, %v1323_v46  ;;  %1939 = vst [vmem:[%s2856_s9 + $0xc8] sm:$0xff] %v2240_v2  ;;  %v949_v25 = vpop.f32.mrb[52].mxu0 }
 0x16c   : > { %3513 = vst [vmem:[#allocation15_spill] sm:$0xff] %v3152_v7  ;;  %v950_v12 = vadd.f32 %v949_v25, %v2846_v38  ;;  %v951_v23 = vpop.f32.mrb[53].mxu0  ;;  %v2271_v49 = vpack.c.bf16 %v3152_v7, %v3149_v37  ;;  %3514 = vst [vmem:[#allocation16_spill] sm:$0xff] %v3161_v26  ;;  %v1109_v7 = vpop.f32.mrb[52].mxu1 }
 0x16d   : > { %v952_v50 = vadd.f32 %v951_v23, %v2848_v19  ;;  %v953_v41 = vpop.f32.mrb[54].mxu0  ;;  %3515 = vst [vmem:[#allocation17_spill] sm:$0xff] %v3166_v63  ;;  %v3173_v59 = vadd.f32 %v1109_v7, %v2846_v38 }
 0x16e   : > { %v1165_v21 = vadd.f32 %v1164_v30, %v950_v12  ;;  %v1324_v22 = vmul.f32 %v950_v12, %v950_v12  ;;  %v954_v2 = vadd.f32 %v953_v41, %v2846_v38  ;;  %v955_v8 = vpop.f32.mrb[55].mxu0  ;;  %1970 = vst [vmem:[%s2856_s9 + $0x1c0] sm:$0xff] %v2271_v49  ;;  %v1111_v49 = vpop.f32.mrb[53].mxu1 }
 0x16f   : > { %v1228_v10 = vadd.f32 %v1227_v16, %v952_v50  ;;  %v1325_v46 = vmul.f32 %v952_v50, %v952_v50  ;;  %v2241_v45 = vpack.c.bf16 %v952_v50, %v950_v12  ;;  %v956_v18 = vadd.f32 %v955_v8, %v2848_v19  ;;  %3516 = vst [vmem:[#allocation18_spill] sm:$0xff] %v3173_v59  ;;  %v1113_v12 = vpop.f32.mrb[54].mxu1 }
 0x170   : > { %v1425_v25 = vadd.f32 %v1424_v24, %v1324_v22  ;;  %v1166_v23 = vadd.f32 %v1165_v21, %v954_v2  ;;  %v1326_v40 = vmul.f32 %v954_v2, %v954_v2  ;;  %v2272_v16 = vpack.c.bf16 %v3166_v63, %v3161_v26  ;;  %v1115_v21 = vpop.f32.mrb[55].mxu1 }
 0x171   : > { %v1488_v37 = vadd.f32 %v1487_v54, %v1325_v46  ;;  %1940 = vst [vmem:[%s2856_s9 + $0xd0] sm:$0xff] %v2241_v45  ;;  %v1229_v30 = vadd.f32 %v1228_v10, %v956_v18  ;;  %v1327_v41 = vmul.f32 %v956_v18, %v956_v18  ;;  %v2242_v47 = vpack.c.bf16 %v956_v18, %v954_v2 }
 0x172   : > { %v1426_v1 = vadd.f32 %v1425_v25, %v1326_v40  ;;  %v3176_v24 = vadd.f32 %v1111_v49, %v2848_v19  ;;  %1971 = vst [vmem:[%s2856_s9 + $0x1c8] sm:$0xff] %v2272_v16  ;;  %v3185_v46 = vadd.f32 %v1113_v12, %v2846_v38  ;;  %v3190_v25 = vadd.f32 %v1115_v21, %v2848_v19 }
 0x173   : > { %v1489_v50 = vadd.f32 %v1488_v37, %v1327_v41  ;;  %1941 = vst [vmem:[%s2856_s9 + $0xd8] sm:$0xff] %v2242_v47  ;;  %v959_v54 = vpop.f32.mrb[56].mxu0 }
 0x174   : > { %3517 = vst [vmem:[#allocation19_spill] sm:$0xff] %v3176_v24  ;;  %v960_v22 = vadd.f32 %v959_v54, %v2846_v38  ;;  %v961_v2 = vpop.f32.mrb[57].mxu0  ;;  %v2273_v8 = vpack.c.bf16 %v3176_v24, %v3173_v59  ;;  %3518 = vst [vmem:[#allocation20_spill] sm:$0xff] %v3185_v46  ;;  %v1119_v24 = vpop.f32.mrb[56].mxu1 }
 0x175   : > { %v962_v10 = vadd.f32 %v961_v2, %v2848_v19  ;;  %v963_v7 = vpop.f32.mrb[58].mxu0  ;;  %3519 = vst [vmem:[#allocation21_spill] sm:$0xff] %v3190_v25  ;;  %v3197_v21 = vadd.f32 %v1119_v24, %v2846_v38  ;;  %v1336_v24 = vmul.f32 %v2862_v55, %v2862_v55 }
 0x176   : > { %v1167_v45 = vadd.f32 %v1166_v23, %v960_v22  ;;  %v1328_v18 = vmul.f32 %v960_v22, %v960_v22  ;;  %v964_v47 = vadd.f32 %v963_v7, %v2846_v38  ;;  %v965_v37 = vpop.f32.mrb[59].mxu0  ;;  %1972 = vst [vmem:[%s2856_s9 + $0x1d0] sm:$0xff] %v2273_v8  ;;  %v1121_v8 = vpop.f32.mrb[57].mxu1 }
 0x177   : > { %v1230_v40 = vadd.f32 %v1229_v30, %v962_v10  ;;  %v1329_v41 = vmul.f32 %v962_v10, %v962_v10  ;;  %v2243_v49 = vpack.c.bf16 %v962_v10, %v960_v22  ;;  %v966_v16 = vadd.f32 %v965_v37, %v2848_v19  ;;  %3520 = vst [vmem:[#allocation22_spill] sm:$0xff] %v3197_v21  ;;  %v1123_v22 = vpop.f32.mrb[58].mxu1 }
 0x178   : > { %v1427_v54 = vadd.f32 %v1426_v1, %v1328_v18  ;;  %v1168_v2 = vadd.f32 %v1167_v45, %v964_v47  ;;  %v1330_v12 = vmul.f32 %v964_v47, %v964_v47  ;;  %v2274_v30 = vpack.c.bf16 %v3190_v25, %v3185_v46  ;;  %v1125_v45 = vpop.f32.mrb[59].mxu1 }
 0x179   : > { %v1490_v59 = vadd.f32 %v1489_v50, %v1329_v41  ;;  %1942 = vst [vmem:[%s2856_s9 + $0xe0] sm:$0xff] %v2243_v49  ;;  %v1231_v23 = vadd.f32 %v1230_v40, %v966_v16  ;;  %v1331_v7 = vmul.f32 %v966_v16, %v966_v16  ;;  %v2244_v63 = vpack.c.bf16 %v966_v16, %v964_v47 }
 0x17a   : > { %v1428_v26 = vadd.f32 %v1427_v54, %v1330_v12  ;;  %v3200_v1 = vadd.f32 %v1121_v8, %v2848_v19  ;;  %1973 = vst [vmem:[%s2856_s9 + $0x1d8] sm:$0xff] %v2274_v30  ;;  %v3211_v49 = vadd.f32 %v1123_v22, %v2846_v38  ;;  %v3216_v12 = vadd.f32 %v1125_v45, %v2848_v19 }
 0x17b   : > { %v1491_v10 = vadd.f32 %v1490_v59, %v1331_v7  ;;  %1943 = vst [vmem:[%s2856_s9 + $0xe8] sm:$0xff] %v2244_v63  ;;  %v969_v50 = vpop.f32.mrb[60].mxu0 }
 0x17c   : > { %3521 = vst [vmem:[#allocation23_spill] sm:$0xff] %v3200_v1  ;;  %v970_v18 = vadd.f32 %v969_v50, %v2846_v38  ;;  %v971_v47 = vpop.f32.mrb[61].mxu0  ;;  %v2275_v37 = vpack.c.bf16 %v3200_v1, %v3197_v21  ;;  %v1129_v21 = vpop.f32.mrb[60].mxu1 }
 0x17d   : > { %v972_v40 = vadd.f32 %v971_v47, %v2848_v19  ;;  %v973_v41 = vpop.f32.mrb[62].mxu0  ;;  %v1337_v47 = vmul.f32 %v2865_v58, %v2865_v58  ;;  %v1131_v45 = vpop.f32.mrb[61].mxu1 }
 0x17e   : > { %v1169_v59 = vadd.f32 %v1168_v2, %v970_v18  ;;  %v1332_v63 = vmul.f32 %v970_v18, %v970_v18  ;;  %v974_v16 = vadd.f32 %v973_v41, %v2846_v38  ;;  %v975_v54 = vpop.f32.mrb[63].mxu0  ;;  %1974 = vst [vmem:[%s2856_s9 + $0x1e0] sm:$0xff] %v2275_v37 }
 0x17f   : > { %v1232_v7 = vadd.f32 %v1231_v23, %v972_v40  ;;  %v1333_v8 = vmul.f32 %v972_v40, %v972_v40  ;;  %v2245_v30 = vpack.c.bf16 %v972_v40, %v970_v18  ;;  %v976_v50 = vadd.f32 %v975_v54, %v2848_v19 }
 0x180   : > { %v1429_v22 = vadd.f32 %v1428_v26, %v1332_v63  ;;  %v1170_v1 = vadd.f32 %v1169_v59, %v974_v16  ;;  %v1334_v2 = vmul.f32 %v974_v16, %v974_v16  ;;  %v2276_v40 = vpack.c.bf16 %v3216_v12, %v3211_v49  ;;  %v1133_v26 = vpop.f32.mrb[62].mxu1 }
 0x181   : > { %v1492_v25 = vadd.f32 %v1491_v10, %v1333_v8  ;;  %1944 = vst [vmem:[%s2856_s9 + $0xf0] sm:$0xff] %v2245_v30  ;;  %v1233_v41 = vadd.f32 %v1232_v7, %v976_v50  ;;  %v1335_v37 = vmul.f32 %v976_v50, %v976_v50  ;;  %v2246_v46 = vpack.c.bf16 %v976_v50, %v974_v16  ;;  %v1135_v7 = vpop.f32.mrb[63].mxu1 }
 0x182   : > { %v1171_v23 = vadd.f32 %v1170_v1, %v2862_v55  ;;  %v1430_v18 = vadd.f32 %v1429_v22, %v1334_v2  ;;  %v3226_v54 = vadd.f32 %v1129_v21, %v2846_v38  ;;  %v3231_v10 = vadd.f32 %v1131_v45, %v2848_v19  ;;  %1975 = vst [vmem:[%s2856_s9 + $0x1e8] sm:$0xff] %v2276_v40 }
 0x183   : > { %v1234_v59 = vadd.f32 %v1233_v41, %v2865_v58  ;;  %v1493_v63 = vadd.f32 %v1492_v25, %v1335_v37  ;;  %1945 = vst [vmem:[%s2856_s9 + $0xf8] sm:$0xff] %v2246_v46  ;;  %v3234_v16 = vadd.f32 %v1133_v26, %v2846_v38  ;;  %v1338_v55 = vmul.f32 %v2872_v3, %v2872_v3 }
 0x184   : > { %v1172_v1 = vadd.f32 %v1171_v23, %v2872_v3  ;;  %v1431_v21 = vadd.f32 %v1430_v18, %v1336_v24  ;;  %v3241_v8 = vadd.f32 %v1135_v7, %v2848_v19  ;;  %v1339_v58 = vmul.f32 %v2875_v4, %v2875_v4 }
 0x185   : > { %v1235_v46 = vadd.f32 %v1234_v59, %v2875_v4  ;;  %v1494_v25 = vadd.f32 %v1493_v63, %v1337_v47  ;;  %v2277_v38 = vpack.c.bf16 %v3231_v10, %v3226_v54  ;;  %v1340_v30 = vmul.f32 %v2886_v28, %v2886_v28 }
 0x186   : > { %v1173_v3 = vadd.f32 %v1172_v1, %v2886_v28  ;;  %v1432_v24 = vadd.f32 %v1431_v21, %v1338_v55  ;;  %v1341_v19 = vmul.f32 %v2889_v29, %v2889_v29  ;;  %v2278_v4 = vpack.c.bf16 %v3241_v8, %v3234_v16 }
 0x187   : > { %v1236_v50 = vadd.f32 %v1235_v46, %v2889_v29  ;;  %v1495_v22 = vadd.f32 %v1494_v25, %v1339_v58  ;;  %1976 = vst [vmem:[%s2856_s9 + $0x1f0] sm:$0xff] %v2277_v38  ;;  %v1342_v47 = vmul.f32 %v2897_v39, %v2897_v39  ;;  %v1343_v28 = vmul.f32 %v2902_v43, %v2902_v43 }
 0x188   : > { %v1174_v2 = vadd.f32 %v1173_v3, %v2897_v39  ;;  %v1433_v41 = vadd.f32 %v1432_v24, %v1340_v30  ;;  %1977 = vst [vmem:[%s2856_s9 + $0x1f8] sm:$0xff] %v2278_v4  ;;  %v1344_v29 = vmul.f32 %v2909_v61, %v2909_v61  ;;  %v1345_v40 = vmul.f32 %v2912_v62, %v2912_v62 }
 0x189   : > { %v1237_v37 = vadd.f32 %v1236_v50, %v2902_v43  ;;  %v1496_v45 = vadd.f32 %v1495_v22, %v1341_v19  ;;  %v1346_v59 = vmul.f32 %v2921_v11, %v2921_v11  ;;  %v1347_v7 = vmul.f32 %v2926_v17, %v2926_v17 }
 0x18a   : > { %v1175_v23 = vadd.f32 %v1174_v2, %v2909_v61  ;;  %v1434_v18 = vadd.f32 %v1433_v41, %v1342_v47  ;;  %v1348_v61 = vmul.f32 %v2933_v35, %v2933_v35 }
 0x18b   : > { %v1238_v26 = vadd.f32 %v1237_v37, %v2912_v62  ;;  %v1497_v39 = vadd.f32 %v1496_v45, %v1343_v28  ;;  %v1349_v62 = vmul.f32 %v2936_v36, %v2936_v36 }
 0x18c   : > { %v1176_v63 = vadd.f32 %v1175_v23, %v2921_v11  ;;  %v1435_v43 = vadd.f32 %v1434_v18, %v1344_v29  ;;  %v1350_v11 = vmul.f32 %v2945_v48, %v2945_v48 }
 0x18d   : > { %v1239_v55 = vadd.f32 %v1238_v26, %v2926_v17  ;;  %v1498_v1 = vadd.f32 %v1497_v39, %v1345_v40  ;;  %v1351_v17 = vmul.f32 %v2950_v53, %v2950_v53 }
 0x18e   : > { %v1177_v21 = vadd.f32 %v1176_v63, %v2933_v35  ;;  %v1436_v58 = vadd.f32 %v1435_v43, %v1346_v59  ;;  %v1352_v35 = vmul.f32 %v2957_v13, %v2957_v13 }
 0x18f   : > { %v1240_v46 = vadd.f32 %v1239_v55, %v2936_v36  ;;  %v1499_v25 = vadd.f32 %v1498_v1, %v1347_v7  ;;  %v1353_v36 = vmul.f32 %v2960_v15, %v2960_v15 }
 0x190   : > { %v1178_v38 = vadd.f32 %v1177_v21, %v2945_v48  ;;  %v1437_v30 = vadd.f32 %v1436_v58, %v1348_v61  ;;  %v1354_v48 = vmul.f32 %v2969_v27, %v2969_v27 }
 0x191   : > { %v1241_v3 = vadd.f32 %v1240_v46, %v2950_v53  ;;  %v1500_v24 = vadd.f32 %v1499_v25, %v1349_v62  ;;  %v1355_v53 = vmul.f32 %v2974_v33, %v2974_v33 }
 0x192   : > { %v1438_v19 = vadd.f32 %v1437_v30, %v1350_v11  ;;  %v1179_v50 = vadd.f32 %v1178_v38, %v2957_v13  ;;  %v1356_v13 = vmul.f32 %v2981_v56, %v2981_v56 }
 0x193   : > { %v1501_v22 = vadd.f32 %v1500_v24, %v1351_v17  ;;  %v1242_v4 = vadd.f32 %v1241_v3, %v2960_v15  ;;  %v1357_v15 = vmul.f32 %v2984_v57, %v2984_v57  ;;  %v1368_v3 = vmul.f32 %v3053_v32, %v3053_v32 }
 0x194   : > { %v1180_v47 = vadd.f32 %v1179_v50, %v2969_v27  ;;  %v1439_v2 = vadd.f32 %v1438_v19, %v1352_v35  ;;  %v1358_v27 = vmul.f32 %v2993_v9, %v2993_v9  ;;  %v1369_v35 = vmul.f32 %v3056_v31, %v3056_v31 }
 0x195   : > { %v1243_v41 = vadd.f32 %v1242_v4, %v2974_v33  ;;  %v1502_v28 = vadd.f32 %v1501_v22, %v1353_v36  ;;  %v1359_v33 = vmul.f32 %v2998_v20, %v2998_v20  ;;  %v1370_v36 = vmul.f32 %v3065_v52, %v3065_v52 }
 0x196   : > { %v1181_v37 = vadd.f32 %v1180_v47, %v2981_v56  ;;  %v1440_v45 = vadd.f32 %v1439_v2, %v1354_v48  ;;  %v1360_v56 = vmul.f32 %v3005_v42, %v3005_v42  ;;  %v1371_v4 = vmul.f32 %v3070_v5, %v3070_v5  ;;  %v3522_v48 = vld [vmem:[#allocation2_spill] sm:$0xff] }
 0x197   : > { %v1244_v29 = vadd.f32 %v1243_v41, %v2984_v57  ;;  %v1503_v23 = vadd.f32 %v1502_v28, %v1355_v53  ;;  %v1361_v57 = vmul.f32 %v3008_v44, %v3008_v44  ;;  %v1372_v2 = vmul.f32 %v3522_v48, %v3522_v48  ;;  %v3523_v53 = vld [vmem:[#allocation3_spill] sm:$0xff] }
 0x198   : > { %v1182_v18 = vadd.f32 %v1181_v37, %v2993_v9  ;;  %v1441_v40 = vadd.f32 %v1440_v45, %v1356_v13  ;;  %v1362_v9 = vmul.f32 %v3017_v60, %v3017_v60  ;;  %v1373_v28 = vmul.f32 %v3523_v53, %v3523_v53 }
 0x199   : > { %v1245_v26 = vadd.f32 %v1244_v29, %v2998_v20  ;;  %v1504_v39 = vadd.f32 %v1503_v23, %v1357_v15  ;;  %v1363_v20 = vmul.f32 %v3022_v6, %v3022_v6 }
 0x19a   : > { %v1183_v59 = vadd.f32 %v1182_v18, %v3005_v42  ;;  %v1442_v63 = vadd.f32 %v1441_v40, %v1358_v27  ;;  %v1364_v42 = vmul.f32 %v3029_v14, %v3029_v14  ;;  %v3526_v18 = vld [vmem:[#allocation6_spill] sm:$0xff] }
 0x19b   : > { %v1246_v43 = vadd.f32 %v1245_v26, %v3008_v44  ;;  %v1505_v7 = vadd.f32 %v1504_v39, %v1359_v33  ;;  %v1365_v44 = vmul.f32 %v3032_v34, %v3032_v34  ;;  %v1376_v33 = vmul.f32 %v3526_v18, %v3526_v18  ;;  %v3527_v39 = vld [vmem:[#allocation7_spill] sm:$0xff] }
 0x19c   : > { %v1184_v55 = vadd.f32 %v1183_v59, %v3017_v60  ;;  %v1443_v1 = vadd.f32 %v1442_v63, %v1360_v56  ;;  %v1366_v60 = vmul.f32 %v3041_v51, %v3041_v51  ;;  %v1377_v59 = vmul.f32 %v3527_v39, %v3527_v39 }
 0x19d   : > { %v1247_v61 = vadd.f32 %v1246_v43, %v3022_v6  ;;  %v1506_v21 = vadd.f32 %v1505_v7, %v1361_v57  ;;  %v1367_v6 = vmul.f32 %v3046_v0, %v3046_v0  ;;  %v3528_v57 = vld [vmem:[#allocation8_spill] sm:$0xff] }
 0x19e   : > { %v1185_v58 = vadd.f32 %v1184_v55, %v3029_v14  ;;  %v1444_v62 = vadd.f32 %v1443_v1, %v1362_v9  ;;  %v1378_v7 = vmul.f32 %v3528_v57, %v3528_v57  ;;  %v3529_v55 = vld [vmem:[#allocation9_spill] sm:$0xff] }
 0x19f   : > { %v1248_v46 = vadd.f32 %v1247_v61, %v3032_v34  ;;  %v1507_v25 = vadd.f32 %v1506_v21, %v1363_v20  ;;  %v1379_v20 = vmul.f32 %v3529_v55, %v3529_v55  ;;  %v3530_v21 = vld [vmem:[#allocation10_spill] sm:$0xff] }
 0x1a0   : > { %v1186_v11 = vadd.f32 %v1185_v58, %v3041_v51  ;;  %v1445_v38 = vadd.f32 %v1444_v62, %v1364_v42  ;;  %v1380_v58 = vmul.f32 %v3530_v21, %v3530_v21 }
 0x1a1   : > { %v1249_v30 = vadd.f32 %v1248_v46, %v3046_v0  ;;  %v1508_v17 = vadd.f32 %v1507_v25, %v1365_v44  ;;  %v3531_v44 = vld [vmem:[#allocation11_spill] sm:$0xff] }
 0x1a2   : > { %v1187_v14 = vadd.f32 %v1186_v11, %v3053_v32  ;;  %v1446_v24 = vadd.f32 %v1445_v38, %v1366_v60  ;;  %v1381_v25 = vmul.f32 %v3531_v44, %v3531_v44  ;;  %v3532_v11 = vld [vmem:[#allocation12_spill] sm:$0xff] }
 0x1a3   : > { %v1250_v34 = vadd.f32 %v1249_v30, %v3056_v31  ;;  %v1509_v19 = vadd.f32 %v1508_v17, %v1367_v6  ;;  %v1382_v6 = vmul.f32 %v3532_v11, %v3532_v11  ;;  %v3533_v17 = vld [vmem:[#allocation13_spill] sm:$0xff] }
 0x1a4   : > { %v1447_v51 = vadd.f32 %v1446_v24, %v1368_v3  ;;  %v1188_v50 = vadd.f32 %v1187_v14, %v3065_v52  ;;  %v3524_v52 = vld [vmem:[#allocation4_spill] sm:$0xff]  ;;  %v1383_v3 = vmul.f32 %v3533_v17, %v3533_v17 }
 0x1a5   : > { %v1510_v0 = vadd.f32 %v1509_v19, %v1369_v35  ;;  %v1251_v22 = vadd.f32 %v1250_v34, %v3070_v5  ;;  %v1374_v45 = vmul.f32 %v3524_v52, %v3524_v52  ;;  %v3525_v5 = vld [vmem:[#allocation5_spill] sm:$0xff]  ;;  %v3534_v34 = vld [vmem:[#allocation14_spill] sm:$0xff] }
 0x1a6   : > { %v1448_v32 = vadd.f32 %v1447_v51, %v1370_v36  ;;  %v1189_v47 = vadd.f32 %v1188_v50, %v3522_v48  ;;  %v1375_v23 = vmul.f32 %v3525_v5, %v3525_v5  ;;  %v1384_v19 = vmul.f32 %v3534_v34, %v3534_v34  ;;  %v3535_v50 = vld [vmem:[#allocation15_spill] sm:$0xff] }
 0x1a7   : > { %v1511_v31 = vadd.f32 %v1510_v0, %v1371_v4  ;;  %v1252_v41 = vadd.f32 %v1251_v22, %v3523_v53  ;;  %v1385_v0 = vmul.f32 %v3535_v50, %v3535_v50  ;;  %v3536_v4 = vld [vmem:[#allocation16_spill] sm:$0xff] }
 0x1a8   : > { %v1449_v13 = vadd.f32 %v1448_v32, %v1372_v2  ;;  %v1190_v37 = vadd.f32 %v1189_v47, %v3524_v52  ;;  %v1386_v48 = vmul.f32 %v3536_v4, %v3536_v4  ;;  %v3537_v2 = vld [vmem:[#allocation17_spill] sm:$0xff] }
 0x1a9   : > { %v1512_v15 = vadd.f32 %v1511_v31, %v1373_v28  ;;  %v1253_v29 = vadd.f32 %v1252_v41, %v3525_v5  ;;  %v1387_v53 = vmul.f32 %v3537_v2, %v3537_v2  ;;  %v3538_v28 = vld [vmem:[#allocation18_spill] sm:$0xff] }
 0x1aa   : > { %v1450_v27 = vadd.f32 %v1449_v13, %v1374_v45  ;;  %v1191_v40 = vadd.f32 %v1190_v37, %v3526_v18  ;;  %v1388_v52 = vmul.f32 %v3538_v28, %v3538_v28  ;;  %v3539_v45 = vld [vmem:[#allocation19_spill] sm:$0xff] }
 0x1ab   : > { %v1513_v26 = vadd.f32 %v1512_v15, %v1375_v23  ;;  %v1254_v56 = vadd.f32 %v1253_v29, %v3527_v39  ;;  %v1389_v5 = vmul.f32 %v3539_v45, %v3539_v45  ;;  %v3540_v23 = vld [vmem:[#allocation20_spill] sm:$0xff] }
 0x1ac   : > { %v1451_v63 = vadd.f32 %v1450_v27, %v1376_v33  ;;  %v1192_v43 = vadd.f32 %v1191_v40, %v3528_v57  ;;  %v1390_v18 = vmul.f32 %v3540_v23, %v3540_v23  ;;  %v3541_v33 = vld [vmem:[#allocation21_spill] sm:$0xff] }
 0x1ad   : > { %v1514_v9 = vadd.f32 %v1513_v26, %v1377_v59  ;;  %v1255_v1 = vadd.f32 %v1254_v56, %v3529_v55  ;;  %v1391_v39 = vmul.f32 %v3541_v33, %v3541_v33  ;;  %v3542_v59 = vld [vmem:[#allocation22_spill] sm:$0xff] }
 0x1ae   : > { %v1452_v61 = vadd.f32 %v1451_v63, %v1378_v7  ;;  %v1193_v42 = vadd.f32 %v1192_v43, %v3530_v21  ;;  %v1392_v57 = vmul.f32 %v3542_v59, %v3542_v59  ;;  %v3543_v7 = vld [vmem:[#allocation23_spill] sm:$0xff]  ;;  %v1396_v21 = vmul.f32 %v3226_v54, %v3226_v54 }
 0x1af   : > { %v1515_v62 = vadd.f32 %v1514_v9, %v1379_v20  ;;  %v1256_v46 = vadd.f32 %v1255_v1, %v3531_v44  ;;  %v1393_v55 = vmul.f32 %v3543_v7, %v3543_v7  ;;  %v1397_v44 = vmul.f32 %v3231_v10, %v3231_v10 }
 0x1b0   : > { %v1453_v60 = vadd.f32 %v1452_v61, %v1380_v58  ;;  %v1194_v38 = vadd.f32 %v1193_v42, %v3532_v11  ;;  %v1394_v61 = vmul.f32 %v3211_v49, %v3211_v49 }
 0x1b1   : > { %v1516_v30 = vadd.f32 %v1515_v62, %v1381_v25  ;;  %v1257_v14 = vadd.f32 %v1256_v46, %v3533_v17  ;;  %v1395_v62 = vmul.f32 %v3216_v12, %v3216_v12 }
 0x1b2   : > { %v1454_v24 = vadd.f32 %v1453_v60, %v1382_v6  ;;  %v1195_v35 = vadd.f32 %v1194_v38, %v3534_v34  ;;  %v1398_v6 = vmul.f32 %v3234_v16, %v3234_v16 }
 0x1b3   : > { %v1517_v51 = vadd.f32 %v1516_v30, %v1383_v3  ;;  %v1258_v36 = vadd.f32 %v1257_v14, %v3535_v50 }
 0x1b4   : > { %v1455_v22 = vadd.f32 %v1454_v24, %v1384_v19  ;;  %v1196_v32 = vadd.f32 %v1195_v35, %v3536_v4 }
 0x1b5   : > { %v1518_v47 = vadd.f32 %v1517_v51, %v1385_v0  ;;  %v1259_v31 = vadd.f32 %v1258_v36, %v3537_v2 }
 0x1b6   : > { %v1456_v41 = vadd.f32 %v1455_v22, %v1386_v48  ;;  %v1197_v13 = vadd.f32 %v1196_v32, %v3538_v28 }
 0x1b7   : > { %v1519_v37 = vadd.f32 %v1518_v47, %v1387_v53  ;;  %v1260_v15 = vadd.f32 %v1259_v31, %v3539_v45 }
 0x1b8   : > { %v1457_v29 = vadd.f32 %v1456_v41, %v1388_v52  ;;  %v1198_v27 = vadd.f32 %v1197_v13, %v3540_v23 }
 0x1b9   : > { %v1520_v40 = vadd.f32 %v1519_v37, %v1389_v5  ;;  %v1261_v26 = vadd.f32 %v1260_v15, %v3541_v33 }
 0x1ba   : > { %v1458_v56 = vadd.f32 %v1457_v29, %v1390_v18  ;;  %v1199_v63 = vadd.f32 %v1198_v27, %v3542_v59 }
 0x1bb   : > { %v1521_v43 = vadd.f32 %v1520_v40, %v1391_v39  ;;  %v1262_v9 = vadd.f32 %v1261_v26, %v3543_v7 }
 0x1bc   : > { %v1459_v1 = vadd.f32 %v1458_v56, %v1392_v57  ;;  %v1200_v20 = vadd.f32 %v1199_v63, %v3211_v49 }
 0x1bd   : > { %v1522_v42 = vadd.f32 %v1521_v43, %v1393_v55  ;;  %v1263_v58 = vadd.f32 %v1262_v9, %v3216_v12 }
 0x1be   : > { %v1460_v46 = vadd.f32 %v1459_v1, %v1394_v61  ;;  %v1201_v25 = vadd.f32 %v1200_v20, %v3226_v54  ;;  %v1399_v54 = vmul.f32 %v3241_v8, %v3241_v8 }
 0x1bf   : > { %v1523_v60 = vadd.f32 %v1522_v42, %v1395_v62  ;;  %v1264_v11 = vadd.f32 %v1263_v58, %v3231_v10 }
 0x1c0   : > { %v1461_v49 = vadd.f32 %v1460_v46, %v1396_v21  ;;  %v1202_v38 = vadd.f32 %v1201_v25, %v3234_v16 }
 0x1c1   : > { %v1524_v30 = vadd.f32 %v1523_v60, %v1397_v44  ;;  %v1265_v12 = vadd.f32 %v1264_v11, %v3241_v8 }
 0x1c2   : > { %v1462_v17 = vadd.f32 %v1461_v49, %v1398_v6  ;;  %1268 = vst [vmem:[%s300_s12] sm:$0xff] %v1202_v38 }
 0x1c3   : > { %v1525_v10 = vadd.f32 %v1524_v30, %v1399_v54  ;;  %1269 = vst [vmem:[%s300_s12 + $0x8] sm:$0xff] %v1265_v12 }
 0x1c4   : > { %1528 = vst [vmem:[%s305_s14] sm:$0xff] %v1462_v17 }
 0x1c5   : > { %1529 = vst [vmem:[%s305_s14 + $0x8] sm:$0xff] %v1525_v10 }
 0x1c6 PF: > { %s17_s23 = sadd.s32 1, %s2526_s23   ;;  %s3544_s21 = smov %s2522_s22 }
 0x1c7   : > { %p14_p6 = scmp.ge.s32.totalorder %s17_s23, 4   ;;  %s3545_s22 = smov %s3547_s24 }
 0x1c9   :  { %16 = sbr.rel (!%p14_p6) target bundleno = 2 (0x2), region = 94 }

// kernel: encoder_pallas.8
= control target key start
LH: loop header
LB: loop body
LE: loop exit
PB: predicated region body
PF: predicated region fallthrough
CT: control target
= control target key end

     0   :  { %s2606_s24 = smov 0   ;;  %s2608_s25 = smov 0   ;;  %s3589_s0 = inlined_call_operand.vmem [shape: bf16[1024,256], index: 0, kind: input, shape index: {}]   ;;  %s3590_s1 = inlined_call_operand.vmem [shape: f32[2,256], index: 1, kind: input, shape index: {}]   ;;  %s3591_s2 = inlined_call_operand.vmem [shape: bf16[256,512], index: 2, kind: input, shape index: {}]   ;;  %s3592_s3 = inlined_call_operand.vmem [shape: f32[1,512], index: 3, kind: input, shape index: {}]   ;;  %s3593_s4 = inlined_call_operand.vmem [shape: f32[32,512], index: 4, kind: output, shape index: {0}]   ;;  %s3594_s5 = inlined_call_operand.vmem [shape: f32[32,512], index: 5, kind: output, shape index: {1}]   ;;  %s3595_s6 = inlined_call_operand.vmem [shape: f32[32,512], index: 6, kind: output, shape index: {2}]   ;;  %s3596_s7 = inlined_call_operand.vmem [shape: f32[32,512], index: 7, kind: output, shape index: {3}]  }
   0x1   :  { %s2610_s26 = smov 0  }
   0x2 LB: > { %s30_s27 = sadd.s32 1, %s2560_s25  ;;  %p2335_p0 = scmp.ge.s32.totalorder %s2564_s26, 1  ;;  %s2564_s26 = sphi %s2610_s26, %s18_s26   ;;  %s2560_s25 = sphi %s2608_s25, %s3648_s25   ;;  %s2556_s24 = sphi %s2606_s24, %s3647_s24  }
   0x3   : > { %p32_p1 = scmp.ge.s32.totalorder %s30_s27, 4  ;;  %p262_p2 = scmp.lt.s32.totalorder %s2564_s26, 5 }
   0x5   : > { %s3650_s27 = smov (%p32_p1, %s30_s27), 0  ;;  %p263_p3 = pnand %p2335_p0, %p262_p2 }
   0x7   : > { %266 = sbr.rel (%p263_p3) target bundleno = 488 (0x1e8), region = 36 }
   0xe   : > { %v2446_v0 = vld [vmem:[%s3591_s2 + $0x4] ss:$16 sps:$4 sm:$0xff]   ;;  %v2448_v1 = vld [vmem:[%s3591_s2 + $0xc] ss:$16 sps:$4 sm:$0xff]   ;;  %v2450_v2 = vld [vmem:[%s3591_s2] ss:$16 sps:$4 sm:$0xff]   ;;  %v460_v36 = vlaneseq }
   0xf   : > { %1111 = vmatprep.subr.bf16.mxu0 %v2446_v0  ;;  %v2451_v3 = vld [vmem:[%s3591_s2 + $0x8] ss:$16 sps:$4 sm:$0xff]   ;;  %1304 = vmatprep.subr.bf16.mxu1 %v2448_v1  ;;  %v2452_v4 = vld [vmem:[%s3591_s2 + $0x24] ss:$16 sps:$4 sm:$0xff]   ;;  %v2454_v5 = vld [vmem:[%s3591_s2 + $0x2c] ss:$16 sps:$4 sm:$0xff]  }
  0x10   : > { %1112 = vmatpush1.bf16.msra.mxu0 %v2450_v2  ;;  %1305 = vmatpush1.bf16.msra.mxu1 %v2451_v3  ;;  %v2456_v6 = vld [vmem:[%s3591_s2 + $0x20] ss:$16 sps:$4 sm:$0xff]   ;;  %v2457_v7 = vld [vmem:[%s3591_s2 + $0x28] ss:$16 sps:$4 sm:$0xff]   ;;  %v2458_v8 = vld [vmem:[%s3591_s2 + $0x44] ss:$16 sps:$4 sm:$0xff]  }
  0x11   : > { %1113 = vmatprep.subr.bf16.mxu0 %v2452_v4  ;;  %1306 = vmatprep.subr.bf16.mxu1 %v2454_v5  ;;  %v2460_v9 = vld [vmem:[%s3591_s2 + $0x4c] ss:$16 sps:$4 sm:$0xff]   ;;  %v2462_v10 = vld [vmem:[%s3591_s2 + $0x40] ss:$16 sps:$4 sm:$0xff]   ;;  %v2463_v11 = vld [vmem:[%s3591_s2 + $0x48] ss:$16 sps:$4 sm:$0xff]  }
  0x12   : > { %v2464_v12 = vld [vmem:[%s3591_s2 + $0x64] ss:$16 sps:$4 sm:$0xff]   ;;  %v2466_v13 = vld [vmem:[%s3591_s2 + $0x6c] ss:$16 sps:$4 sm:$0xff]   ;;  %v2468_v14 = vld [vmem:[%s3591_s2 + $0x60] ss:$16 sps:$4 sm:$0xff]  }
  0x13   : > { %v2469_v15 = vld [vmem:[%s3591_s2 + $0x68] ss:$16 sps:$4 sm:$0xff]   ;;  %v2470_v16 = vld [vmem:[%s3591_s2 + $0x84] ss:$16 sps:$4 sm:$0xff]   ;;  %v2472_v17 = vld [vmem:[%s3591_s2 + $0x8c] ss:$16 sps:$4 sm:$0xff]  }
  0x14   : > { %1114 = vmatpush1.bf16.msra.mxu0 %v2456_v6  ;;  %1307 = vmatpush1.bf16.msra.mxu1 %v2457_v7  ;;  %v2474_v18 = vld [vmem:[%s3591_s2 + $0x80] ss:$16 sps:$4 sm:$0xff]   ;;  %v2475_v19 = vld [vmem:[%s3591_s2 + $0x88] ss:$16 sps:$4 sm:$0xff]   ;;  %v2476_v20 = vld [vmem:[%s3591_s2 + $0xa4] ss:$16 sps:$4 sm:$0xff]  }
  0x15   : > { %1115 = vmatprep.subr.bf16.mxu0 %v2458_v8  ;;  %1308 = vmatprep.subr.bf16.mxu1 %v2460_v9  ;;  %v2478_v21 = vld [vmem:[%s3591_s2 + $0xac] ss:$16 sps:$4 sm:$0xff]   ;;  %v2480_v22 = vld [vmem:[%s3591_s2 + $0xa0] ss:$16 sps:$4 sm:$0xff]   ;;  %v2481_v23 = vld [vmem:[%s3591_s2 + $0xa8] ss:$16 sps:$4 sm:$0xff]  }
  0x16   : > { %v2482_v24 = vld [vmem:[%s3591_s2 + $0xc4] ss:$16 sps:$4 sm:$0xff]   ;;  %v2484_v25 = vld [vmem:[%s3591_s2 + $0xcc] ss:$16 sps:$4 sm:$0xff]   ;;  %v2486_v26 = vld [vmem:[%s3591_s2 + $0xc0] ss:$16 sps:$4 sm:$0xff]  }
  0x17   : > { %v2487_v27 = vld [vmem:[%s3591_s2 + $0xc8] ss:$16 sps:$4 sm:$0xff]   ;;  %v2488_v28 = vld [vmem:[%s3591_s2 + $0xe4] ss:$16 sps:$4 sm:$0xff]   ;;  %v2490_v29 = vld [vmem:[%s3591_s2 + $0xec] ss:$16 sps:$4 sm:$0xff]  }
  0x18   : > { %1116 = vmatpush1.bf16.msra.mxu0 %v2462_v10  ;;  %1309 = vmatpush1.bf16.msra.mxu1 %v2463_v11  ;;  %s2336_s8 = sshll.u32 %s2556_s24, 5  ;;  %v2492_v30 = vld [vmem:[%s3591_s2 + $0xe0] ss:$16 sps:$4 sm:$0xff]   ;;  %v2493_v31 = vld [vmem:[%s3591_s2 + $0xe8] ss:$16 sps:$4 sm:$0xff]   ;;  %v2744_v40 = vshrl.u32 %v460_v36, 7 }
  0x19   : > { %1117 = vmatprep.subr.bf16.mxu0 %v2464_v12  ;;  %1310 = vmatprep.subr.bf16.mxu1 %v2466_v13  ;;  %v2494_v32 = vld [vmem:[%s3591_s2 + $0x104] ss:$16 sps:$4 sm:$0xff]   ;;  %p313_p4 = scmp.lt.s32.totalorder %s2336_s8, 127  ;;  %v2496_v33 = vld [vmem:[%s3591_s2 + $0x10c] ss:$16 sps:$4 sm:$0xff]   ;;  %p320_p5 = scmp.lt.s32.totalorder %s2556_s24, 3 }
  0x1a   : > { %v2498_v34 = vld [vmem:[%s3591_s2 + $0x100] ss:$16 sps:$4 sm:$0xff]   ;;  %v2499_v35 = vld [vmem:[%s3591_s2 + $0x108] ss:$16 sps:$4 sm:$0xff]   ;;  %v2500_v37 = vld [vmem:[%s3591_s2 + $0x124] ss:$16 sps:$4 sm:$0xff]  }
  0x1b   : > { %s3652_s8 = smov (!%p313_p4, %s2336_s8), 127  ;;  %v2502_v38 = vld [vmem:[%s3591_s2 + $0x12c] ss:$16 sps:$4 sm:$0xff]   ;;  %v2504_v39 = vld [vmem:[%s3591_s2 + $0x120] ss:$16 sps:$4 sm:$0xff]   ;;  %v2770_v47 = vsub.s32 1, %v2744_v40 }
  0x1c   : > { %1118 = vmatpush1.bf16.msra.mxu0 %v2468_v14  ;;  %1311 = vmatpush1.bf16.msra.mxu1 %v2469_v15  ;;  %v2505_v41 = vld [vmem:[%s3591_s2 + $0x128] ss:$16 sps:$4 sm:$0xff]   ;;  %v2506_v42 = vld [vmem:[%s3591_s2 + $0x144] ss:$16 sps:$4 sm:$0xff]   ;;  %s2414_s13 = sshll.u32 %s3652_s8, 3  ;;  %v2783_v52 = vsub.s32 0, %v2744_v40 }
  0x1d   : > { %1119 = vmatprep.subr.bf16.mxu0 %v2470_v16  ;;  %1312 = vmatprep.subr.bf16.mxu1 %v2472_v17  ;;  %v2508_v43 = vld [vmem:[%s3591_s2 + $0x14c] ss:$16 sps:$4 sm:$0xff]   ;;  %v2510_v44 = vld [vmem:[%s3591_s2 + $0x140] ss:$16 sps:$4 sm:$0xff]   ;;  %v2511_v45 = vld [vmem:[%s3591_s2 + $0x148] ss:$16 sps:$4 sm:$0xff]   ;;  %s2764_s22 = scalar_lea.vmem %s3589_s0, %s2414_s13 }
  0x1e   : > { %v2512_v46 = vld [vmem:[%s3591_s2 + $0x164] ss:$16 sps:$4 sm:$0xff]   ;;  %v2514_v48 = vld [vmem:[%s3591_s2 + $0x16c] ss:$16 sps:$4 sm:$0xff]   ;;  %v2516_v49 = vld [vmem:[%s3591_s2 + $0x160] ss:$16 sps:$4 sm:$0xff]  }
  0x1f   : > { %v2517_v50 = vld [vmem:[%s3591_s2 + $0x168] ss:$16 sps:$4 sm:$0xff]   ;;  %v363_v51 = vld [vmem:[%s2764_s22] sm:$0xff]  ;;  %v2796_v58 = vld [vmem:[%s2764_s22 + $0x10] sm:$0xff]  ;;  %s3654_s24 = smov (!%p320_p5, %s2556_s24), 3 }
  0x20   : > { %1120 = vmatpush1.bf16.msra.mxu0 %v2474_v18  ;;  %1313 = vmatpush1.bf16.msra.mxu1 %v2475_v19  ;;  %v360_v53 = vld [vmem:[%s3590_s1] ss:$2 sm:$0x3]  ;;  %v2347_v54 = vld [vmem:[%s3590_s1 + $0x1] ss:$2 sm:$0x3]  ;;  %v396_v55 = vunpack.c.h.bf16 %v363_v51  ;;  %v395_v0 = vunpack.c.l.bf16 %v363_v51  ;;  %v400_v5 = vunpack.c.h.bf16 %v2796_v58 }
  0x21   : > { %1121 = vmatprep.subr.bf16.mxu0 %v2476_v20  ;;  %1314 = vmatprep.subr.bf16.mxu1 %v2478_v21  ;;  %v364_v56 = vld [vmem:[%s2764_s22 + $0x8] sm:$0xff]  ;;  %v2793_v57 = vrot.slane %v360_v53, %v2770_v47  ;;  %v2799_v59 = vld [vmem:[%s2764_s22 + $0x18] sm:$0xff]  ;;  %v2518_v60 = vld [vmem:[%s3591_s2 + $0x184] ss:$16 sps:$4 sm:$0xff]   ;;  %v2808_v63 = vrot.slane %v2347_v54, %v2770_v47  ;;  %v2811_v2 = vrot.slane %v360_v53, %v2783_v52  ;;  %s2415_s13 = sshll.u32 %s3654_s24, 5 }
  0x22   : > { %v2520_v61 = vld [vmem:[%s3591_s2 + $0x18c] ss:$16 sps:$4 sm:$0xff]   ;;  %v398_v62 = vunpack.c.h.bf16 %v364_v56  ;;  %v397_v1 = vunpack.c.l.bf16 %v364_v56  ;;  %v402_v6 = vunpack.c.h.bf16 %v2799_v59  ;;  %v2522_v7 = vld [vmem:[%s3591_s2 + $0x180] ss:$16 sps:$4 sm:$0xff]   ;;  %v2523_v8 = vld [vmem:[%s3591_s2 + $0x188] ss:$16 sps:$4 sm:$0xff]   ;;  %v2832_v13 = vrot.slane %v2347_v54, %v2783_v52  ;;  %s3559_s16 = scalar_lea.vmem %s3593_s4, %s2415_s13  ;;  %s3564_s18 = scalar_lea.vmem %s3594_s5, %s2415_s13 }
  0x23   : > { %v471_v3 = vmul.f32 %v2793_v57, %v396_v55  ;;  %v2524_v10 = vld [vmem:[%s3591_s2 + $0x1a4] ss:$16 sps:$4 sm:$0xff]   ;;  %v2526_v11 = vld [vmem:[%s3591_s2 + $0x1ac] ss:$16 sps:$4 sm:$0xff]   ;;  %v470_v15 = vmul.f32 %v2811_v2, %v395_v0  ;;  %v475_v18 = vmul.f32 %v2793_v57, %v400_v5  ;;  %v2528_v20 = vld [vmem:[%s3591_s2 + $0x1a0] ss:$16 sps:$4 sm:$0xff]   ;;  %s334_s21 = scalar_lea.vmem %s3595_s6, %s2415_s13  ;;  %s339_s28 = scalar_lea.vmem %s3596_s7, %s2415_s13 }
  0x24   : > { %1122 = vmatpush1.bf16.msra.mxu0 %v2480_v22  ;;  %1315 = vmatpush1.bf16.msra.mxu1 %v2481_v23  ;;  %v473_v4 = vmul.f32 %v2793_v57, %v398_v62  ;;  %v472_v16 = vmul.f32 %v2811_v2, %v397_v1  ;;  %v477_v19 = vmul.f32 %v2793_v57, %v402_v6  ;;  %v2529_v21 = vld [vmem:[%s3591_s2 + $0x1a8] ss:$16 sps:$4 sm:$0xff]   ;;  %v2530_v22 = vld [vmem:[%s3591_s2 + $0x1c4] ss:$16 sps:$4 sm:$0xff]   ;;  %v2532_v23 = vld [vmem:[%s3591_s2 + $0x1cc] ss:$16 sps:$4 sm:$0xff]  }
  0x25   : > { %1123 = vmatprep.subr.bf16.mxu0 %v2482_v24  ;;  %1316 = vmatprep.subr.bf16.mxu1 %v2484_v25  ;;  %v546_v9 = vadd.f32 %v2808_v63, %v471_v3  ;;  %v367_v25 = vld [vmem:[%s2764_s22 + $0x20] sm:$0xff]  ;;  %v369_v51 = vld [vmem:[%s2764_s22 + $0x30] sm:$0xff]  ;;  %v370_v53 = vld [vmem:[%s2764_s22 + $0x38] sm:$0xff] }
  0x26   : > { %v548_v12 = vadd.f32 %v2808_v63, %v473_v4  ;;  %v408_v0 = vunpack.c.h.bf16 %v369_v51  ;;  %v410_v1 = vunpack.c.h.bf16 %v370_v53 }
  0x27   : > { %v610_v14 = vmax.f32 %v546_v9, 0.0 }
  0x28   : > { %1124 = vmatpush1.bf16.msra.mxu0 %v2486_v26  ;;  %1317 = vmatpush1.bf16.msra.mxu1 %v2487_v27  ;;  %v612_v17 = vmax.f32 %v548_v12, 0.0  ;;  %v368_v26 = vld [vmem:[%s2764_s22 + $0x28] sm:$0xff]  ;;  %v545_v27 = vadd.f32 %v2832_v13, %v470_v15  ;;  %v483_v9 = vmul.f32 %v2793_v57, %v408_v0  ;;  %v409_v15 = vunpack.c.l.bf16 %v370_v53 }
  0x29   : > { %1125 = vmatprep.subr.bf16.mxu0 %v2488_v28  ;;  %1318 = vmatprep.subr.bf16.mxu1 %v2490_v29  ;;  %v547_v28 = vadd.f32 %v2832_v13, %v472_v16  ;;  %v399_v29 = vunpack.c.l.bf16 %v2796_v58  ;;  %v406_v36 = vunpack.c.h.bf16 %v368_v26  ;;  %v372_v12 = vld [vmem:[%s2764_s22 + $0x48] sm:$0xff] }
  0x2a   : > { %v674_v24 = vpack.c.bf16 %v612_v17, %v610_v14  ;;  %v407_v14 = vunpack.c.l.bf16 %v369_v51 }
  0x2c   : > { %1126 = vmatpush1.bf16.msra.mxu0 %v2492_v30  ;;  %1319 = vmatpush1.bf16.msra.mxu1 %v2493_v31  ;;  %v550_v30 = vadd.f32 %v2808_v63, %v475_v18  ;;  %v552_v31 = vadd.f32 %v2808_v63, %v477_v19 }
  0x2d   : > { %1127 = vmatprep.subr.bf16.mxu0 %v2494_v32  ;;  %1320 = vmatprep.subr.bf16.mxu1 %v2496_v33  ;;  %v401_v32 = vunpack.c.l.bf16 %v2799_v59  ;;  %v2534_v33 = vld [vmem:[%s3591_s2 + $0x1c0] ss:$16 sps:$4 sm:$0xff]   ;;  %v403_v59 = vunpack.c.l.bf16 %v367_v25 }
  0x2e   : > { %1143 = vmatprep.mubr.bf16.mxu0 %v674_v24  ;;  %1336 = vmatprep.mubr.bf16.mxu1 %v674_v24  ;;  %v482_v24 = vmul.f32 %v2811_v2, %v407_v14 }
  0x2f   : > { %v478_v5 = vmul.f32 %v2811_v2, %v403_v59 }
  0x30   : > { %1128 = vmatpush1.bf16.msra.mxu0 %v2498_v34  ;;  %1321 = vmatpush1.bf16.msra.mxu1 %v2499_v35  ;;  %v2535_v34 = vld [vmem:[%s3591_s2 + $0x1c8] ss:$16 sps:$4 sm:$0xff]   ;;  %v404_v35 = vunpack.c.h.bf16 %v367_v25  ;;  %v484_v25 = vmul.f32 %v2811_v2, %v409_v15  ;;  %v377_v15 = vld [vmem:[%s2764_s22 + $0x70] sm:$0xff] }
  0x31   : > { %1129 = vmatprep.subr.bf16.mxu0 %v2500_v37  ;;  %1322 = vmatprep.subr.bf16.mxu1 %v2502_v38  ;;  %v2536_v37 = vld [vmem:[%s3591_s2 + $0x1e4] ss:$16 sps:$4 sm:$0xff]   ;;  %v2538_v38 = vld [vmem:[%s3591_s2 + $0x1ec] ss:$16 sps:$4 sm:$0xff]   ;;  %v553_v17 = vadd.f32 %v2832_v13, %v478_v5 }
  0x34   : > { %1130 = vmatpush1.bf16.msra.mxu0 %v2504_v39  ;;  %1323 = vmatpush1.bf16.msra.mxu1 %v2505_v41  ;;  %v609_v39 = vmax.f32 %v545_v27, 0.0  ;;  %v611_v41 = vmax.f32 %v547_v28, 0.0 }
  0x35   : > { %1131 = vmatprep.subr.bf16.mxu0 %v2506_v42  ;;  %1324 = vmatprep.subr.bf16.mxu1 %v2508_v43  ;;  %v474_v42 = vmul.f32 %v2811_v2, %v399_v29  ;;  %v614_v43 = vmax.f32 %v550_v30, 0.0 }
  0x36   : > { %v673_v54 = vpack.c.bf16 %v611_v41, %v609_v39  ;;  %v413_v39 = vunpack.c.l.bf16 %v372_v12 }
  0x37   : > { %v549_v55 = vadd.f32 %v2832_v13, %v474_v42 }
  0x38   : > { %1132 = vmatpush1.bf16.msra.mxu0 %v2510_v44  ;;  %1325 = vmatpush1.bf16.msra.mxu1 %v2511_v45  ;;  %v616_v44 = vmax.f32 %v552_v31, 0.0  ;;  %v476_v45 = vmul.f32 %v2811_v2, %v401_v32  ;;  %v373_v32 = vld [vmem:[%s2764_s22 + $0x50] sm:$0xff] }
  0x39   : > { %1133 = vmatprep.subr.bf16.mxu0 %v2512_v46  ;;  %1326 = vmatprep.subr.bf16.mxu1 %v2514_v48  ;;  %v2540_v46 = vld [vmem:[%s3591_s2 + $0x1e0] ss:$16 sps:$4 sm:$0xff]   ;;  %v2541_v48 = vld [vmem:[%s3591_s2 + $0x1e8] ss:$16 sps:$4 sm:$0xff]   ;;  %v613_v3 = vmax.f32 %v549_v55, 0.0  ;;  %v415_v59 = vunpack.c.l.bf16 %v373_v32 }
  0x3a   : > { %v676_v56 = vpack.c.bf16 %v616_v44, %v614_v43  ;;  %v551_v58 = vadd.f32 %v2832_v13, %v476_v45  ;;  %v416_v43 = vunpack.c.h.bf16 %v373_v32  ;;  %v375_v55 = vld [vmem:[%s2764_s22 + $0x60] sm:$0xff] }
  0x3b   : > { %v420_v0 = vunpack.c.h.bf16 %v375_v55 }
  0x3c   : > { %1134 = vmatpush1.bf16.msra.mxu0 %v2516_v49  ;;  %1327 = vmatpush1.bf16.msra.mxu1 %v2517_v50  ;;  %v479_v49 = vmul.f32 %v2793_v57, %v404_v35  ;;  %v481_v50 = vmul.f32 %v2793_v57, %v406_v36  ;;  %v615_v4 = vmax.f32 %v551_v58, 0.0  ;;  %v559_v35 = vadd.f32 %v2832_v13, %v484_v25 }
  0x3d   : > { %1135 = vmatprep.subr.bf16.mxu0 %v2518_v60  ;;  %1328 = vmatprep.subr.bf16.mxu1 %v2520_v61  ;;  %v405_v60 = vunpack.c.l.bf16 %v368_v26  ;;  %v617_v26 = vmax.f32 %v553_v17, 0.0  ;;  %v491_v53 = vmul.f32 %v2793_v57, %v416_v43  ;;  %v424_v25 = vunpack.c.h.bf16 %v377_v15 }
  0x3e   : > { %v554_v61 = vadd.f32 %v2808_v63, %v479_v49  ;;  %v556_v62 = vadd.f32 %v2808_v63, %v481_v50  ;;  %v675_v16 = vpack.c.bf16 %v615_v4, %v613_v3  ;;  %v488_v49 = vmul.f32 %v2811_v2, %v413_v39 }
  0x3f   : > { %v480_v6 = vmul.f32 %v2811_v2, %v405_v60  ;;  %v566_v3 = vadd.f32 %v2808_v63, %v491_v53 }
  0x40   : > { %1136 = vmatpush1.bf16.msra.mxu0 %v2522_v7  ;;  %1329 = vmatpush1.bf16.msra.mxu1 %v2523_v8  ;;  %v618_v7 = vmax.f32 %v554_v61, 0.0  ;;  %v620_v8 = vmax.f32 %v556_v62, 0.0  ;;  %v563_v61 = vadd.f32 %v2832_v13, %v488_v49 }
  0x41   : > { %1137 = vmatprep.subr.bf16.mxu0 %v2524_v10  ;;  %1330 = vmatprep.subr.bf16.mxu1 %v2526_v11  ;;  %v485_v10 = vmul.f32 %v2793_v57, %v410_v1  ;;  %v371_v11 = vld [vmem:[%s2764_s22 + $0x40] sm:$0xff]  ;;  %v555_v18 = vadd.f32 %v2832_v13, %v480_v6  ;;  %v490_v6 = vmul.f32 %v2811_v2, %v415_v59  ;;  %v381_v59 = vld [vmem:[%s2764_s22 + $0x90] sm:$0xff] }
  0x42   : > { %v412_v19 = vunpack.c.h.bf16 %v371_v11 }
  0x43   : > { %v619_v27 = vmax.f32 %v555_v18, 0.0  ;;  %v565_v17 = vadd.f32 %v2832_v13, %v490_v6  ;;  %v419_v18 = vunpack.c.l.bf16 %v375_v55 }
  0x44   : > { %1138 = vmatpush1.bf16.msra.mxu0 %v2528_v20  ;;  %1331 = vmatpush1.bf16.msra.mxu1 %v2529_v21  ;;  %v678_v20 = vpack.c.bf16 %v620_v8, %v618_v7  ;;  %v558_v21 = vadd.f32 %v2808_v63, %v483_v9  ;;  %v487_v28 = vmul.f32 %v2793_v57, %v412_v19  ;;  %v627_v8 = vmax.f32 %v563_v61, 0.0 }
  0x45   : > { %1139 = vmatprep.subr.bf16.mxu0 %v2530_v22  ;;  %1332 = vmatprep.subr.bf16.mxu1 %v2532_v23  ;;  %v560_v22 = vadd.f32 %v2808_v63, %v485_v10  ;;  %v414_v23 = vunpack.c.h.bf16 %v372_v12  ;;  %v677_v36 = vpack.c.bf16 %v619_v27, %v617_v26  ;;  %v495_v10 = vmul.f32 %v2793_v57, %v420_v0 }
  0x46   : > { %v622_v29 = vmax.f32 %v558_v21, 0.0  ;;  %v494_v27 = vmul.f32 %v2811_v2, %v419_v18  ;;  %v383_v18 = vld [vmem:[%s2764_s22 + $0xa0] sm:$0xff] }
  0x47   : > { %v624_v30 = vmax.f32 %v560_v22, 0.0  ;;  %v489_v31 = vmul.f32 %v2793_v57, %v414_v23  ;;  %v570_v21 = vadd.f32 %v2808_v63, %v495_v10 }
  0x48   : > { %1140 = vmatpush1.bf16.msra.mxu0 %v2534_v33  ;;  %1333 = vmatpush1.bf16.msra.mxu1 %v2535_v34  ;;  %v374_v33 = vld [vmem:[%s2764_s22 + $0x58] sm:$0xff]  ;;  %v557_v34 = vadd.f32 %v2832_v13, %v482_v24 }
  0x49   : > { %1141 = vmatprep.subr.bf16.mxu0 %v2536_v37  ;;  %1334 = vmatprep.subr.bf16.mxu1 %v2538_v38  ;;  %v562_v37 = vadd.f32 %v2808_v63, %v487_v28  ;;  %v411_v38 = vunpack.c.l.bf16 %v371_v11  ;;  %v680_v41 = vpack.c.bf16 %v624_v30, %v622_v29  ;;  %v564_v42 = vadd.f32 %v2808_v63, %v489_v31 }
  0x4a   : > { %v418_v44 = vunpack.c.h.bf16 %v374_v33  ;;  %v621_v45 = vmax.f32 %v557_v34, 0.0  ;;  %v417_v62 = vunpack.c.l.bf16 %v374_v33  ;;  %v630_v11 = vmax.f32 %v566_v3, 0.0 }
  0x4b   : > { %v626_v50 = vmax.f32 %v562_v37, 0.0  ;;  %v628_v51 = vmax.f32 %v564_v42, 0.0  ;;  %v629_v28 = vmax.f32 %v565_v17, 0.0  ;;  %v634_v31 = vmax.f32 %v570_v21, 0.0 }
  0x4c   : > { %1142 = vmatpush1.bf16.msra.mxu0 %v2540_v46  ;;  %1335 = vmatpush1.bf16.msra.mxu1 %v2541_v48  ;;  %v623_v46 = vmax.f32 %v559_v35, 0.0  ;;  %v486_v48 = vmul.f32 %v2811_v2, %v411_v38  ;;  %v492_v9 = vmul.f32 %v2811_v2, %v417_v62  ;;  %v499_v33 = vmul.f32 %v2793_v57, %v424_v25  ;;  %v379_v35 = vld [vmem:[%s2764_s22 + $0x80] sm:$0xff] }
  0x4d   : > { %v682_v1 = vpack.c.bf16 %v628_v51, %v626_v50  ;;  %v569_v37 = vadd.f32 %v2832_v13, %v494_v27  ;;  %v423_v38 = vunpack.c.l.bf16 %v377_v15  ;;  %v428_v43 = vunpack.c.h.bf16 %v379_v35 }
  0x4e   : > { %v679_v58 = vpack.c.bf16 %v623_v46, %v621_v45  ;;  %v561_v60 = vadd.f32 %v2832_v13, %v486_v48  ;;  %v574_v45 = vadd.f32 %v2808_v63, %v499_v33  ;;  %v427_v62 = vunpack.c.l.bf16 %v379_v35 }
  0x4f   : > { %1144 = vmatmul.mubr.bf16.vlgmr.msra.gmra.mrb[0].mxu0 %v673_v54  ;;  %1337 = vmatmul.mubr.bf16.vlgmr.msra.gmra.mrb[0].mxu1 %v673_v54  ;;  %v493_v54 = vmul.f32 %v2793_v57, %v418_v44  ;;  %v498_v49 = vmul.f32 %v2811_v2, %v423_v38  ;;  %v633_v50 = vmax.f32 %v569_v37, 0.0  ;;  %v431_v21 = vunpack.c.l.bf16 %v381_v59  ;;  %v385_v38 = vld [vmem:[%s2764_s22 + $0xb0] sm:$0xff] }
  0x50   : > { %1153 = vmatprep.mubr.bf16.mxu0 %v676_v56  ;;  %1346 = vmatprep.mubr.bf16.mxu1 %v676_v56  ;;  %v376_v56 = vld [vmem:[%s2764_s22 + $0x68] sm:$0xff]  ;;  %v625_v7 = vmax.f32 %v561_v60, 0.0  ;;  %v638_v55 = vmax.f32 %v574_v45, 0.0  ;;  %v382_v60 = vld [vmem:[%s2764_s22 + $0x98] sm:$0xff]  ;;  %v436_v25 = vunpack.c.h.bf16 %v383_v18 }
  0x51   : > { %v568_v4 = vadd.f32 %v2808_v63, %v493_v54  ;;  %v422_v5 = vunpack.c.h.bf16 %v376_v56  ;;  %v421_v22 = vunpack.c.l.bf16 %v376_v56  ;;  %v503_v54 = vmul.f32 %v2793_v57, %v428_v43 }
  0x52   : > { %v681_v19 = vpack.c.bf16 %v627_v8, %v625_v7  ;;  %v573_v61 = vadd.f32 %v2832_v13, %v498_v49  ;;  %v432_v7 = vunpack.c.h.bf16 %v381_v59  ;;  %v434_v8 = vunpack.c.h.bf16 %v382_v60 }
  0x53   : > { %v632_v12 = vmax.f32 %v568_v4, 0.0  ;;  %v497_v14 = vmul.f32 %v2793_v57, %v422_v5  ;;  %v496_v30 = vmul.f32 %v2811_v2, %v421_v22  ;;  %v578_v3 = vadd.f32 %v2808_v63, %v503_v54 }
  0x54   : > { %v637_v10 = vmax.f32 %v573_v61, 0.0  ;;  %v509_v17 = vmul.f32 %v2793_v57, %v434_v8 }
  0x55   : > { %v684_v23 = vpack.c.bf16 %v632_v12, %v630_v11  ;;  %v572_v24 = vadd.f32 %v2808_v63, %v497_v14  ;;  %v642_v14 = vmax.f32 %v578_v3, 0.0  ;;  %v439_v3 = vunpack.c.l.bf16 %v385_v38 }
  0x57   : > { %1154 = vmatmul.mubr.bf16.gmra.mrb[4].mxu0 %v675_v16  ;;  %1347 = vmatmul.mubr.bf16.gmra.mrb[4].mxu1 %v675_v16  ;;  %v378_v16 = vld [vmem:[%s2764_s22 + $0x78] sm:$0xff]  ;;  %v636_v32 = vmax.f32 %v572_v24, 0.0  ;;  %v433_v24 = vunpack.c.l.bf16 %v382_v60 }
  0x58   : > { %1163 = vmatprep.mubr.bf16.mxu0 %v678_v20  ;;  %1356 = vmatprep.mubr.bf16.mxu1 %v678_v20  ;;  %v567_v20 = vadd.f32 %v2832_v13, %v492_v9  ;;  %v426_v26 = vunpack.c.h.bf16 %v378_v16  ;;  %v425_v42 = vunpack.c.l.bf16 %v378_v16  ;;  %v502_v9 = vmul.f32 %v2811_v2, %v427_v62  ;;  %v387_v62 = vld [vmem:[%s2764_s22 + $0xc0] sm:$0xff] }
  0x59   : > { %v686_v44 = vpack.c.bf16 %v636_v32, %v634_v31  ;;  %v507_v16 = vmul.f32 %v2793_v57, %v432_v7  ;;  %v508_v33 = vmul.f32 %v2811_v2, %v433_v24  ;;  %v444_v7 = vunpack.c.h.bf16 %v387_v62 }
  0x5a   : > { %v631_v29 = vmax.f32 %v567_v20, 0.0  ;;  %v501_v34 = vmul.f32 %v2793_v57, %v426_v26  ;;  %v500_v53 = vmul.f32 %v2811_v2, %v425_v42  ;;  %v577_v20 = vadd.f32 %v2832_v13, %v502_v9 }
  0x5b   : > { %v582_v27 = vadd.f32 %v2808_v63, %v507_v16  ;;  %v435_v42 = vunpack.c.l.bf16 %v383_v18  ;;  %v443_v24 = vunpack.c.l.bf16 %v387_v62 }
  0x5c   : > { %v683_v39 = vpack.c.bf16 %v631_v29, %v629_v28  ;;  %v576_v46 = vadd.f32 %v2808_v63, %v501_v34  ;;  %v584_v28 = vadd.f32 %v2808_v63, %v509_v17  ;;  %v641_v31 = vmax.f32 %v577_v20, 0.0 }
  0x5d   : > { %v511_v34 = vmul.f32 %v2793_v57, %v436_v25  ;;  %v646_v35 = vmax.f32 %v582_v27, 0.0  ;;  %v519_v17 = vmul.f32 %v2793_v57, %v444_v7 }
  0x5e   : > { %v640_v56 = vmax.f32 %v576_v46, 0.0 }
  0x5f   : > { %1164 = vmatmul.mubr.bf16.gmra.mrb[8].mxu0 %v677_v36  ;;  %1357 = vmatmul.mubr.bf16.gmra.mrb[8].mxu1 %v677_v36  ;;  %v380_v36 = vld [vmem:[%s2764_s22 + $0x88] sm:$0xff]  ;;  %v586_v45 = vadd.f32 %v2808_v63, %v511_v34  ;;  %v594_v27 = vadd.f32 %v2808_v63, %v519_v17 }
  0x60   : > { %1173 = vmatprep.mubr.bf16.mxu0 %v680_v41  ;;  %1366 = vmatprep.mubr.bf16.mxu1 %v680_v41  ;;  %v571_v41 = vadd.f32 %v2832_v13, %v496_v30  ;;  %v430_v48 = vunpack.c.h.bf16 %v380_v36  ;;  %v429_v4 = vunpack.c.l.bf16 %v380_v36  ;;  %v688_v5 = vpack.c.bf16 %v640_v56, %v638_v55 }
  0x61   : > { %v506_v30 = vmul.f32 %v2811_v2, %v431_v21  ;;  %v648_v36 = vmax.f32 %v584_v28, 0.0  ;;  %v389_v21 = vld [vmem:[%s2764_s22 + $0xd0] sm:$0xff] }
  0x62   : > { %v635_v51 = vmax.f32 %v571_v41, 0.0  ;;  %v504_v12 = vmul.f32 %v2811_v2, %v429_v4 }
  0x63   : > { %v581_v41 = vadd.f32 %v2832_v13, %v506_v30 }
  0x64   : > { %v685_v0 = vpack.c.bf16 %v635_v51, %v633_v50  ;;  %v440_v50 = vunpack.c.h.bf16 %v385_v38 }
  0x65   : > { %v645_v54 = vmax.f32 %v581_v41, 0.0 }
  0x66   : > { %v515_v60 = vmul.f32 %v2793_v57, %v440_v50 }
  0x67   : > { %1174 = vmatmul.mubr.bf16.gmra.mrb[12].mxu0 %v679_v58  ;;  %1367 = vmatmul.mubr.bf16.gmra.mrb[12].mxu1 %v679_v58  ;;  %v505_v58 = vmul.f32 %v2793_v57, %v430_v48  ;;  %v692_v48 = vpack.c.bf16 %v648_v36, %v646_v35 }
  0x68   : > { %1183 = vmatprep.mubr.bf16.mxu0 %v682_v1  ;;  %1376 = vmatprep.mubr.bf16.mxu1 %v682_v1  ;;  %v575_v1 = vadd.f32 %v2832_v13, %v500_v53  ;;  %v510_v53 = vmul.f32 %v2811_v2, %v435_v42  ;;  %v590_v9 = vadd.f32 %v2808_v63, %v515_v60  ;;  %v391_v42 = vld [vmem:[%s2764_s22 + $0xe0] sm:$0xff] }
  0x69   : > { %v580_v6 = vadd.f32 %v2808_v63, %v505_v58  ;;  %v650_v58 = vmax.f32 %v586_v45, 0.0  ;;  %v447_v45 = vunpack.c.l.bf16 %v389_v21  ;;  %v452_v50 = vunpack.c.h.bf16 %v391_v42 }
  0x6a   : > { %v639_v11 = vmax.f32 %v575_v1, 0.0  ;;  %v585_v1 = vadd.f32 %v2832_v13, %v510_v53  ;;  %v654_v18 = vmax.f32 %v590_v9, 0.0 }
  0x6b   : > { %v644_v15 = vmax.f32 %v580_v6, 0.0 }
  0x6c   : > { %v687_v22 = vpack.c.bf16 %v639_v11, %v637_v10 }
  0x6d   : > { %v690_v26 = vpack.c.bf16 %v644_v15, %v642_v14  ;;  %v649_v14 = vmax.f32 %v585_v1, 0.0 }
  0x6f   : > { %1184 = vmatmul.mubr.bf16.gmra.mrb[16].mxu0 %v681_v19  ;;  %1377 = vmatmul.mubr.bf16.gmra.mrb[16].mxu1 %v681_v19  ;;  %v384_v19 = vld [vmem:[%s2764_s22 + $0xa8] sm:$0xff] }
  0x70   : > { %1193 = vmatprep.mubr.bf16.mxu0 %v684_v23  ;;  %1386 = vmatprep.mubr.bf16.mxu1 %v684_v23  ;;  %v579_v23 = vadd.f32 %v2832_v13, %v504_v12  ;;  %v438_v29 = vunpack.c.h.bf16 %v384_v19  ;;  %v437_v46 = vunpack.c.l.bf16 %v384_v19  ;;  %v514_v12 = vmul.f32 %v2811_v2, %v439_v3  ;;  %v393_v3 = vld [vmem:[%s2764_s22 + $0xf0] sm:$0xff] }
  0x72   : > { %v643_v32 = vmax.f32 %v579_v23, 0.0  ;;  %v513_v37 = vmul.f32 %v2793_v57, %v438_v29  ;;  %v512_v56 = vmul.f32 %v2811_v2, %v437_v46  ;;  %v589_v23 = vadd.f32 %v2832_v13, %v514_v12 }
  0x74   : > { %v689_v43 = vpack.c.bf16 %v643_v32, %v641_v31  ;;  %v588_v49 = vadd.f32 %v2808_v63, %v513_v37  ;;  %v448_v31 = vunpack.c.h.bf16 %v389_v21  ;;  %v653_v34 = vmax.f32 %v589_v23, 0.0 }
  0x75   : > { %v658_v37 = vmax.f32 %v594_v27, 0.0  ;;  %v455_v27 = vunpack.c.l.bf16 %v393_v3 }
  0x76   : > { %v652_v59 = vmax.f32 %v588_v49, 0.0 }
  0x77   : > { %1194 = vmatmul.mubr.bf16.gmra.mrb[20].mxu0 %v683_v39  ;;  %1387 = vmatmul.mubr.bf16.gmra.mrb[20].mxu1 %v683_v39  ;;  %v386_v39 = vld [vmem:[%s2764_s22 + $0xb8] sm:$0xff] }
  0x78   : > { %1203 = vmatprep.mubr.bf16.mxu0 %v686_v44  ;;  %1396 = vmatprep.mubr.bf16.mxu1 %v686_v44  ;;  %v583_v44 = vadd.f32 %v2832_v13, %v508_v33  ;;  %v442_v51 = vunpack.c.h.bf16 %v386_v39  ;;  %v441_v6 = vunpack.c.l.bf16 %v386_v39  ;;  %v694_v8 = vpack.c.bf16 %v652_v59, %v650_v58 }
  0x79   : > { %v518_v33 = vmul.f32 %v2811_v2, %v443_v24  ;;  %v523_v39 = vmul.f32 %v2793_v57, %v448_v31 }
  0x7a   : > { %v647_v55 = vmax.f32 %v583_v44, 0.0  ;;  %v517_v61 = vmul.f32 %v2793_v57, %v442_v51  ;;  %v516_v16 = vmul.f32 %v2811_v2, %v441_v6  ;;  %v451_v6 = vunpack.c.l.bf16 %v391_v42 }
  0x7b   : > { %v593_v44 = vadd.f32 %v2832_v13, %v518_v33  ;;  %v598_v53 = vadd.f32 %v2808_v63, %v523_v39 }
  0x7c   : > { %v691_v4 = vpack.c.bf16 %v647_v55, %v645_v54  ;;  %v592_v10 = vadd.f32 %v2808_v63, %v517_v61  ;;  %v527_v61 = vmul.f32 %v2793_v57, %v452_v50 }
  0x7d   : > { %v657_v58 = vmax.f32 %v593_v44, 0.0  ;;  %v662_v62 = vmax.f32 %v598_v53, 0.0  ;;  %v769_v44 = vld [vmem:[%s3592_s3] sm:$0xf] }
  0x7e   : > { %v656_v19 = vmax.f32 %v592_v10, 0.0  ;;  %v602_v9 = vadd.f32 %v2808_v63, %v527_v61 }
  0x7f   : > { %1204 = vmatmul.mubr.bf16.gmra.mrb[24].mxu0 %v685_v0  ;;  %1397 = vmatmul.mubr.bf16.gmra.mrb[24].mxu1 %v685_v0  ;;  %v388_v0 = vld [vmem:[%s2764_s22 + $0xc8] sm:$0xff] }
  0x80   : > { %1213 = vmatprep.mubr.bf16.mxu0 %v688_v5  ;;  %1406 = vmatprep.mubr.bf16.mxu1 %v688_v5  ;;  %v587_v5 = vadd.f32 %v2832_v13, %v512_v56  ;;  %v446_v11 = vunpack.c.h.bf16 %v388_v0  ;;  %v445_v28 = vunpack.c.l.bf16 %v388_v0  ;;  %v696_v29 = vpack.c.bf16 %v656_v19, %v654_v18 }
  0x81   : > { %v522_v56 = vmul.f32 %v2811_v2, %v447_v45  ;;  %v785_v45 = vsub.s32 3, %v2744_v40 }
  0x82   : > { %v651_v15 = vmax.f32 %v587_v5, 0.0  ;;  %v521_v20 = vmul.f32 %v2793_v57, %v446_v11  ;;  %v520_v36 = vmul.f32 %v2811_v2, %v445_v28 }
  0x83   : > { %v597_v5 = vadd.f32 %v2832_v13, %v522_v56 }
  0x84   : > { %v693_v25 = vpack.c.bf16 %v651_v15, %v649_v14  ;;  %v596_v30 = vadd.f32 %v2808_v63, %v521_v20  ;;  %v456_v14 = vunpack.c.h.bf16 %v393_v3  ;;  %v666_v20 = vmax.f32 %v602_v9, 0.0 }
  0x85   : > { %v661_v17 = vmax.f32 %v597_v5, 0.0 }
  0x86   : > { %v660_v38 = vmax.f32 %v596_v30, 0.0 }
  0x87   : > { %1214 = vmatmul.mubr.bf16.gmra.mrb[28].mxu0 %v687_v22  ;;  %1407 = vmatmul.mubr.bf16.gmra.mrb[28].mxu1 %v687_v22  ;;  %v390_v22 = vld [vmem:[%s2764_s22 + $0xd8] sm:$0xff] }
  0x88   : > { %1223 = vmatprep.mubr.bf16.mxu0 %v690_v26  ;;  %1416 = vmatprep.mubr.bf16.mxu1 %v690_v26  ;;  %v591_v26 = vadd.f32 %v2832_v13, %v516_v16  ;;  %v450_v32 = vunpack.c.h.bf16 %v390_v22  ;;  %v449_v49 = vunpack.c.l.bf16 %v390_v22  ;;  %v698_v51 = vpack.c.bf16 %v660_v38, %v658_v37 }
  0x89   : > { %v526_v16 = vmul.f32 %v2811_v2, %v451_v6  ;;  %v531_v22 = vmul.f32 %v2793_v57, %v456_v14 }
  0x8a   : > { %v655_v35 = vmax.f32 %v591_v26, 0.0  ;;  %v525_v41 = vmul.f32 %v2793_v57, %v450_v32  ;;  %v524_v60 = vmul.f32 %v2811_v2, %v449_v49  ;;  %v3031_v49 = vrot.slane %v769_v44, %v785_v45 }
  0x8b   : > { %v601_v24 = vadd.f32 %v2832_v13, %v526_v16  ;;  %v606_v30 = vadd.f32 %v2808_v63, %v531_v22 }
  0x8c   : > { %v695_v46 = vpack.c.bf16 %v655_v35, %v653_v34  ;;  %v600_v54 = vadd.f32 %v2808_v63, %v525_v41  ;;  %v530_v34 = vmul.f32 %v2811_v2, %v455_v27 }
  0x8d   : > { %v665_v32 = vmax.f32 %v601_v24, 0.0  ;;  %v670_v35 = vmax.f32 %v606_v30, 0.0 }
  0x8e   : > { %v664_v0 = vmax.f32 %v600_v54, 0.0  ;;  %v605_v38 = vadd.f32 %v2832_v13, %v530_v34 }
  0x8f   : > { %1224 = vmatmul.mubr.bf16.gmra.mrb[32].mxu0 %v689_v43  ;;  %1417 = vmatmul.mubr.bf16.gmra.mrb[32].mxu1 %v689_v43  ;;  %v392_v43 = vld [vmem:[%s2764_s22 + $0xe8] sm:$0xff] }
  0x90   : > { %1233 = vmatprep.mubr.bf16.mxu0 %v692_v48  ;;  %1426 = vmatprep.mubr.bf16.mxu1 %v692_v48  ;;  %v595_v48 = vadd.f32 %v2832_v13, %v520_v36  ;;  %v454_v55 = vunpack.c.h.bf16 %v392_v43  ;;  %v453_v10 = vunpack.c.l.bf16 %v392_v43  ;;  %v700_v11 = vpack.c.bf16 %v664_v0, %v662_v62 }
  0x92   : > { %v659_v59 = vmax.f32 %v595_v48, 0.0  ;;  %v529_v1 = vmul.f32 %v2793_v57, %v454_v55  ;;  %v528_v19 = vmul.f32 %v2811_v2, %v453_v10  ;;  %v3029_v48 = vrot.slane %v769_v44, %v2770_v47 }
  0x94   : > { %v697_v7 = vpack.c.bf16 %v659_v59, %v657_v58  ;;  %v604_v12 = vadd.f32 %v2808_v63, %v529_v1  ;;  %v603_v26 = vadd.f32 %v2832_v13, %v528_v19 }
  0x96   : > { %v668_v21 = vmax.f32 %v604_v12, 0.0  ;;  %v667_v33 = vmax.f32 %v603_v26, 0.0 }
  0x97   : > { %1234 = vmatmul.mubr.bf16.gmra.mrb[36].mxu0 %v691_v4  ;;  %1427 = vmatmul.mubr.bf16.gmra.mrb[36].mxu1 %v691_v4  ;;  %v394_v4 = vld [vmem:[%s2764_s22 + $0xf8] sm:$0xff] }
  0x98   : > { %1243 = vmatprep.mubr.bf16.mxu0 %v694_v8  ;;  %1436 = vmatprep.mubr.bf16.mxu1 %v694_v8  ;;  %v599_v8 = vadd.f32 %v2832_v13, %v524_v60  ;;  %v458_v15 = vunpack.c.h.bf16 %v394_v4  ;;  %v457_v28 = vunpack.c.l.bf16 %v394_v4  ;;  %v701_v37 = vpack.c.bf16 %v667_v33, %v665_v32 }
  0x9a   : > { %v663_v18 = vmax.f32 %v599_v8, 0.0  ;;  %v533_v23 = vmul.f32 %v2793_v57, %v458_v15  ;;  %v532_v57 = vmul.f32 %v2811_v2, %v457_v28  ;;  %v781_v2 = vsub.s32 2, %v2744_v40 }
  0x9c   : > { %v608_v31 = vadd.f32 %v2808_v63, %v533_v23  ;;  %v607_v39 = vadd.f32 %v2832_v13, %v532_v57  ;;  %v669_v63 = vmax.f32 %v605_v38, 0.0  ;;  %v3024_v13 = vrot.slane %v769_v44, %v2783_v52 }
  0x9e   : > { %v672_v36 = vmax.f32 %v608_v31, 0.0  ;;  %v671_v42 = vmax.f32 %v607_v39, 0.0 }
  0x9f   : > { %1244 = vmatmul.mubr.bf16.gmra.mrb[40].mxu0 %v693_v25  ;;  %1437 = vmatmul.mubr.bf16.gmra.mrb[40].mxu1 %v693_v25  ;;  %v699_v25 = vpack.c.bf16 %v663_v18, %v661_v17 }
  0xa0   : > { %1253 = vmatprep.mubr.bf16.mxu0 %v696_v29  ;;  %1446 = vmatprep.mubr.bf16.mxu1 %v696_v29  ;;  %v702_v29 = vpack.c.bf16 %v668_v21, %v666_v20  ;;  %v704_v41 = vpack.c.bf16 %v672_v36, %v670_v35  ;;  %v703_v43 = vpack.c.bf16 %v671_v42, %v669_v63 }
  0xa7   : > { %1254 = vmatmul.mubr.bf16.gmra.mrb[44].mxu0 %v695_v46  ;;  %1447 = vmatmul.mubr.bf16.gmra.mrb[44].mxu1 %v695_v46  ;;  %v3026_v46 = vrot.slane %v769_v44, %v781_v2 }
  0xa8   : > { %1263 = vmatprep.mubr.bf16.mxu0 %v698_v51  ;;  %1456 = vmatprep.mubr.bf16.mxu1 %v698_v51 }
  0xaf   : > { %1264 = vmatmul.mubr.bf16.gmra.mrb[48].mxu0 %v697_v7  ;;  %1457 = vmatmul.mubr.bf16.gmra.mrb[48].mxu1 %v697_v7 }
  0xb0   : > { %1273 = vmatprep.mubr.bf16.mxu0 %v700_v11  ;;  %1466 = vmatprep.mubr.bf16.mxu1 %v700_v11 }
  0xb7   : > { %1274 = vmatmul.mubr.bf16.gmra.mrb[52].mxu0 %v699_v25  ;;  %1467 = vmatmul.mubr.bf16.gmra.mrb[52].mxu1 %v699_v25 }
  0xb8   : > { %1283 = vmatprep.mubr.bf16.mxu0 %v702_v29  ;;  %1476 = vmatprep.mubr.bf16.mxu1 %v702_v29 }
  0xbf   : > { %1284 = vmatmul.mubr.bf16.gmra.mrb[56].mxu0 %v701_v37  ;;  %1477 = vmatmul.mubr.bf16.gmra.mrb[56].mxu1 %v701_v37 }
  0xc0   : > { %1293 = vmatprep.mubr.bf16.mxu0 %v704_v41  ;;  %1486 = vmatprep.mubr.bf16.mxu1 %v704_v41 }
  0xc7   : > { %1294 = vmatmul.mubr.bf16.gmra.mrb[60].mxu0 %v703_v43  ;;  %1487 = vmatmul.mubr.bf16.gmra.mrb[60].mxu1 %v703_v43 }
 0x122   : > { %v1145_v50 = vpop.f32.mrb[0].mxu0  ;;  %v1338_v51 = vpop.f32.mrb[0].mxu1 }
 0x123   : > { %v1146_v53 = vadd.f32 %v1145_v50, %v3024_v13  ;;  %v1339_v54 = vadd.f32 %v1338_v51, %v3026_v46  ;;  %v1147_v55 = vpop.f32.mrb[1].mxu0  ;;  %v1340_v56 = vpop.f32.mrb[1].mxu1 }
 0x124   : > { %v1148_v40 = vadd.f32 %v1147_v55, %v3029_v48  ;;  %v3037_v52 = vadd.f32 %v1340_v56, %v3031_v49  ;;  %v1149_v58 = vpop.f32.mrb[2].mxu0  ;;  %v1342_v59 = vpop.f32.mrb[2].mxu1 }
 0x125   : > { %v1637_v60 = vmul.f32 %v1146_v53, %v1146_v53  ;;  %v1639_v47 = vmul.f32 %v1339_v54, %v1339_v54  ;;  %v1150_v61 = vadd.f32 %v1149_v58, %v3024_v13  ;;  %v1343_v62 = vadd.f32 %v1342_v59, %v3026_v46  ;;  %v1151_v0 = vpop.f32.mrb[3].mxu0  ;;  %v1344_v1 = vpop.f32.mrb[3].mxu1 }
 0x126   : > { %v1638_v3 = vmul.f32 %v1148_v40, %v1148_v40  ;;  %v1640_v4 = vmul.f32 %v3037_v52, %v3037_v52  ;;  %v1152_v5 = vadd.f32 %v1151_v0, %v3029_v48  ;;  %v1345_v6 = vadd.f32 %v1344_v1, %v3031_v49 }
 0x127   : > { %v1501_v7 = vadd.f32 %v1150_v61, %v1146_v53  ;;  %v1641_v8 = vmul.f32 %v1150_v61, %v1150_v61  ;;  %v1901_v9 = vmax.f32 %v1146_v53, %v1150_v61  ;;  %v2037_v10 = vmin.f32 %v1146_v53, %v1150_v61 }
 0x128   : > { %v1563_v11 = vadd.f32 %v1343_v62, %v1339_v54  ;;  %v1643_v12 = vmul.f32 %v1343_v62, %v1343_v62  ;;  %v1963_v14 = vmax.f32 %v1339_v54, %v1343_v62  ;;  %v2099_v15 = vmin.f32 %v1339_v54, %v1343_v62 }
 0x129   : > { %v1765_v16 = vadd.f32 %v1641_v8, %v1637_v60  ;;  %v1532_v17 = vadd.f32 %v1152_v5, %v1148_v40  ;;  %v1642_v18 = vmul.f32 %v1152_v5, %v1152_v5  ;;  %v1932_v19 = vmax.f32 %v1148_v40, %v1152_v5 }
 0x12a   : > { %v1827_v20 = vadd.f32 %v1643_v12, %v1639_v47  ;;  %v2068_v21 = vmin.f32 %v1148_v40, %v1152_v5  ;;  %v1594_v22 = vadd.f32 %v1345_v6, %v3037_v52  ;;  %v1644_v23 = vmul.f32 %v1345_v6, %v1345_v6  ;;  %v1155_v24 = vpop.f32.mrb[4].mxu0  ;;  %v1348_v25 = vpop.f32.mrb[4].mxu1 }
 0x12b   : > { %v1796_v26 = vadd.f32 %v1642_v18, %v1638_v3  ;;  %v1994_v27 = vmax.f32 %v3037_v52, %v1345_v6  ;;  %v2130_v28 = vmin.f32 %v3037_v52, %v1345_v6  ;;  %v1156_v29 = vadd.f32 %v1155_v24, %v3024_v13  ;;  %v1157_v30 = vpop.f32.mrb[5].mxu0  ;;  %v1350_v31 = vpop.f32.mrb[5].mxu1 }
 0x12c   : > { %v1858_v32 = vadd.f32 %v1644_v23, %v1640_v4  ;;  %v1349_v33 = vadd.f32 %v1348_v25, %v3026_v46  ;;  %v1158_v34 = vadd.f32 %v1157_v30, %v3029_v48  ;;  %v1351_v57 = vadd.f32 %v1350_v31, %v3031_v49  ;;  %v1159_v35 = vpop.f32.mrb[6].mxu0  ;;  %v1352_v36 = vpop.f32.mrb[6].mxu1 }
 0x12d   : > { %v1502_v37 = vadd.f32 %v1501_v7, %v1156_v29  ;;  %v1645_v38 = vmul.f32 %v1156_v29, %v1156_v29  ;;  %v1902_v39 = vmax.f32 %v1901_v9, %v1156_v29  ;;  %v2038_v41 = vmin.f32 %v2037_v10, %v1156_v29  ;;  %v1161_v63 = vpop.f32.mrb[7].mxu0  ;;  %v1354_v42 = vpop.f32.mrb[7].mxu1 }
 0x12e   : > { %v1564_v43 = vadd.f32 %v1563_v11, %v1349_v33  ;;  %v1647_v2 = vmul.f32 %v1349_v33, %v1349_v33  ;;  %v1964_v44 = vmax.f32 %v1963_v14, %v1349_v33  ;;  %v2100_v45 = vmin.f32 %v2099_v15, %v1349_v33 }
 0x12f   : > { %v1766_v50 = vadd.f32 %v1765_v16, %v1645_v38  ;;  %v1533_v51 = vadd.f32 %v1532_v17, %v1158_v34  ;;  %v1646_v53 = vmul.f32 %v1158_v34, %v1158_v34  ;;  %v1933_v54 = vmax.f32 %v1932_v19, %v1158_v34 }
 0x130   : > { %v1828_v55 = vadd.f32 %v1827_v20, %v1647_v2  ;;  %v2069_v56 = vmin.f32 %v2068_v21, %v1158_v34  ;;  %v1595_v40 = vadd.f32 %v1594_v22, %v1351_v57  ;;  %v1648_v52 = vmul.f32 %v1351_v57, %v1351_v57 }
 0x131   : > { %v1797_v58 = vadd.f32 %v1796_v26, %v1646_v53  ;;  %v3052_v59 = vmax.f32 %v1994_v27, %v1351_v57  ;;  %v3054_v60 = vmin.f32 %v2130_v28, %v1351_v57  ;;  %v1160_v47 = vadd.f32 %v1159_v35, %v3024_v13 }
 0x132   : > { %v1859_v61 = vadd.f32 %v1858_v32, %v1648_v52  ;;  %v1353_v62 = vadd.f32 %v1352_v36, %v3026_v46  ;;  %v1162_v0 = vadd.f32 %v1161_v63, %v3029_v48  ;;  %v1355_v1 = vadd.f32 %v1354_v42, %v3031_v49  ;;  %v1165_v3 = vpop.f32.mrb[8].mxu0  ;;  %v1358_v4 = vpop.f32.mrb[8].mxu1 }
 0x133   : > { %v1503_v5 = vadd.f32 %v1502_v37, %v1160_v47  ;;  %v1649_v6 = vmul.f32 %v1160_v47, %v1160_v47  ;;  %v1903_v7 = vmax.f32 %v1902_v39, %v1160_v47  ;;  %v2039_v8 = vmin.f32 %v2038_v41, %v1160_v47  ;;  %v1167_v9 = vpop.f32.mrb[9].mxu0  ;;  %v1360_v10 = vpop.f32.mrb[9].mxu1 }
 0x134   : > { %v1565_v11 = vadd.f32 %v1564_v43, %v1353_v62  ;;  %v1651_v12 = vmul.f32 %v1353_v62, %v1353_v62  ;;  %v1965_v14 = vmax.f32 %v1964_v44, %v1353_v62  ;;  %v2101_v15 = vmin.f32 %v2100_v45, %v1353_v62  ;;  %v1169_v16 = vpop.f32.mrb[10].mxu0  ;;  %v1362_v17 = vpop.f32.mrb[10].mxu1 }
 0x135   : > { %v1767_v18 = vadd.f32 %v1766_v50, %v1649_v6  ;;  %v1534_v19 = vadd.f32 %v1533_v51, %v1162_v0  ;;  %v1650_v20 = vmul.f32 %v1162_v0, %v1162_v0  ;;  %v1934_v21 = vmax.f32 %v1933_v54, %v1162_v0  ;;  %v1171_v22 = vpop.f32.mrb[11].mxu0  ;;  %v1364_v23 = vpop.f32.mrb[11].mxu1 }
 0x136   : > { %v1829_v24 = vadd.f32 %v1828_v55, %v1651_v12  ;;  %v2070_v25 = vmin.f32 %v2069_v56, %v1162_v0  ;;  %v1596_v26 = vadd.f32 %v1595_v40, %v1355_v1  ;;  %v1652_v27 = vmul.f32 %v1355_v1, %v1355_v1 }
 0x137   : > { %v1798_v28 = vadd.f32 %v1797_v58, %v1650_v20  ;;  %v1996_v29 = vmax.f32 %v3052_v59, %v1355_v1  ;;  %v2132_v30 = vmin.f32 %v3054_v60, %v1355_v1  ;;  %v1166_v31 = vadd.f32 %v1165_v3, %v3024_v13 }
 0x138   : > { %v1860_v32 = vadd.f32 %v1859_v61, %v1652_v27  ;;  %v1359_v33 = vadd.f32 %v1358_v4, %v3026_v46  ;;  %v1168_v34 = vadd.f32 %v1167_v9, %v3029_v48  ;;  %v1361_v57 = vadd.f32 %v1360_v10, %v3031_v49 }
 0x139   : > { %v1504_v35 = vadd.f32 %v1503_v5, %v1166_v31  ;;  %v1653_v36 = vmul.f32 %v1166_v31, %v1166_v31  ;;  %v3066_v37 = vmax.f32 %v1903_v7, %v1166_v31  ;;  %v3068_v38 = vmin.f32 %v2039_v8, %v1166_v31 }
 0x13a   : > { %v1566_v39 = vadd.f32 %v1565_v11, %v1359_v33  ;;  %v1655_v41 = vmul.f32 %v1359_v33, %v1359_v33  ;;  %v3070_v63 = vmax.f32 %v1965_v14, %v1359_v33  ;;  %v3072_v42 = vmin.f32 %v2101_v15, %v1359_v33  ;;  %v1175_v43 = vpop.f32.mrb[12].mxu0  ;;  %v1368_v2 = vpop.f32.mrb[12].mxu1 }
 0x13b   : > { %v1768_v44 = vadd.f32 %v1767_v18, %v1653_v36  ;;  %v1535_v45 = vadd.f32 %v1534_v19, %v1168_v34  ;;  %v1654_v50 = vmul.f32 %v1168_v34, %v1168_v34  ;;  %v3074_v51 = vmax.f32 %v1934_v21, %v1168_v34  ;;  %v1177_v53 = vpop.f32.mrb[13].mxu0  ;;  %v1370_v54 = vpop.f32.mrb[13].mxu1 }
 0x13c   : > { %v1830_v55 = vadd.f32 %v1829_v24, %v1655_v41  ;;  %v2071_v56 = vmin.f32 %v2070_v25, %v1168_v34  ;;  %v1597_v40 = vadd.f32 %v1596_v26, %v1361_v57  ;;  %v1656_v52 = vmul.f32 %v1361_v57, %v1361_v57  ;;  %v3076_v58 = vpop.f32.mrb[14].mxu0  ;;  %v3078_v59 = vpop.f32.mrb[14].mxu1 }
 0x13d   : > { %v1799_v60 = vadd.f32 %v1798_v28, %v1654_v50  ;;  %v1997_v47 = vmax.f32 %v1996_v29, %v1361_v57  ;;  %v2133_v61 = vmin.f32 %v2132_v30, %v1361_v57  ;;  %v1170_v62 = vadd.f32 %v1169_v16, %v3024_v13  ;;  %v1181_v0 = vpop.f32.mrb[15].mxu0  ;;  %v1374_v1 = vpop.f32.mrb[15].mxu1 }
 0x13e   : > { %v1861_v3 = vadd.f32 %v1860_v32, %v1656_v52  ;;  %v1363_v4 = vadd.f32 %v1362_v17, %v3026_v46  ;;  %v1172_v5 = vadd.f32 %v1171_v22, %v3029_v48  ;;  %v1365_v6 = vadd.f32 %v1364_v23, %v3031_v49 }
 0x13f   : > { %v1505_v7 = vadd.f32 %v1504_v35, %v1170_v62  ;;  %v1657_v8 = vmul.f32 %v1170_v62, %v1170_v62  ;;  %v1905_v9 = vmax.f32 %v3066_v37, %v1170_v62  ;;  %v2041_v10 = vmin.f32 %v3068_v38, %v1170_v62 }
 0x140   : > { %v1567_v11 = vadd.f32 %v1566_v39, %v1363_v4  ;;  %v1659_v12 = vmul.f32 %v1363_v4, %v1363_v4  ;;  %v1967_v14 = vmax.f32 %v3070_v63, %v1363_v4  ;;  %v2103_v15 = vmin.f32 %v3072_v42, %v1363_v4 }
 0x141   : > { %v1769_v16 = vadd.f32 %v1768_v44, %v1657_v8  ;;  %v1536_v18 = vadd.f32 %v1535_v45, %v1172_v5  ;;  %v1658_v19 = vmul.f32 %v1172_v5, %v1172_v5  ;;  %v1936_v17 = vmax.f32 %v3074_v51, %v1172_v5 }
 0x142   : > { %v1831_v20 = vadd.f32 %v1830_v55, %v1659_v12  ;;  %v2072_v21 = vmin.f32 %v2071_v56, %v1172_v5  ;;  %v1598_v22 = vadd.f32 %v1597_v40, %v1365_v6  ;;  %v1660_v23 = vmul.f32 %v1365_v6, %v1365_v6  ;;  %v3089_v24 = vpop.f32.mrb[16].mxu0  ;;  %v3091_v25 = vpop.f32.mrb[16].mxu1 }
 0x143   : > { %v1800_v26 = vadd.f32 %v1799_v60, %v1658_v19  ;;  %v1998_v27 = vmax.f32 %v1997_v47, %v1365_v6  ;;  %v2134_v28 = vmin.f32 %v2133_v61, %v1365_v6  ;;  %v1176_v29 = vadd.f32 %v1175_v43, %v3024_v13  ;;  %v3094_v30 = vpop.f32.mrb[17].mxu0  ;;  %v3096_v31 = vpop.f32.mrb[17].mxu1 }
 0x144   : > { %v1862_v32 = vadd.f32 %v1861_v3, %v1660_v23  ;;  %v1369_v33 = vadd.f32 %v1368_v2, %v3026_v46  ;;  %v1178_v34 = vadd.f32 %v1177_v53, %v3029_v48  ;;  %v1371_v57 = vadd.f32 %v1370_v54, %v3031_v49  ;;  %v3101_v35 = vpop.f32.mrb[18].mxu0  ;;  %v3103_v36 = vpop.f32.mrb[18].mxu1 }
 0x145   : > { %v1506_v37 = vadd.f32 %v1505_v7, %v1176_v29  ;;  %v1661_v38 = vmul.f32 %v1176_v29, %v1176_v29  ;;  %v1906_v39 = vmax.f32 %v1905_v9, %v1176_v29  ;;  %v2042_v41 = vmin.f32 %v2041_v10, %v1176_v29  ;;  %v3105_v63 = vpop.f32.mrb[19].mxu0  ;;  %v3107_v42 = vpop.f32.mrb[19].mxu1 }
 0x146   : > { %v1568_v43 = vadd.f32 %v1567_v11, %v1369_v33  ;;  %v1663_v44 = vmul.f32 %v1369_v33, %v1369_v33  ;;  %v1968_v45 = vmax.f32 %v1967_v14, %v1369_v33  ;;  %v2104_v2 = vmin.f32 %v2103_v15, %v1369_v33 }
 0x147   : > { %v1770_v50 = vadd.f32 %v1769_v16, %v1661_v38  ;;  %v1537_v51 = vadd.f32 %v1536_v18, %v1178_v34  ;;  %v1662_v53 = vmul.f32 %v1178_v34, %v1178_v34  ;;  %v1937_v54 = vmax.f32 %v1936_v17, %v1178_v34 }
 0x148   : > { %v1832_v55 = vadd.f32 %v1831_v20, %v1663_v44  ;;  %v2073_v56 = vmin.f32 %v2072_v21, %v1178_v34  ;;  %v1599_v40 = vadd.f32 %v1598_v22, %v1371_v57  ;;  %v1664_v52 = vmul.f32 %v1371_v57, %v1371_v57 }
 0x149   : > { %v1801_v60 = vadd.f32 %v1800_v26, %v1662_v53  ;;  %v3109_v47 = vmax.f32 %v1998_v27, %v1371_v57  ;;  %v3111_v61 = vmin.f32 %v2134_v28, %v1371_v57  ;;  %v1180_v62 = vadd.f32 %v3076_v58, %v3024_v13 }
 0x14a   : > { %v1863_v3 = vadd.f32 %v1862_v32, %v1664_v52  ;;  %v1373_v4 = vadd.f32 %v3078_v59, %v3026_v46  ;;  %v1182_v5 = vadd.f32 %v1181_v0, %v3029_v48  ;;  %v1375_v6 = vadd.f32 %v1374_v1, %v3031_v49  ;;  %v3119_v7 = vpop.f32.mrb[20].mxu0  ;;  %v3121_v8 = vpop.f32.mrb[20].mxu1 }
 0x14b   : > { %v1507_v9 = vadd.f32 %v1506_v37, %v1180_v62  ;;  %v1665_v10 = vmul.f32 %v1180_v62, %v1180_v62  ;;  %v1907_v11 = vmax.f32 %v1906_v39, %v1180_v62  ;;  %v2043_v12 = vmin.f32 %v2042_v41, %v1180_v62  ;;  %v3123_v14 = vpop.f32.mrb[21].mxu0  ;;  %v3125_v15 = vpop.f32.mrb[21].mxu1 }
 0x14c   : > { %v1569_v58 = vadd.f32 %v1568_v43, %v1373_v4  ;;  %v1667_v16 = vmul.f32 %v1373_v4, %v1373_v4  ;;  %v1969_v18 = vmax.f32 %v1968_v45, %v1373_v4  ;;  %v2105_v59 = vmin.f32 %v2104_v2, %v1373_v4  ;;  %v3127_v19 = vpop.f32.mrb[22].mxu0  ;;  %v3129_v0 = vpop.f32.mrb[22].mxu1 }
 0x14d   : > { %v1771_v1 = vadd.f32 %v1770_v50, %v1665_v10  ;;  %v1538_v17 = vadd.f32 %v1537_v51, %v1182_v5  ;;  %v1666_v20 = vmul.f32 %v1182_v5, %v1182_v5  ;;  %v1938_v21 = vmax.f32 %v1937_v54, %v1182_v5  ;;  %v3131_v22 = vpop.f32.mrb[23].mxu0  ;;  %v3133_v23 = vpop.f32.mrb[23].mxu1 }
 0x14e   : > { %v1833_v26 = vadd.f32 %v1832_v55, %v1667_v16  ;;  %v2074_v27 = vmin.f32 %v2073_v56, %v1182_v5  ;;  %v1600_v28 = vadd.f32 %v1599_v40, %v1375_v6  ;;  %v1668_v29 = vmul.f32 %v1375_v6, %v1375_v6 }
 0x14f   : > { %v1802_v32 = vadd.f32 %v1801_v60, %v1666_v20  ;;  %v2000_v33 = vmax.f32 %v3109_v47, %v1375_v6  ;;  %v2136_v34 = vmin.f32 %v3111_v61, %v1375_v6  ;;  %v1186_v57 = vadd.f32 %v3089_v24, %v3024_v13 }
 0x150   : > { %v1864_v37 = vadd.f32 %v1863_v3, %v1668_v29  ;;  %v1379_v38 = vadd.f32 %v3091_v25, %v3026_v46  ;;  %v1188_v39 = vadd.f32 %v3094_v30, %v3029_v48  ;;  %v1381_v41 = vadd.f32 %v3096_v31, %v3031_v49 }
 0x151   : > { %v1508_v43 = vadd.f32 %v1507_v9, %v1186_v57  ;;  %v1669_v44 = vmul.f32 %v1186_v57, %v1186_v57  ;;  %v3145_v45 = vmax.f32 %v1907_v11, %v1186_v57  ;;  %v3147_v2 = vmin.f32 %v2043_v12, %v1186_v57 }
 0x152   : > { %v1570_v50 = vadd.f32 %v1569_v58, %v1379_v38  ;;  %v1671_v51 = vmul.f32 %v1379_v38, %v1379_v38  ;;  %v3149_v53 = vmax.f32 %v1969_v18, %v1379_v38  ;;  %v3151_v24 = vmin.f32 %v2105_v59, %v1379_v38  ;;  %v3153_v54 = vpop.f32.mrb[24].mxu0  ;;  %v3155_v25 = vpop.f32.mrb[24].mxu1 }
 0x153   : > { %v1772_v30 = vadd.f32 %v1771_v1, %v1669_v44  ;;  %v1539_v55 = vadd.f32 %v1538_v17, %v1188_v39  ;;  %v1670_v56 = vmul.f32 %v1188_v39, %v1188_v39  ;;  %v3157_v31 = vmax.f32 %v1938_v21, %v1188_v39  ;;  %v3159_v40 = vpop.f32.mrb[25].mxu0  ;;  %v3161_v52 = vpop.f32.mrb[25].mxu1 }
 0x154   : > { %v1834_v60 = vadd.f32 %v1833_v26, %v1671_v51  ;;  %v2075_v47 = vmin.f32 %v2074_v27, %v1188_v39  ;;  %v1601_v61 = vadd.f32 %v1600_v28, %v1381_v41  ;;  %v1672_v62 = vmul.f32 %v1381_v41, %v1381_v41  ;;  %v3163_v3 = vpop.f32.mrb[26].mxu0  ;;  %v3165_v4 = vpop.f32.mrb[26].mxu1 }
 0x155   : > { %v1803_v5 = vadd.f32 %v1802_v32, %v1670_v56  ;;  %v2001_v6 = vmax.f32 %v2000_v33, %v1381_v41  ;;  %v2137_v9 = vmin.f32 %v2136_v34, %v1381_v41  ;;  %v1190_v10 = vadd.f32 %v3101_v35, %v3024_v13  ;;  %v3169_v11 = vpop.f32.mrb[27].mxu0  ;;  %v3171_v12 = vpop.f32.mrb[27].mxu1 }
 0x156   : > { %v1865_v58 = vadd.f32 %v1864_v37, %v1672_v62  ;;  %v1383_v16 = vadd.f32 %v3103_v36, %v3026_v46  ;;  %v1192_v18 = vadd.f32 %v3105_v63, %v3029_v48  ;;  %v1385_v59 = vadd.f32 %v3107_v42, %v3031_v49 }
 0x157   : > { %v1509_v1 = vadd.f32 %v1508_v43, %v1190_v10  ;;  %v1673_v17 = vmul.f32 %v1190_v10, %v1190_v10  ;;  %v1909_v20 = vmax.f32 %v3145_v45, %v1190_v10  ;;  %v2045_v35 = vmin.f32 %v3147_v2, %v1190_v10 }
 0x158   : > { %v1571_v21 = vadd.f32 %v1570_v50, %v1383_v16  ;;  %v1675_v26 = vmul.f32 %v1383_v16, %v1383_v16  ;;  %v1971_v27 = vmax.f32 %v3149_v53, %v1383_v16  ;;  %v2107_v28 = vmin.f32 %v3151_v24, %v1383_v16 }
 0x159   : > { %v1773_v29 = vadd.f32 %v1772_v30, %v1673_v17  ;;  %v1540_v36 = vadd.f32 %v1539_v55, %v1192_v18  ;;  %v1674_v32 = vmul.f32 %v1192_v18, %v1192_v18  ;;  %v1940_v63 = vmax.f32 %v3157_v31, %v1192_v18 }
 0x15a   : > { %v1835_v33 = vadd.f32 %v1834_v60, %v1675_v26  ;;  %v2076_v34 = vmin.f32 %v2075_v47, %v1192_v18  ;;  %v1602_v42 = vadd.f32 %v1601_v61, %v1385_v59  ;;  %v1676_v57 = vmul.f32 %v1385_v59, %v1385_v59  ;;  %v3184_v37 = vpop.f32.mrb[28].mxu0  ;;  %v3186_v38 = vpop.f32.mrb[28].mxu1 }
 0x15b   : > { %v1804_v39 = vadd.f32 %v1803_v5, %v1674_v32  ;;  %v2002_v41 = vmax.f32 %v2001_v6, %v1385_v59  ;;  %v2138_v43 = vmin.f32 %v2137_v9, %v1385_v59  ;;  %v1196_v44 = vadd.f32 %v3119_v7, %v3024_v13  ;;  %v3190_v45 = vpop.f32.mrb[29].mxu0  ;;  %v3192_v2 = vpop.f32.mrb[29].mxu1 }
 0x15c   : > { %v1866_v50 = vadd.f32 %v1865_v58, %v1676_v57  ;;  %v1389_v51 = vadd.f32 %v3121_v8, %v3026_v46  ;;  %v1198_v53 = vadd.f32 %v3123_v14, %v3029_v48  ;;  %v1391_v24 = vadd.f32 %v3125_v15, %v3031_v49  ;;  %v3200_v30 = vpop.f32.mrb[30].mxu0  ;;  %v3202_v55 = vpop.f32.mrb[30].mxu1 }
 0x15d   : > { %v1510_v56 = vadd.f32 %v1509_v1, %v1196_v44  ;;  %v1677_v7 = vmul.f32 %v1196_v44, %v1196_v44  ;;  %v1910_v31 = vmax.f32 %v1909_v20, %v1196_v44  ;;  %v2046_v60 = vmin.f32 %v2045_v35, %v1196_v44  ;;  %v3204_v47 = vpop.f32.mrb[31].mxu0  ;;  %v3206_v61 = vpop.f32.mrb[31].mxu1 }
 0x15e   : > { %v1572_v62 = vadd.f32 %v1571_v21, %v1389_v51  ;;  %v1679_v8 = vmul.f32 %v1389_v51, %v1389_v51  ;;  %v1972_v5 = vmax.f32 %v1971_v27, %v1389_v51  ;;  %v2108_v6 = vmin.f32 %v2107_v28, %v1389_v51 }
 0x15f   : > { %v1774_v14 = vadd.f32 %v1773_v29, %v1677_v7  ;;  %v1541_v9 = vadd.f32 %v1540_v36, %v1198_v53  ;;  %v1678_v10 = vmul.f32 %v1198_v53, %v1198_v53  ;;  %v1941_v15 = vmax.f32 %v1940_v63, %v1198_v53 }
 0x160   : > { %v1836_v58 = vadd.f32 %v1835_v33, %v1679_v8  ;;  %v2077_v16 = vmin.f32 %v2076_v34, %v1198_v53  ;;  %v1603_v18 = vadd.f32 %v1602_v42, %v1391_v24  ;;  %v1680_v59 = vmul.f32 %v1391_v24, %v1391_v24 }
 0x161   : > { %v1805_v1 = vadd.f32 %v1804_v39, %v1678_v10  ;;  %v3208_v17 = vmax.f32 %v2002_v41, %v1391_v24  ;;  %v3210_v20 = vmin.f32 %v2138_v43, %v1391_v24  ;;  %v1200_v35 = vadd.f32 %v3127_v19, %v3024_v13 }
 0x162   : > { %v1867_v21 = vadd.f32 %v1866_v50, %v1680_v59  ;;  %v1393_v26 = vadd.f32 %v3129_v0, %v3026_v46  ;;  %v1202_v27 = vadd.f32 %v3131_v22, %v3029_v48  ;;  %v1395_v28 = vadd.f32 %v3133_v23, %v3031_v49  ;;  %v3220_v29 = vpop.f32.mrb[32].mxu0  ;;  %v3222_v36 = vpop.f32.mrb[32].mxu1 }
 0x163   : > { %v1511_v32 = vadd.f32 %v1510_v56, %v1200_v35  ;;  %v1681_v63 = vmul.f32 %v1200_v35, %v1200_v35  ;;  %v1911_v33 = vmax.f32 %v1910_v31, %v1200_v35  ;;  %v2047_v34 = vmin.f32 %v2046_v60, %v1200_v35  ;;  %v3224_v42 = vpop.f32.mrb[33].mxu0  ;;  %v3226_v19 = vpop.f32.mrb[33].mxu1 }
 0x164   : > { %v1573_v57 = vadd.f32 %v1572_v62, %v1393_v26  ;;  %v1683_v0 = vmul.f32 %v1393_v26, %v1393_v26  ;;  %v1973_v39 = vmax.f32 %v1972_v5, %v1393_v26  ;;  %v2109_v41 = vmin.f32 %v2108_v6, %v1393_v26  ;;  %v3228_v22 = vpop.f32.mrb[34].mxu0  ;;  %v3230_v43 = vpop.f32.mrb[34].mxu1 }
 0x165   : > { %v1775_v23 = vadd.f32 %v1774_v14, %v1681_v63  ;;  %v1542_v44 = vadd.f32 %v1541_v9, %v1202_v27  ;;  %v1682_v50 = vmul.f32 %v1202_v27, %v1202_v27  ;;  %v1942_v51 = vmax.f32 %v1941_v15, %v1202_v27  ;;  %v3232_v53 = vpop.f32.mrb[35].mxu0  ;;  %v3234_v24 = vpop.f32.mrb[35].mxu1 }
 0x166   : > { %v1837_v56 = vadd.f32 %v1836_v58, %v1683_v0  ;;  %v2078_v7 = vmin.f32 %v2077_v16, %v1202_v27  ;;  %v1604_v31 = vadd.f32 %v1603_v18, %v1395_v28  ;;  %v1684_v60 = vmul.f32 %v1395_v28, %v1395_v28 }
 0x167   : > { %v1806_v62 = vadd.f32 %v1805_v1, %v1682_v50  ;;  %v2004_v8 = vmax.f32 %v3208_v17, %v1395_v28  ;;  %v2140_v5 = vmin.f32 %v3210_v20, %v1395_v28  ;;  %v1206_v6 = vadd.f32 %v3153_v54, %v3024_v13 }
 0x168   : > { %v1868_v14 = vadd.f32 %v1867_v21, %v1684_v60  ;;  %v1399_v9 = vadd.f32 %v3155_v25, %v3026_v46  ;;  %v1208_v10 = vadd.f32 %v3159_v40, %v3029_v48  ;;  %v1401_v15 = vadd.f32 %v3161_v52, %v3031_v49 }
 0x169   : > { %v1512_v58 = vadd.f32 %v1511_v32, %v1206_v6  ;;  %v1685_v16 = vmul.f32 %v1206_v6, %v1206_v6  ;;  %v3246_v18 = vmax.f32 %v1911_v33, %v1206_v6  ;;  %v3248_v59 = vmin.f32 %v2047_v34, %v1206_v6 }
 0x16a   : > { %v1574_v1 = vadd.f32 %v1573_v57, %v1399_v9  ;;  %v1687_v17 = vmul.f32 %v1399_v9, %v1399_v9  ;;  %v3250_v20 = vmax.f32 %v1973_v39, %v1399_v9  ;;  %v3252_v54 = vmin.f32 %v2109_v41, %v1399_v9  ;;  %v3254_v35 = vpop.f32.mrb[36].mxu0  ;;  %v3256_v25 = vpop.f32.mrb[36].mxu1 }
 0x16b   : > { %v1776_v40 = vadd.f32 %v1775_v23, %v1685_v16  ;;  %v1543_v21 = vadd.f32 %v1542_v44, %v1208_v10  ;;  %v1686_v26 = vmul.f32 %v1208_v10, %v1208_v10  ;;  %v3258_v52 = vmax.f32 %v1942_v51, %v1208_v10  ;;  %v3260_v27 = vpop.f32.mrb[37].mxu0  ;;  %v3262_v28 = vpop.f32.mrb[37].mxu1 }
 0x16c   : > { %v1838_v32 = vadd.f32 %v1837_v56, %v1687_v17  ;;  %v2079_v63 = vmin.f32 %v2078_v7, %v1208_v10  ;;  %v1605_v33 = vadd.f32 %v1604_v31, %v1401_v15  ;;  %v1688_v34 = vmul.f32 %v1401_v15, %v1401_v15  ;;  %v3264_v57 = vpop.f32.mrb[38].mxu0  ;;  %v3266_v0 = vpop.f32.mrb[38].mxu1 }
 0x16d   : > { %v1807_v39 = vadd.f32 %v1806_v62, %v1686_v26  ;;  %v2005_v41 = vmax.f32 %v2004_v8, %v1401_v15  ;;  %v2141_v50 = vmin.f32 %v2140_v5, %v1401_v15  ;;  %v1210_v23 = vadd.f32 %v3163_v3, %v3024_v13  ;;  %v3270_v44 = vpop.f32.mrb[39].mxu0  ;;  %v3272_v51 = vpop.f32.mrb[39].mxu1 }
 0x16e   : > { %v1869_v60 = vadd.f32 %v1868_v14, %v1688_v34  ;;  %v1403_v56 = vadd.f32 %v3165_v4, %v3026_v46  ;;  %v1212_v7 = vadd.f32 %v3169_v11, %v3029_v48  ;;  %v1405_v31 = vadd.f32 %v3171_v12, %v3031_v49 }
 0x16f   : > { %v1513_v62 = vadd.f32 %v1512_v58, %v1210_v23  ;;  %v1689_v8 = vmul.f32 %v1210_v23, %v1210_v23  ;;  %v1913_v5 = vmax.f32 %v3246_v18, %v1210_v23  ;;  %v2049_v3 = vmin.f32 %v3248_v59, %v1210_v23 }
 0x170   : > { %v1575_v6 = vadd.f32 %v1574_v1, %v1403_v56  ;;  %v1691_v9 = vmul.f32 %v1403_v56, %v1403_v56  ;;  %v1975_v10 = vmax.f32 %v3250_v20, %v1403_v56  ;;  %v2111_v14 = vmin.f32 %v3252_v54, %v1403_v56 }
 0x171   : > { %v1777_v15 = vadd.f32 %v1776_v40, %v1689_v8  ;;  %v1544_v4 = vadd.f32 %v1543_v21, %v1212_v7  ;;  %v1690_v16 = vmul.f32 %v1212_v7, %v1212_v7  ;;  %v1944_v11 = vmax.f32 %v3258_v52, %v1212_v7 }
 0x172   : > { %v1839_v17 = vadd.f32 %v1838_v32, %v1691_v9  ;;  %v2080_v26 = vmin.f32 %v2079_v63, %v1212_v7  ;;  %v1606_v12 = vadd.f32 %v1605_v33, %v1405_v31  ;;  %v1692_v58 = vmul.f32 %v1405_v31, %v1405_v31  ;;  %v3285_v34 = vpop.f32.mrb[40].mxu0  ;;  %v3287_v18 = vpop.f32.mrb[40].mxu1 }
 0x173   : > { %3597 = vst [vmem:[#allocation2_spill] sm:$0xff] %v3287_v18  ;;  %v1808_v59 = vadd.f32 %v1807_v39, %v1690_v16  ;;  %v2006_v1 = vmax.f32 %v2005_v41, %v1405_v31  ;;  %v2142_v23 = vmin.f32 %v2141_v50, %v1405_v31  ;;  %v1216_v20 = vadd.f32 %v3184_v37, %v3024_v13  ;;  %v3291_v54 = vpop.f32.mrb[41].mxu0  ;;  %v3293_v40 = vpop.f32.mrb[41].mxu1 }
 0x174   : > { %3598 = vst [vmem:[#allocation3_spill] sm:$0xff] %v3291_v54  ;;  %3599 = vst [vmem:[#allocation4_spill] sm:$0xff] %v3293_v40  ;;  %v1870_v21 = vadd.f32 %v1869_v60, %v1692_v58  ;;  %v1409_v52 = vadd.f32 %v3186_v38, %v3026_v46  ;;  %v1218_v32 = vadd.f32 %v3190_v45, %v3029_v48  ;;  %v3301_v33 = vpop.f32.mrb[42].mxu0  ;;  %v3303_v39 = vpop.f32.mrb[42].mxu1 }
 0x175   : > { %v1411_v63 = vadd.f32 %v3192_v2, %v3031_v49  ;;  %3600 = vst [vmem:[#allocation5_spill] sm:$0xff] %v3301_v33  ;;  %3601 = vst [vmem:[#allocation6_spill] sm:$0xff] %v3303_v39  ;;  %v1514_v41 = vadd.f32 %v1513_v62, %v1216_v20  ;;  %v1693_v37 = vmul.f32 %v1216_v20, %v1216_v20  ;;  %v3305_v7 = vpop.f32.mrb[43].mxu0  ;;  %v3307_v60 = vpop.f32.mrb[43].mxu1 }
 0x176   : > { %v1914_v50 = vmax.f32 %v1913_v5, %v1216_v20  ;;  %v2050_v56 = vmin.f32 %v2049_v3, %v1216_v20  ;;  %v1576_v31 = vadd.f32 %v1575_v6, %v1409_v52  ;;  %v1695_v38 = vmul.f32 %v1409_v52, %v1409_v52 }
 0x177   : > { %v1976_v8 = vmax.f32 %v1975_v10, %v1409_v52  ;;  %v2112_v9 = vmin.f32 %v2111_v14, %v1409_v52  ;;  %v1778_v45 = vadd.f32 %v1777_v15, %v1693_v37  ;;  %v1545_v16 = vadd.f32 %v1544_v4, %v1218_v32 }
 0x178   : > { %v1694_v58 = vmul.f32 %v1218_v32, %v1218_v32  ;;  %v1945_v2 = vmax.f32 %v1944_v11, %v1218_v32  ;;  %v1840_v40 = vadd.f32 %v1839_v17, %v1695_v38  ;;  %v2081_v33 = vmin.f32 %v2080_v26, %v1218_v32 }
 0x179   : > { %v1607_v54 = vadd.f32 %v1606_v12, %v1411_v63  ;;  %v1696_v39 = vmul.f32 %v1411_v63, %v1411_v63  ;;  %v3309_v18 = vmax.f32 %v2006_v1, %v1411_v63  ;;  %v3311_v5 = vmin.f32 %v2142_v23, %v1411_v63 }
 0x17a   : > { %v1809_v62 = vadd.f32 %v1808_v59, %v1694_v58  ;;  %v1220_v3 = vadd.f32 %v3200_v30, %v3024_v13  ;;  %v1413_v10 = vadd.f32 %v3202_v55, %v3026_v46  ;;  %v1222_v14 = vadd.f32 %v3204_v47, %v3029_v48  ;;  %v3321_v4 = vpop.f32.mrb[44].mxu0  ;;  %v3323_v11 = vpop.f32.mrb[44].mxu1 }
 0x17b   : > { %v1871_v6 = vadd.f32 %v1870_v21, %v1696_v39  ;;  %v1415_v15 = vadd.f32 %v3206_v61, %v3031_v49  ;;  %v3325_v1 = vpop.f32.mrb[45].mxu0  ;;  %v3327_v30 = vpop.f32.mrb[45].mxu1 }
 0x17c   : > { %v1515_v17 = vadd.f32 %v1514_v41, %v1220_v3  ;;  %v1697_v26 = vmul.f32 %v1220_v3, %v1220_v3  ;;  %v1915_v12 = vmax.f32 %v1914_v50, %v1220_v3  ;;  %v2051_v59 = vmin.f32 %v2050_v56, %v1220_v3  ;;  %v3329_v47 = vpop.f32.mrb[46].mxu0  ;;  %v3331_v52 = vpop.f32.mrb[46].mxu1 }
 0x17d   : > { %v1577_v23 = vadd.f32 %v1576_v31, %v1413_v10  ;;  %v1699_v55 = vmul.f32 %v1413_v10, %v1413_v10  ;;  %v1977_v20 = vmax.f32 %v1976_v8, %v1413_v10  ;;  %v2113_v21 = vmin.f32 %v2112_v9, %v1413_v10  ;;  %v3333_v41 = vpop.f32.mrb[47].mxu0  ;;  %v3335_v37 = vpop.f32.mrb[47].mxu1 }
 0x17e   : > { %v1779_v61 = vadd.f32 %v1778_v45, %v1697_v26  ;;  %v1546_v32 = vadd.f32 %v1545_v16, %v1222_v14  ;;  %v1698_v63 = vmul.f32 %v1222_v14, %v1222_v14  ;;  %v1946_v39 = vmax.f32 %v1945_v2, %v1222_v14 }
 0x17f   : > { %v1841_v50 = vadd.f32 %v1840_v40, %v1699_v55  ;;  %v2082_v56 = vmin.f32 %v2081_v33, %v1222_v14  ;;  %v1608_v38 = vadd.f32 %v1607_v54, %v1415_v15  ;;  %v1700_v58 = vmul.f32 %v1415_v15, %v1415_v15 }
 0x180   : > { %v1810_v31 = vadd.f32 %v1809_v62, %v1698_v63  ;;  %v2008_v8 = vmax.f32 %v3309_v18, %v1415_v15  ;;  %v2144_v9 = vmin.f32 %v3311_v5, %v1415_v15  ;;  %v1226_v3 = vadd.f32 %v3220_v29, %v3024_v13 }
 0x181   : > { %v1872_v45 = vadd.f32 %v1871_v6, %v1700_v58  ;;  %v1419_v16 = vadd.f32 %v3222_v36, %v3026_v46  ;;  %v1228_v2 = vadd.f32 %v3224_v42, %v3029_v48  ;;  %v1421_v40 = vadd.f32 %v3226_v19, %v3031_v49 }
 0x182   : > { %v1516_v54 = vadd.f32 %v1515_v17, %v1226_v3  ;;  %v1701_v33 = vmul.f32 %v1226_v3, %v1226_v3  ;;  %v3347_v62 = vmax.f32 %v1915_v12, %v1226_v3  ;;  %v3349_v18 = vmin.f32 %v2051_v59, %v1226_v3  ;;  %v3355_v6 = vpop.f32.mrb[48].mxu0  ;;  %v3357_v36 = vpop.f32.mrb[48].mxu1 }
 0x183   : > { %v1578_v5 = vadd.f32 %v1577_v23, %v1419_v16  ;;  %v1703_v10 = vmul.f32 %v1419_v16, %v1419_v16  ;;  %v3351_v14 = vmax.f32 %v1977_v20, %v1419_v16  ;;  %v3353_v29 = vmin.f32 %v2113_v21, %v1419_v16  ;;  %v3361_v17 = vpop.f32.mrb[49].mxu0  ;;  %v3363_v12 = vpop.f32.mrb[49].mxu1 }
 0x184   : > { %v1780_v42 = vadd.f32 %v1779_v61, %v1701_v33  ;;  %v1547_v15 = vadd.f32 %v1546_v32, %v1228_v2  ;;  %v1702_v26 = vmul.f32 %v1228_v2, %v1228_v2  ;;  %v3359_v19 = vmax.f32 %v1946_v39, %v1228_v2  ;;  %v3365_v63 = vpop.f32.mrb[50].mxu0  ;;  %v3367_v21 = vpop.f32.mrb[50].mxu1 }
 0x185   : > { %v1842_v59 = vadd.f32 %v1841_v50, %v1703_v10  ;;  %v2083_v23 = vmin.f32 %v2082_v56, %v1228_v2  ;;  %v1609_v55 = vadd.f32 %v1608_v38, %v1421_v40  ;;  %v1704_v20 = vmul.f32 %v1421_v40, %v1421_v40  ;;  %3602 = vst [vmem:[#allocation7_spill] sm:$0xff] %v3367_v21  ;;  %v3371_v32 = vpop.f32.mrb[51].mxu0  ;;  %v3373_v39 = vpop.f32.mrb[51].mxu1 }
 0x186   : > { %v1811_v58 = vadd.f32 %v1810_v31, %v1702_v26  ;;  %v2009_v3 = vmax.f32 %v2008_v8, %v1421_v40  ;;  %v2145_v16 = vmin.f32 %v2144_v9, %v1421_v40  ;;  %v1230_v61 = vadd.f32 %v3228_v22, %v3024_v13  ;;  %3603 = vst [vmem:[#allocation8_spill] sm:$0xff] %v3371_v32 }
 0x187   : > { %3604 = vst [vmem:[#allocation9_spill] sm:$0xff] %v3373_v39  ;;  %v1873_v33 = vadd.f32 %v1872_v45, %v1704_v20  ;;  %v1423_v50 = vadd.f32 %v3230_v43, %v3026_v46  ;;  %v1232_v56 = vadd.f32 %v3232_v53, %v3029_v48  ;;  %v1425_v38 = vadd.f32 %v3234_v24, %v3031_v49 }
 0x188   : > { %v1517_v31 = vadd.f32 %v1516_v54, %v1230_v61  ;;  %v1705_v8 = vmul.f32 %v1230_v61, %v1230_v61  ;;  %v1917_v9 = vmax.f32 %v3347_v62, %v1230_v61  ;;  %v2053_v22 = vmin.f32 %v3349_v18, %v1230_v61 }
 0x189   : > { %v1579_v2 = vadd.f32 %v1578_v5, %v1423_v50  ;;  %v1707_v40 = vmul.f32 %v1423_v50, %v1423_v50  ;;  %v1979_v10 = vmax.f32 %v3351_v14, %v1423_v50  ;;  %v2115_v45 = vmin.f32 %v3353_v29, %v1423_v50 }
 0x18a   : > { %v1781_v26 = vadd.f32 %v1780_v42, %v1705_v8  ;;  %v1548_v43 = vadd.f32 %v1547_v15, %v1232_v56  ;;  %v1706_v20 = vmul.f32 %v1232_v56, %v1232_v56  ;;  %v1948_v53 = vmax.f32 %v3359_v19, %v1232_v56  ;;  %v3386_v21 = vpop.f32.mrb[52].mxu0  ;;  %v3388_v62 = vpop.f32.mrb[52].mxu1 }
 0x18b   : > { %v1843_v39 = vadd.f32 %v1842_v59, %v1707_v40  ;;  %v2084_v32 = vmin.f32 %v2083_v23, %v1232_v56  ;;  %v1610_v24 = vadd.f32 %v1609_v55, %v1425_v38  ;;  %v1708_v54 = vmul.f32 %v1425_v38, %v1425_v38  ;;  %3605 = vst [vmem:[#allocation10_spill] sm:$0xff] %v3388_v62  ;;  %v3392_v29 = vpop.f32.mrb[53].mxu0  ;;  %v3394_v42 = vpop.f32.mrb[53].mxu1 }
 0x18c   : > { %v1812_v18 = vadd.f32 %v1811_v58, %v1706_v20  ;;  %v2010_v5 = vmax.f32 %v2009_v3, %v1425_v38  ;;  %v2146_v61 = vmin.f32 %v2145_v16, %v1425_v38  ;;  %v1236_v14 = vadd.f32 %v3254_v35, %v3024_v13  ;;  %3606 = vst [vmem:[#allocation11_spill] sm:$0xff] %v3392_v29  ;;  %v3402_v55 = vpop.f32.mrb[54].mxu0  ;;  %v3404_v58 = vpop.f32.mrb[54].mxu1 }
 0x18d   : > { %3607 = vst [vmem:[#allocation12_spill] sm:$0xff] %v3394_v42  ;;  %v1874_v15 = vadd.f32 %v1873_v33, %v1708_v54  ;;  %v1429_v19 = vadd.f32 %v3256_v25, %v3026_v46  ;;  %v1238_v59 = vadd.f32 %v3260_v27, %v3029_v48  ;;  %v1431_v23 = vadd.f32 %v3262_v28, %v3031_v49  ;;  %v3406_v56 = vpop.f32.mrb[55].mxu0  ;;  %v3408_v33 = vpop.f32.mrb[55].mxu1 }
 0x18e   : > { %3608 = vst [vmem:[#allocation13_spill] sm:$0xff] %v3402_v55  ;;  %3609 = vst [vmem:[#allocation14_spill] sm:$0xff] %v3404_v58  ;;  %v1518_v3 = vadd.f32 %v1517_v31, %v1236_v14  ;;  %v1709_v35 = vmul.f32 %v1236_v14, %v1236_v14  ;;  %v1918_v16 = vmax.f32 %v1917_v9, %v1236_v14 }
 0x18f   : > { %v2054_v50 = vmin.f32 %v2053_v22, %v1236_v14  ;;  %v1580_v38 = vadd.f32 %v1579_v2, %v1429_v19  ;;  %v1711_v25 = vmul.f32 %v1429_v19, %v1429_v19  ;;  %v1980_v8 = vmax.f32 %v1979_v10, %v1429_v19 }
 0x190   : > { %v2116_v40 = vmin.f32 %v2115_v45, %v1429_v19  ;;  %v1782_v27 = vadd.f32 %v1781_v26, %v1709_v35  ;;  %v1549_v20 = vadd.f32 %v1548_v43, %v1238_v59  ;;  %v1710_v54 = vmul.f32 %v1238_v59, %v1238_v59 }
 0x191   : > { %v1949_v28 = vmax.f32 %v1948_v53, %v1238_v59  ;;  %v1844_v42 = vadd.f32 %v1843_v39, %v1711_v25  ;;  %v2085_v55 = vmin.f32 %v2084_v32, %v1238_v59  ;;  %v1611_v29 = vadd.f32 %v1610_v24, %v1431_v23 }
 0x192   : > { %v1712_v58 = vmul.f32 %v1431_v23, %v1431_v23  ;;  %v1813_v31 = vadd.f32 %v1812_v18, %v1710_v54  ;;  %v3410_v62 = vmax.f32 %v2010_v5, %v1431_v23  ;;  %v3412_v9 = vmin.f32 %v2146_v61, %v1431_v23  ;;  %v3422_v39 = vpop.f32.mrb[56].mxu0  ;;  %v3424_v26 = vpop.f32.mrb[56].mxu1 }
 0x193   : > { %v1240_v22 = vadd.f32 %v3264_v57, %v3024_v13  ;;  %v1433_v10 = vadd.f32 %v3266_v0, %v3026_v46  ;;  %v1242_v45 = vadd.f32 %v3270_v44, %v3029_v48  ;;  %v1435_v32 = vadd.f32 %v3272_v51, %v3031_v49  ;;  %v3426_v5 = vpop.f32.mrb[57].mxu0  ;;  %v3428_v57 = vpop.f32.mrb[57].mxu1 }
 0x194   : > { %v1875_v2 = vadd.f32 %v1874_v15, %v1712_v58  ;;  %v3430_v44 = vpop.f32.mrb[58].mxu0  ;;  %v3432_v19 = vpop.f32.mrb[58].mxu1 }
 0x195   : > { %v1519_v43 = vadd.f32 %v1518_v3, %v1240_v22  ;;  %v1713_v53 = vmul.f32 %v1240_v22, %v1240_v22  ;;  %v1919_v24 = vmax.f32 %v1918_v16, %v1240_v22  ;;  %v2055_v18 = vmin.f32 %v2054_v50, %v1240_v22  ;;  %3610 = vst [vmem:[#allocation15_spill] sm:$0xff] %v3430_v44  ;;  %v3434_v3 = vpop.f32.mrb[59].mxu0  ;;  %v3436_v35 = vpop.f32.mrb[59].mxu1 }
 0x196   : > { %v1581_v61 = vadd.f32 %v1580_v38, %v1433_v10  ;;  %v1715_v0 = vmul.f32 %v1433_v10, %v1433_v10  ;;  %v1981_v14 = vmax.f32 %v1980_v8, %v1433_v10  ;;  %v2117_v15 = vmin.f32 %v2116_v40, %v1433_v10  ;;  %3611 = vst [vmem:[#allocation16_spill] sm:$0xff] %v3432_v19  ;;  %v3615_v10 = vld [vmem:[#allocation3_spill] sm:$0xff] }
 0x197   : > { %v1783_v51 = vadd.f32 %v1782_v27, %v1713_v53  ;;  %v1550_v59 = vadd.f32 %v1549_v20, %v1242_v45  ;;  %v1714_v23 = vmul.f32 %v1242_v45, %v1242_v45  ;;  %v1950_v58 = vmax.f32 %v1949_v28, %v1242_v45  ;;  %3612 = vst [vmem:[#allocation17_spill] sm:$0xff] %v3434_v3  ;;  %v3614_v20 = vld [vmem:[#allocation2_spill] sm:$0xff] }
 0x198   : > { %3613 = vst [vmem:[#allocation18_spill] sm:$0xff] %v3436_v35  ;;  %v1845_v16 = vadd.f32 %v1844_v42, %v1715_v0  ;;  %v2086_v50 = vmin.f32 %v2085_v55, %v1242_v45  ;;  %v1612_v25 = vadd.f32 %v1611_v29, %v1435_v32  ;;  %v1716_v54 = vmul.f32 %v1435_v32, %v1435_v32  ;;  %v3616_v42 = vld [vmem:[#allocation4_spill] sm:$0xff] }
 0x199   : > { %v1814_v38 = vadd.f32 %v1813_v31, %v1714_v23  ;;  %v2012_v8 = vmax.f32 %v3410_v62, %v1435_v32  ;;  %v2148_v40 = vmin.f32 %v3412_v9, %v1435_v32  ;;  %v1246_v22 = vadd.f32 %v3285_v34, %v3024_v13 }
 0x19a   : > { %v1876_v27 = vadd.f32 %v1875_v2, %v1716_v54  ;;  %v1439_v28 = vadd.f32 %v3614_v20, %v3026_v46  ;;  %v1248_v53 = vadd.f32 %v3615_v10, %v3029_v48  ;;  %v1441_v55 = vadd.f32 %v3616_v42, %v3031_v49  ;;  %v3448_v35 = vpop.f32.mrb[60].mxu0  ;;  %v3450_v34 = vpop.f32.mrb[60].mxu1 }
 0x19b   : > { %v1520_v29 = vadd.f32 %v1519_v43, %v1246_v22  ;;  %v1717_v45 = vmul.f32 %v1246_v22, %v1246_v22  ;;  %v1920_v31 = vmax.f32 %v1919_v24, %v1246_v22  ;;  %v2056_v0 = vmin.f32 %v2055_v18, %v1246_v22  ;;  %3617 = vst [vmem:[#allocation2_spill] sm:$0xff] %v3448_v35  ;;  %v3452_v10 = vpop.f32.mrb[61].mxu0  ;;  %v3454_v19 = vpop.f32.mrb[61].mxu1 }
 0x19c   : > { %v1582_v62 = vadd.f32 %v1581_v61, %v1439_v28  ;;  %v1719_v23 = vmul.f32 %v1439_v28, %v1439_v28  ;;  %v1982_v9 = vmax.f32 %v1981_v14, %v1439_v28  ;;  %v2118_v32 = vmin.f32 %v2117_v15, %v1439_v28  ;;  %3618 = vst [vmem:[#allocation3_spill] sm:$0xff] %v3450_v34  ;;  %v3456_v61 = vpop.f32.mrb[62].mxu0  ;;  %v3458_v14 = vpop.f32.mrb[62].mxu1 }
 0x19d   : > { %v1784_v2 = vadd.f32 %v1783_v51, %v1717_v45  ;;  %v1551_v54 = vadd.f32 %v1550_v59, %v1248_v53  ;;  %v1718_v20 = vmul.f32 %v1248_v53, %v1248_v53  ;;  %v1951_v3 = vmax.f32 %v1950_v58, %v1248_v53  ;;  %3619 = vst [vmem:[#allocation4_spill] sm:$0xff] %v3452_v10  ;;  %v3623_v51 = vld [vmem:[#allocation5_spill] sm:$0xff]  ;;  %v3462_v45 = vpop.f32.mrb[63].mxu0  ;;  %v3464_v58 = vpop.f32.mrb[63].mxu1 }
 0x19e   : > { %3620 = vst [vmem:[#allocation19_spill] sm:$0xff] %v3454_v19  ;;  %v1846_v43 = vadd.f32 %v1845_v16, %v1719_v23  ;;  %v2087_v42 = vmin.f32 %v2086_v50, %v1248_v53  ;;  %v1613_v24 = vadd.f32 %v1612_v25, %v1441_v55  ;;  %v1720_v18 = vmul.f32 %v1441_v55, %v1441_v55  ;;  %v3626_v16 = vld [vmem:[#allocation6_spill] sm:$0xff] }
 0x19f   : > { %3621 = vst [vmem:[#allocation20_spill] sm:$0xff] %v3456_v61  ;;  %3622 = vst [vmem:[#allocation21_spill] sm:$0xff] %v3458_v14  ;;  %v1815_v15 = vadd.f32 %v1814_v38, %v1718_v20  ;;  %v2013_v22 = vmax.f32 %v2012_v8, %v1441_v55  ;;  %v2149_v28 = vmin.f32 %v2148_v40, %v1441_v55 }
 0x1a0   : > { %v1250_v59 = vadd.f32 %v3623_v51, %v3024_v13  ;;  %3624 = vst [vmem:[#allocation5_spill] sm:$0xff] %v3462_v45  ;;  %3625 = vst [vmem:[#allocation22_spill] sm:$0xff] %v3464_v58  ;;  %v1877_v10 = vadd.f32 %v1876_v27, %v1720_v18  ;;  %v1443_v50 = vadd.f32 %v3626_v16, %v3026_v46 }
 0x1a1   : > { %v1252_v25 = vadd.f32 %v3305_v7, %v3029_v48  ;;  %v1445_v53 = vadd.f32 %v3307_v60, %v3031_v49  ;;  %v1256_v60 = vadd.f32 %v3321_v4, %v3024_v13 }
 0x1a2   : > { %v1521_v38 = vadd.f32 %v1520_v29, %v1250_v59  ;;  %v1721_v8 = vmul.f32 %v1250_v59, %v1250_v59  ;;  %v1921_v40 = vmax.f32 %v1920_v31, %v1250_v59  ;;  %v2057_v55 = vmin.f32 %v2056_v0, %v1250_v59 }
 0x1a3   : > { %v1583_v23 = vadd.f32 %v1582_v62, %v1443_v50  ;;  %v1723_v20 = vmul.f32 %v1443_v50, %v1443_v50  ;;  %v1983_v51 = vmax.f32 %v1982_v9, %v1443_v50  ;;  %v2119_v45 = vmin.f32 %v2118_v32, %v1443_v50 }
 0x1a4   : > { %v1785_v14 = vadd.f32 %v1784_v2, %v1721_v8  ;;  %v1552_v58 = vadd.f32 %v1551_v54, %v1252_v25  ;;  %v1722_v27 = vmul.f32 %v1252_v25, %v1252_v25  ;;  %v1952_v18 = vmax.f32 %v1951_v3, %v1252_v25 }
 0x1a5   : > { %v1847_v61 = vadd.f32 %v1846_v43, %v1723_v20  ;;  %v2088_v16 = vmin.f32 %v2087_v42, %v1252_v25  ;;  %v1614_v19 = vadd.f32 %v1613_v24, %v1445_v53  ;;  %v1724_v34 = vmul.f32 %v1445_v53, %v1445_v53 }
 0x1a6   : > { %v1816_v7 = vadd.f32 %v1815_v15, %v1722_v27  ;;  %v2014_v35 = vmax.f32 %v2013_v22, %v1445_v53  ;;  %v2150_v44 = vmin.f32 %v2149_v28, %v1445_v53  ;;  %v1449_v31 = vadd.f32 %v3323_v11, %v3026_v46 }
 0x1a7   : > { %v1878_v29 = vadd.f32 %v1877_v10, %v1724_v34  ;;  %v1258_v0 = vadd.f32 %v3325_v1, %v3029_v48  ;;  %v1451_v3 = vadd.f32 %v3327_v30, %v3031_v49  ;;  %v1522_v62 = vadd.f32 %v1521_v38, %v1256_v60 }
 0x1a8   : > { %v1725_v9 = vmul.f32 %v1256_v60, %v1256_v60  ;;  %v1922_v32 = vmax.f32 %v1921_v40, %v1256_v60  ;;  %v2058_v2 = vmin.f32 %v2057_v55, %v1256_v60  ;;  %v1584_v54 = vadd.f32 %v1583_v23, %v1449_v31 }
 0x1a9   : > { %v1727_v43 = vmul.f32 %v1449_v31, %v1449_v31  ;;  %v1984_v42 = vmax.f32 %v1983_v51, %v1449_v31  ;;  %v2120_v24 = vmin.f32 %v2119_v45, %v1449_v31  ;;  %v1553_v4 = vadd.f32 %v1552_v58, %v1258_v0 }
 0x1aa   : > { %v1786_v15 = vadd.f32 %v1785_v14, %v1725_v9  ;;  %v1726_v34 = vmul.f32 %v1258_v0, %v1258_v0  ;;  %v1953_v10 = vmax.f32 %v1952_v18, %v1258_v0  ;;  %v2089_v11 = vmin.f32 %v2088_v16, %v1258_v0 }
 0x1ab   : > { %v1848_v22 = vadd.f32 %v1847_v61, %v1727_v43  ;;  %v1615_v28 = vadd.f32 %v1614_v19, %v1451_v3  ;;  %v1728_v59 = vmul.f32 %v1451_v3, %v1451_v3  ;;  %v2015_v50 = vmax.f32 %v2014_v35, %v1451_v3 }
 0x1ac   : > { %v1817_v1 = vadd.f32 %v1816_v7, %v1726_v34  ;;  %v2151_v25 = vmin.f32 %v2150_v44, %v1451_v3  ;;  %v1260_v30 = vadd.f32 %v3329_v47, %v3024_v13  ;;  %v1453_v38 = vadd.f32 %v3331_v52, %v3026_v46 }
 0x1ad   : > { %v1879_v53 = vadd.f32 %v1878_v29, %v1728_v59  ;;  %v1262_v14 = vadd.f32 %v3333_v41, %v3029_v48  ;;  %v1455_v45 = vadd.f32 %v3335_v37, %v3031_v49  ;;  %v1266_v37 = vadd.f32 %v3355_v6, %v3024_v13 }
 0x1ae   : > { %v1523_v61 = vadd.f32 %v1522_v62, %v1260_v30  ;;  %v1729_v58 = vmul.f32 %v1260_v30, %v1260_v30  ;;  %v1923_v19 = vmax.f32 %v1922_v32, %v1260_v30  ;;  %v2059_v8 = vmin.f32 %v2058_v2, %v1260_v30  ;;  %v3628_v30 = vld [vmem:[#allocation8_spill] sm:$0xff] }
 0x1af   : > { %v1585_v40 = vadd.f32 %v1584_v54, %v1453_v38  ;;  %v1731_v35 = vmul.f32 %v1453_v38, %v1453_v38  ;;  %v1985_v44 = vmax.f32 %v1984_v42, %v1453_v38  ;;  %v2121_v55 = vmin.f32 %v2120_v24, %v1453_v38  ;;  %v3629_v38 = vld [vmem:[#allocation9_spill] sm:$0xff] }
 0x1b0   : > { %v1787_v23 = vadd.f32 %v1786_v15, %v1729_v58  ;;  %v1554_v47 = vadd.f32 %v1553_v4, %v1262_v14  ;;  %v1730_v20 = vmul.f32 %v1262_v14, %v1262_v14  ;;  %v1954_v51 = vmax.f32 %v1953_v10, %v1262_v14 }
 0x1b1   : > { %v1849_v27 = vadd.f32 %v1848_v22, %v1731_v35  ;;  %v2090_v52 = vmin.f32 %v2089_v11, %v1262_v14  ;;  %v1616_v18 = vadd.f32 %v1615_v28, %v1455_v45  ;;  %v1732_v16 = vmul.f32 %v1455_v45, %v1455_v45 }
 0x1b2   : > { %v1818_v41 = vadd.f32 %v1817_v1, %v1730_v20  ;;  %v2016_v7 = vmax.f32 %v2015_v50, %v1455_v45  ;;  %v2152_v60 = vmin.f32 %v2151_v25, %v1455_v45  ;;  %v1459_v31 = vadd.f32 %v3357_v36, %v3026_v46  ;;  %v3627_v50 = vld [vmem:[#allocation7_spill] sm:$0xff] }
 0x1b3   : > { %v1880_v29 = vadd.f32 %v1879_v53, %v1732_v16  ;;  %v1268_v0 = vadd.f32 %v3361_v17, %v3029_v48  ;;  %v1461_v3 = vadd.f32 %v3363_v12, %v3031_v49  ;;  %v1524_v62 = vadd.f32 %v1523_v61, %v1266_v37 }
 0x1b4   : > { %v1733_v9 = vmul.f32 %v1266_v37, %v1266_v37  ;;  %v1924_v32 = vmax.f32 %v1923_v19, %v1266_v37  ;;  %v2060_v2 = vmin.f32 %v2059_v8, %v1266_v37  ;;  %v1586_v54 = vadd.f32 %v1585_v40, %v1459_v31  ;;  %v3630_v37 = vld [vmem:[#allocation10_spill] sm:$0xff] }
 0x1b5   : > { %v1735_v43 = vmul.f32 %v1459_v31, %v1459_v31  ;;  %v1986_v42 = vmax.f32 %v1985_v44, %v1459_v31  ;;  %v2122_v24 = vmin.f32 %v2121_v55, %v1459_v31  ;;  %v1555_v6 = vadd.f32 %v1554_v47, %v1268_v0  ;;  %v3631_v31 = vld [vmem:[#allocation11_spill] sm:$0xff] }
 0x1b6   : > { %v1788_v15 = vadd.f32 %v1787_v23, %v1733_v9  ;;  %v1734_v4 = vmul.f32 %v1268_v0, %v1268_v0  ;;  %v1955_v34 = vmax.f32 %v1954_v51, %v1268_v0  ;;  %v2091_v36 = vmin.f32 %v2090_v52, %v1268_v0 }
 0x1b7   : > { %v1850_v10 = vadd.f32 %v1849_v27, %v1735_v43  ;;  %v1617_v22 = vadd.f32 %v1616_v18, %v1461_v3  ;;  %v1736_v11 = vmul.f32 %v1461_v3, %v1461_v3  ;;  %v2017_v28 = vmax.f32 %v2016_v7, %v1461_v3 }
 0x1b8   : > { %v1819_v17 = vadd.f32 %v1818_v41, %v1734_v4  ;;  %v2153_v59 = vmin.f32 %v2152_v60, %v1461_v3  ;;  %v1270_v12 = vadd.f32 %v3365_v63, %v3024_v13  ;;  %v1463_v25 = vadd.f32 %v3627_v50, %v3026_v46  ;;  %v3632_v3 = vld [vmem:[#allocation12_spill] sm:$0xff] }
 0x1b9   : > { %v1881_v1 = vadd.f32 %v1880_v29, %v1736_v11  ;;  %v1272_v53 = vadd.f32 %v3628_v30, %v3029_v48  ;;  %v1465_v14 = vadd.f32 %v3629_v38, %v3031_v49  ;;  %v1276_v7 = vadd.f32 %v3386_v21, %v3024_v13 }
 0x1ba   : > { %v1525_v45 = vadd.f32 %v1524_v62, %v1270_v12  ;;  %v1737_v61 = vmul.f32 %v1270_v12, %v1270_v12  ;;  %v1925_v58 = vmax.f32 %v1924_v32, %v1270_v12  ;;  %v2061_v19 = vmin.f32 %v2060_v2, %v1270_v12  ;;  %v3633_v12 = vld [vmem:[#allocation13_spill] sm:$0xff] }
 0x1bb   : > { %v1587_v8 = vadd.f32 %v1586_v54, %v1463_v25  ;;  %v1739_v40 = vmul.f32 %v1463_v25, %v1463_v25  ;;  %v1987_v35 = vmax.f32 %v1986_v42, %v1463_v25  ;;  %v2123_v44 = vmin.f32 %v2122_v24, %v1463_v25  ;;  %v3634_v25 = vld [vmem:[#allocation14_spill] sm:$0xff] }
 0x1bc   : > { %v1789_v55 = vadd.f32 %v1788_v15, %v1737_v61  ;;  %v1556_v63 = vadd.f32 %v1555_v6, %v1272_v53  ;;  %v1738_v23 = vmul.f32 %v1272_v53, %v1272_v53  ;;  %v1956_v47 = vmax.f32 %v1955_v34, %v1272_v53 }
 0x1bd   : > { %v1851_v20 = vadd.f32 %v1850_v10, %v1739_v40  ;;  %v2092_v51 = vmin.f32 %v2091_v36, %v1272_v53  ;;  %v1618_v27 = vadd.f32 %v1617_v22, %v1465_v14  ;;  %v1740_v52 = vmul.f32 %v1465_v14, %v1465_v14 }
 0x1be   : > { %v1820_v18 = vadd.f32 %v1819_v17, %v1738_v23  ;;  %v2018_v16 = vmax.f32 %v2017_v28, %v1465_v14  ;;  %v2154_v41 = vmin.f32 %v2153_v59, %v1465_v14  ;;  %v1469_v29 = vadd.f32 %v3630_v37, %v3026_v46 }
 0x1bf   : > { %v1882_v60 = vadd.f32 %v1881_v1, %v1740_v52  ;;  %v1278_v0 = vadd.f32 %v3631_v31, %v3029_v48  ;;  %v1471_v62 = vadd.f32 %v3632_v3, %v3031_v49  ;;  %v1526_v9 = vadd.f32 %v1525_v45, %v1276_v7 }
 0x1c0   : > { %v1741_v32 = vmul.f32 %v1276_v7, %v1276_v7  ;;  %v1926_v2 = vmax.f32 %v1925_v58, %v1276_v7  ;;  %v2062_v54 = vmin.f32 %v2061_v19, %v1276_v7  ;;  %v1588_v43 = vadd.f32 %v1587_v8, %v1469_v29 }
 0x1c1   : > { %v1743_v42 = vmul.f32 %v1469_v29, %v1469_v29  ;;  %v1988_v24 = vmax.f32 %v1987_v35, %v1469_v29  ;;  %v2124_v15 = vmin.f32 %v2123_v44, %v1469_v29  ;;  %v1557_v21 = vadd.f32 %v1556_v63, %v1278_v0 }
 0x1c2   : > { %v1790_v6 = vadd.f32 %v1789_v55, %v1741_v32  ;;  %v1742_v4 = vmul.f32 %v1278_v0, %v1278_v0  ;;  %v1957_v34 = vmax.f32 %v1956_v47, %v1278_v0  ;;  %v2093_v36 = vmin.f32 %v2092_v51, %v1278_v0 }
 0x1c3   : > { %v1852_v10 = vadd.f32 %v1851_v20, %v1743_v42  ;;  %v1619_v22 = vadd.f32 %v1618_v27, %v1471_v62  ;;  %v1744_v11 = vmul.f32 %v1471_v62, %v1471_v62  ;;  %v2019_v28 = vmax.f32 %v2018_v16, %v1471_v62 }
 0x1c4   : > { %v1821_v17 = vadd.f32 %v1820_v18, %v1742_v4  ;;  %v2155_v59 = vmin.f32 %v2154_v41, %v1471_v62  ;;  %v1280_v1 = vadd.f32 %v3633_v12, %v3024_v13  ;;  %v1473_v30 = vadd.f32 %v3634_v25, %v3026_v46 }
 0x1c5   : > { %v1883_v50 = vadd.f32 %v1882_v60, %v1744_v11  ;;  %v1282_v53 = vadd.f32 %v3406_v56, %v3029_v48  ;;  %v1475_v38 = vadd.f32 %v3408_v33, %v3031_v49  ;;  %v1286_v33 = vadd.f32 %v3422_v39, %v3024_v13 }
 0x1c6   : > { %v1527_v14 = vadd.f32 %v1526_v9, %v1280_v1  ;;  %v1745_v45 = vmul.f32 %v1280_v1, %v1280_v1  ;;  %v1927_v61 = vmax.f32 %v1926_v2, %v1280_v1  ;;  %v2063_v58 = vmin.f32 %v2062_v54, %v1280_v1 }
 0x1c7   : > { %v1589_v19 = vadd.f32 %v1588_v43, %v1473_v30  ;;  %v1747_v8 = vmul.f32 %v1473_v30, %v1473_v30  ;;  %v1989_v40 = vmax.f32 %v1988_v24, %v1473_v30  ;;  %v2125_v35 = vmin.f32 %v2124_v15, %v1473_v30 }
 0x1c8   : > { %v1791_v44 = vadd.f32 %v1790_v6, %v1745_v45  ;;  %v1558_v55 = vadd.f32 %v1557_v21, %v1282_v53  ;;  %v1746_v63 = vmul.f32 %v1282_v53, %v1282_v53  ;;  %v1958_v23 = vmax.f32 %v1957_v34, %v1282_v53 }
 0x1c9   : > { %v1853_v47 = vadd.f32 %v1852_v10, %v1747_v8  ;;  %v2094_v20 = vmin.f32 %v2093_v36, %v1282_v53  ;;  %v1620_v51 = vadd.f32 %v1619_v22, %v1475_v38  ;;  %v1748_v27 = vmul.f32 %v1475_v38, %v1475_v38  ;;  %v3636_v10 = vld [vmem:[#allocation16_spill] sm:$0xff]  ;;  %v3637_v22 = vld [vmem:[#allocation17_spill] sm:$0xff] }
 0x1ca   : > { %v1822_v56 = vadd.f32 %v1821_v17, %v1746_v63  ;;  %v2020_v52 = vmax.f32 %v2019_v28, %v1475_v38  ;;  %v2156_v18 = vmin.f32 %v2155_v59, %v1475_v38  ;;  %v1479_v41 = vadd.f32 %v3424_v26, %v3026_v46  ;;  %v3638_v17 = vld [vmem:[#allocation18_spill] sm:$0xff] }
 0x1cb   : > { %v1884_v16 = vadd.f32 %v1883_v50, %v1748_v27  ;;  %v1288_v7 = vadd.f32 %v3426_v5, %v3029_v48  ;;  %v1481_v60 = vadd.f32 %v3428_v57, %v3031_v49  ;;  %v1528_v37 = vadd.f32 %v1527_v14, %v1286_v33  ;;  %v3635_v57 = vld [vmem:[#allocation15_spill] sm:$0xff] }
 0x1cc   : > { %v1749_v29 = vmul.f32 %v1286_v33, %v1286_v33  ;;  %v1928_v31 = vmax.f32 %v1927_v61, %v1286_v33  ;;  %v2064_v0 = vmin.f32 %v2063_v58, %v1286_v33  ;;  %v1590_v3 = vadd.f32 %v1589_v19, %v1479_v41 }
 0x1cd   : > { %v1751_v62 = vmul.f32 %v1479_v41, %v1479_v41  ;;  %v1990_v9 = vmax.f32 %v1989_v40, %v1479_v41  ;;  %v2126_v32 = vmin.f32 %v2125_v35, %v1479_v41  ;;  %v1559_v39 = vadd.f32 %v1558_v55, %v1288_v7 }
 0x1ce   : > { %v1792_v2 = vadd.f32 %v1791_v44, %v1749_v29  ;;  %v1750_v54 = vmul.f32 %v1288_v7, %v1288_v7  ;;  %v1959_v43 = vmax.f32 %v1958_v23, %v1288_v7  ;;  %v2095_v26 = vmin.f32 %v2094_v20, %v1288_v7  ;;  %v3639_v23 = vld [vmem:[#allocation2_spill] sm:$0xff] }
 0x1cf   : > { %v1854_v42 = vadd.f32 %v1853_v47, %v1751_v62  ;;  %v1621_v24 = vadd.f32 %v1620_v51, %v1481_v60  ;;  %v1752_v15 = vmul.f32 %v1481_v60, %v1481_v60  ;;  %v2021_v6 = vmax.f32 %v2020_v52, %v1481_v60  ;;  %v3640_v51 = vld [vmem:[#allocation3_spill] sm:$0xff] }
 0x1d0   : > { %v1823_v5 = vadd.f32 %v1822_v56, %v1750_v54  ;;  %v2157_v21 = vmin.f32 %v2156_v18, %v1481_v60  ;;  %v1290_v4 = vadd.f32 %v3635_v57, %v3024_v13  ;;  %v1483_v36 = vadd.f32 %v3636_v10, %v3026_v46  ;;  %v3641_v56 = vld [vmem:[#allocation4_spill] sm:$0xff]  ;;  %v3642_v18 = vld [vmem:[#allocation19_spill] sm:$0xff]  ;;  %v3646_v10 = vld [vmem:[#allocation22_spill] sm:$0xff] }
 0x1d1   : > { %v1885_v34 = vadd.f32 %v1884_v16, %v1752_v15  ;;  %v1292_v11 = vadd.f32 %v3637_v22, %v3029_v48  ;;  %v1485_v28 = vadd.f32 %v3638_v17, %v3031_v49  ;;  %v1296_v47 = vadd.f32 %v3639_v23, %v3024_v13 }
 0x1d2   : > { %v1529_v59 = vadd.f32 %v1528_v37, %v1290_v4  ;;  %v1753_v12 = vmul.f32 %v1290_v4, %v1290_v4  ;;  %v1929_v1 = vmax.f32 %v1928_v31, %v1290_v4  ;;  %v2065_v50 = vmin.f32 %v2064_v0, %v1290_v4  ;;  %v3645_v4 = vld [vmem:[#allocation5_spill] sm:$0xff] }
 0x1d3   : > { %v1591_v25 = vadd.f32 %v1590_v3, %v1483_v36  ;;  %v1755_v30 = vmul.f32 %v1483_v36, %v1483_v36  ;;  %v1991_v53 = vmax.f32 %v1990_v9, %v1483_v36  ;;  %v2127_v38 = vmin.f32 %v2126_v32, %v1483_v36 }
 0x1d4   : > { %v1793_v14 = vadd.f32 %v1792_v2, %v1753_v12  ;;  %v1560_v45 = vadd.f32 %v1559_v39, %v1292_v11  ;;  %v1754_v61 = vmul.f32 %v1292_v11, %v1292_v11  ;;  %v1960_v58 = vmax.f32 %v1959_v43, %v1292_v11 }
 0x1d5   : > { %v1855_v19 = vadd.f32 %v1854_v42, %v1755_v30  ;;  %v2096_v8 = vmin.f32 %v2095_v26, %v1292_v11  ;;  %v1622_v40 = vadd.f32 %v1621_v24, %v1485_v28  ;;  %v1756_v35 = vmul.f32 %v1485_v28, %v1485_v28 }
 0x1d6   : > { %v1824_v44 = vadd.f32 %v1823_v5, %v1754_v61  ;;  %v2022_v55 = vmax.f32 %v2021_v6, %v1485_v28  ;;  %v2158_v63 = vmin.f32 %v2157_v21, %v1485_v28  ;;  %v1489_v27 = vadd.f32 %v3640_v51, %v3026_v46  ;;  %v3643_v5 = vld [vmem:[#allocation20_spill] sm:$0xff]  ;;  %v3644_v21 = vld [vmem:[#allocation21_spill] sm:$0xff] }
 0x1d7   : > { %v1886_v20 = vadd.f32 %v1885_v34, %v1756_v35  ;;  %v1298_v52 = vadd.f32 %v3641_v56, %v3029_v48  ;;  %v1491_v33 = vadd.f32 %v3642_v18, %v3031_v49  ;;  %v1530_v16 = vadd.f32 %v1529_v59, %v1296_v47 }
 0x1d8   : > { %v1757_v41 = vmul.f32 %v1296_v47, %v1296_v47  ;;  %v1930_v7 = vmax.f32 %v1929_v1, %v1296_v47  ;;  %v2066_v60 = vmin.f32 %v2065_v50, %v1296_v47  ;;  %v1592_v37 = vadd.f32 %v1591_v25, %v1489_v27 }
 0x1d9   : > { %v1759_v29 = vmul.f32 %v1489_v27, %v1489_v27  ;;  %v1992_v31 = vmax.f32 %v1991_v53, %v1489_v27  ;;  %v2128_v0 = vmin.f32 %v2127_v38, %v1489_v27  ;;  %v1561_v62 = vadd.f32 %v1560_v45, %v1298_v52 }
 0x1da   : > { %v1794_v3 = vadd.f32 %v1793_v14, %v1757_v41  ;;  %v1758_v9 = vmul.f32 %v1298_v52, %v1298_v52  ;;  %v1961_v32 = vmax.f32 %v1960_v58, %v1298_v52  ;;  %v2097_v39 = vmin.f32 %v2096_v8, %v1298_v52 }
 0x1db   : > { %v1856_v2 = vadd.f32 %v1855_v19, %v1759_v29  ;;  %v1623_v54 = vadd.f32 %v1622_v40, %v1491_v33  ;;  %v1760_v43 = vmul.f32 %v1491_v33, %v1491_v33  ;;  %v2023_v26 = vmax.f32 %v2022_v55, %v1491_v33 }
 0x1dc   : > { %v1825_v42 = vadd.f32 %v1824_v44, %v1758_v9  ;;  %v2159_v24 = vmin.f32 %v2158_v63, %v1491_v33  ;;  %v1300_v6 = vadd.f32 %v3643_v5, %v3024_v13  ;;  %v1493_v57 = vadd.f32 %v3644_v21, %v3026_v46 }
 0x1dd   : > { %v1887_v15 = vadd.f32 %v1886_v20, %v1760_v43  ;;  %v1302_v34 = vadd.f32 %v3645_v4, %v3029_v48  ;;  %v1495_v36 = vadd.f32 %v3646_v10, %v3031_v49 }
 0x1de   : > { %v1531_v22 = vadd.f32 %v1530_v16, %v1300_v6  ;;  %v1761_v11 = vmul.f32 %v1300_v6, %v1300_v6  ;;  %v1931_v17 = vmax.f32 %v1930_v7, %v1300_v6  ;;  %v2067_v28 = vmin.f32 %v2066_v60, %v1300_v6 }
 0x1df   : > { %v1593_v13 = vadd.f32 %v1592_v37, %v1493_v57  ;;  %v1763_v46 = vmul.f32 %v1493_v57, %v1493_v57  ;;  %v1993_v48 = vmax.f32 %v1992_v31, %v1493_v57  ;;  %v2129_v49 = vmin.f32 %v2128_v0, %v1493_v57 }
 0x1e0   : > { %v1795_v59 = vadd.f32 %v1794_v3, %v1761_v11  ;;  %1629 = vst [vmem:[%s334_s21] sm:$0xff] %v1531_v22  ;;  %2029 = vst [vmem:[%s3559_s16] sm:$0xff] %v1931_v17  ;;  %v1562_v1 = vadd.f32 %v1561_v62, %v1302_v34  ;;  %v1762_v50 = vmul.f32 %v1302_v34, %v1302_v34 }
 0x1e1   : > { %v1857_v12 = vadd.f32 %v1856_v2, %v1763_v46  ;;  %2165 = vst [vmem:[%s3564_s18] sm:$0xff] %v2067_v28  ;;  %v1962_v25 = vmax.f32 %v1961_v32, %v1302_v34  ;;  %1631 = vst [vmem:[%s334_s21 + $0x10] sm:$0xff] %v1593_v13  ;;  %v2098_v30 = vmin.f32 %v2097_v39, %v1302_v34 }
 0x1e2   : > { %2031 = vst [vmem:[%s3559_s16 + $0x10] sm:$0xff] %v1993_v48  ;;  %2167 = vst [vmem:[%s3564_s18 + $0x10] sm:$0xff] %v2129_v49  ;;  %v1624_v53 = vadd.f32 %v1623_v54, %v1495_v36  ;;  %v1764_v38 = vmul.f32 %v1495_v36, %v1495_v36  ;;  %v1826_v14 = vadd.f32 %v1825_v42, %v1762_v50 }
 0x1e3   : > { %1893 = vst [vmem:[%s339_s28] sm:$0xff] %v1795_v59  ;;  %v2024_v45 = vmax.f32 %v2023_v26, %v1495_v36  ;;  %1895 = vst [vmem:[%s339_s28 + $0x10] sm:$0xff] %v1857_v12  ;;  %v2160_v58 = vmin.f32 %v2159_v24, %v1495_v36 }
 0x1e4   : > { %v1888_v61 = vadd.f32 %v1887_v15, %v1764_v38  ;;  %1630 = vst [vmem:[%s334_s21 + $0x8] sm:$0xff] %v1562_v1  ;;  %2030 = vst [vmem:[%s3559_s16 + $0x8] sm:$0xff] %v1962_v25 }
 0x1e5   : > { %2166 = vst [vmem:[%s3564_s18 + $0x8] sm:$0xff] %v2098_v30  ;;  %1632 = vst [vmem:[%s334_s21 + $0x18] sm:$0xff] %v1624_v53 }
 0x1e6   : > { %1894 = vst [vmem:[%s339_s28 + $0x8] sm:$0xff] %v1826_v14  ;;  %2032 = vst [vmem:[%s3559_s16 + $0x18] sm:$0xff] %v2024_v45 }
 0x1e7   : > { %1896 = vst [vmem:[%s339_s28 + $0x18] sm:$0xff] %v1888_v61  ;;  %2168 = vst [vmem:[%s3564_s18 + $0x18] sm:$0xff] %v2160_v58 }
 0x1e8 PF: > { %s18_s26 = sadd.s32 1, %s2564_s26   ;;  %s3647_s24 = smov %s2560_s25 }
 0x1e9   : > { %p15_p6 = scmp.ge.s32.totalorder %s18_s26, 6   ;;  %s3648_s25 = smov %s3650_s27 }
 0x1eb   :  { %17 = sbr.rel (!%p15_p6) target bundleno = 2 (0x2), region = 107 }

// kernel: encoder_pallas.9
= control target key start
LH: loop header
LB: loop body
LE: loop exit
PB: predicated region body
PF: predicated region fallthrough
CT: control target
= control target key end

     0   :  { %vm1184_vm1 = vmmov 0   ;;  %s1539_s1 = inlined_call_operand.vmem [shape: bf16[512,256], index: 1, kind: input, shape index: {}]   ;;  %s1540_s0 = inlined_call_operand.vmem [shape: f32[8,512], index: 0, kind: input, shape index: {}]   ;;  %s1541_s2 = inlined_call_operand.vmem [shape: bf16[256,128], index: 2, kind: input, shape index: {}]   ;;  %s1542_s4 = inlined_call_operand.vmem [shape: f32[8,256], index: 4, kind: input, shape index: {}]   ;;  %s1543_s3 = inlined_call_operand.vmem [shape: bf16[128,128], index: 3, kind: input, shape index: {}]   ;;  %s1544_s5 = inlined_call_operand.vmem [shape: f32[8,128], index: 5, kind: output, shape index: {}]  }
   0x1   :  { %v1057_v0 = vld [vmem:[%s1539_s1 + $0x4] ss:$8 sps:$4 sm:$0xff]   ;;  %v1059_v1 = vld [vmem:[%s1539_s1] ss:$8 sps:$4 sm:$0xff]   ;;  %v1060_v2 = vld [vmem:[%s1539_s1 + $0x14] ss:$8 sps:$4 sm:$0xff]  }
   0x2   :  { %428 = vmatprep.subr.bf16.mxu0 %v1057_v0  ;;  %v1062_v3 = vld [vmem:[%s1539_s1 + $0x10] ss:$8 sps:$4 sm:$0xff]   ;;  %v1063_v4 = vld [vmem:[%s1539_s1 + $0x24] ss:$8 sps:$4 sm:$0xff]   ;;  %v1065_v5 = vld [vmem:[%s1539_s1 + $0x20] ss:$8 sps:$4 sm:$0xff]  }
   0x3   :  { %429 = vmatpush1.bf16.msra.mxu0 %v1059_v1  ;;  %v1066_v6 = vld [vmem:[%s1539_s1 + $0x34] ss:$8 sps:$4 sm:$0xff]   ;;  %v1068_v7 = vld [vmem:[%s1539_s1 + $0x30] ss:$8 sps:$4 sm:$0xff]   ;;  %v1069_v8 = vld [vmem:[%s1539_s1 + $0x44] ss:$8 sps:$4 sm:$0xff]  }
   0x4   :  { %430 = vmatprep.subr.bf16.mxu0 %v1060_v2  ;;  %v1071_v9 = vld [vmem:[%s1539_s1 + $0x40] ss:$8 sps:$4 sm:$0xff]   ;;  %v1072_v10 = vld [vmem:[%s1539_s1 + $0x54] ss:$8 sps:$4 sm:$0xff]   ;;  %v1074_v11 = vld [vmem:[%s1539_s1 + $0x50] ss:$8 sps:$4 sm:$0xff]  }
   0x5   :  { %v1075_v12 = vld [vmem:[%s1539_s1 + $0x64] ss:$8 sps:$4 sm:$0xff]   ;;  %v1077_v15 = vld [vmem:[%s1539_s1 + $0x60] ss:$8 sps:$4 sm:$0xff]   ;;  %v1078_v16 = vld [vmem:[%s1539_s1 + $0x74] ss:$8 sps:$4 sm:$0xff]  }
   0x6   :  { %v22_v13 = vld [vmem:[%s1540_s0 + $0x8] sm:$0xff]  ;;  %v1080_v17 = vld [vmem:[%s1539_s1 + $0x70] ss:$8 sps:$4 sm:$0xff]   ;;  %v1084_v20 = vld [vmem:[%s1539_s1 + $0x94] ss:$8 sps:$4 sm:$0xff]  }
   0x7   :  { %431 = vmatpush1.bf16.msra.mxu0 %v1062_v3  ;;  %v33_v14 = vpack.c.bf16 %v22_v13, %v22_v13  ;;  %v1081_v18 = vld [vmem:[%s1539_s1 + $0x84] ss:$8 sps:$4 sm:$0xff]   ;;  %v1083_v19 = vld [vmem:[%s1539_s1 + $0x80] ss:$8 sps:$4 sm:$0xff]   ;;  %v1086_v21 = vld [vmem:[%s1539_s1 + $0x90] ss:$8 sps:$4 sm:$0xff]  }
   0x8   :  { %432 = vmatprep.subr.bf16.mxu0 %v1063_v4  ;;  %v1087_v22 = vld [vmem:[%s1539_s1 + $0xa4] ss:$8 sps:$4 sm:$0xff]   ;;  %v1089_v23 = vld [vmem:[%s1539_s1 + $0xa0] ss:$8 sps:$4 sm:$0xff]   ;;  %v1090_v24 = vld [vmem:[%s1539_s1 + $0xb4] ss:$8 sps:$4 sm:$0xff]  }
   0x9   :  { %460 = vmatprep.mubr.bf16.mxu0 %v33_v14  ;;  %v1092_v25 = vld [vmem:[%s1539_s1 + $0xb0] ss:$8 sps:$4 sm:$0xff]   ;;  %v1093_v26 = vld [vmem:[%s1539_s1 + $0xc4] ss:$8 sps:$4 sm:$0xff]   ;;  %v1095_v27 = vld [vmem:[%s1539_s1 + $0xc0] ss:$8 sps:$4 sm:$0xff]  }
   0xa   :  { %v1096_v28 = vld [vmem:[%s1539_s1 + $0xd4] ss:$8 sps:$4 sm:$0xff]   ;;  %v1098_v29 = vld [vmem:[%s1539_s1 + $0xd0] ss:$8 sps:$4 sm:$0xff]   ;;  %v1099_v30 = vld [vmem:[%s1539_s1 + $0xe4] ss:$8 sps:$4 sm:$0xff]  }
   0xb   :  { %433 = vmatpush1.bf16.msra.mxu0 %v1065_v5  ;;  %v1101_v31 = vld [vmem:[%s1539_s1 + $0xe0] ss:$8 sps:$4 sm:$0xff]   ;;  %v1102_v32 = vld [vmem:[%s1539_s1 + $0xf4] ss:$8 sps:$4 sm:$0xff]   ;;  %v1104_v33 = vld [vmem:[%s1539_s1 + $0xf0] ss:$8 sps:$4 sm:$0xff]  }
   0xc   :  { %434 = vmatprep.subr.bf16.mxu0 %v1066_v6  ;;  %v21_v34 = vld [vmem:[%s1540_s0] sm:$0xff]  ;;  %v24_v36 = vld [vmem:[%s1540_s0 + $0x18] sm:$0xff]  ;;  %v23_v6 = vld [vmem:[%s1540_s0 + $0x10] sm:$0xff] }
   0xd   :  { %v1107_v35 = vld [vmem:[%s1539_s1 + $0x104] ss:$8 sps:$4 sm:$0xff]   ;;  %v32_v37 = vpack.c.bf16 %v21_v34, %v21_v34  ;;  %v1105_v38 = vld [vmem:[%s1539_s1 + $0x100] ss:$8 sps:$4 sm:$0xff]   ;;  %v35_v39 = vpack.c.bf16 %v24_v36, %v24_v36  ;;  %v1110_v40 = vld [vmem:[%s1539_s1 + $0x114] ss:$8 sps:$4 sm:$0xff]  }
   0xe   :  { %v1108_v41 = vld [vmem:[%s1539_s1 + $0x110] ss:$8 sps:$4 sm:$0xff]   ;;  %v1113_v42 = vld [vmem:[%s1539_s1 + $0x124] ss:$8 sps:$4 sm:$0xff]   ;;  %v1111_v43 = vld [vmem:[%s1539_s1 + $0x120] ss:$8 sps:$4 sm:$0xff]  }
   0xf   :  { %435 = vmatpush1.bf16.msra.mxu0 %v1068_v7  ;;  %v1116_v44 = vld [vmem:[%s1539_s1 + $0x134] ss:$8 sps:$4 sm:$0xff]   ;;  %v1114_v45 = vld [vmem:[%s1539_s1 + $0x130] ss:$8 sps:$4 sm:$0xff]   ;;  %v1119_v46 = vld [vmem:[%s1539_s1 + $0x144] ss:$8 sps:$4 sm:$0xff]   ;;  %v34_v7 = vpack.c.bf16 %v23_v6, %v23_v6 }
  0x10   :  { %436 = vmatprep.subr.bf16.mxu0 %v1069_v8  ;;  %v1117_v47 = vld [vmem:[%s1539_s1 + $0x140] ss:$8 sps:$4 sm:$0xff]   ;;  %v1122_v48 = vld [vmem:[%s1539_s1 + $0x154] ss:$8 sps:$4 sm:$0xff]   ;;  %v1120_v49 = vld [vmem:[%s1539_s1 + $0x150] ss:$8 sps:$4 sm:$0xff]  }
  0x11   :  { %v1125_v50 = vld [vmem:[%s1539_s1 + $0x164] ss:$8 sps:$4 sm:$0xff]   ;;  %v1123_v51 = vld [vmem:[%s1539_s1 + $0x160] ss:$8 sps:$4 sm:$0xff]   ;;  %v1128_v52 = vld [vmem:[%s1539_s1 + $0x174] ss:$8 sps:$4 sm:$0xff]  }
  0x12   :  { %v1126_v53 = vld [vmem:[%s1539_s1 + $0x170] ss:$8 sps:$4 sm:$0xff]   ;;  %v1131_v54 = vld [vmem:[%s1539_s1 + $0x184] ss:$8 sps:$4 sm:$0xff]   ;;  %v1129_v55 = vld [vmem:[%s1539_s1 + $0x180] ss:$8 sps:$4 sm:$0xff]  }
  0x13   :  { %437 = vmatpush1.bf16.msra.mxu0 %v1071_v9  ;;  %v1134_v56 = vld [vmem:[%s1539_s1 + $0x194] ss:$8 sps:$4 sm:$0xff]   ;;  %v1132_v57 = vld [vmem:[%s1539_s1 + $0x190] ss:$8 sps:$4 sm:$0xff]   ;;  %v1137_v58 = vld [vmem:[%s1539_s1 + $0x1a4] ss:$8 sps:$4 sm:$0xff]  }
  0x14   :  { %438 = vmatprep.subr.bf16.mxu0 %v1072_v10  ;;  %v1135_v59 = vld [vmem:[%s1539_s1 + $0x1a0] ss:$8 sps:$4 sm:$0xff]   ;;  %v1140_v60 = vld [vmem:[%s1539_s1 + $0x1b4] ss:$8 sps:$4 sm:$0xff]   ;;  %v1138_v61 = vld [vmem:[%s1539_s1 + $0x1b0] ss:$8 sps:$4 sm:$0xff]  }
  0x15   :  { %v1143_v62 = vld [vmem:[%s1539_s1 + $0x1c4] ss:$8 sps:$4 sm:$0xff]   ;;  %v1141_v63 = vld [vmem:[%s1539_s1 + $0x1c0] ss:$8 sps:$4 sm:$0xff]   ;;  %v1146_v0 = vld [vmem:[%s1539_s1 + $0x1d4] ss:$8 sps:$4 sm:$0xff]  }
  0x16   :  { %v1144_v1 = vld [vmem:[%s1539_s1 + $0x1d0] ss:$8 sps:$4 sm:$0xff]   ;;  %v1149_v2 = vld [vmem:[%s1539_s1 + $0x1e4] ss:$8 sps:$4 sm:$0xff]   ;;  %v1147_v3 = vld [vmem:[%s1539_s1 + $0x1e0] ss:$8 sps:$4 sm:$0xff]  }
  0x17   :  { %439 = vmatpush1.bf16.msra.mxu0 %v1074_v11  ;;  %v1152_v4 = vld [vmem:[%s1539_s1 + $0x1f4] ss:$8 sps:$4 sm:$0xff]   ;;  %v1150_v5 = vld [vmem:[%s1539_s1 + $0x1f0] ss:$8 sps:$4 sm:$0xff]   ;;  %v1153_v8 = vld [vmem:[%s1541_s2 + $0x40] sm:$0xff]  }
  0x18   :  { %440 = vmatprep.subr.bf16.mxu0 %v1075_v12  ;;  %v1154_v9 = vld [vmem:[%s1541_s2] sm:$0xff]   ;;  %998 = vmatprep.subr.bf16.mxu1 %v1153_v8  ;;  %v1155_v10 = vld [vmem:[%s1541_s2 + $0x48] sm:$0xff]   ;;  %v1157_v12 = vld [vmem:[%s1541_s2 + $0x50] sm:$0xff]  }
  0x19   :  { %999 = vmatpush3.bf16.msra.mxu1 %v1154_v9  ;;  %v1156_v11 = vld [vmem:[%s1541_s2 + $0x8] sm:$0xff]   ;;  %v1158_v13 = vld [vmem:[%s1541_s2 + $0x10] sm:$0xff]   ;;  %v1159_v14 = vld [vmem:[%s1541_s2 + $0x58] sm:$0xff]  }
  0x1a   :  { %1000 = vmatprep.subr.bf16.mxu1 %v1155_v10 }
  0x1b   :  { %441 = vmatpush1.bf16.msra.mxu0 %v1077_v15  ;;  %v1160_v15 = vld [vmem:[%s1541_s2 + $0x18] sm:$0xff]  }
  0x1c   :  { %442 = vmatprep.subr.bf16.mxu0 %v1078_v16  ;;  %v1161_v16 = vld [vmem:[%s1541_s2 + $0x60] sm:$0xff]  }
  0x1d   :  { %1001 = vmatpush3.bf16.msra.mxu1 %v1156_v11 }
  0x1e   :  { %1002 = vmatprep.subr.bf16.mxu1 %v1157_v12 }
  0x1f   :  { %443 = vmatpush1.bf16.msra.mxu0 %v1080_v17  ;;  %v1162_v17 = vld [vmem:[%s1541_s2 + $0x20] sm:$0xff]  }
  0x20   :  { %444 = vmatprep.subr.bf16.mxu0 %v1081_v18  ;;  %v1163_v18 = vld [vmem:[%s1541_s2 + $0x68] sm:$0xff]  }
  0x21   :  { %1003 = vmatpush3.bf16.msra.mxu1 %v1158_v13 }
  0x22   :  { %1004 = vmatprep.subr.bf16.mxu1 %v1159_v14 }
  0x23   :  { %445 = vmatpush1.bf16.msra.mxu0 %v1083_v19  ;;  %v1164_v19 = vld [vmem:[%s1541_s2 + $0x28] sm:$0xff]  }
  0x24   :  { %446 = vmatprep.subr.bf16.mxu0 %v1084_v20  ;;  %v1165_v20 = vld [vmem:[%s1541_s2 + $0x70] sm:$0xff]  }
  0x25   :  { %1005 = vmatpush3.bf16.msra.mxu1 %v1160_v15 }
  0x26   :  { %1006 = vmatprep.subr.bf16.mxu1 %v1161_v16 }
  0x27   :  { %447 = vmatpush1.bf16.msra.mxu0 %v1086_v21  ;;  %v1166_v21 = vld [vmem:[%s1541_s2 + $0x30] sm:$0xff]  }
  0x28   :  { %448 = vmatprep.subr.bf16.mxu0 %v1087_v22  ;;  %v1167_v22 = vld [vmem:[%s1541_s2 + $0x78] sm:$0xff]  }
  0x29   :  { %1007 = vmatpush3.bf16.msra.mxu1 %v1162_v17 }
  0x2a   :  { %1008 = vmatprep.subr.bf16.mxu1 %v1163_v18 }
  0x2b   :  { %449 = vmatpush1.bf16.msra.mxu0 %v1089_v23  ;;  %v1168_v23 = vld [vmem:[%s1541_s2 + $0x38] sm:$0xff]  }
  0x2c   :  { %450 = vmatprep.subr.bf16.mxu0 %v1090_v24  ;;  %v1183_v24 = vmov 0.0  }
  0x2d   :  { %1009 = vmatpush3.bf16.msra.mxu1 %v1164_v19 }
  0x2e   :  { %1010 = vmatprep.subr.bf16.mxu1 %v1165_v20 }
  0x2f   :  { %451 = vmatpush1.bf16.msra.mxu0 %v1092_v25  ;;  %v25_v25 = vlaneseq }
  0x30   :  { %452 = vmatprep.subr.bf16.mxu0 %v1093_v26 }
  0x31   :  { %1011 = vmatpush3.bf16.msra.mxu1 %v1166_v21  ;;  %v1468_v26 = vshrl.u32 %v25_v25, 7 }
  0x32   :  { %1012 = vmatprep.subr.bf16.mxu1 %v1167_v22 }
  0x33   :  { %453 = vmatpush1.bf16.msra.mxu0 %v1095_v27  ;;  %v102_v27 = vsub.s32 0, %v1468_v26  ;;  %vm27_vm0 = vcmp.lt.s32.totalorder %v1468_v26, 4  ;;  %v564_v16 = vsub.s32 1, %v1468_v26  ;;  %v574_v22 = vsub.s32 2, %v1468_v26 }
  0x34   :  { %454 = vmatprep.subr.bf16.mxu0 %v1096_v28  ;;  %v1474_v28 = vld [vmem:[%s1542_s4] sm:$0xff] }
  0x35   :  { %1013 = vmatpush3.bf16.msra.mxu1 %v1168_v23 }
  0x36   :  { %1029 = vmatprep.subr.bf16.mxu1 %v1183_v24 }
  0x37   :  { %455 = vmatpush1.bf16.msra.mxu0 %v1098_v29  ;;  %v1479_v29 = vld [vmem:[%s1542_s4 + $0x8] sm:$0xff] }
  0x38   :  { %456 = vmatprep.subr.bf16.mxu0 %v1099_v30  ;;  %v103_v30 = vrot.slane %v1474_v28, %v102_v27 }
  0x3b   :  { %457 = vmatpush1.bf16.msra.mxu0 %v1101_v31  ;;  %v107_v31 = vrot.slane %v1479_v29, %v102_v27 }
  0x3c   :  { %458 = vmatprep.subr.bf16.mxu0 %v1102_v32  ;;  %v1485_v32 = vsel %vm27_vm0, 1.0, %v1183_v24 }
  0x3f   :  { %459 = vmatpush1.bf16.msra.mxu0 %v1104_v33 }
  0x40   :  { %469 = vmatprep.subr.bf16.mxu0 %v1107_v35 }
  0x42   :  { %461 = vmatmul.mubr.bf16.vlgmr.msra.gmra.mrb[0].mxu0 %v32_v37 }
  0x43   :  { %470 = vmatpush1.bf16.msra.mxu0 %v1105_v38  ;;  %501 = vmatprep.mubr.bf16.mxu0 %v35_v39 }
  0x44   :  { %471 = vmatprep.subr.bf16.mxu0 %v1110_v40 }
  0x47   :  { %472 = vmatpush1.bf16.msra.mxu0 %v1108_v41 }
  0x48   :  { %473 = vmatprep.subr.bf16.mxu0 %v1113_v42 }
  0x4b   :  { %474 = vmatpush1.bf16.msra.mxu0 %v1111_v43 }
  0x4c   :  { %475 = vmatprep.subr.bf16.mxu0 %v1116_v44 }
  0x4f   :  { %476 = vmatpush1.bf16.msra.mxu0 %v1114_v45 }
  0x50   :  { %477 = vmatprep.subr.bf16.mxu0 %v1119_v46 }
  0x53   :  { %478 = vmatpush1.bf16.msra.mxu0 %v1117_v47 }
  0x54   :  { %479 = vmatprep.subr.bf16.mxu0 %v1122_v48 }
  0x57   :  { %480 = vmatpush1.bf16.msra.mxu0 %v1120_v49 }
  0x58   :  { %481 = vmatprep.subr.bf16.mxu0 %v1125_v50 }
  0x5b   :  { %482 = vmatpush1.bf16.msra.mxu0 %v1123_v51 }
  0x5c   :  { %483 = vmatprep.subr.bf16.mxu0 %v1128_v52 }
  0x5f   :  { %484 = vmatpush1.bf16.msra.mxu0 %v1126_v53 }
  0x60   :  { %485 = vmatprep.subr.bf16.mxu0 %v1131_v54 }
  0x63   :  { %486 = vmatpush1.bf16.msra.mxu0 %v1129_v55 }
  0x64   :  { %487 = vmatprep.subr.bf16.mxu0 %v1134_v56 }
  0x67   :  { %488 = vmatpush1.bf16.msra.mxu0 %v1132_v57 }
  0x68   :  { %489 = vmatprep.subr.bf16.mxu0 %v1137_v58 }
  0x6b   :  { %490 = vmatpush1.bf16.msra.mxu0 %v1135_v59 }
  0x6c   :  { %491 = vmatprep.subr.bf16.mxu0 %v1140_v60 }
  0x6f   :  { %492 = vmatpush1.bf16.msra.mxu0 %v1138_v61 }
  0x70   :  { %493 = vmatprep.subr.bf16.mxu0 %v1143_v62 }
  0x73   :  { %494 = vmatpush1.bf16.msra.mxu0 %v1141_v63 }
  0x74   :  { %495 = vmatprep.subr.bf16.mxu0 %v1146_v0 }
  0x77   :  { %496 = vmatpush1.bf16.msra.mxu0 %v1144_v1 }
  0x78   :  { %497 = vmatprep.subr.bf16.mxu0 %v1149_v2 }
  0x7b   :  { %498 = vmatpush1.bf16.msra.mxu0 %v1147_v3 }
  0x7c   :  { %499 = vmatprep.subr.bf16.mxu0 %v1152_v4 }
  0x7f   :  { %500 = vmatpush1.bf16.msra.mxu0 %v1150_v5 }
  0x82   :  { %502 = vmatmul.mubr.bf16.vlgmr.msra.gmra.mrb[0].mxu0 %v34_v7 }
 0x155   :  { %v503_v33 = vpop.f32.mrb[0].mxu0 }
 0x156   :  { %v1049_v34 = vadd.f32 %v503_v33, %v103_v30  ;;  %v505_v35 = vpop.f32.mrb[1].mxu0 }
 0x157   :  { %v1050_v36 = vadd.f32 %v505_v35, %v107_v31  ;;  %v507_v37 = vpop.f32.mrb[2].mxu0 }
 0x158   :  { %v510_v38 = vmul.f32 %v1049_v34, %v1485_v32  ;;  %v508_v39 = vpop.f32.mrb[3].mxu0 }
 0x159   :  { %v511_v40 = vmul.f32 %v1050_v36, %v1485_v32 }
 0x15a   :  { %v512_v41 = vrot.slane %v510_v38, 4  ;;  %v526_v42 = vmul.f32 %v510_v38, %v510_v38 }
 0x15b   :  { %v518_v43 = vrot.slane %v511_v40, 4  ;;  %v527_v44 = vmul.f32 %v511_v40, %v511_v40 }
 0x15c   :  { %v513_v45 = vadd.f32 %v512_v41, %v510_v38  ;;  %v528_v46 = vrot.slane %v526_v42, 4 }
 0x15d   :  { %v519_v47 = vadd.f32 %v518_v43, %v511_v40  ;;  %v534_v48 = vrot.slane %v527_v44, 4 }
 0x15e   :  { %v514_v49 = vrot.slane %v513_v45, 2  ;;  %v529_v50 = vadd.f32 %v528_v46, %v526_v42  ;;  %v1174_v46 = vld [vmem:[%s1543_s3 + $0x28] sm:$0xff]  }
 0x15f   :  { %v520_v51 = vrot.slane %v519_v47, 2  ;;  %v535_v52 = vadd.f32 %v534_v48, %v527_v44  ;;  %v1169_v44 = vld [vmem:[%s1543_s3] sm:$0xff]   ;;  %v1176_v48 = vld [vmem:[%s1543_s3 + $0x38] sm:$0xff]  }
 0x160   :  { %v515_v53 = vadd.f32 %v514_v49, %v513_v45  ;;  %v530_v54 = vrot.slane %v529_v50, 2  ;;  %v1173_v45 = vld [vmem:[%s1543_s3 + $0x20] sm:$0xff]   ;;  %v620_v49 = vsub.s32 3, %v1468_v26 }
 0x161   :  { %v521_v55 = vadd.f32 %v520_v51, %v519_v47  ;;  %v536_v56 = vrot.slane %v535_v52, 2  ;;  %v1175_v47 = vld [vmem:[%s1543_s3 + $0x30] sm:$0xff]  }
 0x162   :  { %v516_v57 = vrot.slane %v515_v53, 1  ;;  %v531_v58 = vadd.f32 %v530_v54, %v529_v50  ;;  %v621_v51 = vrot.slane %v1474_v28, %v620_v49 }
 0x163   :  { %v522_v59 = vrot.slane %v521_v55, 1  ;;  %v537_v60 = vadd.f32 %v536_v56, %v535_v52 }
 0x164   :  { %v517_v61 = vadd.f32 %v516_v57, %v515_v53  ;;  %v532_v62 = vrot.slane %v531_v58, 1 }
 0x165   :  { %v523_v63 = vadd.f32 %v522_v59, %v521_v55  ;;  %v538_v0 = vrot.slane %v537_v60, 1 }
 0x166   :  { %v524_v1 = vmul.f32 0.25, %v517_v61  ;;  %v533_v2 = vadd.f32 %v532_v62, %v531_v58 }
 0x167   :  { %v525_v3 = vmul.f32 0.25, %v523_v63  ;;  %v539_v4 = vadd.f32 %v538_v0, %v537_v60 }
 0x168   :  { %v540_v5 = vmul.f32 0.25, %v533_v2  ;;  %v542_v6 = vmul.f32 %v524_v1, %v524_v1 }
 0x169   :  { %v541_v7 = vmul.f32 0.25, %v539_v4  ;;  %v543_v8 = vmul.f32 %v525_v3, %v525_v3 }
 0x16a   :  { %v544_v9 = vsub.f32 %v540_v5, %v542_v6 }
 0x16b   :  { %v545_v10 = vsub.f32 %v541_v7, %v543_v8 }
 0x16c   :  { %v546_v11 = vadd.f32 1e-05, %v544_v9 }
 0x16d   :  { %v547_v12 = vadd.f32 1e-05, %v545_v10 }
 0x16e   :  { %1177 = vrsqrt.f32 %v546_v11 }
 0x16f   :  { %1179 = vrsqrt.f32 %v547_v12  ;;  %v786_v12 = vsub.s32 4, %v1468_v26 }
 0x178   :  { %v1178_v13 = vpop.eup %1177 }
 0x179   :  { %v1180_v14 = vpop.eup %1179  ;;  %v550_v15 = vmul.f32 %v1178_v13, %v1474_v28 }
 0x17a   :  { %v551_v17 = vmul.f32 %v1180_v14, %v1479_v29 }
 0x17b   :  { %v552_v18 = vmul.f32 %v550_v15, %v524_v1  ;;  %v565_v21 = vrot.slane %v550_v15, %v564_v16 }
 0x17c   :  { %v553_v19 = vmul.f32 %v551_v17, %v525_v3  ;;  %v569_v23 = vrot.slane %v551_v17, %v564_v16  ;;  %v791_v16 = vsub.s32 5, %v1468_v26 }
 0x17d   :  { %v556_v20 = vrot.slane %v552_v18, 7  ;;  %v570_v31 = vmul.f32 %v1049_v34, %v565_v21  ;;  %v1171_v34 = vld [vmem:[%s1543_s3 + $0x10] sm:$0xff]  }
 0x17e   :  { %v557_v25 = vrot.slane %v553_v19, 7  ;;  %v571_v35 = vmul.f32 %v1050_v36, %v569_v23  ;;  %v1172_v36 = vld [vmem:[%s1543_s3 + $0x18] sm:$0xff]   ;;  %v814_v23 = vsub.s32 6, %v1468_v26 }
 0x17f   :  { %v560_v27 = vsub.f32 %v1474_v28, %v556_v20 }
 0x180   :  { %v561_v30 = vsub.f32 %v1479_v29, %v557_v25  ;;  %v1170_v29 = vld [vmem:[%s1543_s3 + $0x8] sm:$0xff]   ;;  %v815_v25 = vrot.slane %v1474_v28, %v814_v23 }
 0x181   :  { %v575_v33 = vrot.slane %v560_v27, %v574_v22 }
 0x182   :  { %v579_v37 = vrot.slane %v561_v30, %v574_v22 }
 0x183   :  { %v580_v38 = vadd.f32 %v575_v33, %v570_v31 }
 0x184   :  { %v581_v39 = vadd.f32 %v579_v37, %v571_v35 }
 0x185   :  { %v582_v40 = vmax.f32 %v580_v38, 0.0 }
 0x186   :  { %v583_v41 = vmax.f32 %v581_v39, 0.0 }
 0x187   :  { %v584_v43 = vpack.c.bf16 %v582_v40, %v582_v40 }
 0x188   :  { %v585_v42 = vpack.c.bf16 %v583_v41, %v583_v41 }
 0x18a   :  { %750 = vmatprep.mubr.bf16.mxu1 %v585_v42 }
 0x18b   :  { %751 = vmatmul.mubr.bf16.vlgmr.msra.gmra.mrb[0].mxu1 %v584_v43 }
 0x18c   :  { %1030 = vmatpush3.bf16.msra.mxu1 %v1169_v44  ;;  %1045 = vmatprep.mubr.msk.bf16.mxu1 %vm1184_vm1, %v1183_v24 }
 0x18d   :  { %1031 = vmatprep.subr.bf16.mxu1 %v1183_v24 }
 0x190   :  { %1032 = vmatpush3.bf16.msra.mxu1 %v1170_v29 }
 0x191   :  { %1033 = vmatprep.subr.bf16.mxu1 %v1183_v24 }
 0x194   :  { %1034 = vmatpush3.bf16.msra.mxu1 %v1171_v34 }
 0x195   :  { %1035 = vmatprep.subr.bf16.mxu1 %v1183_v24 }
 0x198   :  { %1036 = vmatpush3.bf16.msra.mxu1 %v1172_v36 }
 0x199   :  { %1037 = vmatprep.subr.bf16.mxu1 %v1183_v24 }
 0x19c   :  { %1038 = vmatpush3.bf16.msra.mxu1 %v1173_v45 }
 0x19d   :  { %1039 = vmatprep.subr.bf16.mxu1 %v1183_v24 }
 0x1a0   :  { %1040 = vmatpush3.bf16.msra.mxu1 %v1174_v46 }
 0x1a1   :  { %1041 = vmatprep.subr.bf16.mxu1 %v1183_v24 }
 0x1a4   :  { %1042 = vmatpush3.bf16.msra.mxu1 %v1175_v47 }
 0x1a5   :  { %1043 = vmatprep.subr.bf16.mxu1 %v1183_v24 }
 0x1a8   :  { %1044 = vmatpush3.bf16.msra.mxu1 %v1176_v48 }
 0x25e   :  { %v1014_v50 = vpop.f32.mrb[0].mxu1 }
 0x25f   :  { %v1015_v52 = vpop.f32.mrb[1].mxu1 }
 0x260   :  { %v1016_v53 = vadd.f32 %v1015_v52, %v1014_v50  ;;  %v1017_v54 = vpop.f32.mrb[2].mxu1 }
 0x261   :  { %v1018_v55 = vpop.f32.mrb[3].mxu1 }
 0x262   :  { %v753_v56 = vadd.f32 %v1016_v53, %v621_v51 }
 0x264   :  { %v758_v57 = vmul.f32 %v1485_v32, %v753_v56 }
 0x266   :  { %v759_v58 = vrot.slane %v758_v57, 4  ;;  %v766_v59 = vmul.f32 %v758_v57, %v758_v57 }
 0x268   :  { %v760_v60 = vadd.f32 %v759_v58, %v758_v57  ;;  %v767_v61 = vrot.slane %v766_v59, 4 }
 0x26a   :  { %v761_v62 = vrot.slane %v760_v60, 2  ;;  %v768_v63 = vadd.f32 %v767_v61, %v766_v59 }
 0x26c   :  { %v762_v0 = vadd.f32 %v761_v62, %v760_v60  ;;  %v769_v24 = vrot.slane %v768_v63, 2 }
 0x26e   :  { %v763_v1 = vrot.slane %v762_v0, 1  ;;  %v770_v2 = vadd.f32 %v769_v24, %v768_v63 }
 0x270   :  { %v764_v3 = vadd.f32 %v763_v1, %v762_v0  ;;  %v771_v4 = vrot.slane %v770_v2, 1 }
 0x272   :  { %v765_v5 = vmul.f32 0.25, %v764_v3  ;;  %v772_v6 = vadd.f32 %v771_v4, %v770_v2 }
 0x274   :  { %v773_v7 = vmul.f32 0.25, %v772_v6  ;;  %v774_v8 = vmul.f32 %v765_v5, %v765_v5 }
 0x276   :  { %v775_v9 = vsub.f32 %v773_v7, %v774_v8 }
 0x278   :  { %v776_v10 = vadd.f32 1e-05, %v775_v9 }
 0x27a   :  { %1181 = vrsqrt.f32 %v776_v10 }
 0x284   :  { %v1182_v32 = vpop.eup %1181 }
 0x285   :  { %v778_v11 = vmul.f32 %v1182_v32, %v1474_v28 }
 0x287   :  { %v779_v13 = vmul.f32 %v778_v11, %v765_v5  ;;  %v787_v15 = vrot.slane %v778_v11, %v786_v12 }
 0x289   :  { %v781_v14 = vrot.slane %v779_v13, 7  ;;  %v788_v18 = vmul.f32 %v787_v15, %v753_v56 }
 0x28b   :  { %v783_v17 = vsub.f32 %v1474_v28, %v781_v14 }
 0x28d   :  { %v792_v19 = vrot.slane %v783_v17, %v791_v16 }
 0x28f   :  { %v793_v20 = vadd.f32 %v792_v19, %v788_v18 }
 0x291   :  { %v794_v21 = vmax.f32 %v793_v20, 0.0 }
 0x293   :  { %v795_v22 = vpack.c.bf16 %v794_v21, %v794_v21 }
 0x295   :  { %1046 = vmatmul.mubr.bf16.vlgmr.msra.gmra.mrb[4].mxu1 %v795_v22 }
 0x368   :  { %v898_v27 = vpop.f32.mrb[4].mxu1 }
 0x369   :  { %v899_v30 = vadd.f32 %v898_v27, %v815_v25  ;;  %v1047_v31 = vpop.f32.mrb[5].mxu1 }
 0x36a   :  { %v901_v33 = vpop.f32.mrb[6].mxu1 }
 0x36b   :  { %904 = vst [vmem:[%s1544_s5] sm:$0xff] %v899_v30  ;;  %v1048_v35 = vpop.f32.mrb[7].mxu1 }

</bundles_post_ra>
